<compile_context>
chip_gen: v5e
topology: v5e:2x2
jax: 0.10.0
libtpu: 0.0.40
codegen_flags: <defaults>
</compile_context>

<pallas_src>
import functools

import jax
import jax.numpy as jnp
from jax.experimental import pallas as pl
from jax.experimental.pallas import tpu as pltpu


_EPS = 1e-5
_VMEM_SPEC = pl.BlockSpec(memory_space=pltpu.MemorySpace.VMEM)


# ----------------------- host-side constant builders -----------------------

def convT1_weight_matrix(wt):
    """ConvTranspose2d(nz, C, 4, 1, 0) on a 1x1 input == a GEMM.
    wt: (Cin=nz, Cout, 4, 4) -> (16*Cout, Cin) with rows ordered (i, j, co)."""
    cin, cout, k, _ = wt.shape
    return jnp.transpose(wt, (2, 3, 1, 0)).reshape(k * k * cout, cin)


# Valid (parity, patch-offset) -> kernel-tap map for ConvT(k=4, s=2, p=1):
#   output row oy = 2*m + q uses input row iy = m - 1 + dy with tap
#   kh = q + 3 - 2*dy (only the combinations below land in [0, 4)).
_KH_MAP = {(0, 0): 3, (0, 1): 1, (1, 1): 2, (1, 2): 0}


def convT_s2_weight_matrix(wt):
    """ConvTranspose2d(k=4, s=2, p=1) lowered to a 3x3 stride-1 conv emitting
    all 4 output parities.  wt: (Cin, Cout, 4, 4) -> (4*Cout, 9*Cin),
    rows ordered (qy, qx, co), cols ordered (dy, dx, ci)."""
    cin, cout = wt.shape[0], wt.shape[1]
    rows = []
    for qy in range(2):
        for qx in range(2):
            cols = []
            for dy in range(3):
                for dx in range(3):
                    if (qy, dy) in _KH_MAP and (qx, dx) in _KH_MAP:
                        blk = wt[:, :, _KH_MAP[(qy, dy)], _KH_MAP[(qx, dx)]]
                        cols.append(jnp.transpose(blk))          # (Cout, Cin)
                    else:
                        cols.append(jnp.zeros((cout, cin), jnp.float32))
            rows.append(jnp.concatenate(cols, axis=1))           # (Cout, 9*Cin)
    return jnp.concatenate(rows, axis=0)                         # (4*Cout, 9*Cin)


def shift_masks(h, w, n):
    """(9, h*w*n) edge masks for the 3x3 patch shifts over a row-major
    (h, w, n) lane ordering: zero where the shifted source falls off the
    h x w grid (this also kills the row-wraparound lanes of the flat shift)."""
    t = jnp.arange(h * w * n)
    hh = t // (w * n)
    ww = (t // n) % w
    rows = []
    for dy in range(3):
        for dx in range(3):
            dh, dw = dy - 1, dx - 1
            ok = ((hh + dh >= 0) & (hh + dh < h) &
                  (ww + dw >= 0) & (ww + dw < w))
            rows.append(ok.astype(jnp.float32))
    return jnp.stack(rows, axis=0)


def shuffle_perm(h, w, n):
    """0/1 lane-permutation matrix taking parity-blocked lanes
    (qy, qx, h, w, n) to row-major lanes (2h+qy, 2w+qx, n) on the 2h x 2w
    grid (pixel shuffle as a tiny matmul).  Shape (4*h*w*n, 4*h*w*n)."""
    m = h * w * n
    src = jnp.arange(4 * m)
    nn = src % n
    r = src // n
    ww = r % w
    r = r // w
    hh = r % h
    q = r // h
    qx = q % 2
    qy = q // 2
    dst = ((2 * hh + qy) * (2 * w) + (2 * ww + qx)) * n + nn
    return jax.nn.one_hot(dst, 4 * m, dtype=jnp.float32)


# ------------------------------ kernel helpers ------------------------------

def _lane_shift(x, s):
    """out[:, t] = x[:, t + s], zero-filled past the ends (static s)."""
    if s == 0:
        return x
    c, m = x.shape
    if s > 0:
        return jnp.concatenate([x[:, s:], jnp.zeros((c, s), x.dtype)], axis=1)
    s = -s
    return jnp.concatenate([jnp.zeros((c, s), x.dtype), x[:, :m - s]], axis=1)


def _bn_relu(y, gamma, beta):
    """BatchNorm2d (training-mode batch stats, biased var, eps=1e-5) + ReLU.
    y: (C, N*H*W) -> stats are per-channel over the lane axis."""
    mu = jnp.mean(y, axis=1, keepdims=True)
    var = jnp.mean(jnp.square(y - mu), axis=1, keepdims=True)
    yhat = (y - mu) * jax.lax.rsqrt(var + _EPS)
    return jnp.maximum(yhat * gamma + beta, 0.0)


def _up_block(x, wmat, masks, gamma, beta, h, w, n, perm=None):
    """One ConvTranspose2d(k=4, s=2, p=1) + BN + ReLU on a (Cin, h*w*n)
    activation with row-major (h, w, n) lane order, all in VMEM."""
    blocks = []
    for dy in range(3):
        for dx in range(3):
            s = (dy - 1) * w * n + (dx - 1) * n
            idx = dy * 3 + dx
            xs = _lane_shift(x, s)
            blocks.append(xs * masks[idx:idx + 1, :])
    p = jnp.concatenate(blocks, axis=0)                           # (9*Cin, M)
    y = jnp.dot(wmat, p, preferred_element_type=jnp.float32)      # (4*Cout, M)
    cout = wmat.shape[0] // 4
    # Gather the 4 parity row-blocks along lanes -> (Cout, 4*M): every output
    # pixel exactly once, so per-row lane stats == correct BN batch stats.
    ycat = jnp.concatenate(
        [y[q * cout:(q + 1) * cout, :] for q in range(4)], axis=1)
    ycat = _bn_relu(ycat, gamma, beta)
    if perm is not None:
        # Relinearise parity-blocked lanes to row-major for the next layer.
        ycat = jnp.dot(ycat, perm, preferred_element_type=jnp.float32)
    return ycat


# ------------------------------- fused kernel -------------------------------

def _dcgan_kernel(ngf, batch,
                  z_ref, w1_ref, g1_ref, b1_ref,
                  w2_ref, m2_ref, g2_ref, b2_ref, t2_ref,
                  w3_ref, m3_ref, g3_ref, b3_ref, t3_ref,
                  w4_ref, m4_ref, g4_ref, b4_ref,
                  w5_ref, o_ref):
    c1 = ngf * 8

    # ---- Layer 1: ConvTranspose2d(nz, 8*ngf, 4, 1, 0) on a 1x1 input == GEMM
    u = jnp.dot(w1_ref[...], z_ref[...],
                preferred_element_type=jnp.float32)               # (16*c1, N)
    # Rows of u are ordered (i, j, co); regroup to (c1, 16*N) so lanes are a
    # row-major (4, 4, N) image per channel.
    x = jnp.concatenate(
        [u[k * c1:(k + 1) * c1, :] for k in range(16)], axis=1)
    x = _bn_relu(x, g1_ref[...], b1_ref[...])

    # ---- Layers 2-4: ConvTranspose2d(k=4, s=2, p=1) + BN + ReLU ------------
    x = _up_block(x, w2_ref[...], m2_ref[...], g2_ref[...], b2_ref[...],
                  4, 4, batch, perm=t2_ref[...])    # (4*ngf, 8*8*N), row-major
    x = _up_block(x, w3_ref[...], m3_ref[...], g3_ref[...], b3_ref[...],
                  8, 8, batch, perm=t3_ref[...])    # (2*ngf, 16*16*N), row-major
    x = _up_block(x, w4_ref[...], m4_ref[...], g4_ref[...], b4_ref[...],
                  16, 16, batch, perm=None)         # (ngf, 32*32*N), parity-blocked

    # ---- Layer 5: ConvTranspose2d(ngf, nc, 1, 1, 2) + Tanh epilogue --------
    # k=1, p=2 is a 1x1 channel mix followed by a 2-pixel crop per side; the
    # crop commutes with tanh and is applied in the wrapper on the tiny result.
    v = jnp.dot(w5_ref[...], x, preferred_element_type=jnp.float32)
    o_ref[...] = jnp.tanh(v)                         # (nc, 32*32*N), lane-dense


# --------------------------- model construction -----------------------------

def init_params(key, nz=16, ngf=8, nc=1, batch=2):
    """Synthetic parameters mirroring MNISTDCGenerator.__init__ (all convs
    bias=False), pre-lowered into the GEMM / mask / permutation form used by
    the fused kernel."""
    k1, k2, k3, k4, k5, kbn = jax.random.split(key, 6)
    wt1 = 0.02 * jax.random.normal(k1, (nz, ngf * 8, 4, 4), jnp.float32)
    wt2 = 0.02 * jax.random.normal(k2, (ngf * 8, ngf * 4, 4, 4), jnp.float32)
    wt3 = 0.02 * jax.random.normal(k3, (ngf * 4, ngf * 2, 4, 4), jnp.float32)
    wt4 = 0.02 * jax.random.normal(k4, (ngf * 2, ngf, 4, 4), jnp.float32)
    wt5 = 0.02 * jax.random.normal(k5, (ngf, nc, 1, 1), jnp.float32)

    def bn_params(k, c):
        kg, kb = jax.random.split(k)
        gamma = 1.0 + 0.1 * jax.random.normal(kg, (c, 1), jnp.float32)
        beta = 0.1 * jax.random.normal(kb, (c, 1), jnp.float32)
        return gamma, beta

    kb1, kb2, kb3, kb4 = jax.random.split(kbn, 4)
    g1, b1 = bn_params(kb1, ngf * 8)
    g2, b2 = bn_params(kb2, ngf * 4)
    g3, b3 = bn_params(kb3, ngf * 2)
    g4, b4 = bn_params(kb4, ngf)

    return {
        "ngf": ngf, "nc": nc,
        "w1": convT1_weight_matrix(wt1), "g1": g1, "b1": b1,
        "w2": convT_s2_weight_matrix(wt2), "m2": shift_masks(4, 4, batch),
        "g2": g2, "b2": b2, "t2": shuffle_perm(4, 4, batch),
        "w3": convT_s2_weight_matrix(wt3), "m3": shift_masks(8, 8, batch),
        "g3": g3, "b3": b3, "t3": shuffle_perm(8, 8, batch),
        "w4": convT_s2_weight_matrix(wt4), "m4": shift_masks(16, 16, batch),
        "g4": g4, "b4": b4,
        "w5": jnp.transpose(wt5[:, :, 0, 0]),       # (nc, ngf)
    }


def mnist_dcgen_forward(z_nchw, params):
    """Forward pass (test=False branch): (N, nz, 1, 1) -> (N, nc, 28, 28)."""
    # TODO(synk): test=True branch (F.interpolate to 224x224, /255) not implemented.
    n, nz = z_nchw.shape[0], z_nchw.shape[1]
    ngf, nc = params["ngf"], params["nc"]
    z = jnp.transpose(z_nchw.reshape(n, nz)).astype(jnp.float32)   # (nz, N)

    out = pl.pallas_call(
        functools.partial(_dcgan_kernel, ngf, n),
        out_shape=jax.ShapeDtypeStruct((nc, 32 * 32 * n), jnp.float32),
        in_specs=[_VMEM_SPEC] * 19,
        out_specs=_VMEM_SPEC,
    )(z, params["w1"], params["g1"], params["b1"],
      params["w2"], params["m2"], params["g2"], params["b2"], params["t2"],
      params["w3"], params["m3"], params["g3"], params["b3"], params["t3"],
      params["w4"], params["m4"], params["g4"], params["b4"],
      params["w5"])

    # Kernel output lanes are ordered (qy2, qx2, A16, B16, n) where the 32x32
    # spatial position is (2*A + qy, 2*B + qx).  Decode to NCHW and apply the
    # k=1/p=2 transposed-conv crop (32x32 -> 28x28) on the 8 KiB result.
    img = out.reshape(nc, 2, 2, 16, 16, n)
    img = jnp.transpose(img, (5, 0, 3, 1, 4, 2)).reshape(n, nc, 32, 32)
    return img[:, :, 2:30, 2:30]


# ----------------------------------- main ------------------------------------

if __name__ == "__main__":
    nz, ngf, nc, batch = 16, 8, 1, 2   # small shapes consistent with the module
    key = jax.random.PRNGKey(0)
    key_params, key_z = jax.random.split(key)

    params = init_params(key_params, nz=nz, ngf=ngf, nc=nc, batch=batch)
    z = jax.random.normal(key_z, (batch, nz, 1, 1), jnp.float32)

    fwd = jax.jit(functools.partial(mnist_dcgen_forward, params=params))
    out = jax.block_until_ready(fwd(z))

    assert out.shape == (batch, nc, 28, 28), out.shape
    assert out.dtype == jnp.float32
    assert bool(jnp.all(jnp.isfinite(out)))
    assert bool(jnp.all(jnp.abs(out) <= 1.0 + 1e-6))   # tanh range
    print("KERNEL_OK")
</pallas_src>

<mosaic_0001>
module attributes {stable_mosaic.version = 11 : i64} {
  func.func @_dcgan_kernel(%arg0: memref<16x2xf32, #tpu.memory_space<vmem>>, %arg1: memref<1024x16xf32, #tpu.memory_space<vmem>>, %arg2: memref<64x1xf32, #tpu.memory_space<vmem>>, %arg3: memref<64x1xf32, #tpu.memory_space<vmem>>, %arg4: memref<128x576xf32, #tpu.memory_space<vmem>>, %arg5: memref<9x32xf32, #tpu.memory_space<vmem>>, %arg6: memref<32x1xf32, #tpu.memory_space<vmem>>, %arg7: memref<32x1xf32, #tpu.memory_space<vmem>>, %arg8: memref<128x128xf32, #tpu.memory_space<vmem>>, %arg9: memref<64x288xf32, #tpu.memory_space<vmem>>, %arg10: memref<9x128xf32, #tpu.memory_space<vmem>>, %arg11: memref<16x1xf32, #tpu.memory_space<vmem>>, %arg12: memref<16x1xf32, #tpu.memory_space<vmem>>, %arg13: memref<512x512xf32, #tpu.memory_space<vmem>>, %arg14: memref<32x144xf32, #tpu.memory_space<vmem>>, %arg15: memref<9x512xf32, #tpu.memory_space<vmem>>, %arg16: memref<8x1xf32, #tpu.memory_space<vmem>>, %arg17: memref<8x1xf32, #tpu.memory_space<vmem>>, %arg18: memref<1x8xf32, #tpu.memory_space<vmem>>, %arg19: memref<1x2048xf32, #tpu.memory_space<vmem>>) attributes {dimension_semantics = [], scalar_prefetch = 0 : i64, scratch_operands = 0 : i64, tpu.core_type = #tpu.core_type<tc>} {
    %c0 = arith.constant 0 : index
    %c0_0 = arith.constant 0 : index
    %0 = vector.load %arg1[%c0, %c0_0] : memref<1024x16xf32, #tpu.memory_space<vmem>>, vector<1024x16xf32>
    %c0_1 = arith.constant 0 : index
    %c0_2 = arith.constant 0 : index
    %1 = vector.load %arg0[%c0_1, %c0_2] : memref<16x2xf32, #tpu.memory_space<vmem>>, vector<16x2xf32>
    %cst = arith.constant dense<0.000000e+00> : vector<1024x2xf32>
    %2 = tpu.matmul %0, %1, %cst {dimension_numbers = #tpu.dot_dimension_numbers<[1], [0], [0], [1], [0, 0, 1, 1], [], []>} : vector<1024x16xf32>, vector<16x2xf32>, vector<1024x2xf32> -> vector<1024x2xf32>
    %3 = vector.extract_strided_slice %2 {offsets = [0, 0], sizes = [64, 2], strides = [1, 1]} : vector<1024x2xf32> to vector<64x2xf32>
    %4 = vector.extract_strided_slice %2 {offsets = [64, 0], sizes = [64, 2], strides = [1, 1]} : vector<1024x2xf32> to vector<64x2xf32>
    %5 = vector.extract_strided_slice %2 {offsets = [128, 0], sizes = [64, 2], strides = [1, 1]} : vector<1024x2xf32> to vector<64x2xf32>
    %6 = vector.extract_strided_slice %2 {offsets = [192, 0], sizes = [64, 2], strides = [1, 1]} : vector<1024x2xf32> to vector<64x2xf32>
    %7 = vector.extract_strided_slice %2 {offsets = [256, 0], sizes = [64, 2], strides = [1, 1]} : vector<1024x2xf32> to vector<64x2xf32>
    %8 = vector.extract_strided_slice %2 {offsets = [320, 0], sizes = [64, 2], strides = [1, 1]} : vector<1024x2xf32> to vector<64x2xf32>
    %9 = vector.extract_strided_slice %2 {offsets = [384, 0], sizes = [64, 2], strides = [1, 1]} : vector<1024x2xf32> to vector<64x2xf32>
    %10 = vector.extract_strided_slice %2 {offsets = [448, 0], sizes = [64, 2], strides = [1, 1]} : vector<1024x2xf32> to vector<64x2xf32>
    %11 = vector.extract_strided_slice %2 {offsets = [512, 0], sizes = [64, 2], strides = [1, 1]} : vector<1024x2xf32> to vector<64x2xf32>
    %12 = vector.extract_strided_slice %2 {offsets = [576, 0], sizes = [64, 2], strides = [1, 1]} : vector<1024x2xf32> to vector<64x2xf32>
    %13 = vector.extract_strided_slice %2 {offsets = [640, 0], sizes = [64, 2], strides = [1, 1]} : vector<1024x2xf32> to vector<64x2xf32>
    %14 = vector.extract_strided_slice %2 {offsets = [704, 0], sizes = [64, 2], strides = [1, 1]} : vector<1024x2xf32> to vector<64x2xf32>
    %15 = vector.extract_strided_slice %2 {offsets = [768, 0], sizes = [64, 2], strides = [1, 1]} : vector<1024x2xf32> to vector<64x2xf32>
    %16 = vector.extract_strided_slice %2 {offsets = [832, 0], sizes = [64, 2], strides = [1, 1]} : vector<1024x2xf32> to vector<64x2xf32>
    %17 = vector.extract_strided_slice %2 {offsets = [896, 0], sizes = [64, 2], strides = [1, 1]} : vector<1024x2xf32> to vector<64x2xf32>
    %18 = vector.extract_strided_slice %2 {offsets = [960, 0], sizes = [64, 2], strides = [1, 1]} : vector<1024x2xf32> to vector<64x2xf32>
    %19 = tpu.concatenate %3, %4, %5, %6, %7, %8, %9, %10, %11, %12, %13, %14, %15, %16, %17, %18 in 1 : vector<64x2xf32>, vector<64x2xf32>, vector<64x2xf32>, vector<64x2xf32>, vector<64x2xf32>, vector<64x2xf32>, vector<64x2xf32>, vector<64x2xf32>, vector<64x2xf32>, vector<64x2xf32>, vector<64x2xf32>, vector<64x2xf32>, vector<64x2xf32>, vector<64x2xf32>, vector<64x2xf32>, vector<64x2xf32> -> vector<64x32xf32>
    %c0_3 = arith.constant 0 : index
    %c0_4 = arith.constant 0 : index
    %20 = vector.load %arg2[%c0_3, %c0_4] : memref<64x1xf32, #tpu.memory_space<vmem>>, vector<64x1xf32>
    %c0_5 = arith.constant 0 : index
    %c0_6 = arith.constant 0 : index
    %21 = vector.load %arg3[%c0_5, %c0_6] : memref<64x1xf32, #tpu.memory_space<vmem>>, vector<64x1xf32>
    %cst_7 = arith.constant dense<0.000000e+00> : vector<64xf32>
    %22 = vector.multi_reduction <add>, %19, %cst_7 [1] : vector<64x32xf32> to vector<64xf32>
    %23 = vector.shape_cast %22 : vector<64xf32> to vector<64x1xf32>
    %cst_8 = arith.constant 3.200000e+01 : f32
    %24 = vector.broadcast %cst_8 : f32 to vector<64x1xf32>
    %25 = arith.divf %23, %24 : vector<64x1xf32>
    %26 = vector.broadcast %25 : vector<64x1xf32> to vector<64x32xf32>
    %27 = arith.subf %19, %26 : vector<64x32xf32>
    %28 = arith.mulf %27, %27 : vector<64x32xf32>
    %cst_9 = arith.constant dense<0.000000e+00> : vector<64xf32>
    %29 = vector.multi_reduction <add>, %28, %cst_9 [1] : vector<64x32xf32> to vector<64xf32>
    %30 = vector.shape_cast %29 : vector<64xf32> to vector<64x1xf32>
    %cst_10 = arith.constant 3.200000e+01 : f32
    %31 = vector.broadcast %cst_10 : f32 to vector<64x1xf32>
    %32 = arith.divf %30, %31 : vector<64x1xf32>
    %33 = vector.broadcast %25 : vector<64x1xf32> to vector<64x32xf32>
    %34 = arith.subf %19, %33 : vector<64x32xf32>
    %cst_11 = arith.constant 9.99999974E-6 : f32
    %35 = vector.broadcast %cst_11 : f32 to vector<64x1xf32>
    %36 = arith.addf %32, %35 : vector<64x1xf32>
    %37 = math.rsqrt %36 : vector<64x1xf32>
    %38 = vector.broadcast %37 : vector<64x1xf32> to vector<64x32xf32>
    %39 = arith.mulf %34, %38 : vector<64x32xf32>
    %40 = vector.broadcast %20 : vector<64x1xf32> to vector<64x32xf32>
    %41 = arith.mulf %39, %40 : vector<64x32xf32>
    %42 = vector.broadcast %21 : vector<64x1xf32> to vector<64x32xf32>
    %43 = arith.addf %41, %42 : vector<64x32xf32>
    %cst_12 = arith.constant 0.000000e+00 : f32
    %44 = vector.broadcast %cst_12 : f32 to vector<64x32xf32>
    %45 = arith.maximumf %43, %44 : vector<64x32xf32>
    %c0_13 = arith.constant 0 : index
    %c0_14 = arith.constant 0 : index
    %46 = vector.load %arg4[%c0_13, %c0_14] : memref<128x576xf32, #tpu.memory_space<vmem>>, vector<128x576xf32>
    %c0_15 = arith.constant 0 : index
    %c0_16 = arith.constant 0 : index
    %47 = vector.load %arg5[%c0_15, %c0_16] : memref<9x32xf32, #tpu.memory_space<vmem>>, vector<9x32xf32>
    %c0_17 = arith.constant 0 : index
    %c0_18 = arith.constant 0 : index
    %48 = vector.load %arg6[%c0_17, %c0_18] : memref<32x1xf32, #tpu.memory_space<vmem>>, vector<32x1xf32>
    %c0_19 = arith.constant 0 : index
    %c0_20 = arith.constant 0 : index
    %49 = vector.load %arg7[%c0_19, %c0_20] : memref<32x1xf32, #tpu.memory_space<vmem>>, vector<32x1xf32>
    %c0_21 = arith.constant 0 : index
    %c0_22 = arith.constant 0 : index
    %50 = vector.load %arg8[%c0_21, %c0_22] : memref<128x128xf32, #tpu.memory_space<vmem>>, vector<128x128xf32>
    %cst_23 = arith.constant 0.000000e+00 : f32
    %51 = vector.broadcast %cst_23 : f32 to vector<64x10xf32>
    %52 = vector.extract_strided_slice %45 {offsets = [0, 0], sizes = [64, 22], strides = [1, 1]} : vector<64x32xf32> to vector<64x22xf32>
    %53 = tpu.concatenate %51, %52 in 1 : vector<64x10xf32>, vector<64x22xf32> -> vector<64x32xf32>
    %54 = vector.extract_strided_slice %47 {offsets = [0, 0], sizes = [1, 32], strides = [1, 1]} : vector<9x32xf32> to vector<1x32xf32>
    %55 = vector.broadcast %54 : vector<1x32xf32> to vector<64x32xf32>
    %56 = arith.mulf %53, %55 : vector<64x32xf32>
    %cst_24 = arith.constant 0.000000e+00 : f32
    %57 = vector.broadcast %cst_24 : f32 to vector<64x8xf32>
    %58 = vector.extract_strided_slice %45 {offsets = [0, 0], sizes = [64, 24], strides = [1, 1]} : vector<64x32xf32> to vector<64x24xf32>
    %59 = tpu.concatenate %57, %58 in 1 : vector<64x8xf32>, vector<64x24xf32> -> vector<64x32xf32>
    %60 = vector.extract_strided_slice %47 {offsets = [1, 0], sizes = [1, 32], strides = [1, 1]} : vector<9x32xf32> to vector<1x32xf32>
    %61 = vector.broadcast %60 : vector<1x32xf32> to vector<64x32xf32>
    %62 = arith.mulf %59, %61 : vector<64x32xf32>
    %cst_25 = arith.constant 0.000000e+00 : f32
    %63 = vector.broadcast %cst_25 : f32 to vector<64x6xf32>
    %64 = vector.extract_strided_slice %45 {offsets = [0, 0], sizes = [64, 26], strides = [1, 1]} : vector<64x32xf32> to vector<64x26xf32>
    %65 = tpu.concatenate %63, %64 in 1 : vector<64x6xf32>, vector<64x26xf32> -> vector<64x32xf32>
    %66 = vector.extract_strided_slice %47 {offsets = [2, 0], sizes = [1, 32], strides = [1, 1]} : vector<9x32xf32> to vector<1x32xf32>
    %67 = vector.broadcast %66 : vector<1x32xf32> to vector<64x32xf32>
    %68 = arith.mulf %65, %67 : vector<64x32xf32>
    %cst_26 = arith.constant 0.000000e+00 : f32
    %69 = vector.broadcast %cst_26 : f32 to vector<64x2xf32>
    %70 = vector.extract_strided_slice %45 {offsets = [0, 0], sizes = [64, 30], strides = [1, 1]} : vector<64x32xf32> to vector<64x30xf32>
    %71 = tpu.concatenate %69, %70 in 1 : vector<64x2xf32>, vector<64x30xf32> -> vector<64x32xf32>
    %72 = vector.extract_strided_slice %47 {offsets = [3, 0], sizes = [1, 32], strides = [1, 1]} : vector<9x32xf32> to vector<1x32xf32>
    %73 = vector.broadcast %72 : vector<1x32xf32> to vector<64x32xf32>
    %74 = arith.mulf %71, %73 : vector<64x32xf32>
    %75 = vector.extract_strided_slice %47 {offsets = [4, 0], sizes = [1, 32], strides = [1, 1]} : vector<9x32xf32> to vector<1x32xf32>
    %76 = vector.broadcast %75 : vector<1x32xf32> to vector<64x32xf32>
    %77 = arith.mulf %45, %76 : vector<64x32xf32>
    %78 = vector.extract_strided_slice %45 {offsets = [0, 2], sizes = [64, 30], strides = [1, 1]} : vector<64x32xf32> to vector<64x30xf32>
    %cst_27 = arith.constant 0.000000e+00 : f32
    %79 = vector.broadcast %cst_27 : f32 to vector<64x2xf32>
    %80 = tpu.concatenate %78, %79 in 1 : vector<64x30xf32>, vector<64x2xf32> -> vector<64x32xf32>
    %81 = vector.extract_strided_slice %47 {offsets = [5, 0], sizes = [1, 32], strides = [1, 1]} : vector<9x32xf32> to vector<1x32xf32>
    %82 = vector.broadcast %81 : vector<1x32xf32> to vector<64x32xf32>
    %83 = arith.mulf %80, %82 : vector<64x32xf32>
    %84 = vector.extract_strided_slice %45 {offsets = [0, 6], sizes = [64, 26], strides = [1, 1]} : vector<64x32xf32> to vector<64x26xf32>
    %cst_28 = arith.constant 0.000000e+00 : f32
    %85 = vector.broadcast %cst_28 : f32 to vector<64x6xf32>
    %86 = tpu.concatenate %84, %85 in 1 : vector<64x26xf32>, vector<64x6xf32> -> vector<64x32xf32>
    %87 = vector.extract_strided_slice %47 {offsets = [6, 0], sizes = [1, 32], strides = [1, 1]} : vector<9x32xf32> to vector<1x32xf32>
    %88 = vector.broadcast %87 : vector<1x32xf32> to vector<64x32xf32>
    %89 = arith.mulf %86, %88 : vector<64x32xf32>
    %90 = vector.extract_strided_slice %45 {offsets = [0, 8], sizes = [64, 24], strides = [1, 1]} : vector<64x32xf32> to vector<64x24xf32>
    %cst_29 = arith.constant 0.000000e+00 : f32
    %91 = vector.broadcast %cst_29 : f32 to vector<64x8xf32>
    %92 = tpu.concatenate %90, %91 in 1 : vector<64x24xf32>, vector<64x8xf32> -> vector<64x32xf32>
    %93 = vector.extract_strided_slice %47 {offsets = [7, 0], sizes = [1, 32], strides = [1, 1]} : vector<9x32xf32> to vector<1x32xf32>
    %94 = vector.broadcast %93 : vector<1x32xf32> to vector<64x32xf32>
    %95 = arith.mulf %92, %94 : vector<64x32xf32>
    %96 = vector.extract_strided_slice %45 {offsets = [0, 10], sizes = [64, 22], strides = [1, 1]} : vector<64x32xf32> to vector<64x22xf32>
    %cst_30 = arith.constant 0.000000e+00 : f32
    %97 = vector.broadcast %cst_30 : f32 to vector<64x10xf32>
    %98 = tpu.concatenate %96, %97 in 1 : vector<64x22xf32>, vector<64x10xf32> -> vector<64x32xf32>
    %99 = vector.extract_strided_slice %47 {offsets = [8, 0], sizes = [1, 32], strides = [1, 1]} : vector<9x32xf32> to vector<1x32xf32>
    %100 = vector.broadcast %99 : vector<1x32xf32> to vector<64x32xf32>
    %101 = arith.mulf %98, %100 : vector<64x32xf32>
    %102 = tpu.concatenate %56, %62, %68, %74, %77, %83, %89, %95, %101 in 0 : vector<64x32xf32>, vector<64x32xf32>, vector<64x32xf32>, vector<64x32xf32>, vector<64x32xf32>, vector<64x32xf32>, vector<64x32xf32>, vector<64x32xf32>, vector<64x32xf32> -> vector<576x32xf32>
    %cst_31 = arith.constant dense<0.000000e+00> : vector<128x32xf32>
    %103 = tpu.matmul %46, %102, %cst_31 {dimension_numbers = #tpu.dot_dimension_numbers<[1], [0], [0], [1], [0, 0, 1, 1], [], []>} : vector<128x576xf32>, vector<576x32xf32>, vector<128x32xf32> -> vector<128x32xf32>
    %104 = vector.extract_strided_slice %103 {offsets = [0, 0], sizes = [32, 32], strides = [1, 1]} : vector<128x32xf32> to vector<32x32xf32>
    %105 = vector.extract_strided_slice %103 {offsets = [32, 0], sizes = [32, 32], strides = [1, 1]} : vector<128x32xf32> to vector<32x32xf32>
    %106 = vector.extract_strided_slice %103 {offsets = [64, 0], sizes = [32, 32], strides = [1, 1]} : vector<128x32xf32> to vector<32x32xf32>
    %107 = vector.extract_strided_slice %103 {offsets = [96, 0], sizes = [32, 32], strides = [1, 1]} : vector<128x32xf32> to vector<32x32xf32>
    %108 = tpu.concatenate %104, %105, %106, %107 in 1 : vector<32x32xf32>, vector<32x32xf32>, vector<32x32xf32>, vector<32x32xf32> -> vector<32x128xf32>
    %cst_32 = arith.constant dense<0.000000e+00> : vector<32xf32>
    %109 = vector.multi_reduction <add>, %108, %cst_32 [1] : vector<32x128xf32> to vector<32xf32>
    %110 = vector.shape_cast %109 : vector<32xf32> to vector<32x1xf32>
    %cst_33 = arith.constant 1.280000e+02 : f32
    %111 = vector.broadcast %cst_33 : f32 to vector<32x1xf32>
    %112 = arith.divf %110, %111 : vector<32x1xf32>
    %113 = vector.broadcast %112 : vector<32x1xf32> to vector<32x128xf32>
    %114 = arith.subf %108, %113 : vector<32x128xf32>
    %115 = arith.mulf %114, %114 : vector<32x128xf32>
    %cst_34 = arith.constant dense<0.000000e+00> : vector<32xf32>
    %116 = vector.multi_reduction <add>, %115, %cst_34 [1] : vector<32x128xf32> to vector<32xf32>
    %117 = vector.shape_cast %116 : vector<32xf32> to vector<32x1xf32>
    %cst_35 = arith.constant 1.280000e+02 : f32
    %118 = vector.broadcast %cst_35 : f32 to vector<32x1xf32>
    %119 = arith.divf %117, %118 : vector<32x1xf32>
    %120 = vector.broadcast %112 : vector<32x1xf32> to vector<32x128xf32>
    %121 = arith.subf %108, %120 : vector<32x128xf32>
    %cst_36 = arith.constant 9.99999974E-6 : f32
    %122 = vector.broadcast %cst_36 : f32 to vector<32x1xf32>
    %123 = arith.addf %119, %122 : vector<32x1xf32>
    %124 = math.rsqrt %123 : vector<32x1xf32>
    %125 = vector.broadcast %124 : vector<32x1xf32> to vector<32x128xf32>
    %126 = arith.mulf %121, %125 : vector<32x128xf32>
    %127 = vector.broadcast %48 : vector<32x1xf32> to vector<32x128xf32>
    %128 = arith.mulf %126, %127 : vector<32x128xf32>
    %129 = vector.broadcast %49 : vector<32x1xf32> to vector<32x128xf32>
    %130 = arith.addf %128, %129 : vector<32x128xf32>
    %cst_37 = arith.constant 0.000000e+00 : f32
    %131 = vector.broadcast %cst_37 : f32 to vector<32x128xf32>
    %132 = arith.maximumf %130, %131 : vector<32x128xf32>
    %cst_38 = arith.constant dense<0.000000e+00> : vector<32x128xf32>
    %133 = tpu.matmul %132, %50, %cst_38 {dimension_numbers = #tpu.dot_dimension_numbers<[1], [0], [0], [1], [0, 0, 1, 1], [], []>} : vector<32x128xf32>, vector<128x128xf32>, vector<32x128xf32> -> vector<32x128xf32>
    %c0_39 = arith.constant 0 : index
    %c0_40 = arith.constant 0 : index
    %134 = vector.load %arg9[%c0_39, %c0_40] : memref<64x288xf32, #tpu.memory_space<vmem>>, vector<64x288xf32>
    %c0_41 = arith.constant 0 : index
    %c0_42 = arith.constant 0 : index
    %135 = vector.load %arg10[%c0_41, %c0_42] : memref<9x128xf32, #tpu.memory_space<vmem>>, vector<9x128xf32>
    %c0_43 = arith.constant 0 : index
    %c0_44 = arith.constant 0 : index
    %136 = vector.load %arg11[%c0_43, %c0_44] : memref<16x1xf32, #tpu.memory_space<vmem>>, vector<16x1xf32>
    %c0_45 = arith.constant 0 : index
    %c0_46 = arith.constant 0 : index
    %137 = vector.load %arg12[%c0_45, %c0_46] : memref<16x1xf32, #tpu.memory_space<vmem>>, vector<16x1xf32>
    %c0_47 = arith.constant 0 : index
    %c0_48 = arith.constant 0 : index
    %138 = vector.load %arg13[%c0_47, %c0_48] : memref<512x512xf32, #tpu.memory_space<vmem>>, vector<512x512xf32>
    %cst_49 = arith.constant 0.000000e+00 : f32
    %139 = vector.broadcast %cst_49 : f32 to vector<32x18xf32>
    %140 = vector.extract_strided_slice %133 {offsets = [0, 0], sizes = [32, 110], strides = [1, 1]} : vector<32x128xf32> to vector<32x110xf32>
    %141 = tpu.concatenate %139, %140 in 1 : vector<32x18xf32>, vector<32x110xf32> -> vector<32x128xf32>
    %142 = vector.extract_strided_slice %135 {offsets = [0, 0], sizes = [1, 128], strides = [1, 1]} : vector<9x128xf32> to vector<1x128xf32>
    %143 = vector.broadcast %142 : vector<1x128xf32> to vector<32x128xf32>
    %144 = arith.mulf %141, %143 : vector<32x128xf32>
    %cst_50 = arith.constant 0.000000e+00 : f32
    %145 = vector.broadcast %cst_50 : f32 to vector<32x16xf32>
    %146 = vector.extract_strided_slice %133 {offsets = [0, 0], sizes = [32, 112], strides = [1, 1]} : vector<32x128xf32> to vector<32x112xf32>
    %147 = tpu.concatenate %145, %146 in 1 : vector<32x16xf32>, vector<32x112xf32> -> vector<32x128xf32>
    %148 = vector.extract_strided_slice %135 {offsets = [1, 0], sizes = [1, 128], strides = [1, 1]} : vector<9x128xf32> to vector<1x128xf32>
    %149 = vector.broadcast %148 : vector<1x128xf32> to vector<32x128xf32>
    %150 = arith.mulf %147, %149 : vector<32x128xf32>
    %cst_51 = arith.constant 0.000000e+00 : f32
    %151 = vector.broadcast %cst_51 : f32 to vector<32x14xf32>
    %152 = vector.extract_strided_slice %133 {offsets = [0, 0], sizes = [32, 114], strides = [1, 1]} : vector<32x128xf32> to vector<32x114xf32>
    %153 = tpu.concatenate %151, %152 in 1 : vector<32x14xf32>, vector<32x114xf32> -> vector<32x128xf32>
    %154 = vector.extract_strided_slice %135 {offsets = [2, 0], sizes = [1, 128], strides = [1, 1]} : vector<9x128xf32> to vector<1x128xf32>
    %155 = vector.broadcast %154 : vector<1x128xf32> to vector<32x128xf32>
    %156 = arith.mulf %153, %155 : vector<32x128xf32>
    %cst_52 = arith.constant 0.000000e+00 : f32
    %157 = vector.broadcast %cst_52 : f32 to vector<32x2xf32>
    %158 = vector.extract_strided_slice %133 {offsets = [0, 0], sizes = [32, 126], strides = [1, 1]} : vector<32x128xf32> to vector<32x126xf32>
    %159 = tpu.concatenate %157, %158 in 1 : vector<32x2xf32>, vector<32x126xf32> -> vector<32x128xf32>
    %160 = vector.extract_strided_slice %135 {offsets = [3, 0], sizes = [1, 128], strides = [1, 1]} : vector<9x128xf32> to vector<1x128xf32>
    %161 = vector.broadcast %160 : vector<1x128xf32> to vector<32x128xf32>
    %162 = arith.mulf %159, %161 : vector<32x128xf32>
    %163 = vector.extract_strided_slice %135 {offsets = [4, 0], sizes = [1, 128], strides = [1, 1]} : vector<9x128xf32> to vector<1x128xf32>
    %164 = vector.broadcast %163 : vector<1x128xf32> to vector<32x128xf32>
    %165 = arith.mulf %133, %164 : vector<32x128xf32>
    %166 = vector.extract_strided_slice %133 {offsets = [0, 2], sizes = [32, 126], strides = [1, 1]} : vector<32x128xf32> to vector<32x126xf32>
    %cst_53 = arith.constant 0.000000e+00 : f32
    %167 = vector.broadcast %cst_53 : f32 to vector<32x2xf32>
    %168 = tpu.concatenate %166, %167 in 1 : vector<32x126xf32>, vector<32x2xf32> -> vector<32x128xf32>
    %169 = vector.extract_strided_slice %135 {offsets = [5, 0], sizes = [1, 128], strides = [1, 1]} : vector<9x128xf32> to vector<1x128xf32>
    %170 = vector.broadcast %169 : vector<1x128xf32> to vector<32x128xf32>
    %171 = arith.mulf %168, %170 : vector<32x128xf32>
    %172 = vector.extract_strided_slice %133 {offsets = [0, 14], sizes = [32, 114], strides = [1, 1]} : vector<32x128xf32> to vector<32x114xf32>
    %cst_54 = arith.constant 0.000000e+00 : f32
    %173 = vector.broadcast %cst_54 : f32 to vector<32x14xf32>
    %174 = tpu.concatenate %172, %173 in 1 : vector<32x114xf32>, vector<32x14xf32> -> vector<32x128xf32>
    %175 = vector.extract_strided_slice %135 {offsets = [6, 0], sizes = [1, 128], strides = [1, 1]} : vector<9x128xf32> to vector<1x128xf32>
    %176 = vector.broadcast %175 : vector<1x128xf32> to vector<32x128xf32>
    %177 = arith.mulf %174, %176 : vector<32x128xf32>
    %178 = vector.extract_strided_slice %133 {offsets = [0, 16], sizes = [32, 112], strides = [1, 1]} : vector<32x128xf32> to vector<32x112xf32>
    %cst_55 = arith.constant 0.000000e+00 : f32
    %179 = vector.broadcast %cst_55 : f32 to vector<32x16xf32>
    %180 = tpu.concatenate %178, %179 in 1 : vector<32x112xf32>, vector<32x16xf32> -> vector<32x128xf32>
    %181 = vector.extract_strided_slice %135 {offsets = [7, 0], sizes = [1, 128], strides = [1, 1]} : vector<9x128xf32> to vector<1x128xf32>
    %182 = vector.broadcast %181 : vector<1x128xf32> to vector<32x128xf32>
    %183 = arith.mulf %180, %182 : vector<32x128xf32>
    %184 = vector.extract_strided_slice %133 {offsets = [0, 18], sizes = [32, 110], strides = [1, 1]} : vector<32x128xf32> to vector<32x110xf32>
    %cst_56 = arith.constant 0.000000e+00 : f32
    %185 = vector.broadcast %cst_56 : f32 to vector<32x18xf32>
    %186 = tpu.concatenate %184, %185 in 1 : vector<32x110xf32>, vector<32x18xf32> -> vector<32x128xf32>
    %187 = vector.extract_strided_slice %135 {offsets = [8, 0], sizes = [1, 128], strides = [1, 1]} : vector<9x128xf32> to vector<1x128xf32>
    %188 = vector.broadcast %187 : vector<1x128xf32> to vector<32x128xf32>
    %189 = arith.mulf %186, %188 : vector<32x128xf32>
    %190 = tpu.concatenate %144, %150, %156, %162, %165, %171, %177, %183, %189 in 0 : vector<32x128xf32>, vector<32x128xf32>, vector<32x128xf32>, vector<32x128xf32>, vector<32x128xf32>, vector<32x128xf32>, vector<32x128xf32>, vector<32x128xf32>, vector<32x128xf32> -> vector<288x128xf32>
    %cst_57 = arith.constant dense<0.000000e+00> : vector<64x128xf32>
    %191 = tpu.matmul %134, %190, %cst_57 {dimension_numbers = #tpu.dot_dimension_numbers<[1], [0], [0], [1], [0, 0, 1, 1], [], []>} : vector<64x288xf32>, vector<288x128xf32>, vector<64x128xf32> -> vector<64x128xf32>
    %192 = vector.extract_strided_slice %191 {offsets = [0, 0], sizes = [16, 128], strides = [1, 1]} : vector<64x128xf32> to vector<16x128xf32>
    %193 = vector.extract_strided_slice %191 {offsets = [16, 0], sizes = [16, 128], strides = [1, 1]} : vector<64x128xf32> to vector<16x128xf32>
    %194 = vector.extract_strided_slice %191 {offsets = [32, 0], sizes = [16, 128], strides = [1, 1]} : vector<64x128xf32> to vector<16x128xf32>
    %195 = vector.extract_strided_slice %191 {offsets = [48, 0], sizes = [16, 128], strides = [1, 1]} : vector<64x128xf32> to vector<16x128xf32>
    %196 = tpu.concatenate %192, %193, %194, %195 in 1 : vector<16x128xf32>, vector<16x128xf32>, vector<16x128xf32>, vector<16x128xf32> -> vector<16x512xf32>
    %cst_58 = arith.constant dense<0.000000e+00> : vector<16xf32>
    %197 = vector.multi_reduction <add>, %196, %cst_58 [1] : vector<16x512xf32> to vector<16xf32>
    %198 = vector.shape_cast %197 : vector<16xf32> to vector<16x1xf32>
    %cst_59 = arith.constant 5.120000e+02 : f32
    %199 = vector.broadcast %cst_59 : f32 to vector<16x1xf32>
    %200 = arith.divf %198, %199 : vector<16x1xf32>
    %201 = vector.broadcast %200 : vector<16x1xf32> to vector<16x512xf32>
    %202 = arith.subf %196, %201 : vector<16x512xf32>
    %203 = arith.mulf %202, %202 : vector<16x512xf32>
    %cst_60 = arith.constant dense<0.000000e+00> : vector<16xf32>
    %204 = vector.multi_reduction <add>, %203, %cst_60 [1] : vector<16x512xf32> to vector<16xf32>
    %205 = vector.shape_cast %204 : vector<16xf32> to vector<16x1xf32>
    %cst_61 = arith.constant 5.120000e+02 : f32
    %206 = vector.broadcast %cst_61 : f32 to vector<16x1xf32>
    %207 = arith.divf %205, %206 : vector<16x1xf32>
    %208 = vector.broadcast %200 : vector<16x1xf32> to vector<16x512xf32>
    %209 = arith.subf %196, %208 : vector<16x512xf32>
    %cst_62 = arith.constant 9.99999974E-6 : f32
    %210 = vector.broadcast %cst_62 : f32 to vector<16x1xf32>
    %211 = arith.addf %207, %210 : vector<16x1xf32>
    %212 = math.rsqrt %211 : vector<16x1xf32>
    %213 = vector.broadcast %212 : vector<16x1xf32> to vector<16x512xf32>
    %214 = arith.mulf %209, %213 : vector<16x512xf32>
    %215 = vector.broadcast %136 : vector<16x1xf32> to vector<16x512xf32>
    %216 = arith.mulf %214, %215 : vector<16x512xf32>
    %217 = vector.broadcast %137 : vector<16x1xf32> to vector<16x512xf32>
    %218 = arith.addf %216, %217 : vector<16x512xf32>
    %cst_63 = arith.constant 0.000000e+00 : f32
    %219 = vector.broadcast %cst_63 : f32 to vector<16x512xf32>
    %220 = arith.maximumf %218, %219 : vector<16x512xf32>
    %cst_64 = arith.constant dense<0.000000e+00> : vector<16x512xf32>
    %221 = tpu.matmul %220, %138, %cst_64 {dimension_numbers = #tpu.dot_dimension_numbers<[1], [0], [0], [1], [0, 0, 1, 1], [], []>} : vector<16x512xf32>, vector<512x512xf32>, vector<16x512xf32> -> vector<16x512xf32>
    %c0_65 = arith.constant 0 : index
    %c0_66 = arith.constant 0 : index
    %222 = vector.load %arg14[%c0_65, %c0_66] : memref<32x144xf32, #tpu.memory_space<vmem>>, vector<32x144xf32>
    %c0_67 = arith.constant 0 : index
    %c0_68 = arith.constant 0 : index
    %223 = vector.load %arg15[%c0_67, %c0_68] : memref<9x512xf32, #tpu.memory_space<vmem>>, vector<9x512xf32>
    %c0_69 = arith.constant 0 : index
    %c0_70 = arith.constant 0 : index
    %224 = vector.load %arg16[%c0_69, %c0_70] : memref<8x1xf32, #tpu.memory_space<vmem>>, vector<8x1xf32>
    %c0_71 = arith.constant 0 : index
    %c0_72 = arith.constant 0 : index
    %225 = vector.load %arg17[%c0_71, %c0_72] : memref<8x1xf32, #tpu.memory_space<vmem>>, vector<8x1xf32>
    %cst_73 = arith.constant 0.000000e+00 : f32
    %226 = vector.broadcast %cst_73 : f32 to vector<16x34xf32>
    %227 = vector.extract_strided_slice %221 {offsets = [0, 0], sizes = [16, 478], strides = [1, 1]} : vector<16x512xf32> to vector<16x478xf32>
    %228 = tpu.concatenate %226, %227 in 1 : vector<16x34xf32>, vector<16x478xf32> -> vector<16x512xf32>
    %229 = vector.extract_strided_slice %223 {offsets = [0, 0], sizes = [1, 512], strides = [1, 1]} : vector<9x512xf32> to vector<1x512xf32>
    %230 = vector.broadcast %229 : vector<1x512xf32> to vector<16x512xf32>
    %231 = arith.mulf %228, %230 : vector<16x512xf32>
    %cst_74 = arith.constant 0.000000e+00 : f32
    %232 = vector.broadcast %cst_74 : f32 to vector<16x32xf32>
    %233 = vector.extract_strided_slice %221 {offsets = [0, 0], sizes = [16, 480], strides = [1, 1]} : vector<16x512xf32> to vector<16x480xf32>
    %234 = tpu.concatenate %232, %233 in 1 : vector<16x32xf32>, vector<16x480xf32> -> vector<16x512xf32>
    %235 = vector.extract_strided_slice %223 {offsets = [1, 0], sizes = [1, 512], strides = [1, 1]} : vector<9x512xf32> to vector<1x512xf32>
    %236 = vector.broadcast %235 : vector<1x512xf32> to vector<16x512xf32>
    %237 = arith.mulf %234, %236 : vector<16x512xf32>
    %cst_75 = arith.constant 0.000000e+00 : f32
    %238 = vector.broadcast %cst_75 : f32 to vector<16x30xf32>
    %239 = vector.extract_strided_slice %221 {offsets = [0, 0], sizes = [16, 482], strides = [1, 1]} : vector<16x512xf32> to vector<16x482xf32>
    %240 = tpu.concatenate %238, %239 in 1 : vector<16x30xf32>, vector<16x482xf32> -> vector<16x512xf32>
    %241 = vector.extract_strided_slice %223 {offsets = [2, 0], sizes = [1, 512], strides = [1, 1]} : vector<9x512xf32> to vector<1x512xf32>
    %242 = vector.broadcast %241 : vector<1x512xf32> to vector<16x512xf32>
    %243 = arith.mulf %240, %242 : vector<16x512xf32>
    %cst_76 = arith.constant 0.000000e+00 : f32
    %244 = vector.broadcast %cst_76 : f32 to vector<16x2xf32>
    %245 = vector.extract_strided_slice %221 {offsets = [0, 0], sizes = [16, 510], strides = [1, 1]} : vector<16x512xf32> to vector<16x510xf32>
    %246 = tpu.concatenate %244, %245 in 1 : vector<16x2xf32>, vector<16x510xf32> -> vector<16x512xf32>
    %247 = vector.extract_strided_slice %223 {offsets = [3, 0], sizes = [1, 512], strides = [1, 1]} : vector<9x512xf32> to vector<1x512xf32>
    %248 = vector.broadcast %247 : vector<1x512xf32> to vector<16x512xf32>
    %249 = arith.mulf %246, %248 : vector<16x512xf32>
    %250 = vector.extract_strided_slice %223 {offsets = [4, 0], sizes = [1, 512], strides = [1, 1]} : vector<9x512xf32> to vector<1x512xf32>
    %251 = vector.broadcast %250 : vector<1x512xf32> to vector<16x512xf32>
    %252 = arith.mulf %221, %251 : vector<16x512xf32>
    %253 = vector.extract_strided_slice %221 {offsets = [0, 2], sizes = [16, 510], strides = [1, 1]} : vector<16x512xf32> to vector<16x510xf32>
    %cst_77 = arith.constant 0.000000e+00 : f32
    %254 = vector.broadcast %cst_77 : f32 to vector<16x2xf32>
    %255 = tpu.concatenate %253, %254 in 1 : vector<16x510xf32>, vector<16x2xf32> -> vector<16x512xf32>
    %256 = vector.extract_strided_slice %223 {offsets = [5, 0], sizes = [1, 512], strides = [1, 1]} : vector<9x512xf32> to vector<1x512xf32>
    %257 = vector.broadcast %256 : vector<1x512xf32> to vector<16x512xf32>
    %258 = arith.mulf %255, %257 : vector<16x512xf32>
    %259 = vector.extract_strided_slice %221 {offsets = [0, 30], sizes = [16, 482], strides = [1, 1]} : vector<16x512xf32> to vector<16x482xf32>
    %cst_78 = arith.constant 0.000000e+00 : f32
    %260 = vector.broadcast %cst_78 : f32 to vector<16x30xf32>
    %261 = tpu.concatenate %259, %260 in 1 : vector<16x482xf32>, vector<16x30xf32> -> vector<16x512xf32>
    %262 = vector.extract_strided_slice %223 {offsets = [6, 0], sizes = [1, 512], strides = [1, 1]} : vector<9x512xf32> to vector<1x512xf32>
    %263 = vector.broadcast %262 : vector<1x512xf32> to vector<16x512xf32>
    %264 = arith.mulf %261, %263 : vector<16x512xf32>
    %265 = vector.extract_strided_slice %221 {offsets = [0, 32], sizes = [16, 480], strides = [1, 1]} : vector<16x512xf32> to vector<16x480xf32>
    %cst_79 = arith.constant 0.000000e+00 : f32
    %266 = vector.broadcast %cst_79 : f32 to vector<16x32xf32>
    %267 = tpu.concatenate %265, %266 in 1 : vector<16x480xf32>, vector<16x32xf32> -> vector<16x512xf32>
    %268 = vector.extract_strided_slice %223 {offsets = [7, 0], sizes = [1, 512], strides = [1, 1]} : vector<9x512xf32> to vector<1x512xf32>
    %269 = vector.broadcast %268 : vector<1x512xf32> to vector<16x512xf32>
    %270 = arith.mulf %267, %269 : vector<16x512xf32>
    %271 = vector.extract_strided_slice %221 {offsets = [0, 34], sizes = [16, 478], strides = [1, 1]} : vector<16x512xf32> to vector<16x478xf32>
    %cst_80 = arith.constant 0.000000e+00 : f32
    %272 = vector.broadcast %cst_80 : f32 to vector<16x34xf32>
    %273 = tpu.concatenate %271, %272 in 1 : vector<16x478xf32>, vector<16x34xf32> -> vector<16x512xf32>
    %274 = vector.extract_strided_slice %223 {offsets = [8, 0], sizes = [1, 512], strides = [1, 1]} : vector<9x512xf32> to vector<1x512xf32>
    %275 = vector.broadcast %274 : vector<1x512xf32> to vector<16x512xf32>
    %276 = arith.mulf %273, %275 : vector<16x512xf32>
    %277 = tpu.concatenate %231, %237, %243, %249, %252, %258, %264, %270, %276 in 0 : vector<16x512xf32>, vector<16x512xf32>, vector<16x512xf32>, vector<16x512xf32>, vector<16x512xf32>, vector<16x512xf32>, vector<16x512xf32>, vector<16x512xf32>, vector<16x512xf32> -> vector<144x512xf32>
    %cst_81 = arith.constant dense<0.000000e+00> : vector<32x512xf32>
    %278 = tpu.matmul %222, %277, %cst_81 {dimension_numbers = #tpu.dot_dimension_numbers<[1], [0], [0], [1], [0, 0, 1, 1], [], []>} : vector<32x144xf32>, vector<144x512xf32>, vector<32x512xf32> -> vector<32x512xf32>
    %279 = vector.extract_strided_slice %278 {offsets = [0, 0], sizes = [8, 512], strides = [1, 1]} : vector<32x512xf32> to vector<8x512xf32>
    %280 = vector.extract_strided_slice %278 {offsets = [8, 0], sizes = [8, 512], strides = [1, 1]} : vector<32x512xf32> to vector<8x512xf32>
    %281 = vector.extract_strided_slice %278 {offsets = [16, 0], sizes = [8, 512], strides = [1, 1]} : vector<32x512xf32> to vector<8x512xf32>
    %282 = vector.extract_strided_slice %278 {offsets = [24, 0], sizes = [8, 512], strides = [1, 1]} : vector<32x512xf32> to vector<8x512xf32>
    %283 = tpu.concatenate %279, %280, %281, %282 in 1 : vector<8x512xf32>, vector<8x512xf32>, vector<8x512xf32>, vector<8x512xf32> -> vector<8x2048xf32>
    %cst_82 = arith.constant dense<0.000000e+00> : vector<8xf32>
    %284 = vector.multi_reduction <add>, %283, %cst_82 [1] : vector<8x2048xf32> to vector<8xf32>
    %285 = vector.shape_cast %284 : vector<8xf32> to vector<8x1xf32>
    %cst_83 = arith.constant 2.048000e+03 : f32
    %286 = vector.broadcast %cst_83 : f32 to vector<8x1xf32>
    %287 = arith.divf %285, %286 : vector<8x1xf32>
    %288 = vector.broadcast %287 : vector<8x1xf32> to vector<8x2048xf32>
    %289 = arith.subf %283, %288 : vector<8x2048xf32>
    %290 = arith.mulf %289, %289 : vector<8x2048xf32>
    %cst_84 = arith.constant dense<0.000000e+00> : vector<8xf32>
    %291 = vector.multi_reduction <add>, %290, %cst_84 [1] : vector<8x2048xf32> to vector<8xf32>
    %292 = vector.shape_cast %291 : vector<8xf32> to vector<8x1xf32>
    %cst_85 = arith.constant 2.048000e+03 : f32
    %293 = vector.broadcast %cst_85 : f32 to vector<8x1xf32>
    %294 = arith.divf %292, %293 : vector<8x1xf32>
    %295 = vector.broadcast %287 : vector<8x1xf32> to vector<8x2048xf32>
    %296 = arith.subf %283, %295 : vector<8x2048xf32>
    %cst_86 = arith.constant 9.99999974E-6 : f32
    %297 = vector.broadcast %cst_86 : f32 to vector<8x1xf32>
    %298 = arith.addf %294, %297 : vector<8x1xf32>
    %299 = math.rsqrt %298 : vector<8x1xf32>
    %300 = vector.broadcast %299 : vector<8x1xf32> to vector<8x2048xf32>
    %301 = arith.mulf %296, %300 : vector<8x2048xf32>
    %302 = vector.broadcast %224 : vector<8x1xf32> to vector<8x2048xf32>
    %303 = arith.mulf %301, %302 : vector<8x2048xf32>
    %304 = vector.broadcast %225 : vector<8x1xf32> to vector<8x2048xf32>
    %305 = arith.addf %303, %304 : vector<8x2048xf32>
    %cst_87 = arith.constant 0.000000e+00 : f32
    %306 = vector.broadcast %cst_87 : f32 to vector<8x2048xf32>
    %307 = arith.maximumf %305, %306 : vector<8x2048xf32>
    %c0_88 = arith.constant 0 : index
    %c0_89 = arith.constant 0 : index
    %308 = vector.load %arg18[%c0_88, %c0_89] : memref<1x8xf32, #tpu.memory_space<vmem>>, vector<1x8xf32>
    %cst_90 = arith.constant dense<0.000000e+00> : vector<1x2048xf32>
    %309 = tpu.matmul %308, %307, %cst_90 {dimension_numbers = #tpu.dot_dimension_numbers<[1], [0], [0], [1], [0, 0, 1, 1], [], []>} : vector<1x8xf32>, vector<8x2048xf32>, vector<1x2048xf32> -> vector<1x2048xf32>
    %310 = math.tanh %309 : vector<1x2048xf32>
    %c0_91 = arith.constant 0 : index
    %c0_92 = arith.constant 0 : index
    %311 = vector.load %arg19[%c0_91, %c0_92] : memref<1x2048xf32, #tpu.memory_space<vmem>>, vector<1x2048xf32>
    tpu.vector_store %arg19[%c0_91, %c0_92], %310 {strides = array<i32>} : memref<1x2048xf32, #tpu.memory_space<vmem>>, vector<1x2048xf32>,
    return
  }
}

</mosaic_0001>

<bundles_post_ra>
// kernel: mnist_dcgen_forward.1
= control target key start
LH: loop header
LB: loop body
LE: loop exit
PB: predicated region body
PF: predicated region fallthrough
CT: control target
= control target key end

     0   :  { %s8660_s0 = inlined_call_operand.vmem [shape: f32[16,2], index: 0, kind: input, shape index: {}]   ;;  %s8661_s1 = inlined_call_operand.hbm [shape: f32[1024,16], index: 1, kind: input, shape index: {}]   ;;  %s8662_s2 = inlined_call_operand.hbm [shape: f32[64,1], index: 2, kind: input, shape index: {}]   ;;  %s8663_s3 = inlined_call_operand.hbm [shape: f32[64,1], index: 3, kind: input, shape index: {}]   ;;  %s8664_s4 = inlined_call_operand.hbm [shape: f32[128,576], index: 4, kind: input, shape index: {}]   ;;  %s8665_s5 = inlined_call_operand.hbm [shape: f32[9,32], index: 5, kind: input, shape index: {}]   ;;  %s8666_s6 = inlined_call_operand.hbm [shape: f32[32,1], index: 6, kind: input, shape index: {}]   ;;  %s8667_s7 = inlined_call_operand.hbm [shape: f32[32,1], index: 7, kind: input, shape index: {}]   ;;  %s8668_s8 = inlined_call_operand.hbm [shape: f32[128,128], index: 8, kind: input, shape index: {}]   ;;  %s8669_s9 = inlined_call_operand.hbm [shape: f32[64,288], index: 9, kind: input, shape index: {}]   ;;  %s8670_s10 = inlined_call_operand.hbm [shape: f32[9,128], index: 10, kind: input, shape index: {}]   ;;  %s8671_s11 = inlined_call_operand.vmem [shape: f32[16,1], index: 11, kind: input, shape index: {}]   ;;  %s8672_s12 = inlined_call_operand.vmem [shape: f32[16,1], index: 12, kind: input, shape index: {}]   ;;  %s8673_s13 = inlined_call_operand.hbm [shape: f32[512,512], index: 13, kind: input, shape index: {}]   ;;  %s8674_s14 = inlined_call_operand.hbm [shape: f32[32,144], index: 14, kind: input, shape index: {}]   ;;  %s8675_s15 = inlined_call_operand.hbm [shape: f32[9,512], index: 15, kind: input, shape index: {}]   ;;  %s8676_s16 = inlined_call_operand.hbm [shape: f32[8,1], index: 16, kind: input, shape index: {}]   ;;  %s8677_s17 = inlined_call_operand.hbm [shape: f32[8,1], index: 17, kind: input, shape index: {}]   ;;  %s8678_s18 = inlined_call_operand.vmem [shape: f32[1,8], index: 18, kind: input, shape index: {}]   ;;  %s8679_s19 = inlined_call_operand.vmem [shape: f32[1,2048], index: 19, kind: output, shape index: {}]  }
   0x1   :  { %8684 = sst [smem:[#allocation92_spill]] %s8660_s0 }
   0x2   :  { %8685 = sst [smem:[#allocation93_spill]] %s8661_s1 }
   0x3   :  { %8686 = sst [smem:[#allocation94_spill]] %s8662_s2 }
   0x4   :  { %8687 = sst [smem:[#allocation95_spill]] %s8663_s3 }
   0x5   :  { %8688 = sst [smem:[#allocation96_spill]] %s8679_s19 }
   0x6   :  { %24 = vsyncpa [#allocation3], 0 }
   0x7   :  { %25 = vsyncpa [#allocation5], 0 }
   0x8   :  { %26 = vsyncpa [#allocation8], 0 }
   0x9   :  { %27 = vsyncpa [#allocation11], 0 }
   0xa   :  { %28 = vsyncpa [#allocation14], 0 }
   0xb   :  { %29 = vsyncpa [#allocation17], 0 }
   0xc   :  { %30 = vsyncpa [#allocation20], 0 }
   0xd   :  { %31 = vsyncpa [#allocation23], 0  ;;  %s8689_s20 = sld [smem:[#allocation94_spill]]  ;;  %s6199_s1 = smov [#allocation4]  }
   0xe   :  { %s53_s22 = sshll.u32 %s6199_s1, 4  ;;  %s77_s24 = sshll.u32 %s8664_s4, 4  ;;  %s54_s22 = int_to_ptr.vmem [resolvable:$true] %s53_s22  ;;  %s78_s24 = int_to_ptr.hbm [resolvable:$true] %s77_s24 }
   0xf   :  { %s6200_s25 = smov 128   ;;  %s6201_s3 = smov 8  }
  0x10   :  { %s6202_s26 = smov [#allocation7]   ;;  %s6203_s28 = smov 640  }
  0x11   :  { %s79_s27 = sshll.u32 %s6202_s26, 4  ;;  %s6204_s29 = smov 40   ;;  %s80_s27 = int_to_ptr.vmem [resolvable:$true] %s79_s27 }
  0x12   :  { %85 = dma.hbm_to_vmem [thread:$0]  %s78_s24, 10240, %s80_s27, [#allocation8], %s6203_s28, %s6203_s28, %s6204_s29  }
  0x13   :  { %s51_s21 = sshll.u32 %s8689_s20, 4  ;;  %s103_s20 = sshll.u32 %s8666_s6, 4  ;;  %s52_s21 = int_to_ptr.hbm [resolvable:$true] %s51_s21  ;;  %s104_s20 = int_to_ptr.hbm [resolvable:$true] %s103_s20 }
  0x14   :  { %59 = dma.hbm_to_vmem [thread:$0]  %s52_s21, 1024, %s54_s22, [#allocation5], %s6200_s25, %s6200_s25, %s6201_s3  }
  0x15   :  { %s6205_s1 = smov [#allocation10]   ;;  %s129_s19 = sshll.u32 %s8668_s8, 4  ;;  %s130_s19 = int_to_ptr.hbm [resolvable:$true] %s129_s19 }
  0x16   :  { %s105_s4 = sshll.u32 %s6205_s1, 4  ;;  %s6206_s21 = smov [#allocation13]   ;;  %s106_s4 = int_to_ptr.vmem [resolvable:$true] %s105_s4 }
  0x17   :  { %111 = dma.hbm_to_vmem [thread:$0]  %s104_s20, 512, %s106_s4, [#allocation11], %s6200_s25, %s6200_s25, %s6201_s3  }
  0x18   :  { %s131_s22 = sshll.u32 %s6206_s21, 4  ;;  %s155_s27 = sshll.u32 %s8670_s10, 4  ;;  %s132_s22 = int_to_ptr.vmem [resolvable:$true] %s131_s22  ;;  %s156_s27 = int_to_ptr.hbm [resolvable:$true] %s155_s27 }
  0x19   :  { %137 = dma.hbm_to_vmem [thread:$0]  %s130_s19, 2048, %s132_s22, [#allocation14], %s6200_s25, %s6200_s25, %s6201_s3  }
  0x1a   :  { %s185_s8 = sshll.u32 %s8674_s14, 4  ;;  %s6207_s29 = smov [#allocation16]   ;;  %s186_s8 = int_to_ptr.hbm [resolvable:$true] %s185_s8 }
  0x1b   :  { %s157_s0 = sshll.u32 %s6207_s29, 4  ;;  %s6208_s30 = smov [#allocation19]   ;;  %s158_s0 = int_to_ptr.vmem [resolvable:$true] %s157_s0 }
  0x1c   :  { %163 = dma.hbm_to_vmem [thread:$0]  %s156_s27, 256, %s158_s0, [#allocation17], %s6200_s25, %s6200_s25, %s6201_s3  }
  0x1d   :  { %s187_s10 = sshll.u32 %s6208_s30, 4  ;;  %s6209_s20 = smov 256   ;;  %s188_s10 = int_to_ptr.vmem [resolvable:$true] %s187_s10 }
  0x1e   :  { %s6210_s1 = smov 16   ;;  %s212_s2 = sshll.u32 %s8676_s16, 4  ;;  %s213_s2 = int_to_ptr.hbm [resolvable:$true] %s212_s2 }
  0x1f   :  { %193 = dma.hbm_to_vmem [thread:$0]  %s186_s8, 1024, %s188_s10, [#allocation20], %s6209_s20, %s6209_s20, %s6210_s1  }
  0x20   :  { %s6211_s14 = smov [#allocation22]   ;;  %s8690_s24 = sld [smem:[#allocation93_spill]] }
  0x21   :  { %s214_s23 = sshll.u32 %s6211_s14, 4  ;;  %s6212_s27 = smov [#allocation2]   ;;  %s215_s23 = int_to_ptr.vmem [resolvable:$true] %s214_s23 }
  0x22   :  { %217 = dma.hbm_to_vmem [thread:$0]  %s213_s2, 128, %s215_s23, [#allocation23]  }
  0x23   :  { %s40_s6 = sshll.u32 %s6212_s27, 4  ;;  %s8691_s0 = sld [smem:[#allocation95_spill]]  ;;  %s41_s6 = int_to_ptr.vmem [resolvable:$true] %s40_s6 }
  0x24   :  { %s90_s10 = sshll.u32 %s8665_s5, 4  ;;  %s6213_s20 = smov [#allocation6]   ;;  %s91_s10 = int_to_ptr.hbm [resolvable:$true] %s90_s10 }
  0x25   :  { %s66_s19 = sshll.u32 %s6213_s20, 4  ;;  %s6214_s4 = smov [#allocation9]   ;;  %s67_s19 = int_to_ptr.vmem [resolvable:$true] %s66_s19 }
  0x26   :  { %s38_s26 = sshll.u32 %s8690_s24, 4  ;;  %s92_s2 = sshll.u32 %s6214_s4, 4  ;;  %s39_s26 = int_to_ptr.hbm [resolvable:$true] %s38_s26  ;;  %s93_s2 = int_to_ptr.vmem [resolvable:$true] %s92_s2 }
  0x27   :  { %46 = dma.hbm_to_vmem [thread:$0]  %s39_s26, 16384, %s41_s6, [#allocation3], %s6200_s25, %s6200_s25, %s6201_s3  }
  0x28   :  { %s116_s21 = sshll.u32 %s8667_s7, 4  ;;  %s142_s24 = sshll.u32 %s8669_s9, 4  ;;  %s117_s21 = int_to_ptr.hbm [resolvable:$true] %s116_s21  ;;  %s143_s24 = int_to_ptr.hbm [resolvable:$true] %s142_s24 }
  0x29   :  { %s64_s8 = sshll.u32 %s8691_s0, 4  ;;  %s6215_s26 = smov [#allocation12]   ;;  %s65_s8 = int_to_ptr.hbm [resolvable:$true] %s64_s8 }
  0x2a   :  { %72 = dma.hbm_to_vmem [thread:$0]  %s65_s8, 1024, %s67_s19, [#allocation5], %s6200_s25, %s6200_s25, %s6201_s3  }
  0x2b   :  { %98 = dma.hbm_to_vmem [thread:$0]  %s91_s10, 256, %s93_s2, [#allocation8], %s6200_s25, %s6200_s25, %s6201_s3  }
  0x2c   :  { %s118_s27 = sshll.u32 %s6215_s26, 4  ;;  %s6216_s6 = smov [#allocation15]   ;;  %s119_s27 = int_to_ptr.vmem [resolvable:$true] %s118_s27 }
  0x2d   :  { %124 = dma.hbm_to_vmem [thread:$0]  %s117_s21, 512, %s119_s27, [#allocation11], %s6200_s25, %s6200_s25, %s6201_s3  }
  0x2e   :  { %s144_s7 = sshll.u32 %s6216_s6, 4  ;;  %s6217_s28 = smov 384   ;;  %s145_s7 = int_to_ptr.vmem [resolvable:$true] %s144_s7 }
  0x2f   :  { %s6218_s29 = smov 24   ;;  %s172_s16 = sshll.u32 %s8673_s13, 4  ;;  %s173_s16 = int_to_ptr.hbm [resolvable:$true] %s172_s16 }
  0x30   :  { %150 = dma.hbm_to_vmem [thread:$0]  %s143_s24, 3072, %s145_s7, [#allocation14], %s6217_s28, %s6217_s28, %s6218_s29  }
  0x31   :  { %s6219_s9 = smov [#allocation18]   ;;  %s198_s19 = sshll.u32 %s8675_s15, 4  ;;  %s199_s19 = int_to_ptr.hbm [resolvable:$true] %s198_s19 }
  0x32   :  { %s174_s30 = sshll.u32 %s6219_s9, 4  ;;  %s6220_s25 = smov 512   ;;  %s175_s30 = int_to_ptr.vmem [resolvable:$true] %s174_s30 }
  0x33   :  { %s6221_s4 = smov 32   ;;  %s6222_s2 = smov [#allocation21]  }
  0x34   :  { %180 = dma.hbm_to_vmem [thread:$0]  %s173_s16, 32768, %s175_s30, [#allocation17], %s6220_s25, %s6220_s25, %s6221_s4  }
  0x35   :  { %s200_s14 = sshll.u32 %s6222_s2, 4  ;;  %s223_s5 = sshll.u32 %s8677_s17, 4  ;;  %s201_s14 = int_to_ptr.vmem [resolvable:$true] %s200_s14  ;;  %s224_s5 = int_to_ptr.hbm [resolvable:$true] %s223_s5 }
  0x36   :  { %206 = dma.hbm_to_vmem [thread:$0]  %s199_s19, 1024, %s201_s14, [#allocation20], %s6220_s25, %s6220_s25, %s6221_s4  }
  0x37   :  { %s6223_s13 = smov [#allocation24]  }
  0x38   :  { %s225_s22 = sshll.u32 %s6223_s13, 4  ;;  %s226_s22 = int_to_ptr.vmem [resolvable:$true] %s225_s22 }
  0x39   :  { %228 = dma.hbm_to_vmem [thread:$0]  %s224_s5, 128, %s226_s22, [#allocation23]  }
  0x3a   :  { %6183 = dma.done.wait [#allocation3], 16384  }
  0x3b   :  { %6184 = vsyncadd [#allocation3], 4294950912 }
  0x3c   :  { %6185 = dma.done.wait [#allocation5], 2048  }
  0x3d   :  { %6186 = vsyncadd [#allocation5], 4294965248 }
  0x3e   :  { %6187 = dma.done.wait [#allocation8], 10496  }
  0x3f   :  { %6188 = vsyncadd [#allocation8], 4294956800 }
  0x40   :  { %6189 = dma.done.wait [#allocation11], 1024  }
  0x41   :  { %6190 = vsyncadd [#allocation11], 4294966272 }
  0x42   :  { %6191 = dma.done.wait [#allocation14], 5120  }
  0x43   :  { %6192 = vsyncadd [#allocation14], 4294962176 }
  0x44   :  { %6193 = dma.done.wait [#allocation17], 33024  }
  0x45   :  { %6194 = vsyncadd [#allocation17], 4294934272 }
  0x46   :  { %6195 = dma.done.wait [#allocation20], 2048  }
  0x47   :  { %6196 = vsyncadd [#allocation20], 4294965248 }
  0x48   :  { %6197 = dma.done.wait [#allocation23], 256  }
  0x49   :  { %6198 = vsyncadd [#allocation23], 4294967040  ;;  %s8692_s24 = sld [smem:[#allocation92_spill]]  ;;  %v291_v2 = vld [vmem:[#allocation2] sm:$0xff]  ;;  %vm8683_vm0 = vcmask 130048   ;;  %v410_v4 = vld [vmem:[#allocation2 + $0x3b8] sm:$0xff] }
  0x4a   :  { %v379_v3 = vld [vmem:[#allocation2 + $0x2c0] sm:$0xff]  ;;  %v292_v5 = vld [vmem:[#allocation2 + $0x8] sm:$0xff]  ;;  %v293_v8 = vld [vmem:[#allocation2 + $0x10] sm:$0xff]  ;;  %v6224_v34 = vmov 0   ;;  %s6225_s6 = smov 22   ;;  %s6226_s7 = smov 30  }
  0x4b   :  { %v380_v6 = vld [vmem:[#allocation2 + $0x2c8] sm:$0xff]  ;;  %v411_v7 = vld [vmem:[#allocation2 + $0x3c0] sm:$0xff]  ;;  %v381_v9 = vld [vmem:[#allocation2 + $0x2d0] sm:$0xff]  ;;  %5746 = vset.pattern.permute.xlu2 %v6224_v34  ;;  %5744 = vset.pattern.permute.xlu0 %v6224_v34  ;;  %s6227_s28 = smov 28   ;;  %s6228_s0 = smov 2   ;;  %vm1687_vm1 = vcmask 15360  }
  0x4c   :  { %v412_v10 = vld [vmem:[#allocation2 + $0x3c8] sm:$0xff]  ;;  %v294_v11 = vld [vmem:[#allocation2 + $0x18] sm:$0xff]  ;;  %v413_v13 = vld [vmem:[#allocation2 + $0x3d0] sm:$0xff]  ;;  %5745 = vset.pattern.permute.xlu1 %v6224_v34  ;;  %s6229_s8 = smov 4   ;;  %s6230_s16 = smov 26   ;;  %vm1696_vm2 = vcmask 31744  }
  0x4d   :  { %v382_v12 = vld [vmem:[#allocation2 + $0x2d8] sm:$0xff]  ;;  %v295_v14 = vld [vmem:[#allocation2 + $0x20] sm:$0xff]  ;;  %v296_v17 = vld [vmem:[#allocation2 + $0x28] sm:$0xff]  ;;  %s6232_s9 = smov 10   ;;  %s6233_s30 = smov 12   ;;  %vm1705_vm3 = vcmask 48128  }
  0x4e   :  { %v383_v15 = vld [vmem:[#allocation2 + $0x2e0] sm:$0xff]  ;;  %v414_v16 = vld [vmem:[#allocation2 + $0x3d8] sm:$0xff]  ;;  %v384_v18 = vld [vmem:[#allocation2 + $0x2e8] sm:$0xff]  ;;  %s6234_s10 = smov 14   ;;  %vm1714_vm4 = vcmask 64512   ;;  %vm1723_vm5 = vcmask 80896  }
  0x4f   :  { %v420_v0 = vld [vmem:[%s8692_s24 + $0x8] sm:$0xff]  ;;  %v419_v1 = vld [vmem:[%s8692_s24] sm:$0xff]  ;;  %v297_v20 = vld [vmem:[#allocation2 + $0x30] sm:$0xff]  ;;  %vm1732_vm6 = vcmask 97280   ;;  %s6235_s20 = smov 18   ;;  %s6236_s19 = smov 20  }
  0x50   :  { %820 = vmatpush.msra.mxu0 %v420_v0  ;;  %5670 = vmatpush.msra.mxu1 %v420_v0  ;;  %v415_v19 = vld [vmem:[#allocation2 + $0x3e0] sm:$0xff]  ;;  %v385_v21 = vld [vmem:[#allocation2 + $0x2f0] sm:$0xff]  ;;  %v416_v22 = vld [vmem:[#allocation2 + $0x3e8] sm:$0xff]  ;;  %vm1741_vm7 = vcmask 113664   ;;  %vm1767_vm8 = vcmask 162816   ;;  %vm8682_vm9 = vcmask 146432  }
  0x51   :  { %5671 = vmatpush.msra.mxu3 %v420_v0  ;;  %v298_v23 = vld [vmem:[#allocation2 + $0x38] sm:$0xff]  ;;  %v417_v25 = vld [vmem:[#allocation2 + $0x3f0] sm:$0xff]  ;;  %v299_v26 = vld [vmem:[#allocation2 + $0x40] sm:$0xff]  ;;  %vm1776_vm10 = vcmask 179200   ;;  %vm1785_vm11 = vcmask 195584   ;;  %vm1794_vm12 = vcmask 211968  }
  0x52   :  { %821 = vmatpush.msra.mxu0 %v419_v1  ;;  %5672 = vmatpush.msra.mxu1 %v419_v1  ;;  %v386_v24 = vld [vmem:[#allocation2 + $0x2f8] sm:$0xff]  ;;  %v387_v27 = vld [vmem:[#allocation2 + $0x300] sm:$0xff]  ;;  %v300_v29 = vld [vmem:[#allocation2 + $0x48] sm:$0xff]  ;;  %vm1803_vm13 = vcmask 228352   ;;  %vm1812_vm14 = vcmask 244736   ;;  %vm1837_vm15 = vcmask 261120  }
  0x53   :  { %5486 = vmatmul.msk.f32.vlgmr.msra.gmra.mxu0 %vm8683_vm0, %v291_v2  ;;  %5574 = vmatmul.msk.f32.vlgmr.msra.gmra.mxu1 %vm8683_vm0, %v379_v3  ;;  %v418_v28 = vld [vmem:[#allocation2 + $0x3f8] sm:$0xff]  ;;  %v388_v30 = vld [vmem:[#allocation2 + $0x308] sm:$0xff]  ;;  %v301_v31 = vld [vmem:[#allocation2 + $0x50] sm:$0xff]  ;;  %s6239_s25 = smov 120   ;;  %s6240_s2 = smov 118  }
  0x54   :  { %5673 = vmatpush.msra.mxu3 %v419_v1  ;;  %v389_v32 = vld [vmem:[#allocation2 + $0x310] sm:$0xff]  ;;  %v1836_v33 = vld [vmem:[#allocation6 + $0x38] sm:$0xff]  ;;  %v303_v37 = vld [vmem:[#allocation2 + $0x60] sm:$0xff]  ;;  %s6241_s14 = smov 122   ;;  %s6242_s23 = smov 64  }
  0x55   :  { %5605 = vmatmul.msk.f32.vlgmr.msra.gmra.mxu3 %vm8683_vm0, %v410_v4  ;;  %2106 = vperm.xlu2 %5746, %v1836_v33   ;;  %v302_v35 = vld [vmem:[#allocation2 + $0x58] sm:$0xff]  ;;  %v391_v38 = vld [vmem:[#allocation2 + $0x320] sm:$0xff]  ;;  %v1835_v39 = vld [vmem:[#allocation6 + $0x30] sm:$0xff]  ;;  %s6243_s21 = smov 96   ;;  %s6245_s5 = smov 112  }
  0x56   :  { %v390_v36 = vld [vmem:[#allocation2 + $0x318] sm:$0xff]  ;;  %v304_v41 = vld [vmem:[#allocation2 + $0x68] sm:$0xff]  ;;  %v305_v45 = vld [vmem:[#allocation2 + $0x70] sm:$0xff]  ;;  %s6246_s13 = smov 114  }
  0x57   :  { %v1828_v40 = vld [vmem:[#allocation4 + $0x38] sm:$0xff]  ;;  %v392_v42 = vld [vmem:[#allocation2 + $0x328] sm:$0xff]  ;;  %v393_v46 = vld [vmem:[#allocation2 + $0x330] sm:$0xff] }
  0x58   :  { %2058 = vperm.xlu0 %5744, %v1828_v40   ;;  %v1834_v43 = vld [vmem:[#allocation6 + $0x28] sm:$0xff]  ;;  %v1824_v44 = vld [vmem:[#allocation4 + $0x18] sm:$0xff]  ;;  %v1823_v47 = vld [vmem:[#allocation4 + $0x10] sm:$0xff] }
  0x59   :  { %v306_v48 = vld [vmem:[#allocation2 + $0x78] sm:$0xff]  ;;  %v307_v52 = vld [vmem:[#allocation2 + $0x80] sm:$0xff]  ;;  %v308_v56 = vld [vmem:[#allocation2 + $0x88] sm:$0xff] }
  0x5a   :  { %v394_v49 = vld [vmem:[#allocation2 + $0x338] sm:$0xff]  ;;  %v395_v53 = vld [vmem:[#allocation2 + $0x340] sm:$0xff]  ;;  %v396_v57 = vld [vmem:[#allocation2 + $0x348] sm:$0xff] }
  0x5b   :  { %5487 = vmatmul.msk.f32.gmra.mxu0 %vm8683_vm0, %v292_v5  ;;  %5575 = vmatmul.msk.f32.gmra.mxu1 %vm8683_vm0, %v380_v6  ;;  %v1827_v59 = vld [vmem:[#allocation4 + $0x30] sm:$0xff]  ;;  %v1826_v1 = vld [vmem:[#allocation4 + $0x28] sm:$0xff]  ;;  %v310_v4 = vld [vmem:[#allocation2 + $0x98] sm:$0xff] }
  0x5c   :  { %2053 = vperm.xlu1 %5745, %v1827_v59   ;;  %v309_v62 = vld [vmem:[#allocation2 + $0x90] sm:$0xff]  ;;  %v398_v5 = vld [vmem:[#allocation2 + $0x358] sm:$0xff] }
  0x5d   :  { %5606 = vmatmul.msk.f32.gmra.mxu3 %vm8683_vm0, %v411_v7  ;;  %2101 = vperm.xlu2 %5746, %v1835_v39   ;;  %v397_v63 = vld [vmem:[#allocation2 + $0x350] sm:$0xff]  ;;  %v1825_v7 = vld [vmem:[#allocation4 + $0x20] sm:$0xff] }
  0x5e   :  { %v321_v59 = vld [vmem:[#allocation2 + $0xf0] sm:$0xff] }
  0x60   :  { %2038 = vperm.xlu0 %5744, %v1824_v44  }
  0x63   :  { %5488 = vmatmul.msk.f32.gmra.mxu0 %vm8683_vm0, %v293_v8  ;;  %5576 = vmatmul.msk.f32.gmra.mxu1 %vm8683_vm0, %v381_v9 }
  0x64   :  { %2048 = vperm.xlu1 %5745, %v1826_v1  }
  0x65   :  { %5607 = vmatmul.msk.f32.gmra.mxu3 %vm8683_vm0, %v412_v10  ;;  %2096 = vperm.xlu2 %5746, %v1834_v43   ;;  %v311_v10 = vld [vmem:[#allocation2 + $0xa0] sm:$0xff] }
  0x6b   :  { %5489 = vmatmul.msk.f32.gmra.mxu0 %vm8683_vm0, %v294_v11  ;;  %5577 = vmatmul.msk.f32.gmra.mxu1 %vm8683_vm0, %v382_v12  ;;  %v399_v11 = vld [vmem:[#allocation2 + $0x360] sm:$0xff] }
  0x6c   :  { %2043 = vperm.xlu1 %5745, %v1825_v7   ;;  %v324_v7 = vld [vmem:[#allocation2 + $0x108] sm:$0xff] }
  0x6d   :  { %5608 = vmatmul.msk.f32.gmra.mxu3 %vm8683_vm0, %v413_v13  ;;  %2033 = vperm.xlu2 %5746, %v1823_v47   ;;  %v1833_v13 = vld [vmem:[#allocation6 + $0x20] sm:$0xff] }
  0x73   :  { %5490 = vmatmul.msk.f32.gmra.mxu0 %vm8683_vm0, %v295_v14  ;;  %5578 = vmatmul.msk.f32.gmra.mxu1 %vm8683_vm0, %v383_v15 }
  0x74   :  { %2091 = vperm.xlu1 %5745, %v1833_v13  }
  0x75   :  { %5609 = vmatmul.msk.f32.gmra.mxu3 %vm8683_vm0, %v414_v16  ;;  %v312_v16 = vld [vmem:[#allocation2 + $0xa8] sm:$0xff] }
  0x7b   :  { %5491 = vmatmul.msk.f32.gmra.mxu0 %vm8683_vm0, %v296_v17  ;;  %5579 = vmatmul.msk.f32.gmra.mxu1 %vm8683_vm0, %v384_v18  ;;  %v400_v17 = vld [vmem:[#allocation2 + $0x368] sm:$0xff] }
  0x7d   :  { %5610 = vmatmul.msk.f32.gmra.mxu3 %vm8683_vm0, %v415_v19 }
  0x83   :  { %5492 = vmatmul.msk.f32.gmra.mxu0 %vm8683_vm0, %v297_v20  ;;  %5580 = vmatmul.msk.f32.gmra.mxu1 %vm8683_vm0, %v385_v21  ;;  %v313_v21 = vld [vmem:[#allocation2 + $0xb0] sm:$0xff] }
  0x85   :  { %5611 = vmatmul.msk.f32.gmra.mxu3 %vm8683_vm0, %v416_v22  ;;  %v401_v22 = vld [vmem:[#allocation2 + $0x370] sm:$0xff] }
  0x8b   :  { %5493 = vmatmul.msk.f32.gmra.mxu0 %vm8683_vm0, %v298_v23  ;;  %5581 = vmatmul.msk.f32.gmra.mxu1 %vm8683_vm0, %v386_v24 }
  0x8d   :  { %5612 = vmatmul.msk.f32.gmra.mxu3 %vm8683_vm0, %v417_v25 }
  0x93   :  { %5494 = vmatmul.msk.f32.gmra.mxu0 %vm8683_vm0, %v299_v26  ;;  %5582 = vmatmul.msk.f32.gmra.mxu1 %vm8683_vm0, %v387_v27  ;;  %v314_v26 = vld [vmem:[#allocation2 + $0xb8] sm:$0xff] }
  0x94   :  { %v402_v27 = vld [vmem:[#allocation2 + $0x378] sm:$0xff] }
  0x95   :  { %5613 = vmatmul.msk.f32.gmra.mxu3 %vm8683_vm0, %v418_v28 }
  0x9b   :  { %5495 = vmatmul.msk.f32.gmra.mxu0 %vm8683_vm0, %v300_v29  ;;  %5583 = vmatmul.msk.f32.gmra.mxu1 %vm8683_vm0, %v388_v30 }
  0xa3   :  { %5496 = vmatmul.msk.f32.gmra.mxu0 %vm8683_vm0, %v301_v31  ;;  %5584 = vmatmul.msk.f32.gmra.mxu1 %vm8683_vm0, %v389_v32  ;;  %v315_v31 = vld [vmem:[#allocation2 + $0xc0] sm:$0xff] }
  0xa4   :  { %v403_v32 = vld [vmem:[#allocation2 + $0x380] sm:$0xff] }
  0xab   :  { %5497 = vmatmul.msk.f32.gmra.mxu0 %vm8683_vm0, %v302_v35  ;;  %5585 = vmatmul.msk.f32.gmra.mxu1 %vm8683_vm0, %v390_v36  ;;  %v316_v36 = vld [vmem:[#allocation2 + $0xc8] sm:$0xff] }
  0xb3   :  { %5498 = vmatmul.msk.f32.gmra.mxu0 %vm8683_vm0, %v303_v37  ;;  %5586 = vmatmul.msk.f32.gmra.mxu1 %vm8683_vm0, %v391_v38  ;;  %v404_v37 = vld [vmem:[#allocation2 + $0x388] sm:$0xff] }
  0xbb   :  { %5499 = vmatmul.msk.f32.gmra.mxu0 %vm8683_vm0, %v304_v41  ;;  %5587 = vmatmul.msk.f32.gmra.mxu1 %vm8683_vm0, %v392_v42  ;;  %v317_v41 = vld [vmem:[#allocation2 + $0xd0] sm:$0xff] }
  0xbc   :  { %v405_v42 = vld [vmem:[#allocation2 + $0x390] sm:$0xff] }
  0xc3   :  { %5500 = vmatmul.msk.f32.gmra.mxu0 %vm8683_vm0, %v305_v45  ;;  %5588 = vmatmul.msk.f32.gmra.mxu1 %vm8683_vm0, %v393_v46  ;;  %v318_v45 = vld [vmem:[#allocation2 + $0xd8] sm:$0xff] }
  0xc4   :  { %v406_v46 = vld [vmem:[#allocation2 + $0x398] sm:$0xff] }
  0xcb   :  { %5501 = vmatmul.msk.f32.gmra.mxu0 %vm8683_vm0, %v306_v48  ;;  %5589 = vmatmul.msk.f32.gmra.mxu1 %vm8683_vm0, %v394_v49  ;;  %v319_v49 = vld [vmem:[#allocation2 + $0xe0] sm:$0xff] }
  0xd0   :  { %v6473_v50 = vpop.f32.mrf.mxu0  ;;  %v1087_v51 = vpop.f32.mrf.mxu1 }
  0xd1   :  { %1535 = vrot.lane.b32.xlu0 %v1087_v51, %s6225_s6  ;;  %v407_v51 = vld [vmem:[#allocation2 + $0x3a0] sm:$0xff] }
  0xd3   :  { %5502 = vmatmul.msk.f32.gmra.mxu0 %vm8683_vm0, %v307_v52  ;;  %5590 = vmatmul.msk.f32.gmra.mxu1 %vm8683_vm0, %v395_v53 }
  0xd8   :  { %v6478_v54 = vpop.f32.mrf.mxu0  ;;  %v1090_v55 = vpop.f32.mrf.mxu1 }
  0xd9   :  { %v1180_v58 = vpop.f32.mrf.mxu3  ;;  %1537 = vrot.lane.b32.xlu0 %v1090_v55, %s6225_s6  ;;  %v320_v55 = vld [vmem:[#allocation2 + $0xe8] sm:$0xff] }
  0xda   :  { %1645 = vrot.lane.b32.xlu1 %v1180_v58, %s6227_s28 }
  0xdb   :  { %5503 = vmatmul.msk.f32.gmra.mxu0 %vm8683_vm0, %v308_v56  ;;  %5591 = vmatmul.msk.f32.gmra.mxu1 %vm8683_vm0, %v396_v57  ;;  %v408_v56 = vld [vmem:[#allocation2 + $0x3a8] sm:$0xff] }
  0xe0   :  { %v6483_v60 = vpop.f32.mrf.mxu0  ;;  %v1093_v61 = vpop.f32.mrf.mxu1 }
  0xe1   :  { %v1183_v0 = vpop.f32.mrf.mxu3 }
  0xe2   :  { %1663 = vrot.lane.b32.xlu2 %v1183_v0, %s6226_s7  ;;  %1539 = vrot.lane.b32.xlu1 %v1093_v61, %s6225_s6  ;;  %v409_v61 = vld [vmem:[#allocation2 + $0x3b0] sm:$0xff]  ;;  %v322_v0 = vld [vmem:[#allocation2 + $0xf8] sm:$0xff] }
  0xe3   :  { %5504 = vmatmul.msk.f32.gmra.mxu0 %vm8683_vm0, %v309_v62  ;;  %5592 = vmatmul.msk.f32.gmra.mxu1 %vm8683_vm0, %v397_v63 }
  0xe8   :  { %v6488_v2 = vpop.f32.mrf.mxu0  ;;  %v1096_v3 = vpop.f32.mrf.mxu1 }
  0xe9   :  { %8693 = vst [vmem:[#allocation33_spill] sm:$0xff] %v6488_v2  ;;  %v1186_v6 = vpop.f32.mrf.mxu3 }
  0xea   :  { %1665 = vrot.lane.b32.xlu0 %v1186_v6, %s6226_s7 }
  0xeb   :  { %5505 = vmatmul.msk.f32.gmra.mxu0 %vm8683_vm0, %v310_v4  ;;  %5593 = vmatmul.msk.f32.gmra.mxu1 %vm8683_vm0, %v398_v5  ;;  %v323_v4 = vld [vmem:[#allocation2 + $0x100] sm:$0xff] }
  0xf0   :  { %v6493_v8 = vpop.f32.mrf.mxu0  ;;  %v1099_v9 = vpop.f32.mrf.mxu1 }
  0xf1   :  { %v1189_v12 = vpop.f32.mrf.mxu3 }
  0xf2   :  { %1667 = vrot.lane.b32.xlu2 %v1189_v12, %s6226_s7  ;;  %1541 = vrot.lane.b32.xlu0 %v1096_v3, %s6225_s6 }
  0xf3   :  { %5506 = vmatmul.msk.f32.gmra.mxu0 %vm8683_vm0, %v311_v10  ;;  %5594 = vmatmul.msk.f32.gmra.mxu1 %vm8683_vm0, %v399_v11  ;;  %v325_v11 = vld [vmem:[#allocation2 + $0x110] sm:$0xff] }
  0xf8   :  { %v6499_v14 = vpop.f32.mrf.mxu0  ;;  %v1102_v15 = vpop.f32.mrf.mxu1 }
  0xf9   :  { %v1192_v18 = vpop.f32.mrf.mxu3  ;;  %1545 = vrot.lane.b32.xlu1 %v1102_v15, %s6225_s6  ;;  %v326_v15 = vld [vmem:[#allocation2 + $0x118] sm:$0xff] }
  0xfa   :  { %1669 = vrot.lane.b32.xlu2 %v1192_v18, %s6226_s7  ;;  %1543 = vrot.lane.b32.xlu0 %v1099_v9, %s6225_s6  ;;  %v327_v18 = vld [vmem:[#allocation2 + $0x120] sm:$0xff] }
  0xfb   :  { %5507 = vmatmul.msk.f32.gmra.mxu0 %vm8683_vm0, %v312_v16  ;;  %5595 = vmatmul.msk.f32.gmra.mxu1 %vm8683_vm0, %v400_v17 }
 0x100   :  { %v6506_v19 = vpop.f32.mrf.mxu0  ;;  %v1105_v20 = vpop.f32.mrf.mxu1 }
 0x101   :  { %v1195_v23 = vpop.f32.mrf.mxu3 }
 0x102   :  { %1547 = vrot.lane.b32.xlu2 %v1105_v20, %s6225_s6  ;;  %1671 = vrot.lane.b32.xlu0 %v1195_v23, %s6226_s7 }
 0x103   :  { %5508 = vmatmul.msk.f32.gmra.mxu0 %vm8683_vm0, %v313_v21  ;;  %5596 = vmatmul.msk.f32.gmra.mxu1 %vm8683_vm0, %v401_v22  ;;  %v328_v22 = vld [vmem:[#allocation2 + $0x128] sm:$0xff] }
 0x108   :  { %v6513_v24 = vpop.f32.mrf.mxu0  ;;  %v1108_v25 = vpop.f32.mrf.mxu1 }
 0x109   :  { %8694 = vst [vmem:[#allocation34_spill] sm:$0xff] %v6513_v24  ;;  %v1198_v28 = vpop.f32.mrf.mxu3  ;;  %v370_v24 = vld [vmem:[#allocation2 + $0x278] sm:$0xff] }
 0x10a   :  { %1673 = vrot.lane.b32.xlu2 %v1198_v28, %s6226_s7 }
 0x10b   :  { %5509 = vmatmul.msk.f32.gmra.mxu0 %vm8683_vm0, %v314_v26  ;;  %5597 = vmatmul.msk.f32.gmra.mxu1 %vm8683_vm0, %v402_v27  ;;  %v329_v26 = vld [vmem:[#allocation2 + $0x130] sm:$0xff] }
 0x110   :  { %v847_v29 = vpop.f32.mrf.mxu0  ;;  %v1111_v30 = vpop.f32.mrf.mxu1 }
 0x111   :  { %v1201_v33 = vpop.f32.mrf.mxu3  ;;  %1567 = vrot.lane.b32.xlu0 %v1111_v30, %s6218_s29 }
 0x112   :  { %1549 = vrot.lane.b32.xlu2 %v1108_v25, %s6225_s6 }
 0x113   :  { %5510 = vmatmul.msk.f32.gmra.mxu0 %vm8683_vm0, %v315_v31  ;;  %5598 = vmatmul.msk.f32.gmra.mxu1 %vm8683_vm0, %v403_v32  ;;  %v331_v32 = vld [vmem:[#allocation2 + $0x140] sm:$0xff] }
 0x118   :  { %v850_v34 = vpop.f32.mrf.mxu0  ;;  %v1114_v35 = vpop.f32.mrf.mxu1 }
 0x119   :  { %v1204_v38 = vpop.f32.mrf.mxu3  ;;  %1569 = vrot.lane.b32.xlu1 %v1114_v35, %s6218_s29  ;;  %v332_v35 = vld [vmem:[#allocation2 + $0x148] sm:$0xff] }
 0x11a   :  { %1675 = vrot.lane.b32.xlu2 %v1201_v33, %s6226_s7  ;;  %1677 = vrot.lane.b32.xlu0 %v1204_v38, %s6226_s7 }
 0x11b   :  { %5511 = vmatmul.msk.f32.gmra.mxu0 %vm8683_vm0, %v316_v36  ;;  %5599 = vmatmul.msk.f32.gmra.mxu1 %vm8683_vm0, %v404_v37  ;;  %v333_v37 = vld [vmem:[#allocation2 + $0x150] sm:$0xff] }
 0x120   :  { %v853_v39 = vpop.f32.mrf.mxu0  ;;  %v1117_v40 = vpop.f32.mrf.mxu1 }
 0x122   :  { %1215 = vrot.lane.b32.xlu2 %v847_v29, %s6228_s0  ;;  %1217 = vrot.lane.b32.xlu0 %v850_v34, %s6228_s0  ;;  %v330_v29 = vld [vmem:[#allocation2 + $0x138] sm:$0xff] }
 0x123   :  { %5512 = vmatmul.msk.f32.gmra.mxu0 %vm8683_vm0, %v317_v41  ;;  %5600 = vmatmul.msk.f32.gmra.mxu1 %vm8683_vm0, %v405_v42 }
 0x128   :  { %v856_v43 = vpop.f32.mrf.mxu0  ;;  %v1120_v44 = vpop.f32.mrf.mxu1 }
 0x12a   :  { %1219 = vrot.lane.b32.xlu0 %v853_v39, %s6228_s0  ;;  %1221 = vrot.lane.b32.xlu2 %v856_v43, %s6228_s0  ;;  %v335_v43 = vld [vmem:[#allocation2 + $0x160] sm:$0xff] }
 0x12b   :  { %5513 = vmatmul.msk.f32.gmra.mxu0 %vm8683_vm0, %v318_v45  ;;  %5601 = vmatmul.msk.f32.gmra.mxu1 %vm8683_vm0, %v406_v46  ;;  %v336_v46 = vld [vmem:[#allocation2 + $0x168] sm:$0xff] }
 0x130   :  { %v859_v47 = vpop.f32.mrf.mxu0  ;;  %v1123_v48 = vpop.f32.mrf.mxu1 }
 0x131   :  { %1575 = vrot.lane.b32.xlu1 %v1123_v48, %s6218_s29 }
 0x132   :  { %1571 = vrot.lane.b32.xlu0 %v1117_v40, %s6218_s29  ;;  %v334_v40 = vld [vmem:[#allocation2 + $0x158] sm:$0xff] }
 0x133   :  { %5514 = vmatmul.msk.f32.gmra.mxu0 %vm8683_vm0, %v319_v49  ;;  %5602 = vmatmul.msk.f32.gmra.mxu1 %vm8683_vm0, %v407_v51  ;;  %v337_v49 = vld [vmem:[#allocation2 + $0x170] sm:$0xff]  ;;  %v6596_v51 = vpop.permute.xlu0 %2058 }
 0x134   :  { %8695 = vst [vmem:[#allocation35_spill] sm:$0xff] %v6596_v51 }
 0x138   :  { %v862_v52 = vpop.f32.mrf.mxu0  ;;  %v1126_v53 = vpop.f32.mrf.mxu1 }
 0x13a   :  { %1573 = vrot.lane.b32.xlu0 %v1120_v44, %s6218_s29 }
 0x13b   :  { %5515 = vmatmul.msk.f32.gmra.mxu0 %vm8683_vm0, %v320_v55  ;;  %5603 = vmatmul.msk.f32.gmra.mxu1 %vm8683_vm0, %v408_v56  ;;  %v6600_v56 = vpop.permute.xlu0 %2038 }
 0x13c   :  { %8696 = vst [vmem:[#allocation36_spill] sm:$0xff] %v6600_v56 }
 0x140   :  { %v865_v57 = vpop.f32.mrf.mxu0  ;;  %v1129_v58 = vpop.f32.mrf.mxu1 }
 0x141   :  { %1227 = vrot.lane.b32.xlu1 %v865_v57, %s6228_s0 }
 0x142   :  { %1223 = vrot.lane.b32.xlu0 %v859_v47, %s6228_s0 }
 0x143   :  { %5516 = vmatmul.msk.f32.gmra.mxu0 %vm8683_vm0, %v321_v59  ;;  %5604 = vmatmul.msk.f32.gmra.mxu1 %vm8683_vm0, %v409_v61  ;;  %v6604_v59 = vpop.permute.xlu1 %2053 }
 0x144   :  { %8697 = vst [vmem:[#allocation37_spill] sm:$0xff] %v6604_v59 }
 0x148   :  { %v868_v62 = vpop.f32.mrf.mxu0  ;;  %v1132_v63 = vpop.f32.mrf.mxu1 }
 0x149   :  { %1581 = vrot.lane.b32.xlu2 %v1132_v63, %s6218_s29  ;;  %v6607_v63 = vpop.permute.xlu0 %1535 }
 0x14a   :  { %1225 = vrot.lane.b32.xlu0 %v862_v52, %s6228_s0 }
 0x14b   :  { %5517 = vmatmul.msk.f32.gmra.mxu0 %vm8683_vm0, %v322_v0  ;;  %v6612_v0 = vpop.permute.xlu1 %2048 }
 0x14c   :  { %8698 = vst [vmem:[#allocation38_spill] sm:$0xff] %v6612_v0 }
 0x150   :  { %v871_v1 = vpop.f32.mrf.mxu0  ;;  %v1135_v3 = vpop.f32.mrf.mxu1 }
 0x151   :  { %1247 = vrot.lane.b32.xlu1 %v871_v1, %s6229_s8  ;;  %1599 = vrot.lane.b32.xlu2 %v1135_v3, %s6230_s16  ;;  %v341_v3 = vld [vmem:[#allocation2 + $0x190] sm:$0xff] }
 0x152   :  { %1577 = vrot.lane.b32.xlu0 %v1126_v53, %s6218_s29  ;;  %v338_v53 = vld [vmem:[#allocation2 + $0x178] sm:$0xff] }
 0x153   :  { %5518 = vmatmul.msk.f32.gmra.mxu0 %vm8683_vm0, %v323_v4  ;;  %v6615_v4 = vpop.permute.xlu0 %1537 }
 0x158   :  { %v874_v5 = vpop.f32.mrf.mxu0  ;;  %v1138_v6 = vpop.f32.mrf.mxu1 }
 0x159   :  { %1249 = vrot.lane.b32.xlu1 %v874_v5, %s6229_s8  ;;  %v6618_v5 = vpop.permute.xlu2 %2106 }
 0x15a   :  { %1579 = vrot.lane.b32.xlu0 %v1129_v58, %s6218_s29  ;;  %s6231_s29 = smov 6   ;;  %v339_v58 = vld [vmem:[#allocation2 + $0x180] sm:$0xff]  ;;  %8699 = vst [vmem:[#allocation39_spill] sm:$0xff] %v6618_v5  ;;  %v361_v5 = vld [vmem:[#allocation2 + $0x230] sm:$0xff] }
 0x15b   :  { %5519 = vmatmul.msk.f32.gmra.mxu0 %vm8683_vm0, %v324_v7 }
 0x160   :  { %v877_v9 = vpop.f32.mrf.mxu0  ;;  %v1141_v10 = vpop.f32.mrf.mxu1 }
 0x161   :  { %1601 = vrot.lane.b32.xlu1 %v1138_v6, %s6230_s16  ;;  %v6620_v6 = vpop.permute.xlu1 %2043 }
 0x162   :  { %1229 = vrot.lane.b32.xlu0 %v868_v62, %s6228_s0  ;;  %v340_v62 = vld [vmem:[#allocation2 + $0x188] sm:$0xff]  ;;  %8700 = vst [vmem:[#allocation40_spill] sm:$0xff] %v6620_v6 }
 0x163   :  { %5520 = vmatmul.msk.f32.gmra.mxu0 %vm8683_vm0, %v325_v11  ;;  %v6626_v11 = vpop.permute.xlu2 %2101 }
 0x164   :  { %8701 = vst [vmem:[#allocation41_spill] sm:$0xff] %v6626_v11  ;;  %v360_v11 = vld [vmem:[#allocation2 + $0x228] sm:$0xff] }
 0x168   :  { %v880_v12 = vpop.f32.mrf.mxu0  ;;  %v1144_v13 = vpop.f32.mrf.mxu1 }
 0x169   :  { %1603 = vrot.lane.b32.xlu1 %v1141_v10, %s6230_s16  ;;  %1605 = vrot.lane.b32.xlu2 %v1144_v13, %s6230_s16  ;;  %v6624_v10 = vpop.permute.xlu0 %1665  ;;  %v343_v13 = vld [vmem:[#allocation2 + $0x1a0] sm:$0xff] }
 0x16a   :  { %1251 = vrot.lane.b32.xlu0 %v877_v9, %s6229_s8  ;;  %v342_v9 = vld [vmem:[#allocation2 + $0x198] sm:$0xff] }
 0x16b   :  { %5521 = vmatmul.msk.f32.gmra.mxu0 %vm8683_vm0, %v326_v15  ;;  %v6628_v15 = vpop.permute.xlu1 %2091 }
 0x16c   :  { %8702 = vst [vmem:[#allocation42_spill] sm:$0xff] %v6628_v15  ;;  %v363_v15 = vld [vmem:[#allocation2 + $0x240] sm:$0xff] }
 0x170   :  { %v883_v16 = vpop.f32.mrf.mxu0  ;;  %v1147_v17 = vpop.f32.mrf.mxu1 }
 0x171   :  { %1253 = vrot.lane.b32.xlu1 %v880_v12, %s6229_s8 }
 0x173   :  { %5522 = vmatmul.msk.f32.gmra.mxu0 %vm8683_vm0, %v327_v18 }
 0x178   :  { %v886_v20 = vpop.f32.mrf.mxu0  ;;  %v1150_v21 = vpop.f32.mrf.mxu1 }
 0x179   :  { %1255 = vrot.lane.b32.xlu1 %v883_v16, %s6229_s8  ;;  %1257 = vrot.lane.b32.xlu0 %v886_v20, %s6229_s8  ;;  %v6632_v16 = vpop.permute.xlu0 %1541  ;;  %v344_v20 = vld [vmem:[#allocation2 + $0x1a8] sm:$0xff] }
 0x17a   :  { %8703 = vst [vmem:[#allocation43_spill] sm:$0xff] %v6632_v16 }
 0x17b   :  { %5523 = vmatmul.msk.f32.gmra.mxu0 %vm8683_vm0, %v328_v22 }
 0x180   :  { %v889_v23 = vpop.f32.mrf.mxu0  ;;  %v1153_v25 = vpop.f32.mrf.mxu1 }
 0x181   :  { %1607 = vrot.lane.b32.xlu1 %v1147_v17, %s6230_s16  ;;  %1259 = vrot.lane.b32.xlu2 %v889_v23, %s6229_s8  ;;  %v6634_v17 = vpop.permute.xlu2 %2096  ;;  %v345_v23 = vld [vmem:[#allocation2 + $0x1b0] sm:$0xff] }
 0x182   :  { %8704 = vst [vmem:[#allocation44_spill] sm:$0xff] %v6634_v17  ;;  %v362_v17 = vld [vmem:[#allocation2 + $0x238] sm:$0xff] }
 0x183   :  { %5524 = vmatmul.msk.f32.gmra.mxu0 %vm8683_vm0, %v329_v26 }
 0x188   :  { %v892_v27 = vpop.f32.mrf.mxu0  ;;  %v1156_v28 = vpop.f32.mrf.mxu1 }
 0x189   :  { %1609 = vrot.lane.b32.xlu1 %v1150_v21, %s6230_s16  ;;  %1611 = vrot.lane.b32.xlu2 %v1153_v25, %s6230_s16  ;;  %v6637_v21 = vpop.permute.xlu1 %1645  ;;  %v6640_v25 = vpop.permute.xlu0 %1543 }
 0x18a   :  { %1261 = vrot.lane.b32.xlu0 %v892_v27, %s6229_s8  ;;  %8705 = vst [vmem:[#allocation45_spill] sm:$0xff] %v6637_v21  ;;  %v6643_v26 = vpop.permute.xlu2 %2033  ;;  %s6251_s8 = smov 34  }
 0x18b   :  { %5525 = vmatmul.msk.f32.gmra.mxu0 %vm8683_vm0, %v330_v29  ;;  %8706 = vst [vmem:[#allocation46_spill] sm:$0xff] %v6640_v25  ;;  %v346_v29 = vld [vmem:[#allocation2 + $0x1b8] sm:$0xff] }
 0x18c   :  { %8707 = vst [vmem:[#allocation47_spill] sm:$0xff] %v6643_v26  ;;  %v364_v26 = vld [vmem:[#allocation2 + $0x248] sm:$0xff] }
 0x190   :  { %v895_v30 = vpop.f32.mrf.mxu0  ;;  %v1159_v31 = vpop.f32.mrf.mxu1 }
 0x191   :  { %1631 = vrot.lane.b32.xlu1 %v1159_v31, %s6227_s28  ;;  %1279 = vrot.lane.b32.xlu2 %v895_v30, %s6231_s29  ;;  %v6646_v27 = vpop.permute.xlu1 %1539  ;;  %v6649_v30 = vpop.permute.xlu0 %1671 }
 0x192   :  { %1613 = vrot.lane.b32.xlu0 %v1156_v28, %s6230_s16  ;;  %8708 = vst [vmem:[#allocation48_spill] sm:$0xff] %v6649_v30  ;;  %v6652_v31 = vpop.permute.xlu2 %1663  ;;  %s8835_s16 = sld [smem:[#allocation96_spill]] }
 0x193   :  { %5526 = vmatmul.msk.f32.gmra.mxu0 %vm8683_vm0, %v331_v32 }
 0x198   :  { %v898_v33 = vpop.f32.mrf.mxu0  ;;  %v1162_v34 = vpop.f32.mrf.mxu1 }
 0x199   :  { %1633 = vrot.lane.b32.xlu1 %v1162_v34, %s6227_s28  ;;  %v6654_v32 = vpop.permute.xlu1 %1545  ;;  %v347_v34 = vld [vmem:[#allocation2 + $0x1c0] sm:$0xff] }
 0x19a   :  { %1281 = vrot.lane.b32.xlu0 %v898_v33, %s6231_s29  ;;  %8709 = vst [vmem:[#allocation49_spill] sm:$0xff] %v6654_v32  ;;  %v372_v32 = vld [vmem:[#allocation2 + $0x288] sm:$0xff] }
 0x19b   :  { %5527 = vmatmul.msk.f32.gmra.mxu0 %vm8683_vm0, %v332_v35  ;;  %v6658_v35 = vpop.permute.xlu0 %1567 }
 0x1a0   :  { %v901_v36 = vpop.f32.mrf.mxu0  ;;  %v1165_v38 = vpop.f32.mrf.mxu1 }
 0x1a1   :  { %1283 = vrot.lane.b32.xlu1 %v901_v36, %s6231_s29  ;;  %1635 = vrot.lane.b32.xlu2 %v1165_v38, %s6227_s28  ;;  %v6660_v36 = vpop.permute.xlu2 %1667  ;;  %v348_v38 = vld [vmem:[#allocation2 + $0x1c8] sm:$0xff] }
 0x1a3   :  { %5528 = vmatmul.msk.f32.gmra.mxu0 %vm8683_vm0, %v333_v37 }
 0x1a8   :  { %v904_v39 = vpop.f32.mrf.mxu0  ;;  %v1168_v41 = vpop.f32.mrf.mxu1 }
 0x1a9   :  { %1285 = vrot.lane.b32.xlu1 %v904_v39, %s6231_s29  ;;  %v6662_v39 = vpop.permute.xlu1 %1569 }
 0x1ab   :  { %5529 = vmatmul.msk.f32.gmra.mxu0 %vm8683_vm0, %v334_v40  ;;  %v6666_v40 = vpop.permute.xlu0 %1677 }
 0x1ac   :  { %8710 = vst [vmem:[#allocation50_spill] sm:$0xff] %v6666_v40 }
 0x1b0   :  { %v907_v42 = vpop.f32.mrf.mxu0  ;;  %v1171_v44 = vpop.f32.mrf.mxu1 }
 0x1b1   :  { %1637 = vrot.lane.b32.xlu1 %v1168_v41, %s6227_s28  ;;  %1287 = vrot.lane.b32.xlu0 %v907_v42, %s6231_s29  ;;  %v6668_v41 = vpop.permute.xlu2 %1669 }
 0x1b2   :  { %8711 = vst [vmem:[#allocation51_spill] sm:$0xff] %v6668_v41 }
 0x1b3   :  { %5530 = vmatmul.msk.f32.gmra.mxu0 %vm8683_vm0, %v335_v43  ;;  %v349_v43 = vld [vmem:[#allocation2 + $0x1d0] sm:$0xff] }
 0x1b8   :  { %v910_v45 = vpop.f32.mrf.mxu0  ;;  %v1174_v47 = vpop.f32.mrf.mxu1 }
 0x1b9   :  { %1639 = vrot.lane.b32.xlu1 %v1171_v44, %s6227_s28  ;;  %1641 = vrot.lane.b32.xlu2 %v1174_v47, %s6227_s28  ;;  %v6671_v44 = vpop.permute.xlu1 %1575  ;;  %v6674_v47 = vpop.permute.xlu0 %1217 }
 0x1ba   :  { %8712 = vst [vmem:[#allocation52_spill] sm:$0xff] %v6671_v44 }
 0x1bb   :  { %5531 = vmatmul.msk.f32.gmra.mxu0 %vm8683_vm0, %v336_v46  ;;  %v350_v46 = vld [vmem:[#allocation2 + $0x1d8] sm:$0xff] }
 0x1c0   :  { %v913_v48 = vpop.f32.mrf.mxu0  ;;  %v1177_v55 = vpop.f32.mrf.mxu1 }
 0x1c1   :  { %1289 = vrot.lane.b32.xlu1 %v910_v45, %s6231_s29 }
 0x1c3   :  { %5532 = vmatmul.msk.f32.gmra.mxu0 %vm8683_vm0, %v337_v49  ;;  %v6680_v49 = vpop.permute.xlu1 %1227 }
 0x1c8   :  { %v916_v52 = vpop.f32.mrf.mxu0 }
 0x1c9   :  { %1291 = vrot.lane.b32.xlu1 %v913_v48, %s6231_s29  ;;  %v6677_v48 = vpop.permute.xlu2 %1547 }
 0x1ca   :  { %8713 = vst [vmem:[#allocation53_spill] sm:$0xff] %v6677_v48 }
 0x1cb   :  { %5533 = vmatmul.msk.f32.gmra.mxu0 %vm8683_vm0, %v338_v53  ;;  %v351_v53 = vld [vmem:[#allocation2 + $0x1e0] sm:$0xff] }
 0x1d0   :  { %v919_v57 = vpop.f32.mrf.mxu0 }
 0x1d1   :  { %1643 = vrot.lane.b32.xlu1 %v1177_v55, %s6227_s28  ;;  %1311 = vrot.lane.b32.xlu0 %v919_v57, %s6201_s3  ;;  %v6683_v55 = vpop.permute.xlu0 %1219  ;;  %v6686_v57 = vpop.permute.xlu2 %1673  ;;  %s6250_s28 = smov 94  }
 0x1d2   :  { %8714 = vst [vmem:[#allocation54_spill] sm:$0xff] %v6686_v57 }
 0x1d3   :  { %5534 = vmatmul.msk.f32.gmra.mxu0 %vm8683_vm0, %v339_v58  ;;  %v6688_v58 = vpop.permute.xlu1 %1247 }
 0x1d8   :  { %v922_v61 = vpop.f32.mrf.mxu0 }
 0x1d9   :  { %1293 = vrot.lane.b32.xlu1 %v916_v52, %s6231_s29  ;;  %1313 = vrot.lane.b32.xlu2 %v922_v61, %s6201_s3 }
 0x1db   :  { %5535 = vmatmul.msk.f32.gmra.mxu0 %vm8683_vm0, %v340_v62  ;;  %v352_v62 = vld [vmem:[#allocation2 + $0x1e8] sm:$0xff] }
 0x1e0   :  { %v925_v1 = vpop.f32.mrf.mxu0 }
 0x1e1   :  { %1315 = vrot.lane.b32.xlu2 %v925_v1, %s6201_s3  ;;  %v6692_v1 = vpop.permute.xlu0 %1571 }
 0x1e3   :  { %5536 = vmatmul.msk.f32.gmra.mxu0 %vm8683_vm0, %v341_v3  ;;  %v6694_v3 = vpop.permute.xlu2 %1549 }
 0x1e4   :  { %8715 = vst [vmem:[#allocation55_spill] sm:$0xff] %v6694_v3 }
 0x1e8   :  { %v928_v7 = vpop.f32.mrf.mxu0 }
 0x1e9   :  { %1317 = vrot.lane.b32.xlu1 %v928_v7, %s6201_s3  ;;  %v6696_v7 = vpop.permute.xlu1 %1249 }
 0x1eb   :  { %5537 = vmatmul.msk.f32.gmra.mxu0 %vm8683_vm0, %v342_v9 }
 0x1f0   :  { %v931_v12 = vpop.f32.mrf.mxu0 }
 0x1f1   :  { %1319 = vrot.lane.b32.xlu2 %v931_v12, %s6201_s3  ;;  %v353_v12 = vld [vmem:[#allocation2 + $0x1f0] sm:$0xff] }
 0x1f3   :  { %5538 = vmatmul.msk.f32.gmra.mxu0 %vm8683_vm0, %v343_v13  ;;  %v6700_v13 = vpop.permute.xlu0 %1573 }
 0x1f4   :  { %8716 = vst [vmem:[#allocation56_spill] sm:$0xff] %v6700_v13 }
 0x1f8   :  { %v934_v18 = vpop.f32.mrf.mxu0 }
 0x1f9   :  { %1321 = vrot.lane.b32.xlu2 %v934_v18, %s6201_s3  ;;  %v6702_v18 = vpop.permute.xlu2 %1675 }
 0x1fa   :  { %8717 = vst [vmem:[#allocation57_spill] sm:$0xff] %v6702_v18 }
 0x1fb   :  { %5539 = vmatmul.msk.f32.gmra.mxu0 %vm8683_vm0, %v344_v20 }
 0x200   :  { %v937_v22 = vpop.f32.mrf.mxu0 }
 0x201   :  { %1323 = vrot.lane.b32.xlu1 %v937_v22, %s6201_s3  ;;  %v354_v22 = vld [vmem:[#allocation2 + $0x1f8] sm:$0xff] }
 0x203   :  { %5540 = vmatmul.msk.f32.gmra.mxu0 %vm8683_vm0, %v345_v23  ;;  %v6704_v23 = vpop.permute.xlu1 %1601 }
 0x208   :  { %v940_v28 = vpop.f32.mrf.mxu0 }
 0x209   :  { %1325 = vrot.lane.b32.xlu2 %v940_v28, %s6201_s3 }
 0x20b   :  { %5541 = vmatmul.msk.f32.gmra.mxu0 %vm8683_vm0, %v346_v29  ;;  %v355_v29 = vld [vmem:[#allocation2 + $0x200] sm:$0xff] }
 0x210   :  { %v943_v33 = vpop.f32.mrf.mxu0 }
 0x211   :  { %1343 = vrot.lane.b32.xlu0 %v943_v33, %s6232_s9  ;;  %v6708_v33 = vpop.permute.xlu0 %1223 }
 0x213   :  { %5542 = vmatmul.msk.f32.gmra.mxu0 %vm8683_vm0, %v347_v34  ;;  %v6711_v34 = vpop.permute.xlu2 %1215 }
 0x218   :  { %v946_v37 = vpop.f32.mrf.mxu0 }
 0x219   :  { %1345 = vrot.lane.b32.xlu0 %v946_v37, %s6232_s9  ;;  %v6713_v37 = vpop.permute.xlu1 %1603 }
 0x21b   :  { %5543 = vmatmul.msk.f32.gmra.mxu0 %vm8683_vm0, %v348_v38 }
 0x220   :  { %v949_v42 = vpop.f32.mrf.mxu0 }
 0x221   :  { %1347 = vrot.lane.b32.xlu1 %v949_v42, %s6232_s9  ;;  %v356_v42 = vld [vmem:[#allocation2 + $0x208] sm:$0xff] }
 0x223   :  { %5544 = vmatmul.msk.f32.gmra.mxu0 %vm8683_vm0, %v349_v43  ;;  %v6717_v43 = vpop.permute.xlu0 %1225 }
 0x228   :  { %v952_v45 = vpop.f32.mrf.mxu0 }
 0x229   :  { %1349 = vrot.lane.b32.xlu2 %v952_v45, %s6232_s9  ;;  %v6720_v45 = vpop.permute.xlu2 %1221 }
 0x22a   :  { %8718 = vst [vmem:[#allocation58_spill] sm:$0xff] %v6720_v45 }
 0x22b   :  { %5545 = vmatmul.msk.f32.gmra.mxu0 %vm8683_vm0, %v350_v46  ;;  %v6722_v46 = vpop.permute.xlu1 %1253 }
 0x22c   :  { %8719 = vst [vmem:[#allocation59_spill] sm:$0xff] %v6722_v46 }
 0x230   :  { %v955_v52 = vpop.f32.mrf.mxu0 }
 0x231   :  { %1351 = vrot.lane.b32.xlu2 %v955_v52, %s6232_s9 }
 0x233   :  { %5546 = vmatmul.msk.f32.gmra.mxu0 %vm8683_vm0, %v351_v53  ;;  %v357_v53 = vld [vmem:[#allocation2 + $0x210] sm:$0xff] }
 0x238   :  { %v958_v61 = vpop.f32.mrf.mxu0 }
 0x239   :  { %1353 = vrot.lane.b32.xlu1 %v958_v61, %s6232_s9  ;;  %v6726_v61 = vpop.permute.xlu2 %1581 }
 0x23a   :  { %8720 = vst [vmem:[#allocation60_spill] sm:$0xff] %v6726_v61 }
 0x23b   :  { %5547 = vmatmul.msk.f32.gmra.mxu0 %vm8683_vm0, %v352_v62  ;;  %v6728_v62 = vpop.permute.xlu0 %1577 }
 0x23c   :  { %8721 = vst [vmem:[#allocation61_spill] sm:$0xff] %v6728_v62 }
 0x240   :  { %v961_v9 = vpop.f32.mrf.mxu0 }
 0x241   :  { %1355 = vrot.lane.b32.xlu2 %v961_v9, %s6232_s9  ;;  %v6730_v9 = vpop.permute.xlu1 %1255 }
 0x243   :  { %5548 = vmatmul.msk.f32.gmra.mxu0 %vm8683_vm0, %v353_v12 }
 0x248   :  { %v964_v20 = vpop.f32.mrf.mxu0 }
 0x249   :  { %1357 = vrot.lane.b32.xlu2 %v964_v20, %s6232_s9  ;;  %v358_v20 = vld [vmem:[#allocation2 + $0x218] sm:$0xff] }
 0x24b   :  { %5549 = vmatmul.msk.f32.gmra.mxu0 %vm8683_vm0, %v354_v22  ;;  %v6734_v22 = vpop.permute.xlu2 %1599 }
 0x250   :  { %v967_v28 = vpop.f32.mrf.mxu0 }
 0x251   :  { %1375 = vrot.lane.b32.xlu0 %v967_v28, %s6233_s30  ;;  %v6736_v28 = vpop.permute.xlu0 %1579 }
 0x252   :  { %8722 = vst [vmem:[#allocation62_spill] sm:$0xff] %v6736_v28 }
 0x253   :  { %5550 = vmatmul.msk.f32.gmra.mxu0 %vm8683_vm0, %v355_v29 }
 0x258   :  { %v970_v38 = vpop.f32.mrf.mxu0 }
 0x259   :  { %1377 = vrot.lane.b32.xlu1 %v970_v38, %s6233_s30  ;;  %v359_v38 = vld [vmem:[#allocation2 + $0x220] sm:$0xff]  ;;  %v6744_v59 = vpop.permute.xlu0 %1229 }
 0x25a   :  { %8725 = vst [vmem:[#allocation65_spill] sm:$0xff] %v6744_v59 }
 0x25b   :  { %5551 = vmatmul.msk.f32.gmra.mxu0 %vm8683_vm0, %v356_v42  ;;  %v6738_v42 = vpop.permute.xlu1 %1607 }
 0x25c   :  { %8723 = vst [vmem:[#allocation63_spill] sm:$0xff] %v6738_v42 }
 0x260   :  { %v973_v52 = vpop.f32.mrf.mxu0 }
 0x261   :  { %1379 = vrot.lane.b32.xlu0 %v973_v52, %s6233_s30  ;;  %v6742_v52 = vpop.permute.xlu2 %1605 }
 0x262   :  { %8724 = vst [vmem:[#allocation64_spill] sm:$0xff] %v6742_v52 }
 0x263   :  { %5552 = vmatmul.msk.f32.gmra.mxu0 %vm8683_vm0, %v357_v53 }
 0x268   :  { %v976_v12 = vpop.f32.mrf.mxu0 }
 0x269   :  { %1381 = vrot.lane.b32.xlu0 %v976_v12, %s6233_s30  ;;  %v6747_v12 = vpop.permute.xlu1 %1609  ;;  %v6751_v51 = vpop.permute.xlu2 %1259 }
 0x26a   :  { %8726 = vst [vmem:[#allocation66_spill] sm:$0xff] %v6747_v12 }
 0x26b   :  { %5553 = vmatmul.msk.f32.gmra.mxu0 %vm8683_vm0, %v358_v20 }
 0x270   :  { %v979_v29 = vpop.f32.mrf.mxu0 }
 0x271   :  { %1383 = vrot.lane.b32.xlu2 %v979_v29, %s6233_s30  ;;  %v6753_v29 = vpop.permute.xlu0 %1251 }
 0x273   :  { %5554 = vmatmul.msk.f32.gmra.mxu0 %vm8683_vm0, %v359_v38  ;;  %v6756_v38 = vpop.permute.xlu1 %1631 }
 0x278   :  { %v982_v53 = vpop.f32.mrf.mxu0 }
 0x279   :  { %1385 = vrot.lane.b32.xlu0 %v982_v53, %s6233_s30  ;;  %v6759_v53 = vpop.permute.xlu0 %1257 }
 0x27b   :  { %5555 = vmatmul.msk.f32.gmra.mxu0 %vm8683_vm0, %v360_v11  ;;  %v6762_v11 = vpop.permute.xlu2 %1611  ;;  %v6764_v0 = vpop.permute.xlu1 %1633 }
 0x27c   :  { %8727 = vst [vmem:[#allocation67_spill] sm:$0xff] %v6762_v11 }
 0x280   :  { %v985_v20 = vpop.f32.mrf.mxu0 }
 0x281   :  { %1387 = vrot.lane.b32.xlu0 %v985_v20, %s6233_s30 }
 0x283   :  { %5556 = vmatmul.msk.f32.gmra.mxu0 %vm8683_vm0, %v361_v5  ;;  %v6767_v5 = vpop.permute.xlu0 %1261  ;;  %v6770_v6 = vpop.permute.xlu2 %1279 }
 0x284   :  { %8728 = vst [vmem:[#allocation68_spill] sm:$0xff] %v6767_v5  ;;  %v6772_v18 = vpop.permute.xlu1 %1283 }
 0x288   :  { %v988_v56 = vpop.f32.mrf.mxu0 }
 0x289   :  { %1389 = vrot.lane.b32.xlu2 %v988_v56, %s6233_s30 }
 0x28b   :  { %5557 = vmatmul.msk.f32.gmra.mxu0 %vm8683_vm0, %v362_v17  ;;  %v6776_v17 = vpop.permute.xlu0 %1613  ;;  %v6778_v11 = vpop.permute.xlu2 %1635 }
 0x28c   :  { %8729 = vst [vmem:[#allocation69_spill] sm:$0xff] %v6776_v17  ;;  %v6781_v48 = vpop.permute.xlu1 %1285 }
 0x28d   :  { %8730 = vst [vmem:[#allocation70_spill] sm:$0xff] %v6781_v48 }
 0x290   :  { %v991_v20 = vpop.f32.mrf.mxu0 }
 0x291   :  { %1407 = vrot.lane.b32.xlu2 %v991_v20, %s6234_s10  ;;  %v365_v20 = vld [vmem:[#allocation2 + $0x250] sm:$0xff] }
 0x293   :  { %5558 = vmatmul.msk.f32.gmra.mxu0 %vm8683_vm0, %v363_v15  ;;  %v6784_v15 = vpop.permute.xlu0 %1281  ;;  %v6786_v40 = vpop.permute.xlu2 %1641 }
 0x294   :  { %8731 = vst [vmem:[#allocation71_spill] sm:$0xff] %v6786_v40  ;;  %v371_v40 = vld [vmem:[#allocation2 + $0x280] sm:$0xff] }
 0x298   :  { %v994_v56 = vpop.f32.mrf.mxu0 }
 0x299   :  { %1409 = vrot.lane.b32.xlu1 %v994_v56, %s6234_s10  ;;  %v366_v56 = vld [vmem:[#allocation2 + $0x258] sm:$0xff] }
 0x29b   :  { %5559 = vmatmul.msk.f32.gmra.mxu0 %vm8683_vm0, %v364_v26  ;;  %v6790_v26 = vpop.permute.xlu1 %1637  ;;  %v6792_v17 = vpop.permute.xlu0 %1287 }
 0x29c   :  { %8732 = vst [vmem:[#allocation72_spill] sm:$0xff] %v6790_v26  ;;  %v6795_v3 = vpop.permute.xlu2 %1313 }
 0x2a0   :  { %v997_v28 = vpop.f32.mrf.mxu0 }
 0x2a1   :  { %1411 = vrot.lane.b32.xlu1 %v997_v28, %s6234_s10  ;;  %v367_v28 = vld [vmem:[#allocation2 + $0x260] sm:$0xff] }
 0x2a3   :  { %5560 = vmatmul.msk.f32.gmra.mxu0 %vm8683_vm0, %v365_v20  ;;  %v6798_v20 = vpop.permute.xlu1 %1639  ;;  %v6800_v41 = vpop.permute.xlu0 %1311 }
 0x2a4   :  { %8733 = vst [vmem:[#allocation73_spill] sm:$0xff] %v6798_v20 }
 0x2a8   :  { %v1000_v21 = vpop.f32.mrf.mxu0 }
 0x2a9   :  { %1413 = vrot.lane.b32.xlu2 %v1000_v21, %s6234_s10  ;;  %v368_v21 = vld [vmem:[#allocation2 + $0x268] sm:$0xff] }
 0x2ab   :  { %5561 = vmatmul.msk.f32.gmra.mxu0 %vm8683_vm0, %v366_v56  ;;  %v6804_v56 = vpop.permute.xlu2 %1315  ;;  %v6806_v26 = vpop.permute.xlu0 %1343 }
 0x2ac   :  { %v6808_v16 = vpop.permute.xlu1 %1289 }
 0x2ad   :  { %8734 = vst [vmem:[#allocation74_spill] sm:$0xff] %v6808_v16 }
 0x2b0   :  { %v1003_v61 = vpop.f32.mrf.mxu0 }
 0x2b1   :  { %1415 = vrot.lane.b32.xlu0 %v1003_v61, %s6234_s10  ;;  %v369_v61 = vld [vmem:[#allocation2 + $0x270] sm:$0xff] }
 0x2b3   :  { %5562 = vmatmul.msk.f32.gmra.mxu0 %vm8683_vm0, %v367_v28  ;;  %v6812_v28 = vpop.permute.xlu2 %1319  ;;  %v6814_v59 = vpop.permute.xlu0 %1345 }
 0x2b8   :  { %v1006_v52 = vpop.f32.mrf.mxu0 }
 0x2b9   :  { %1417 = vrot.lane.b32.xlu0 %v1006_v52, %s6234_s10  ;;  %v1292_v52 = vpop.permute.xlu1 %1291 }
 0x2bb   :  { %5563 = vmatmul.msk.f32.gmra.mxu0 %vm8683_vm0, %v368_v21  ;;  %v6818_v21 = vpop.permute.xlu2 %1321 }
 0x2bc   :  { %8735 = vst [vmem:[#allocation75_spill] sm:$0xff] %v6818_v21 }
 0x2c0   :  { %v1009_v13 = vpop.f32.mrf.mxu0 }
 0x2c1   :  { %1419 = vrot.lane.b32.xlu2 %v1009_v13, %s6234_s10  ;;  %v6824_v13 = vpop.permute.xlu1 %1643 }
 0x2c2   :  { %8736 = vst [vmem:[#allocation76_spill] sm:$0xff] %v6824_v13 }
 0x2c3   :  { %5564 = vmatmul.msk.f32.gmra.mxu0 %vm8683_vm0, %v369_v61  ;;  %v6820_v12 = vpop.permute.xlu0 %1375  ;;  %v6826_v61 = vpop.permute.xlu2 %1325 }
 0x2c4   :  { %8737 = vst [vmem:[#allocation77_spill] sm:$0xff] %v6826_v61 }
 0x2c8   :  { %v1012_v5 = vpop.f32.mrf.mxu0 }
 0x2c9   :  { %1421 = vrot.lane.b32.xlu0 %v1012_v5, %s6234_s10  ;;  %v6834_v48 = vpop.permute.xlu1 %1293 }
 0x2ca   :  { %8739 = vst [vmem:[#allocation79_spill] sm:$0xff] %v6834_v48 }
 0x2cb   :  { %5565 = vmatmul.msk.f32.gmra.mxu0 %vm8683_vm0, %v370_v24  ;;  %v6832_v24 = vpop.permute.xlu2 %1349 }
 0x2cc   :  { %8738 = vst [vmem:[#allocation78_spill] sm:$0xff] %v6832_v24 }
 0x2d0   :  { %v1015_v57 = vpop.f32.mrf.mxu0 }
 0x2d1   :  { %1439 = vrot.lane.b32.xlu1 %v1015_v57, %s6210_s1  ;;  %v373_v57 = vld [vmem:[#allocation2 + $0x290] sm:$0xff]  ;;  %v6840_v13 = vpop.permute.xlu1 %1317 }
 0x2d2   :  { %8741 = vst [vmem:[#allocation81_spill] sm:$0xff] %v6840_v13  ;;  %v375_v13 = vld [vmem:[#allocation2 + $0x2a0] sm:$0xff] }
 0x2d3   :  { %5566 = vmatmul.msk.f32.gmra.mxu0 %vm8683_vm0, %v371_v40  ;;  %v6828_v5 = vpop.permute.xlu0 %1379  ;;  %v6842_v61 = vpop.permute.xlu2 %1351 }
 0x2d8   :  { %v1018_v62 = vpop.f32.mrf.mxu0 }
 0x2d9   :  { %1441 = vrot.lane.b32.xlu1 %v1018_v62, %s6210_s1  ;;  %v374_v62 = vld [vmem:[#allocation2 + $0x298] sm:$0xff]  ;;  %v1324_v48 = vpop.permute.xlu1 %1323 }
 0x2db   :  { %5567 = vmatmul.msk.f32.gmra.mxu0 %vm8683_vm0, %v372_v32  ;;  %v6837_v40 = vpop.permute.xlu0 %1381 }
 0x2dc   :  { %8740 = vst [vmem:[#allocation80_spill] sm:$0xff] %v6837_v40  ;;  %v1356_v40 = vpop.permute.xlu2 %1355 }
 0x2e0   :  { %v1021_v46 = vpop.f32.mrf.mxu0 }
 0x2e1   :  { %1443 = vrot.lane.b32.xlu2 %v1021_v46, %s6210_s1  ;;  %v1694_v46 = vsel %vm1687_vm1, %v6506_v19, %v6680_v49 }
 0x2e3   :  { %5568 = vmatmul.msk.f32.gmra.mxu0 %vm8683_vm0, %v373_v57  ;;  %v1703_v57 = vsel %vm1696_vm2, %v1694_v46, %v6751_v51  ;;  %v376_v46 = vld [vmem:[#allocation2 + $0x2a8] sm:$0xff] }
 0x2e8   :  { %v1024_v2 = vpop.f32.mrf.mxu0 }
 0x2e9   :  { %1445 = vrot.lane.b32.xlu1 %v1024_v2, %s6210_s1  ;;  %v1712_v2 = vsel %vm1705_vm3, %v1703_v57, %v1292_v52 }
 0x2eb   :  { %v6845_v32 = vpop.permute.xlu0 %1385  ;;  %5569 = vmatmul.msk.f32.gmra.mxu0 %vm8683_vm0, %v374_v62  ;;  %v1721_v62 = vsel %vm1714_vm4, %v1712_v2, %v1324_v48 }
 0x2ec   :  { %8742 = vst [vmem:[#allocation82_spill] sm:$0xff] %v6845_v32  ;;  %v1730_v45 = vsel %vm1723_vm5, %v1721_v62, %v1356_v40  ;;  %v378_v40 = vld [vmem:[#allocation2 + $0x2b8] sm:$0xff] }
 0x2f0   :  { %v1027_v24 = vpop.f32.mrf.mxu0 }
 0x2f1   :  { %1447 = vrot.lane.b32.xlu1 %v1027_v24, %s6210_s1  ;;  %v377_v24 = vld [vmem:[#allocation2 + $0x2b0] sm:$0xff] }
 0x2f3   :  { %v1388_v19 = vpop.permute.xlu0 %1387  ;;  %5570 = vmatmul.msk.f32.gmra.mxu0 %vm8683_vm0, %v375_v13 }
 0x2f4   :  { %v6859_v51 = vsel %vm1732_vm6, %v1730_v45, %v1388_v19 }
 0x2f5   :  { %8743 = vst [vmem:[#allocation83_spill] sm:$0xff] %v6859_v51 }
 0x2f8   :  { %v1030_v49 = vpop.f32.mrf.mxu0 }
 0x2f9   :  { %1449 = vrot.lane.b32.xlu0 %v1030_v49, %s6210_s1 }
 0x2fb   :  { %5571 = vmatmul.msk.f32.gmra.mxu0 %vm8683_vm0, %v376_v46 }
 0x300   :  { %v1033_v52 = vpop.f32.mrf.mxu0 }
 0x301   :  { %1451 = vrot.lane.b32.xlu1 %v1033_v52, %s6210_s1 }
 0x303   :  { %5572 = vmatmul.msk.f32.gmra.mxu0 %vm8683_vm0, %v377_v24 }
 0x308   :  { %v1036_v48 = vpop.f32.mrf.mxu0 }
 0x309   :  { %1453 = vrot.lane.b32.xlu1 %v1036_v48, %s6210_s1  ;;  %v6875_v48 = vpop.permute.xlu2 %1357 }
 0x30a   :  { %8744 = vst [vmem:[#allocation84_spill] sm:$0xff] %v6875_v48 }
 0x30b   :  { %5573 = vmatmul.msk.f32.gmra.mxu0 %vm8683_vm0, %v378_v40 }
 0x310   :  { %v1039_v45 = vpop.f32.mrf.mxu0 }
 0x311   :  { %1471 = vrot.lane.b32.xlu2 %v1039_v45, %s6235_s20  ;;  %v6877_v45 = vpop.permute.xlu2 %1383 }
 0x318   :  { %v1042_v13 = vpop.f32.mrf.mxu0 }
 0x319   :  { %1473 = vrot.lane.b32.xlu0 %v1042_v13, %s6235_s20 }
 0x320   :  { %v1045_v57 = vpop.f32.mrf.mxu0 }
 0x321   :  { %1475 = vrot.lane.b32.xlu2 %v1045_v57, %s6235_s20  ;;  %v6879_v57 = vpop.permute.xlu2 %1389 }
 0x322   :  { %8745 = vst [vmem:[#allocation85_spill] sm:$0xff] %v6879_v57 }
 0x328   :  { %v1048_v2 = vpop.f32.mrf.mxu0 }
 0x329   :  { %1477 = vrot.lane.b32.xlu2 %v1048_v2, %s6235_s20  ;;  %v1348_v2 = vpop.permute.xlu1 %1347 }
 0x330   :  { %v1051_v62 = vpop.f32.mrf.mxu0 }
 0x331   :  { %1479 = vrot.lane.b32.xlu0 %v1051_v62, %s6235_s20 }
 0x338   :  { %v1054_v19 = vpop.f32.mrf.mxu0 }
 0x339   :  { %1481 = vrot.lane.b32.xlu1 %v1054_v19, %s6235_s20  ;;  %v6881_v19 = vpop.permute.xlu1 %1353 }
 0x33a   :  { %8746 = vst [vmem:[#allocation86_spill] sm:$0xff] %v6881_v19 }
 0x340   :  { %v1057_v49 = vpop.f32.mrf.mxu0 }
 0x341   :  { %1483 = vrot.lane.b32.xlu1 %v1057_v49, %s6235_s20 }
 0x348   :  { %v1060_v46 = vpop.f32.mrf.mxu0 }
 0x349   :  { %1485 = vrot.lane.b32.xlu0 %v1060_v46, %s6235_s20  ;;  %v6883_v46 = vpop.permute.xlu2 %1407 }
 0x350   :  { %v1063_v52 = vpop.f32.mrf.mxu0 }
 0x351   :  { %1503 = vrot.lane.b32.xlu0 %v1063_v52, %s6236_s19  ;;  %v1378_v52 = vpop.permute.xlu1 %1377  ;;  %v6885_v51 = vpop.permute.xlu2 %1413 }
 0x352   :  { %8747 = vst [vmem:[#allocation87_spill] sm:$0xff] %v6885_v51 }
 0x358   :  { %v1066_v24 = vpop.f32.mrf.mxu0 }
 0x359   :  { %1505 = vrot.lane.b32.xlu2 %v1066_v24, %s6236_s19  ;;  %v6887_v30 = vpop.permute.xlu2 %1419 }
 0x35a   :  { %8748 = vst [vmem:[#allocation88_spill] sm:$0xff] %v6887_v30  ;;  %v1689_v30 = vsel %vm1687_vm1, %v6478_v54, %v6674_v47 }
 0x360   :  { %v1069_v40 = vpop.f32.mrf.mxu0 }
 0x361   :  { %1507 = vrot.lane.b32.xlu2 %v1069_v40, %s6236_s19  ;;  %v1410_v40 = vpop.permute.xlu1 %1409  ;;  %v1444_v57 = vpop.permute.xlu2 %1443 }
 0x368   :  { %v1072_v13 = vpop.f32.mrf.mxu0 }
 0x369   :  { %1509 = vrot.lane.b32.xlu0 %v1072_v13, %s6236_s19  ;;  %v6889_v13 = vpop.permute.xlu0 %1415 }
 0x36b   :  { %v6893_v32 = vpop.permute.xlu2 %1471 }
 0x370   :  { %v1075_v62 = vpop.f32.mrf.mxu0 }
 0x371   :  { %1511 = vrot.lane.b32.xlu2 %v1075_v62, %s6236_s19  ;;  %v1412_v62 = vpop.permute.xlu1 %1411  ;;  %v6891_v20 = vpop.permute.xlu0 %1417 }
 0x372   :  { %8749 = vst [vmem:[#allocation89_spill] sm:$0xff] %v6891_v20  ;;  %v1698_v20 = vsel %vm1696_vm2, %v1689_v30, %v6696_v7  ;;  %v1690_v30 = vsel %vm1687_vm1, %v6483_v60, %v6683_v55 }
 0x373   :  { %v1707_v25 = vsel %vm1705_vm3, %v1698_v20, %v6784_v15 }
 0x378   :  { %v1078_v49 = vpop.f32.mrf.mxu0 }
 0x379   :  { %1513 = vrot.lane.b32.xlu2 %v1078_v49, %s6236_s19  ;;  %v6895_v42 = vpop.permute.xlu1 %1439  ;;  %v6897_v49 = vpop.permute.xlu0 %1421 }
 0x37a   :  { %8750 = vst [vmem:[#allocation90_spill] sm:$0xff] %v6897_v49  ;;  %v1716_v49 = vsel %vm1714_vm4, %v1707_v25, %v6795_v3  ;;  %v1699_v3 = vsel %vm1696_vm2, %v1690_v30, %v6753_v29 }
 0x37b   :  { %v1476_v19 = vpop.permute.xlu2 %1475  ;;  %v1708_v15 = vsel %vm1705_vm3, %v1699_v3, %v6772_v18 }
 0x37c   :  { %v1717_v60 = vsel %vm1714_vm4, %v1708_v15, %v6804_v56 }
 0x37d   :  { %v1726_v29 = vsel %vm1723_vm5, %v1717_v60, %v1348_v2 }
 0x37e   :  { %v1735_v18 = vsel %vm1732_vm6, %v1726_v29, %v6828_v5  ;;  %v8758_v29 = vld [vmem:[#allocation82_spill] sm:$0xff] }
 0x380   :  { %v1081_v24 = vpop.f32.mrf.mxu0 }
 0x381   :  { %1515 = vrot.lane.b32.xlu1 %v1081_v24, %s6236_s19  ;;  %v6899_v51 = vpop.permute.xlu0 %1449  ;;  %v1442_v24 = vpop.permute.xlu1 %1441 }
 0x382   :  { %8751 = vst [vmem:[#allocation91_spill] sm:$0xff] %v6899_v51  ;;  %v1725_v51 = vsel %vm1723_vm5, %v1716_v49, %v6814_v59 }
 0x383   :  { %v6904_v44 = vpop.permute.xlu2 %1477  ;;  %v1734_v16 = vsel %vm1732_vm6, %v1725_v51, %v1378_v52 }
 0x384   :  { %v1743_v54 = vsel %vm1741_vm7, %v1734_v16, %v1410_v40  ;;  %v1744_v40 = vsel %vm1741_vm7, %v1735_v18, %v1412_v62 }
 0x385   :  { %v1751_v47 = vsel %vm8683_vm0, %v1743_v54, %v1442_v24 }
 0x388   :  { %v1084_v48 = vpop.f32.mrf.mxu0 }
 0x389   :  { %1517 = vrot.lane.b32.xlu2 %v1084_v48, %s6236_s19  ;;  %v6908_v21 = vpop.permute.xlu1 %1445 }
 0x38b   :  { %v1474_v48 = vpop.permute.xlu0 %1473 }
 0x38c   :  { %v1760_v7 = vsel %vm8682_vm9, %v1751_v47, %v1474_v48 }
 0x391   :  { %v1448_v55 = vpop.permute.xlu1 %1447 }
 0x3a3   :  { %v6923_v25 = vpop.permute.xlu0 %1479 }
 0x3b3   :  { %v1506_v59 = vpop.permute.xlu2 %1505 }
 0x3b4   :  { %v1769_v16 = vsel %vm1767_vm8, %v1760_v7, %v1506_v59  ;;  %v8752_v59 = vld [vmem:[#allocation74_spill] sm:$0xff] }
 0x3b5   :  { %v1778_v20 = vsel %vm1776_vm10, %v1769_v16, %v6615_v4  ;;  %v8753_v16 = vld [vmem:[#allocation46_spill] sm:$0xff] }
 0x3b6   :  { %v1787_v51 = vsel %vm1785_vm11, %v1778_v20, %v6662_v39  ;;  %v1752_v39 = vsel %vm8683_vm0, %v1744_v40, %v1444_v57  ;;  %v8754_v20 = vld [vmem:[#allocation75_spill] sm:$0xff] }
 0x3b7   :  { %v1796_v52 = vsel %vm1794_vm12, %v1787_v51, %v6704_v23  ;;  %v1688_v23 = vsel %vm1687_vm1, %v6473_v50, %v6711_v34  ;;  %v1761_v5 = vsel %vm8682_vm9, %v1752_v39, %v1476_v19  ;;  %v6966_v34 = vpop.permute.xlu1 %1451  ;;  %v8757_v51 = vld [vmem:[#allocation63_spill] sm:$0xff]  ;;  %v8760_v39 = vld [vmem:[#allocation89_spill] sm:$0xff] }
 0x3b8   :  { %v1805_v4 = vsel %vm1803_vm13, %v1796_v52, %v6764_v0  ;;  %v1697_v62 = vsel %vm1696_vm2, %v1688_v23, %v6688_v58  ;;  %v8761_v23 = vld [vmem:[#allocation48_spill] sm:$0xff] }
 0x3b9   :  { %v6946_v56 = vsel %vm1812_vm14, %v1805_v4, %v6624_v10  ;;  %v1706_v57 = vsel %vm1705_vm3, %v1697_v62, %v6770_v6  ;;  %v8759_v4 = vld [vmem:[#allocation73_spill] sm:$0xff] }
 0x3ba   :  { %v1841_v2 = vsel %vm1837_vm15, %v6946_v56, 0.0  ;;  %v1715_v50 = vsel %vm1714_vm4, %v1706_v57, %v6800_v41  ;;  %v8763_v57 = vld [vmem:[#allocation58_spill] sm:$0xff] }
 0x3bb   :  { %v6955_v49 = vpop.permute.xlu0 %1485  ;;  %v1508_v0 = vpop.permute.xlu2 %1507  ;;  %1842 = vadd.xlane.f32.xlu2 %v1841_v2  ;;  %v1724_v48 = vsel %vm1723_vm5, %v1715_v50, %v6806_v26 }
 0x3bc   :  { %v1770_v10 = vsel %vm1767_vm8, %v1761_v5, %v1508_v0  ;;  %v1733_v6 = vsel %vm1732_vm6, %v1724_v48, %v6820_v12  ;;  %v8762_v0 = vld [vmem:[#allocation91_spill] sm:$0xff] }
 0x3bd   :  { %v1779_v24 = vsel %vm1776_vm10, %v1770_v10, %v6646_v27  ;;  %v1742_v41 = vsel %vm1741_vm7, %v1733_v6, %v6883_v46 }
 0x3be   :  { %v1788_v19 = vsel %vm1785_vm11, %v1779_v24, %v6692_v1  ;;  %v1750_v1 = vsel %vm8683_vm0, %v1742_v41, %v6895_v42  ;;  %v8764_v24 = vld [vmem:[#allocation33_spill] sm:$0xff]  ;;  %v8766_v41 = vld [vmem:[#allocation70_spill] sm:$0xff] }
 0x3bf   :  { %v1797_v58 = vsel %vm1794_vm12, %v1788_v19, %v6713_v37  ;;  %v1692_v37 = vsel %vm1687_vm1, %v6493_v8, %v6708_v33  ;;  %v1759_v12 = vsel %vm8682_vm9, %v1750_v1, %v6893_v32  ;;  %v1454_v7 = vpop.permute.xlu1 %1453  ;;  %v1691_v50 = vsel %vm1687_vm1, %v8764_v24, %v8763_v57 }
 0x3c0   :  { %v1806_v27 = vsel %vm1803_vm13, %v1797_v58, %v6778_v11  ;;  %v1701_v46 = vsel %vm1696_vm2, %v1692_v37, %v6730_v9  ;;  %v8765_v58 = vld [vmem:[#allocation59_spill] sm:$0xff] }
 0x3c1   :  { %v6982_v54 = vsel %vm1812_vm14, %v1806_v27, %v6660_v36  ;;  %v1710_v42 = vsel %vm1705_vm3, %v1701_v46, %v6792_v17  ;;  %v1700_v6 = vsel %vm1696_vm2, %v1691_v50, %v8765_v58  ;;  %v8769_v46 = vld [vmem:[#allocation61_spill] sm:$0xff] }
 0x3c2   :  { %v1844_v26 = vsel %vm1837_vm15, %v6982_v54, 0.0  ;;  %v1719_v30 = vsel %vm1714_vm4, %v1710_v42, %v6812_v28  ;;  %v1709_v1 = vsel %vm1705_vm3, %v1700_v6, %v8766_v41  ;;  %v8770_v42 = vld [vmem:[#allocation78_spill] sm:$0xff]  ;;  %v8789_v6 = vld [vmem:[#allocation55_spill] sm:$0xff]  ;;  %v8790_v41 = vld [vmem:[#allocation60_spill] sm:$0xff] }
 0x3c3   :  { %v1504_v11 = vpop.permute.xlu0 %1503  ;;  %1845 = vadd.xlane.f32.xlu1 %v1844_v26  ;;  %v1728_v33 = vsel %vm1723_vm5, %v1719_v30, %v6842_v61  ;;  %v8767_v26 = vld [vmem:[#allocation49_spill] sm:$0xff]  ;;  %v8771_v30 = vld [vmem:[#allocation66_spill] sm:$0xff] }
 0x3c4   :  { %v1768_v36 = vsel %vm1767_vm8, %v1759_v12, %v1504_v11  ;;  %v1737_v32 = vsel %vm1732_vm6, %v1728_v33, %v6877_v45  ;;  %v8768_v12 = vld [vmem:[#allocation81_spill] sm:$0xff]  ;;  %v8772_v33 = vld [vmem:[#allocation80_spill] sm:$0xff] }
 0x3c5   :  { %v1777_v47 = vsel %vm1776_vm10, %v1768_v36, %v6607_v63  ;;  %v1746_v63 = vsel %vm1741_vm7, %v1737_v32, %v6889_v13  ;;  %v1718_v11 = vsel %vm1714_vm4, %v1709_v1, %v8768_v12  ;;  %v8773_v32 = vld [vmem:[#allocation71_spill] sm:$0xff] }
 0x3c6   :  { %v1786_v8 = vsel %vm1785_vm11, %v1777_v47, %v6658_v35  ;;  %v1754_v35 = vsel %vm8683_vm0, %v1746_v63, %v1448_v55  ;;  %v1727_v47 = vsel %vm1723_vm5, %v1718_v11, %v8770_v42  ;;  %v8774_v63 = vld [vmem:[#allocation87_spill] sm:$0xff]  ;;  %v8793_v11 = vld [vmem:[#allocation50_spill] sm:$0xff]  ;;  %v1831_v42 = vld [vmem:[#allocation6 + $0x10] sm:$0xff] }
 0x3c7   :  { %v1795_v9 = vsel %vm1794_vm12, %v1786_v8, %v6734_v22  ;;  %v1693_v22 = vsel %vm1687_vm1, %v6499_v14, %v6717_v43  ;;  %v1763_v45 = vsel %vm8682_vm9, %v1754_v35, %v6923_v25  ;;  %v8755_v14 = vld [vmem:[#allocation52_spill] sm:$0xff]  ;;  %v8756_v25 = vld [vmem:[#allocation86_spill] sm:$0xff]  ;;  %v1482_v18 = vpop.permute.xlu1 %1481 }
 0x3c8   :  { %v1804_v17 = vsel %vm1803_vm13, %v1795_v9, %v6756_v38  ;;  %v1702_v13 = vsel %vm1696_vm2, %v1693_v22, %v6759_v53  ;;  %v1736_v9 = vsel %vm1732_vm6, %v1727_v47, %v8772_v33  ;;  %v8794_v47 = vld [vmem:[#allocation88_spill] sm:$0xff] }
 0x3c9   :  { %v7016_v28 = vsel %vm1812_vm14, %v1804_v17, %v6652_v31  ;;  %v1711_v3 = vsel %vm1705_vm3, %v1702_v13, %v8752_v59  ;;  %v1745_v35 = vsel %vm1741_vm7, %v1736_v9, %v8774_v63  ;;  %v8776_v13 = vld [vmem:[#allocation65_spill] sm:$0xff] }
 0x3ca   :  { %v1838_v61 = vsel %vm1837_vm15, %v7016_v28, 0.0  ;;  %v1720_v60 = vsel %vm1714_vm4, %v1711_v3, %v8754_v20  ;;  %v8796_v63 = vld [vmem:[#allocation53_spill] sm:$0xff] }
 0x3cb   :  { %1839 = vadd.xlane.f32.xlu0 %v1838_v61  ;;  %v1512_v38 = vpop.permute.xlu2 %1511  ;;  %v1729_v55 = vsel %vm1723_vm5, %v1720_v60, %v8756_v25  ;;  %v8775_v61 = vld [vmem:[#allocation54_spill] sm:$0xff] }
 0x3cc   :  { %v1772_v31 = vsel %vm1767_vm8, %v1763_v45, %v1512_v38  ;;  %v1738_v52 = vsel %vm1732_vm6, %v1729_v55, %v8758_v29  ;;  %v1753_v45 = vsel %vm8683_vm0, %v1745_v35, %v6908_v21  ;;  %v8781_v55 = vld [vmem:[#allocation77_spill] sm:$0xff] }
 0x3cd   :  { %v1781_v15 = vsel %vm1776_vm10, %v1772_v31, %v8753_v16  ;;  %v1747_v2 = vsel %vm1741_vm7, %v1738_v52, %v8760_v39  ;;  %v8777_v31 = vld [vmem:[#allocation34_spill] sm:$0xff]  ;;  %v1762_v3 = vsel %vm8682_vm9, %v1753_v45, %v6904_v44  ;;  %v8783_v44 = vld [vmem:[#allocation84_spill] sm:$0xff] }
 0x3ce   :  { %v1790_v43 = vsel %vm1785_vm11, %v1781_v15, %v8755_v14  ;;  %v1755_v62 = vsel %vm8683_vm0, %v1747_v2, %v8762_v0  ;;  %v1695_v59 = vsel %vm1687_vm1, %v8777_v31, %v8776_v13  ;;  %v8778_v15 = vld [vmem:[#allocation68_spill] sm:$0xff]  ;;  %v8779_v14 = vld [vmem:[#allocation79_spill] sm:$0xff]  ;;  %v8787_v0 = vld [vmem:[#allocation90_spill] sm:$0xff] }
 0x3cf   :  { %v1799_v53 = vsel %vm1794_vm12, %v1790_v43, %v8757_v51  ;;  %v1764_v19 = vsel %vm8682_vm9, %v1755_v62, %v1482_v18  ;;  %v1704_v20 = vsel %vm1696_vm2, %v1695_v59, %v8778_v15  ;;  %v8780_v43 = vld [vmem:[#allocation43_spill] sm:$0xff]  ;;  %v8784_v18 = vld [vmem:[#allocation64_spill] sm:$0xff]  ;;  %v1832_v15 = vld [vmem:[#allocation6 + $0x18] sm:$0xff] }
 0x3d0   :  { %v1808_v40 = vsel %vm1803_vm13, %v1799_v53, %v8759_v4  ;;  %v1713_v21 = vsel %vm1705_vm3, %v1704_v20, %v8779_v14  ;;  %v8782_v53 = vld [vmem:[#allocation56_spill] sm:$0xff] }
 0x3d1   :  { %v7049_v5 = vsel %vm1812_vm14, %v1808_v40, %v8761_v23  ;;  %v1722_v51 = vsel %vm1714_vm4, %v1713_v21, %v8781_v55  ;;  %v8785_v40 = vld [vmem:[#allocation85_spill] sm:$0xff]  ;;  %v8786_v2 = vld [vmem:[#allocation72_spill] sm:$0xff] }
 0x3d2   :  { %v1850_v10 = vsel %vm1837_vm15, %v7049_v5, 0.0  ;;  %v1731_v52 = vsel %vm1723_vm5, %v1722_v51, %v8783_v44  ;;  %v8799_v31 = vld [vmem:[#allocation76_spill] sm:$0xff] }
 0x3d3   :  { %v1514_v48 = vpop.permute.xlu2 %1513  ;;  %1851 = vadd.xlane.f32.xlu2 %v1850_v10  ;;  %v1740_v39 = vsel %vm1732_vm6, %v1731_v52, %v8785_v40  ;;  %v8788_v10 = vld [vmem:[#allocation51_spill] sm:$0xff]  ;;  %v1822_v20 = vld [vmem:[#allocation4 + $0x8] sm:$0xff] }
 0x3d4   :  { %v1773_v27 = vsel %vm1767_vm8, %v1764_v19, %v1514_v48  ;;  %v1749_v62 = vsel %vm1741_vm7, %v1740_v39, %v8787_v0 }
 0x3d5   :  { %v1782_v37 = vsel %vm1776_vm10, %v1773_v27, %v8767_v26  ;;  %v1757_v24 = vsel %vm8683_vm0, %v1749_v62, %v1454_v7  ;;  %v8791_v26 = vld [vmem:[#allocation69_spill] sm:$0xff] }
 0x3d6   :  { %v1791_v36 = vsel %vm1785_vm11, %v1782_v37, %v8769_v46  ;;  %v1766_v19 = vsel %vm8682_vm9, %v1757_v24, %v6955_v49  ;;  %v8792_v7 = vld [vmem:[#allocation45_spill] sm:$0xff] }
 0x3d7   :  { %v1800_v8 = vsel %vm1794_vm12, %v1791_v36, %v8771_v30  ;;  %v1484_v36 = vpop.permute.xlu1 %1483  ;;  %v8795_v30 = vld [vmem:[#allocation83_spill] sm:$0xff] }
 0x3d8   :  { %v1809_v17 = vsel %vm1803_vm13, %v1800_v8, %v8773_v32  ;;  %v1748_v8 = vsel %vm1741_vm7, %v8795_v30, %v8794_v47 }
 0x3d9   :  { %v7082_v22 = vsel %vm1812_vm14, %v1809_v17, %v8775_v61  ;;  %v1756_v33 = vsel %vm8683_vm0, %v1748_v8, %v6966_v34  ;;  %v8797_v61 = vld [vmem:[#allocation62_spill] sm:$0xff] }
 0x3da   :  { %v1853_v38 = vsel %vm1837_vm15, %v7082_v22, 0.0  ;;  %v1765_v9 = vsel %vm8682_vm9, %v1756_v33, %v1484_v36 }
 0x3db   :  { %v1510_v16 = vpop.permute.xlu0 %1509  ;;  %1854 = vadd.xlane.f32.xlu2 %v1853_v38  ;;  %v8798_v38 = vld [vmem:[#allocation67_spill] sm:$0xff] }
 0x3dc   :  { %v1771_v60 = vsel %vm1767_vm8, %v1762_v3, %v1510_v16  ;;  %v8800_v3 = vld [vmem:[#allocation57_spill] sm:$0xff] }
 0x3dd   :  { %v1780_v25 = vsel %vm1776_vm10, %v1771_v60, %v8780_v43  ;;  %v6237_v60 = vmov 32.0  }
 0x3de   :  { %v1789_v29 = vsel %vm1785_vm11, %v1780_v25, %v8782_v53  ;;  %5753 = vrcp.f32 %v6237_v60 }
 0x3df   :  { %v1798_v4 = vsel %vm1794_vm12, %v1789_v29, %v8784_v18 }
 0x3e0   :  { %v1807_v23 = vsel %vm1803_vm13, %v1798_v4, %v8786_v2 }
 0x3e1   :  { %v7116_v57 = vsel %vm1812_vm14, %v1807_v23, %v8788_v10 }
 0x3e2   :  { %v1847_v50 = vsel %vm1837_vm15, %v7116_v57, 0.0 }
 0x3e3   :  { %1848 = vadd.xlane.f32.xlu0 %v1847_v50  ;;  %v1518_v48 = vpop.permute.xlu2 %1517 }
 0x3e4   :  { %v1775_v58 = vsel %vm1767_vm8, %v1766_v19, %v1518_v48  ;;  %v5754_v14 = vpop.eup %5753 }
 0x3e5   :  { %v1784_v27 = vsel %vm1776_vm10, %v1775_v58, %v8789_v6  ;;  %v1863_v21 = vmul.f32 32.0, %v5754_v14  ;;  %vm1867_vm2 = vweird.f32 %v5754_v14 }
 0x3e6   :  { %v1793_v1 = vsel %vm1785_vm11, %v1784_v27, %v8790_v41 }
 0x3e7   :  { %v1802_v37 = vsel %vm1794_vm12, %v1793_v1, %v8791_v26  ;;  %v1864_v43 = vsub.f32 1.0, %v1863_v21 }
 0x3e8   :  { %v1811_v12 = vsel %vm1803_vm13, %v1802_v37, %v8792_v7 }
 0x3e9   :  { %v7134_v46 = vsel %vm1812_vm14, %v1811_v12, %v8793_v11  ;;  %v1865_v25 = vmul.f32 %v5754_v14, %v1864_v43 }
 0x3ea   :  { %v1859_v49 = vsel %vm1837_vm15, %v7134_v46, 0.0 }
 0x3eb   :  { %1860 = vadd.xlane.f32.xlu0 %v1859_v49  ;;  %v1866_v55 = vadd.f32 %v5754_v14, %v1865_v25 }
 0x3ed   :  { %v7156_v51 = vsel %vm1867_vm2, %v5754_v14, %v1866_v55 }
 0x3f3   :  { %v1516_v32 = vpop.permute.xlu1 %1515  ;;  %2081 = vperm.xlu2 %5746, %v1831_v42  }
 0x3f4   :  { %v1774_v17 = vsel %vm1767_vm8, %v1765_v9, %v1516_v32  ;;  %v1829_v32 = vld [vmem:[#allocation6] sm:$0xff] }
 0x3f5   :  { %v1783_v35 = vsel %vm1776_vm10, %v1774_v17, %v8796_v63 }
 0x3f6   :  { %v1792_v45 = vsel %vm1785_vm11, %v1783_v35, %v8797_v61 }
 0x3f7   :  { %v1801_v13 = vsel %vm1794_vm12, %v1792_v45, %v8798_v38 }
 0x3f8   :  { %v1810_v59 = vsel %vm1803_vm13, %v1801_v13, %v8799_v31 }
 0x3f9   :  { %v1819_v34 = vsel %vm1812_vm14, %v1810_v59, %v8800_v3 }
 0x3fa   :  { %v1856_v16 = vsel %vm1837_vm15, %v1819_v34, 0.0 }
 0x3fb   :  { %1857 = vadd.xlane.f32.xlu1 %v1856_v16 }
 0x3ff   :  { %2086 = vperm.xlu0 %5744, %v1832_v15  }
 0x414   :  { %2028 = vperm.xlu1 %5745, %v1822_v20  }
 0x42e   :  { %v1843_v53 = vpop.xlane.xlu2 %1842 }
 0x42f   :  { %v1870_v29 = vmul.f32 %v7156_v51, %v1843_v53  ;;  %v8801_v53 = vld [vmem:[#allocation47_spill] sm:$0xff] }
 0x431   :  { %v7160_v44 = vsub.f32 %v6946_v56, %v1870_v29 }
 0x433   :  { %v1886_v40 = vmul.f32 %v7160_v44, %v7160_v44 }
 0x435   :  { %v1896_v23 = vsel %vm1837_vm15, %v1886_v40, 0.0 }
 0x436   :  { %v1846_v52 = vpop.xlane.xlu1 %1845 }
 0x437   :  { %v1871_v18 = vmul.f32 %v7156_v51, %v1846_v52 }
 0x439   :  { %v7164_v4 = vsub.f32 %v6982_v54, %v1871_v18 }
 0x43b   :  { %v1887_v39 = vmul.f32 %v7164_v4, %v7164_v4 }
 0x43d   :  { %v1899_v2 = vsel %vm1837_vm15, %v1887_v39, 0.0 }
 0x43e   :  { %v1840_v0 = vpop.xlane.xlu0 %1839  ;;  %1900 = vadd.xlane.f32.xlu0 %v1899_v2  ;;  %1897 = vadd.xlane.f32.xlu1 %v1896_v23 }
 0x43f   :  { %v1869_v56 = vmul.f32 %v7156_v51, %v1840_v0 }
 0x441   :  { %v7174_v62 = vsub.f32 %v7016_v28, %v1869_v56 }
 0x443   :  { %v1885_v54 = vmul.f32 %v7174_v62, %v7174_v62 }
 0x445   :  { %v1893_v10 = vsel %vm1837_vm15, %v1885_v54, 0.0 }
 0x446   :  { %1894 = vadd.xlane.f32.xlu2 %v1893_v10  ;;  %v1852_v24 = vpop.xlane.xlu2 %1851 }
 0x447   :  { %v1873_v50 = vmul.f32 %v7156_v51, %v1852_v24 }
 0x449   :  { %v7181_v19 = vsub.f32 %v7049_v5, %v1873_v50 }
 0x44b   :  { %v1889_v48 = vmul.f32 %v7181_v19, %v7181_v19 }
 0x44d   :  { %v1905_v58 = vsel %vm1837_vm15, %v1889_v48, 0.0 }
 0x44e   :  { %1906 = vadd.xlane.f32.xlu1 %v1905_v58  ;;  %v1855_v28 = vpop.xlane.xlu2 %1854 }
 0x44f   :  { %v1874_v6 = vmul.f32 %v7156_v51, %v1855_v28 }
 0x451   :  { %v7188_v27 = vsub.f32 %v7082_v22, %v1874_v6 }
 0x453   :  { %v1890_v41 = vmul.f32 %v7188_v27, %v7188_v27 }
 0x455   :  { %v1908_v1 = vsel %vm1837_vm15, %v1890_v41, 0.0 }
 0x456   :  { %v1849_v26 = vpop.xlane.xlu0 %1848  ;;  %1909 = vadd.xlane.f32.xlu0 %v1908_v1  ;;  %v2082_v3 = vpop.permute.xlu2 %2081 }
 0x457   :  { %v1872_v5 = vmul.f32 %v7156_v51, %v1849_v26 }
 0x459   :  { %v7195_v37 = vsub.f32 %v7116_v57, %v1872_v5  ;;  %v1821_v57 = vld [vmem:[#allocation4] sm:$0xff] }
 0x45b   :  { %v1888_v7 = vmul.f32 %v7195_v37, %v7195_v37 }
 0x45d   :  { %v1902_v12 = vsel %vm1837_vm15, %v1888_v7, 0.0 }
 0x45e   :  { %1903 = vadd.xlane.f32.xlu2 %v1902_v12  ;;  %v1861_v22 = vpop.xlane.xlu0 %1860 }
 0x45f   :  { %v1876_v11 = vmul.f32 %v7156_v51, %v1861_v22  ;;  %v8802_v22 = vld [vmem:[#allocation40_spill] sm:$0xff] }
 0x461   :  { %v7202_v49 = vsub.f32 %v7134_v46, %v1876_v11  ;;  %v1830_v46 = vld [vmem:[#allocation6 + $0x8] sm:$0xff] }
 0x463   :  { %v1892_v36 = vmul.f32 %v7202_v49, %v7202_v49 }
 0x465   :  { %v1914_v42 = vsel %vm1837_vm15, %v1892_v36, 0.0 }
 0x466   :  { %1915 = vadd.xlane.f32.xlu1 %v1914_v42 }
 0x46a   :  { %2023 = vperm.xlu0 %5744, %v1821_v57  }
 0x46e   :  { %v1858_v47 = vpop.xlane.xlu1 %1857 }
 0x46f   :  { %v1875_v30 = vmul.f32 %v7156_v51, %v1858_v47  ;;  %v8803_v47 = vld [vmem:[#allocation42_spill] sm:$0xff] }
 0x471   :  { %v7208_v8 = vsub.f32 %v1819_v34, %v1875_v30  ;;  %v7213_v17 = vpop.permute.xlu0 %2086 }
 0x473   :  { %v1891_v33 = vmul.f32 %v7208_v8, %v7208_v8 }
 0x475   :  { %v1911_v9 = vsel %vm1837_vm15, %v1891_v33, 0.0 }
 0x476   :  { %1912 = vadd.xlane.f32.xlu2 %v1911_v9 }
 0x47f   :  { %2076 = vperm.xlu1 %5745, %v1830_v46  }
 0x486   :  { %v7215_v63 = vpop.permute.xlu1 %2028 }
 0x48e   :  { %2071 = vperm.xlu2 %5746, %v1829_v32  }
 0x4b1   :  { %v1901_v35 = vpop.xlane.xlu0 %1900  ;;  %v1898_v38 = vpop.xlane.xlu1 %1897 }
 0x4b2   :  { %v1919_v61 = vmul.f32 %v1901_v35, %v7156_v51  ;;  %v1918_v39 = vmul.f32 %v1898_v38, %v7156_v51 }
 0x4b4   :  { %v1927_v45 = vadd.f32 1e-05, %v1919_v61  ;;  %v7225_v54 = vadd.f32 1e-05, %v1918_v39 }
 0x4b6   :  { %5755 = vrsqrt.f32 %v1927_v45  ;;  %vm1959_vm8 = vweird.f32 %v1927_v45  ;;  %vm1949_vm9 = vweird.f32 %v7225_v54 }
 0x4b9   :  { %v1895_v25 = vpop.xlane.xlu2 %1894 }
 0x4ba   :  { %v1917_v35 = vmul.f32 %v1895_v25, %v7156_v51 }
 0x4bc   :  { %v5756_v13 = vpop.eup %5755 }
 0x4bd   :  { %v1954_v31 = vmul.f32 %v5756_v13, %v1927_v45  ;;  %vm1960_vm6 = vweird.f32 %v5756_v13 }
 0x4be   :  { %vm1961_vm13 = vmor %vm1959_vm8, %vm1960_vm6 }
 0x4bf   :  { %v1955_v59 = vmul.f32 %v5756_v13, %v1954_v31 }
 0x4c1   :  { %v1956_v34 = vmul.f32 0.5, %v1955_v59  ;;  %v1907_v16 = vpop.xlane.xlu1 %1906  ;;  %v8804_v59 = vld [vmem:[#allocation38_spill] sm:$0xff] }
 0x4c2   :  { %v1921_v15 = vmul.f32 %v1907_v16, %v7156_v51 }
 0x4c3   :  { %v1957_v20 = vsub.f32 1.5, %v1956_v34  ;;  %v7247_v34 = vadd.f32 1e-05, %v1917_v35 }
 0x4c4   :  { %v1929_v60 = vadd.f32 1e-05, %v1921_v15 }
 0x4c5   :  { %v1958_v14 = vmul.f32 %v5756_v13, %v1957_v20  ;;  %v8805_v20 = vld [vmem:[#allocation44_spill] sm:$0xff] }
 0x4c6   :  { %5757 = vrsqrt.f32 %v1929_v60  ;;  %vm1979_vm6 = vweird.f32 %v1929_v60 }
 0x4c7   :  { %v1962_v21 = vsel %vm1961_vm13, %v5756_v13, %v1958_v14 }
 0x4c8   :  { %v2015_v43 = vmul.f32 %v1962_v21, %v7164_v4 }
 0x4c9   :  { %v1910_v55 = vpop.xlane.xlu0 %1909 }
 0x4ca   :  { %v2063_v29 = vmul.f32 %v8801_v53, %v2015_v43  ;;  %v1922_v52 = vmul.f32 %v1910_v55, %v7156_v51 }
 0x4cc   :  { %v5758_v18 = vpop.eup %5757  ;;  %v2111_v40 = vadd.f32 %v2082_v3, %v2063_v29  ;;  %v1930_v2 = vadd.f32 1e-05, %v1922_v52 }
 0x4cd   :  { %v1974_v23 = vmul.f32 %v5758_v18, %v1929_v60  ;;  %vm1980_vm2 = vweird.f32 %v5758_v18 }
 0x4ce   :  { %v7223_v0 = vmax.f32 %v2111_v40, 0.0  ;;  %5759 = vrsqrt.f32 %v1930_v2  ;;  %vm1981_vm8 = vmor %vm1979_vm6, %vm1980_vm2  ;;  %vm1989_vm2 = vweird.f32 %v1930_v2  ;;  %v8806_v40 = vld [vmem:[#allocation36_spill] sm:$0xff] }
 0x4cf   :  { %v1975_v56 = vmul.f32 %v5758_v18, %v1974_v23  ;;  %5761 = vrsqrt.f32 %v7225_v54 }
 0x4d0   :  { %2284 = vrot.lane.b32.xlu2 %v7223_v0, %s6201_s3 }
 0x4d1   :  { %v1976_v4 = vmul.f32 0.5, %v1975_v56  ;;  %v1904_v10 = vpop.xlane.xlu2 %1903 }
 0x4d2   :  { %v1920_v24 = vmul.f32 %v1904_v10, %v7156_v51 }
 0x4d3   :  { %v1977_v50 = vsub.f32 1.5, %v1976_v4 }
 0x4d4   :  { %v5760_v48 = vpop.eup %5759  ;;  %v1928_v58 = vadd.f32 1e-05, %v1920_v24 }
 0x4d5   :  { %v1978_v28 = vmul.f32 %v5758_v18, %v1977_v50  ;;  %v1984_v6 = vmul.f32 %v5760_v48, %v1930_v2  ;;  %v7232_v12 = vpop.eup %5761  ;;  %vm1990_vm13 = vweird.f32 %v5760_v48 }
 0x4d6   :  { %5763 = vrsqrt.f32 %v1928_v58  ;;  %v1944_v9 = vmul.f32 %v7232_v12, %v7225_v54  ;;  %vm1991_vm6 = vmor %vm1989_vm2, %vm1990_vm13  ;;  %vm1969_vm13 = vweird.f32 %v1928_v58 }
 0x4d7   :  { %v1982_v41 = vsel %vm1981_vm8, %v5758_v18, %v1978_v28  ;;  %v1985_v1 = vmul.f32 %v5760_v48, %v1984_v6  ;;  %v8807_v28 = vld [vmem:[#allocation35_spill] sm:$0xff] }
 0x4d8   :  { %v2017_v26 = vmul.f32 %v1982_v41, %v7181_v19  ;;  %v1945_v13 = vmul.f32 %v7232_v12, %v1944_v9 }
 0x4d9   :  { %v1986_v5 = vmul.f32 0.5, %v1985_v1  ;;  %v1916_v7 = vpop.xlane.xlu1 %1915 }
 0x4da   :  { %v2065_v11 = vmul.f32 %v8802_v22, %v2017_v26  ;;  %v1924_v36 = vmul.f32 %v1916_v7, %v7156_v51  ;;  %v1946_v14 = vmul.f32 0.5, %v1945_v13  ;;  %v8808_v26 = vld [vmem:[#allocation39_spill] sm:$0xff] }
 0x4db   :  { %v1987_v42 = vsub.f32 1.5, %v1986_v5 }
 0x4dc   :  { %v5764_v57 = vpop.eup %5763  ;;  %v2113_v30 = vadd.f32 %v8803_v47, %v2065_v11  ;;  %v1932_v33 = vadd.f32 1e-05, %v1924_v36  ;;  %v1947_v29 = vsub.f32 1.5, %v1946_v14  ;;  %v2024_v13 = vpop.permute.xlu0 %2023 }
 0x4dd   :  { %v1988_v46 = vmul.f32 %v5760_v48, %v1987_v42  ;;  %v1964_v19 = vmul.f32 %v5764_v57, %v1928_v58  ;;  %vm1970_vm8 = vweird.f32 %v5764_v57 }
 0x4de   :  { %v7239_v32 = vmax.f32 %v2113_v30, 0.0  ;;  %5765 = vrsqrt.f32 %v1932_v33  ;;  %vm1971_vm2 = vmor %vm1969_vm13, %vm1970_vm8  ;;  %vm1950_vm8 = vweird.f32 %v7232_v12  ;;  %vm2009_vm13 = vweird.f32 %v1932_v33 }
 0x4df   :  { %v1992_v61 = vsel %vm1991_vm6, %v5760_v48, %v1988_v46  ;;  %v1965_v45 = vmul.f32 %v5764_v57, %v1964_v19  ;;  %5767 = vrsqrt.f32 %v7247_v34  ;;  %vm1951_vm0 = vmor %vm1949_vm9, %vm1950_vm8  ;;  %v8809_v19 = vld [vmem:[#allocation37_spill] sm:$0xff] }
 0x4e0   :  { %v2018_v38 = vmul.f32 %v1992_v61, %v7188_v27  ;;  %2288 = vrot.lane.b32.xlu0 %v7239_v32, %s6201_s3 }
 0x4e1   :  { %v1966_v31 = vmul.f32 0.5, %v1965_v45  ;;  %v8810_v45 = vld [vmem:[#allocation41_spill] sm:$0xff] }
 0x4e2   :  { %v2066_v3 = vmul.f32 %v8804_v59, %v2018_v38 }
 0x4e3   :  { %v1967_v16 = vsub.f32 1.5, %v1966_v31 }
 0x4e4   :  { %v5766_v15 = vpop.eup %5765  ;;  %v2114_v60 = vadd.f32 %v8805_v20, %v2066_v3 }
 0x4e5   :  { %v1968_v21 = vmul.f32 %v5764_v57, %v1967_v16  ;;  %v2004_v43 = vmul.f32 %v5766_v15, %v1932_v33  ;;  %vm2010_vm6 = vweird.f32 %v5766_v15  ;;  %v5768_v10 = vpop.eup %5767 }
 0x4e6   :  { %v7250_v27 = vmax.f32 %v2114_v60, 0.0  ;;  %vm1940_vm8 = vweird.f32 %v5768_v10 }
 0x4e7   :  { %v1972_v25 = vsel %vm1971_vm2, %v5764_v57, %v1968_v21  ;;  %v2005_v55 = vmul.f32 %v5766_v15, %v2004_v43  ;;  %vm2011_vm2 = vmor %vm2009_vm13, %vm2010_vm6  ;;  %vm1939_vm13 = vweird.f32 %v7247_v34  ;;  %v7378_v43 = vld [vmem:[#allocation9] sm:$0xff] }
 0x4e8   :  { %v2016_v53 = vmul.f32 %v1972_v25, %v7195_v37  ;;  %2290 = vrot.lane.b32.xlu2 %v7250_v27, %s6201_s3  ;;  %v1948_v37 = vmul.f32 %v7232_v12, %v1947_v29 }
 0x4e9   :  { %v2006_v52 = vmul.f32 0.5, %v2005_v55  ;;  %v1913_v18 = vpop.xlane.xlu2 %1912 }
 0x4ea   :  { %v2064_v39 = vmul.f32 %v8806_v40, %v2016_v53  ;;  %v1923_v2 = vmul.f32 %v1913_v18, %v7156_v51  ;;  %v1934_v51 = vmul.f32 %v5768_v10, %v7247_v34  ;;  %v1952_v58 = vsel %vm1951_vm0, %v7232_v12, %v1948_v37 }
 0x4eb   :  { %v2007_v23 = vsub.f32 1.5, %v2006_v52  ;;  %v2014_v7 = vmul.f32 %v1952_v58, %v7160_v44  ;;  %v2312_v53 = vperm.slane %v7378_v43, 1 }
 0x4ec   :  { %v2112_v56 = vadd.f32 %v7213_v17, %v2064_v39  ;;  %v1931_v4 = vadd.f32 1e-05, %v1923_v2  ;;  %v1935_v1 = vmul.f32 %v5768_v10, %v1934_v51 }
 0x4ed   :  { %v2008_v24 = vmul.f32 %v5766_v15, %v2007_v23 }
 0x4ee   :  { %v7261_v50 = vmax.f32 %v2112_v56, 0.0  ;;  %5769 = vrsqrt.f32 %v1931_v4  ;;  %v1936_v42 = vmul.f32 0.5, %v1935_v1  ;;  %vm1999_vm9 = vweird.f32 %v1931_v4 }
 0x4ef   :  { %v2012_v48 = vsel %vm2011_vm2, %v5766_v15, %v2008_v24  ;;  %vm1941_vm2 = vmor %vm1939_vm13, %vm1940_vm8 }
 0x4f0   :  { %v2020_v17 = vmul.f32 %v2012_v48, %v7202_v49  ;;  %2286 = vrot.lane.b32.xlu1 %v7261_v50, %s6201_s3  ;;  %v2062_v49 = vmul.f32 %v7215_v63, %v2014_v7  ;;  %v1937_v30 = vsub.f32 1.5, %v1936_v42 }
 0x4f1   :  { %v2077_v36 = vpop.permute.xlu1 %2076 }
 0x4f2   :  { %v2068_v6 = vmul.f32 %v8807_v28, %v2020_v17  ;;  %v2110_v57 = vadd.f32 %v2077_v36, %v2062_v49  ;;  %v1938_v46 = vmul.f32 %v5768_v10, %v1937_v30 }
 0x4f4   :  { %v5770_v41 = vpop.eup %5769  ;;  %v2116_v5 = vadd.f32 %v8808_v26, %v2068_v6  ;;  %v7279_v33 = vmax.f32 %v2110_v57, 0.0  ;;  %v1942_v61 = vsel %vm1941_vm2, %v5768_v10, %v1938_v46 }
 0x4f5   :  { %v1994_v54 = vmul.f32 %v5770_v41, %v1931_v4  ;;  %vm2000_vm0 = vweird.f32 %v5770_v41  ;;  %v2013_v59 = vmul.f32 %v1942_v61, %v7174_v62 }
 0x4f6   :  { %v7272_v22 = vmax.f32 %v2116_v5, 0.0  ;;  %vm2001_vm6 = vmor %vm1999_vm9, %vm2000_vm0 }
 0x4f7   :  { %v1995_v11 = vmul.f32 %v5770_v41, %v1994_v54  ;;  %v2061_v3 = vmul.f32 %v2024_v13, %v2013_v59 }
 0x4f8   :  { %2294 = vrot.lane.b32.xlu0 %v7272_v22, %s6201_s3  ;;  %2253 = vrot.lane.b32.xlu2 %v7272_v22, %s6232_s9 }
 0x4f9   :  { %v1996_v12 = vmul.f32 0.5, %v1995_v11  ;;  %v2271_v11 = vperm.slane %v7378_v43, 0 }
 0x4fb   :  { %v1997_v47 = vsub.f32 1.5, %v1996_v12 }
 0x4fd   :  { %v1998_v44 = vmul.f32 %v5770_v41, %v1997_v47 }
 0x4ff   :  { %v2002_v9 = vsel %vm2001_vm6, %v5770_v41, %v1998_v44 }
 0x500   :  { %v2019_v63 = vmul.f32 %v2002_v9, %v7208_v8  ;;  %2282 = vrot.lane.b32.xlu0 %v7279_v33, %s6201_s3  ;;  %2247 = vrot.lane.b32.xlu2 %v7239_v32, %s6232_s9  ;;  %v2072_v8 = vpop.permute.xlu2 %2071 }
 0x501   :  { %v2109_v34 = vadd.f32 %v2072_v8, %v2061_v3 }
 0x502   :  { %v2067_v35 = vmul.f32 %v8809_v19, %v2019_v63 }
 0x503   :  { %v7298_v16 = vmax.f32 %v2109_v34, 0.0 }
 0x504   :  { %v2115_v38 = vadd.f32 %v8810_v45, %v2067_v35 }
 0x506   :  { %v7289_v31 = vmax.f32 %v2115_v38, 0.0 }
 0x508   :  { %2241 = vrot.lane.b32.xlu2 %v7279_v33, %s6232_s9  ;;  %2251 = vrot.lane.b32.xlu0 %v7289_v31, %s6232_s9 }
 0x509   :  { %2292 = vrot.lane.b32.xlu1 %v7289_v31, %s6201_s3 }
 0x510   :  { %2374 = vrot.lane.b32.xlu2 %v7289_v31, %s6228_s0  ;;  %2245 = vrot.lane.b32.xlu0 %v7261_v50, %s6232_s9 }
 0x511   :  { %2280 = vrot.lane.b32.xlu1 %v7298_v16, %s6201_s3  ;;  %s6238_s3 = smov 126  }
 0x518   :  { %2368 = vrot.lane.b32.xlu2 %v7261_v50, %s6228_s0  ;;  %2239 = vrot.lane.b32.xlu0 %v7298_v16, %s6232_s9 }
 0x519   :  { %2249 = vrot.lane.b32.xlu1 %v7250_v27, %s6232_s9 }
 0x520   :  { %2362 = vrot.lane.b32.xlu2 %v7298_v16, %s6228_s0  ;;  %2372 = vrot.lane.b32.xlu0 %v7250_v27, %s6228_s0 }
 0x521   :  { %2243 = vrot.lane.b32.xlu1 %v7223_v0, %s6232_s9 }
 0x528   :  { %2331 = vrot.lane.b32.xlu2 %v7250_v27, %s6231_s29  ;;  %2366 = vrot.lane.b32.xlu0 %v7223_v0, %s6228_s0 }
 0x529   :  { %2370 = vrot.lane.b32.xlu1 %v7239_v32, %s6228_s0 }
 0x52a   :  { %v2285_v62 = vpop.permute.xlu2 %2284 }
 0x52b   :  { %v2306_v58 = vsel %vm1714_vm4, 0.0, %v2285_v62 }
 0x52c   :  { %v2315_v5 = vmul.f32 %v2312_v53, %v2306_v58 }
 0x530   :  { %2325 = vrot.lane.b32.xlu2 %v7223_v0, %s6231_s29  ;;  %2335 = vrot.lane.b32.xlu0 %v7272_v22, %s6231_s29 }
 0x531   :  { %2376 = vrot.lane.b32.xlu1 %v7272_v22, %s6228_s0 }
 0x538   :  { %2420 = vrot.lane.b32.xlu2 %v7239_v32, %s6238_s3  ;;  %2329 = vrot.lane.b32.xlu0 %v7239_v32, %s6231_s29 }
 0x539   :  { %2364 = vrot.lane.b32.xlu1 %v7279_v33, %s6228_s0 }
 0x540   :  { %2416 = vrot.lane.b32.xlu2 %v7223_v0, %s6238_s3  ;;  %2323 = vrot.lane.b32.xlu0 %v7279_v33, %s6231_s29 }
 0x541   :  { %2333 = vrot.lane.b32.xlu1 %v7289_v31, %s6231_s29 }
 0x542   :  { %v2291_v15 = vpop.permute.xlu2 %2290 }
 0x543   :  { %v2309_v4 = vsel %vm1714_vm4, 0.0, %v2291_v15 }
 0x544   :  { %v2318_v48 = vmul.f32 %v2312_v53, %v2309_v4 }
 0x548   :  { %2504 = vrot.lane.b32.xlu2 %v7250_v27, %s6239_s25  ;;  %2424 = vrot.lane.b32.xlu0 %v7289_v31, %s6238_s3 }
 0x549   :  { %2327 = vrot.lane.b32.xlu1 %v7261_v50, %s6231_s29 }
 0x550   :  { %2500 = vrot.lane.b32.xlu2 %v7261_v50, %s6239_s25  ;;  %2418 = vrot.lane.b32.xlu0 %v7261_v50, %s6238_s3 }
 0x551   :  { %2321 = vrot.lane.b32.xlu1 %v7298_v16, %s6231_s29 }
 0x552   :  { %v7354_v20 = vpop.permute.xlu2 %2253  ;;  %v2289_v14 = vpop.permute.xlu0 %2288 }
 0x553   :  { %v2308_v37 = vsel %vm1714_vm4, 0.0, %v2289_v14  ;;  %v2270_v36 = vsel %vm1723_vm5, 0.0, %v7354_v20  ;;  %v2125_v14 = vld [vmem:[#allocation7] sm:$0xff] }
 0x554   :  { %v2317_v17 = vmul.f32 %v2312_v53, %v2308_v37  ;;  %v2279_v30 = vmul.f32 %v2271_v11, %v2270_v36  ;;  %v7466_v36 = vperm.slane %v7378_v43, 5 }
 0x558   :  { %2426 = vrot.lane.b32.xlu2 %v7272_v22, %s6238_s3  ;;  %2506 = vrot.lane.b32.xlu0 %v7289_v31, %s6239_s25 }
 0x559   :  { %2422 = vrot.lane.b32.xlu1 %v7250_v27, %s6238_s3 }
 0x55a   :  { %v7362_v60 = vpop.permute.xlu2 %2247 }
 0x55b   :  { %v2267_v46 = vsel %vm1723_vm5, 0.0, %v7362_v60 }
 0x55c   :  { %v2276_v61 = vmul.f32 %v2271_v11, %v2267_v46 }
 0x560   :  { %2543 = vrot.lane.b32.xlu2 %v7239_v32, %s6240_s2  ;;  %2412 = vrot.lane.b32.xlu0 %v7298_v16, %s6238_s3 }
 0x561   :  { %2414 = vrot.lane.b32.xlu1 %v7279_v33, %s6238_s3 }
 0x562   :  { %v7370_v21 = vpop.permute.xlu2 %2241  ;;  %v2287_v39 = vpop.permute.xlu1 %2286 }
 0x563   :  { %v2307_v51 = vsel %vm1714_vm4, 0.0, %v2287_v39  ;;  %v2264_v8 = vsel %vm1723_vm5, 0.0, %v7370_v21  ;;  %v2394_v39 = vperm.slane %v7378_v43, 3 }
 0x564   :  { %v2316_v1 = vmul.f32 %v2312_v53, %v2307_v51  ;;  %v2273_v62 = vmul.f32 %v2271_v11, %v2264_v8 }
 0x568   :  { %2461 = vrot.lane.b32.xlu2 %v7239_v32, %s6241_s14  ;;  %2498 = vrot.lane.b32.xlu0 %v7223_v0, %s6239_s25 }
 0x569   :  { %2502 = vrot.lane.b32.xlu1 %v7239_v32, %s6239_s25 }
 0x56a   :  { %v2295_v25 = vpop.permute.xlu0 %2294  ;;  %v7380_v55 = vpop.permute.xlu2 %2374 }
 0x56b   :  { %v2311_v29 = vsel %vm1714_vm4, 0.0, %v2295_v25  ;;  %v2207_v25 = vld [vmem:[#allocation10] sm:$0xff] }
 0x56c   :  { %v2320_v52 = vmul.f32 %v2312_v53, %v2311_v29 }
 0x56e   :  { %2625 = vmatpush.msra.mxu2 %v2320_v52  ;;  %5674 = vmatpush.msrb.mxu3 %v2320_v52  ;;  %v2130_v52 = vld [vmem:[#allocation7 + $0x28] sm:$0xff] }
 0x570   :  { %2549 = vrot.lane.b32.xlu2 %v7272_v22, %s6240_s2  ;;  %2494 = vrot.lane.b32.xlu0 %v7298_v16, %s6239_s25 }
 0x571   :  { %2496 = vrot.lane.b32.xlu1 %v7279_v33, %s6239_s25 }
 0x572   :  { %v2283_v18 = vpop.permute.xlu0 %2282  ;;  %v7390_v40 = vpop.permute.xlu2 %2368 }
 0x573   :  { %v2305_v26 = vsel %vm1714_vm4, 0.0, %v2283_v18 }
 0x574   :  { %v2314_v54 = vmul.f32 %v2312_v53, %v2305_v26 }
 0x578   :  { %2467 = vrot.lane.b32.xlu2 %v7272_v22, %s6241_s14  ;;  %2545 = vrot.lane.b32.xlu0 %v7250_v27, %s6240_s2 }
 0x579   :  { %2547 = vrot.lane.b32.xlu1 %v7289_v31, %s6240_s2 }
 0x57a   :  { %v2252_v2 = vpop.permute.xlu0 %2251  ;;  %v7398_v23 = vpop.permute.xlu2 %2362 }
 0x57b   :  { %v2293_v56 = vpop.permute.xlu1 %2292  ;;  %v2269_v57 = vsel %vm1723_vm5, 0.0, %v2252_v2  ;;  %v2392_v2 = vsel %vm1687_vm1, 0.0, %v7380_v55  ;;  %v2389_v55 = vsel %vm1687_vm1, 0.0, %v7390_v40 }
 0x57c   :  { %v2310_v10 = vsel %vm1714_vm4, 0.0, %v2293_v56  ;;  %v2278_v9 = vmul.f32 %v2271_v11, %v2269_v57  ;;  %v2401_v37 = vmul.f32 %v2394_v39, %v2392_v2  ;;  %v2140_v57 = vld [vmem:[#allocation7 + $0x78] sm:$0xff] }
 0x57d   :  { %v2319_v24 = vmul.f32 %v2312_v53, %v2310_v10 }
 0x57f   :  { %2626 = vmatpush.msra.mxu2 %v2319_v24  ;;  %5675 = vmatpush.msrb.mxu3 %v2319_v24  ;;  %v2211_v24 = vld [vmem:[#allocation12] sm:$0xff] }
 0x580   :  { %2537 = vrot.lane.b32.xlu2 %v7279_v33, %s6240_s2  ;;  %2463 = vrot.lane.b32.xlu0 %v7250_v27, %s6241_s14 }
 0x581   :  { %2508 = vrot.lane.b32.xlu1 %v7272_v22, %s6239_s25  ;;  %2627 = vmatpush.msra.mxu2 %v2318_v48 }
 0x582   :  { %5676 = vmatpush.msrb.mxu3 %v2318_v48  ;;  %v2246_v28 = vpop.permute.xlu0 %2245  ;;  %v7411_v6 = vpop.permute.xlu2 %2331 }
 0x583   :  { %v2281_v41 = vpop.permute.xlu1 %2280  ;;  %2628 = vmatpush.msra.mxu2 %v2317_v17  ;;  %v2266_v19 = vsel %vm1723_vm5, 0.0, %v2246_v28  ;;  %v2135_v28 = vld [vmem:[#allocation7 + $0x50] sm:$0xff] }
 0x584   :  { %5677 = vmatpush.msrb.mxu3 %v2317_v17  ;;  %v2304_v7 = vsel %vm1714_vm4, 0.0, %v2281_v41  ;;  %v2275_v59 = vmul.f32 %v2271_v11, %v2266_v19 }
 0x585   :  { %2629 = vmatpush.msra.mxu2 %v2316_v1  ;;  %v2313_v49 = vmul.f32 %v2312_v53, %v2304_v7 }
 0x586   :  { %5678 = vmatpush.msrb.mxu3 %v2316_v1 }
 0x587   :  { %2630 = vmatpush.msra.mxu2 %v2315_v5 }
 0x588   :  { %5679 = vmatpush.msrb.mxu3 %v2315_v5  ;;  %2455 = vrot.lane.b32.xlu2 %v7279_v33, %s6241_s14  ;;  %v2398_v5 = vmul.f32 %v2394_v39, %v2389_v55 }
 0x589   :  { %2539 = vrot.lane.b32.xlu0 %v7223_v0, %s6240_s2  ;;  %2465 = vrot.lane.b32.xlu1 %v7289_v31, %s6241_s14 }
 0x58a   :  { %2631 = vmatpush.msra.mxu2 %v2314_v54  ;;  %5680 = vmatpush.msrb.mxu3 %v2314_v54  ;;  %v2240_v42 = vpop.permute.xlu0 %2239  ;;  %v7424_v12 = vpop.permute.xlu2 %2325 }
 0x58b   :  { %v2250_v47 = vpop.permute.xlu1 %2249  ;;  %v2263_v34 = vsel %vm1723_vm5, 0.0, %v2240_v42 }
 0x58c   :  { %2632 = vmatpush.msra.mxu2 %v2313_v49  ;;  %5681 = vmatpush.msrb.mxu3 %v2313_v49  ;;  %v2268_v44 = vsel %vm1723_vm5, 0.0, %v2250_v47  ;;  %v2272_v20 = vmul.f32 %v2271_v11, %v2263_v34 }
 0x58d   :  { %v2277_v63 = vmul.f32 %v2271_v11, %v2268_v44 }
 0x58e   :  { %2633 = vmatpush.msra.mxu2 %v2279_v30  ;;  %5682 = vmatpush.msrb.mxu3 %v2279_v30 }
 0x590   :  { %2634 = vmatpush.msra.mxu2 %v2278_v9  ;;  %5683 = vmatpush.msrb.mxu3 %v2278_v9 }
 0x591   :  { %2457 = vrot.lane.b32.xlu0 %v7223_v0, %s6241_s14  ;;  %2541 = vrot.lane.b32.xlu1 %v7261_v50, %s6240_s2 }
 0x592   :  { %2635 = vmatpush.msra.mxu2 %v2277_v63  ;;  %5684 = vmatpush.msrb.mxu3 %v2277_v63  ;;  %v2373_v35 = vpop.permute.xlu0 %2372  ;;  %v7435_v45 = vpop.permute.xlu2 %2420  ;;  %v2353_v63 = vperm.slane %v7378_v43, 2 }
 0x593   :  { %v2244_v38 = vpop.permute.xlu1 %2243  ;;  %v2391_v10 = vsel %vm1687_vm1, 0.0, %v2373_v35  ;;  %v2350_v35 = vsel %vm1705_vm3, 0.0, %v7411_v6  ;;  %v2347_v6 = vsel %vm1705_vm3, 0.0, %v7424_v12 }
 0x594   :  { %v2265_v13 = vsel %vm1723_vm5, 0.0, %v2244_v38  ;;  %2636 = vmatpush.msra.mxu2 %v2276_v61  ;;  %5685 = vmatpush.msrb.mxu3 %v2276_v61  ;;  %v2400_v51 = vmul.f32 %v2394_v39, %v2391_v10  ;;  %vm3006_vm5 = vcmask 785408  }
 0x595   :  { %v2274_v3 = vmul.f32 %v2271_v11, %v2265_v13  ;;  %v2386_v11 = vsel %vm1687_vm1, 0.0, %v7398_v23 }
 0x596   :  { %2637 = vmatpush.msra.mxu2 %v2275_v59  ;;  %5686 = vmatpush.msrb.mxu3 %v2275_v59  ;;  %v2395_v46 = vmul.f32 %v2394_v39, %v2386_v11  ;;  %v2359_v59 = vmul.f32 %v2353_v63, %v2350_v35  ;;  %v2165_v35 = vld [vmem:[#allocation7 + $0x140] sm:$0xff] }
 0x598   :  { %2638 = vmatpush.msra.mxu2 %v2274_v3  ;;  %5687 = vmatpush.msrb.mxu3 %v2274_v3  ;;  %v2145_v3 = vld [vmem:[#allocation7 + $0xa0] sm:$0xff] }
 0x599   :  { %2453 = vrot.lane.b32.xlu0 %v7298_v16, %s6241_s14  ;;  %2459 = vrot.lane.b32.xlu1 %v7261_v50, %s6241_s14 }
 0x59a   :  { %2639 = vmatpush.msra.mxu2 %v2273_v62  ;;  %5688 = vmatpush.msrb.mxu3 %v2273_v62  ;;  %v2367_v15 = vpop.permute.xlu0 %2366  ;;  %v7445_v60 = vpop.permute.xlu2 %2416 }
 0x59b   :  { %v2371_v21 = vpop.permute.xlu1 %2370  ;;  %v2388_v26 = vsel %vm1687_vm1, 0.0, %v2367_v15 }
 0x59c   :  { %2640 = vmatpush.msra.mxu2 %v2272_v20  ;;  %5689 = vmatpush.msrb.mxu3 %v2272_v20  ;;  %v2390_v48 = vsel %vm1687_vm1, 0.0, %v2371_v21  ;;  %v2397_v54 = vmul.f32 %v2394_v39, %v2388_v26 }
 0x59d   :  { %2641 = vmatmul.f32.vlgmr.msra.gmra.mxu2 %v2125_v14  ;;  %v2399_v1 = vmul.f32 %v2394_v39, %v2390_v48 }
 0x5a1   :  { %3100 = vperm.xlu0 %5744, %v2207_v25   ;;  %2535 = vrot.lane.b32.xlu1 %v7298_v16, %s6240_s2  ;;  %v2185_v25 = vld [vmem:[#allocation7 + $0x1e0] sm:$0xff] }
 0x5a2   :  { %v2336_v53 = vpop.permute.xlu0 %2335  ;;  %v7449_v29 = vpop.permute.xlu2 %2504  ;;  %2677 = vmatmul.f32.vlgmr.msrb.gmra.mxu3 %v2185_v25 }
 0x5a3   :  { %v2377_v18 = vpop.permute.xlu1 %2376  ;;  %v2352_v47 = vsel %vm1705_vm3, 0.0, %v2336_v53 }
 0x5a4   :  { %v2393_v56 = vsel %vm1687_vm1, 0.0, %v2377_v18  ;;  %v2361_v19 = vmul.f32 %v2353_v63, %v2352_v47 }
 0x5a5   :  { %2644 = vmatmul.f32.gmra.mxu2 %v2130_v52  ;;  %v2402_v4 = vmul.f32 %v2394_v39, %v2393_v56  ;;  %v2356_v52 = vmul.f32 %v2353_v63, %v2347_v6  ;;  %v2150_v56 = vld [vmem:[#allocation7 + $0xc8] sm:$0xff] }
 0x5a7   :  { %2690 = vmatpush.msrb.mxu2 %v2402_v4 }
 0x5a9   :  { %3124 = vperm.xlu1 %5745, %v2211_v24   ;;  %2691 = vmatpush.msrb.mxu2 %v2401_v37  ;;  %v2190_v24 = vld [vmem:[#allocation7 + $0x208] sm:$0xff] }
 0x5aa   :  { %v2330_v17 = vpop.permute.xlu0 %2329  ;;  %v7457_v58 = vpop.permute.xlu2 %2500  ;;  %2680 = vmatmul.f32.gmra.mxu3 %v2190_v24  ;;  %v7487_v37 = vld [vmem:[#allocation9 + $0x8] ss:$0 sm:$0xff] }
 0x5ab   :  { %v2365_v41 = vpop.permute.xlu1 %2364  ;;  %2692 = vmatpush.msrb.mxu2 %v2400_v51  ;;  %v2349_v38 = vsel %vm1705_vm3, 0.0, %v2330_v17  ;;  %v2155_v17 = vld [vmem:[#allocation7 + $0xf0] sm:$0xff] }
 0x5ac   :  { %v2387_v7 = vsel %vm1687_vm1, 0.0, %v2365_v41  ;;  %v2358_v14 = vmul.f32 %v2353_v63, %v2349_v38  ;;  %v2440_v41 = vsel %vm1812_vm14, %v7435_v45, 0.0 }
 0x5ad   :  { %2647 = vmatmul.f32.gmra.mxu2 %v2135_v28  ;;  %v2396_v42 = vmul.f32 %v2394_v39, %v2387_v7  ;;  %v2195_v7 = vld [vmem:[#allocation7 + $0x230] sm:$0xff]  ;;  %v2449_v11 = vmul.f32 %v7466_v36, %v2440_v41  ;;  %v2126_v41 = vld [vmem:[#allocation7 + $0x8] sm:$0xff] }
 0x5ae   :  { %2693 = vmatpush.msrb.mxu2 %v2399_v1 }
 0x5b0   :  { %2694 = vmatpush.msrb.mxu2 %v2398_v5 }
 0x5b2   :  { %2695 = vmatpush.msrb.mxu2 %v2397_v54  ;;  %v2324_v40 = vpop.permute.xlu0 %2323  ;;  %v2427_v49 = vpop.permute.xlu2 %2426  ;;  %2683 = vmatmul.f32.gmra.mxu3 %v2195_v7 }
 0x5b3   :  { %v2334_v30 = vpop.permute.xlu1 %2333  ;;  %v2443_v44 = vsel %vm1812_vm14, %v2427_v49, 0.0  ;;  %v2346_v53 = vsel %vm1705_vm3, 0.0, %v2324_v40  ;;  %v2438_v40 = vsel %vm1812_vm14, %v7445_v60, 0.0  ;;  %v2160_v49 = vld [vmem:[#allocation7 + $0x118] sm:$0xff] }
 0x5b4   :  { %2696 = vmatpush.msrb.mxu2 %v2396_v42  ;;  %v2452_v9 = vmul.f32 %v7466_v36, %v2443_v44  ;;  %v2351_v23 = vsel %vm1705_vm3, 0.0, %v2334_v30  ;;  %v2355_v39 = vmul.f32 %v2353_v63, %v2346_v53 }
 0x5b5   :  { %2650 = vmatmul.f32.gmra.mxu2 %v2140_v57  ;;  %v2360_v61 = vmul.f32 %v2353_v63, %v2351_v23  ;;  %v2447_v57 = vmul.f32 %v7466_v36, %v2438_v40 }
 0x5b6   :  { %2697 = vmatpush.msrb.mxu2 %v2395_v46  ;;  %2755 = vmatpush.msra.mxu3 %v2452_v9  ;;  %v2200_v46 = vld [vmem:[#allocation7 + $0x258] sm:$0xff] }
 0x5b8   :  { %2698 = vmatpush.msrb.mxu2 %v2361_v19 }
 0x5ba   :  { %2699 = vmatpush.msrb.mxu2 %v2360_v61  ;;  %v2425_v13 = vpop.permute.xlu0 %2424  ;;  %v7476_v8 = vpop.permute.xlu2 %2543  ;;  %2686 = vmatmul.f32.gmra.mxu3 %v2200_v46 }
 0x5bb   :  { %v2442_v34 = vsel %vm1812_vm14, %v2425_v13, 0.0  ;;  %v2328_v62 = vpop.permute.xlu1 %2327 }
 0x5bc   :  { %v2451_v15 = vmul.f32 %v7466_v36, %v2442_v34  ;;  %v2348_v20 = vsel %vm1705_vm3, 0.0, %v2328_v62  ;;  %2700 = vmatpush.msrb.mxu2 %v2359_v59  ;;  %v2170_v34 = vld [vmem:[#allocation7 + $0x168] sm:$0xff] }
 0x5bd   :  { %2653 = vmatmul.f32.gmra.mxu2 %v2145_v3  ;;  %v2357_v21 = vmul.f32 %v2353_v63, %v2348_v20 }
 0x5be   :  { %2701 = vmatpush.msrb.mxu2 %v2358_v14  ;;  %2756 = vmatpush.msra.mxu3 %v2451_v15 }
 0x5c0   :  { %2702 = vmatpush.msrb.mxu2 %v2357_v21 }
 0x5c2   :  { %2703 = vmatpush.msrb.mxu2 %v2356_v52  ;;  %v2419_v18 = vpop.permute.xlu0 %2418  ;;  %v7484_v2 = vpop.permute.xlu2 %2461  ;;  %v2180_v52 = vld [vmem:[#allocation7 + $0x1b8] sm:$0xff] }
 0x5c3   :  { %v2322_v4 = vpop.permute.xlu1 %2321  ;;  %v2439_v54 = vsel %vm1812_vm14, %v2419_v18, 0.0 }
 0x5c4   :  { %v2345_v10 = vsel %vm1705_vm3, 0.0, %v2322_v4  ;;  %2704 = vmatpush.msrb.mxu2 %v2355_v39  ;;  %v2448_v45 = vmul.f32 %v7466_v36, %v2439_v54  ;;  %v2526_v39 = vperm.slane %v7378_v43, 7  ;;  %vm2576_vm3 = vcmask 523264  }
 0x5c5   :  { %2656 = vmatmul.f32.gmra.mxu2 %v2150_v56  ;;  %v2354_v12 = vmul.f32 %v2353_v63, %v2345_v10  ;;  %v2403_v63 = vperm.slane %v7378_v43, 4  ;;  %v2523_v10 = vsel %vm1785_vm11, %v7449_v29, 0.0 }
 0x5c7   :  { %2705 = vmatpush.msrb.mxu2 %v2354_v12  ;;  %v2411_v23 = vmul.f32 %v2403_v63, %v7272_v22  ;;  %v2410_v38 = vmul.f32 %v2403_v63, %v7289_v31  ;;  %v2409_v13 = vmul.f32 %v2403_v63, %v7250_v27  ;;  %v2407_v59 = vmul.f32 %v2403_v63, %v7261_v50  ;;  %v2127_v27 = vld [vmem:[#allocation7 + $0x10] sm:$0xff] }
 0x5c8   :  { %v2406_v62 = vmul.f32 %v2403_v63, %v7223_v0  ;;  %v2405_v31 = vmul.f32 %v2403_v63, %v7279_v33  ;;  %v2404_v15 = vmul.f32 %v2403_v63, %v7298_v16  ;;  %v2563_v0 = vsel %vm1776_vm10, %v7476_v8, 0.0  ;;  %v2132_v16 = vld [vmem:[#allocation7 + $0x38] sm:$0xff] }
 0x5c9   :  { %v2572_v25 = vmul.f32 %v7487_v37, %v2563_v0 }
 0x5ca   :  { %v7489_v48 = vpop.permute.xlu0 %2506  ;;  %v2550_v51 = vpop.permute.xlu2 %2549 }
 0x5cb   :  { %v2423_v28 = vpop.permute.xlu1 %2422  ;;  %v2566_v55 = vsel %vm1776_vm10, %v2550_v51, 0.0  ;;  %v2524_v56 = vsel %vm1785_vm11, %v7489_v48, 0.0  ;;  %v2137_v51 = vld [vmem:[#allocation7 + $0x60] sm:$0xff] }
 0x5cc   :  { %v2441_v1 = vsel %vm1812_vm14, %v2423_v28, 0.0  ;;  %v2575_v26 = vmul.f32 %v7487_v37, %v2566_v55  ;;  %v2533_v24 = vmul.f32 %v2526_v39, %v2524_v56  ;;  %v2532_v28 = vmul.f32 %v2526_v39, %v2523_v10  ;;  %v2162_v56 = vld [vmem:[#allocation7 + $0x128] sm:$0xff] }
 0x5cd   :  { %v2450_v5 = vmul.f32 %v7466_v36, %v2441_v1  ;;  %2659 = vmatmul.f32.gmra.mxu2 %v2155_v17  ;;  %v2521_v55 = vsel %vm1785_vm11, %v7457_v58, 0.0  ;;  %v2138_v10 = vld [vmem:[#allocation7 + $0x68] sm:$0xff] }
 0x5ce   :  { %2893 = vmatpush.msra.mxu2 %v2575_v26 }
 0x5cf   :  { %2757 = vmatpush.msra.mxu3 %v2450_v5  ;;  %v2530_v5 = vmul.f32 %v2526_v39, %v2521_v55  ;;  %v2161_v55 = vld [vmem:[#allocation7 + $0x120] sm:$0xff] }
 0x5d1   :  { %2758 = vmatpush.msra.mxu3 %v2449_v11  ;;  %v2142_v11 = vld [vmem:[#allocation7 + $0x88] sm:$0xff] }
 0x5d2   :  { %v2413_v42 = vpop.permute.xlu0 %2412  ;;  %v2468_v12 = vpop.permute.xlu2 %2467 }
 0x5d3   :  { %v2415_v47 = vpop.permute.xlu1 %2414  ;;  %2759 = vmatpush.msra.mxu3 %v2448_v45  ;;  %v2436_v30 = vsel %vm1812_vm14, %v2413_v42, 0.0  ;;  %v2484_v42 = vsel %vm1794_vm12, %v2468_v12, 0.0  ;;  %v2167_v12 = vld [vmem:[#allocation7 + $0x150] sm:$0xff] }
 0x5d4   :  { %v2437_v44 = vsel %vm1812_vm14, %v2415_v47, 0.0  ;;  %v2445_v60 = vmul.f32 %v7466_v36, %v2436_v30 }
 0x5d5   :  { %v2446_v9 = vmul.f32 %v7466_v36, %v2437_v44  ;;  %2662 = vmatmul.f32.gmra.mxu2 %v2160_v49  ;;  %2760 = vmatpush.msra.mxu3 %v2447_v57  ;;  %v2408_v36 = vmul.f32 %v2403_v63, %v7239_v32  ;;  %v2175_v32 = vld [vmem:[#allocation7 + $0x190] sm:$0xff]  ;;  %v2485_v44 = vperm.slane %v7378_v43, 6 }
 0x5d6   :  { %v2131_v49 = vld [vmem:[#allocation7 + $0x30] sm:$0xff] }
 0x5d7   :  { %2761 = vmatpush.msra.mxu3 %v2446_v9 }
 0x5d9   :  { %2762 = vmatpush.msra.mxu3 %v2445_v60 }
 0x5da   :  { %v7509_v19 = vpop.permute.xlu0 %2498  ;;  %v2538_v58 = vpop.permute.xlu2 %2537 }
 0x5db   :  { %v2503_v61 = vpop.permute.xlu1 %2502  ;;  %2763 = vmatpush.msra.mxu3 %v2411_v23  ;;  %v2520_v29 = vsel %vm1785_vm11, %v7509_v19, 0.0  ;;  %v2493_v23 = vmul.f32 %v2485_v44, %v2484_v42  ;;  %v2560_v19 = vsel %vm1776_vm10, %v2538_v58, 0.0  ;;  %v2163_v42 = vld [vmem:[#allocation7 + $0x130] sm:$0xff] }
 0x5dc   :  { %v2522_v17 = vsel %vm1785_vm11, %v2503_v61, 0.0  ;;  %v2529_v54 = vmul.f32 %v2526_v39, %v2520_v29  ;;  %v2153_v29 = vld [vmem:[#allocation7 + $0xe0] sm:$0xff] }
 0x5dd   :  { %2665 = vmatmul.f32.gmra.mxu2 %v2165_v35  ;;  %2764 = vmatpush.msra.mxu3 %v2410_v38  ;;  %v2531_v26 = vmul.f32 %v2526_v39, %v2522_v17  ;;  %v2147_v38 = vld [vmem:[#allocation7 + $0xb0] sm:$0xff]  ;;  %v2172_v17 = vld [vmem:[#allocation7 + $0x178] sm:$0xff] }
 0x5df   :  { %2765 = vmatpush.msra.mxu3 %v2409_v13  ;;  %v2481_v13 = vsel %vm1794_vm12, %v7484_v2, 0.0 }
 0x5e1   :  { %2766 = vmatpush.msra.mxu3 %v2408_v36  ;;  %v2569_v36 = vmul.f32 %v7487_v37, %v2560_v19  ;;  %v2191_v19 = vld [vmem:[#allocation7 + $0x210] sm:$0xff] }
 0x5e2   :  { %v2495_v3 = vpop.permute.xlu0 %2494 }
 0x5e3   :  { %v2497_v22 = vpop.permute.xlu1 %2496  ;;  %2767 = vmatpush.msra.mxu3 %v2407_v59  ;;  %v2518_v40 = vsel %vm1785_vm11, %v2495_v3, 0.0  ;;  %v2136_v3 = vld [vmem:[#allocation7 + $0x58] sm:$0xff] }
 0x5e4   :  { %v2519_v7 = vsel %vm1785_vm11, %v2497_v22, 0.0  ;;  %v2527_v30 = vmul.f32 %v2526_v39, %v2518_v40  ;;  %v2187_v40 = vld [vmem:[#allocation7 + $0x1f0] sm:$0xff] }
 0x5e5   :  { %2668 = vmatmul.f32.gmra.mxu2 %v2170_v34  ;;  %2768 = vmatpush.msra.mxu3 %v2406_v62  ;;  %v2528_v45 = vmul.f32 %v2526_v39, %v2519_v7  ;;  %v2456_v34 = vpop.permute.xlu2 %2455  ;;  %v2490_v62 = vmul.f32 %v2485_v44, %v2481_v13 }
 0x5e7   :  { %2769 = vmatpush.msra.mxu3 %v2405_v31 }
 0x5e9   :  { %2770 = vmatpush.msra.mxu3 %v2404_v15 }
 0x5ea   :  { %v2546_v20 = vpop.permute.xlu0 %2545  ;;  %2771 = vmatmul.f32.vlgmr.msra.gmra.mxu3 %v2127_v27 }
 0x5eb   :  { %v2548_v14 = vpop.permute.xlu1 %2547  ;;  %v2564_v50 = vsel %vm1776_vm10, %v2546_v20, 0.0  ;;  %v2478_v20 = vsel %vm1794_vm12, %v2456_v34, 0.0  ;;  %v2129_v34 = vld [vmem:[#allocation7 + $0x20] sm:$0xff] }
 0x5ec   :  { %v2565_v6 = vsel %vm1776_vm10, %v2548_v14, 0.0  ;;  %v2573_v33 = vmul.f32 %v7487_v37, %v2564_v50  ;;  %v2152_v14 = vld [vmem:[#allocation7 + $0xd8] sm:$0xff] }
 0x5ed   :  { %v2574_v21 = vmul.f32 %v7487_v37, %v2565_v6  ;;  %2671 = vmatmul.f32.gmra.mxu2 %v2175_v32  ;;  %v2487_v6 = vmul.f32 %v2485_v44, %v2478_v20  ;;  %v2203_v20 = vld [vmem:[#allocation7 + $0x270] sm:$0xff] }
 0x5ef   :  { %2894 = vmatpush.msra.mxu2 %v2574_v21  ;;  %v2141_v21 = vld [vmem:[#allocation7 + $0x80] sm:$0xff] }
 0x5f1   :  { %2895 = vmatpush.msra.mxu2 %v2573_v33 }
 0x5f2   :  { %v2464_v53 = vpop.permute.xlu0 %2463  ;;  %2774 = vmatmul.f32.gmra.mxu3 %v2132_v16  ;;  %v2128_v16 = vld [vmem:[#allocation7 + $0x18] sm:$0xff] }
 0x5f3   :  { %v2509_v18 = vpop.permute.xlu1 %2508  ;;  %2896 = vmatpush.msra.mxu2 %v2572_v25  ;;  %v2482_v35 = vsel %vm1794_vm12, %v2464_v53, 0.0 }
 0x5f4   :  { %v2525_v4 = vsel %vm1785_vm11, %v2509_v18, 0.0  ;;  %v2491_v59 = vmul.f32 %v2485_v44, %v2482_v35  ;;  %v2146_v18 = vld [vmem:[#allocation7 + $0xa8] sm:$0xff] }
 0x5f5   :  { %2674 = vmatmul.f32.gmra.mxu2 %v2180_v52  ;;  %v2534_v8 = vmul.f32 %v2526_v39, %v2525_v4  ;;  %v2157_v52 = vld [vmem:[#allocation7 + $0x100] sm:$0xff]  ;;  %v2178_v35 = vld [vmem:[#allocation7 + $0x1a8] sm:$0xff] }
 0x5f6   :  { %v2133_v39 = vld [vmem:[#allocation7 + $0x40] sm:$0xff] }
 0x5f7   :  { %2820 = vmatpush.msrb.mxu1 %v2534_v8  ;;  %v2151_v8 = vld [vmem:[#allocation7 + $0xd0] sm:$0xff] }
 0x5f9   :  { %2821 = vmatpush.msrb.mxu1 %v2533_v24  ;;  %v2156_v24 = vld [vmem:[#allocation7 + $0xf8] sm:$0xff] }
 0x5fa   :  { %2777 = vmatmul.f32.gmra.mxu3 %v2137_v51  ;;  %v2143_v51 = vld [vmem:[#allocation7 + $0x90] sm:$0xff] }
 0x5fb   :  { %v2540_v48 = vpop.permute.xlu0 %2539  ;;  %v2466_v1 = vpop.permute.xlu1 %2465  ;;  %2822 = vmatpush.msrb.mxu1 %v2532_v28 }
 0x5fc   :  { %v2561_v9 = vsel %vm1776_vm10, %v2540_v48, 0.0  ;;  %v2483_v46 = vsel %vm1794_vm12, %v2466_v1, 0.0  ;;  %v2177_v48 = vld [vmem:[#allocation7 + $0x1a0] sm:$0xff] }
 0x5fd   :  { %2706 = vmatmul.f32.vlgmr.msrb.gmra.mxu2 %v2126_v41  ;;  %2823 = vmatpush.msrb.mxu1 %v2531_v26  ;;  %v2570_v61 = vmul.f32 %v7487_v37, %v2561_v9  ;;  %v2492_v43 = vmul.f32 %v2485_v44, %v2483_v46  ;;  %v2148_v41 = vld [vmem:[#allocation7 + $0xb8] sm:$0xff]  ;;  %v2166_v26 = vld [vmem:[#allocation7 + $0x148] sm:$0xff] }
 0x5fe   :  { %v2186_v46 = vld [vmem:[#allocation7 + $0x1e8] sm:$0xff] }
 0x5ff   :  { %2824 = vmatpush.msrb.mxu1 %v2530_v5  ;;  %v2182_v5 = vld [vmem:[#allocation7 + $0x1c8] sm:$0xff] }
 0x601   :  { %2825 = vmatpush.msrb.mxu1 %v2529_v54  ;;  %v2171_v54 = vld [vmem:[#allocation7 + $0x170] sm:$0xff] }
 0x602   :  { %2780 = vmatmul.f32.gmra.mxu3 %v2142_v11  ;;  %v2158_v11 = vld [vmem:[#allocation7 + $0x108] sm:$0xff] }
 0x603   :  { %v2458_v57 = vpop.permute.xlu0 %2457  ;;  %v2542_v47 = vpop.permute.xlu1 %2541  ;;  %2826 = vmatpush.msrb.mxu1 %v2528_v45  ;;  %v2176_v45 = vld [vmem:[#allocation7 + $0x198] sm:$0xff] }
 0x604   :  { %v2562_v60 = vsel %vm1776_vm10, %v2542_v47, 0.0  ;;  %v2479_v31 = vsel %vm1794_vm12, %v2458_v57, 0.0  ;;  %v2181_v47 = vld [vmem:[#allocation7 + $0x1c0] sm:$0xff] }
 0x605   :  { %v2571_v63 = vmul.f32 %v7487_v37, %v2562_v60  ;;  %2709 = vmatmul.f32.gmra.mxu2 %v2131_v49  ;;  %2827 = vmatpush.msrb.mxu1 %v2527_v30  ;;  %v2488_v32 = vmul.f32 %v2485_v44, %v2479_v31  ;;  %v2192_v49 = vld [vmem:[#allocation7 + $0x218] sm:$0xff]  ;;  %v2173_v60 = vld [vmem:[#allocation7 + $0x180] sm:$0xff]  ;;  %v2134_v31 = vld [vmem:[#allocation7 + $0x48] sm:$0xff] }
 0x606   :  { %v2168_v30 = vld [vmem:[#allocation7 + $0x158] sm:$0xff] }
 0x607   :  { %2828 = vmatpush.msrb.mxu1 %v2493_v23  ;;  %2897 = vmatpush.msra.mxu2 %v2571_v63  ;;  %v2202_v63 = vld [vmem:[#allocation7 + $0x268] sm:$0xff] }
 0x609   :  { %2829 = vmatpush.msrb.mxu1 %v2492_v43  ;;  %2898 = vmatpush.msra.mxu2 %v2570_v61  ;;  %v2196_v43 = vld [vmem:[#allocation7 + $0x238] sm:$0xff] }
 0x60a   :  { %2783 = vmatmul.f32.gmra.mxu3 %v2147_v38  ;;  %v2183_v38 = vld [vmem:[#allocation7 + $0x1d0] sm:$0xff] }
 0x60b   :  { %v2460_v22 = vpop.permute.xlu1 %2459  ;;  %2830 = vmatpush.msrb.mxu1 %v2491_v59  ;;  %2899 = vmatpush.msra.mxu2 %v2569_v36  ;;  %v2454_v27 = vpop.permute.xlu0 %2453  ;;  %v2201_v36 = vld [vmem:[#allocation7 + $0x260] sm:$0xff]  ;;  %v2188_v59 = vld [vmem:[#allocation7 + $0x1f8] sm:$0xff] }
 0x60c   :  { %v2480_v15 = vsel %vm1794_vm12, %v2460_v22, 0.0  ;;  %v2477_v50 = vsel %vm1794_vm12, %v2454_v27, 0.0  ;;  %v2193_v22 = vld [vmem:[#allocation7 + $0x220] sm:$0xff] }
 0x60d   :  { %2712 = vmatmul.f32.gmra.mxu2 %v2136_v3  ;;  %2831 = vmatpush.msrb.mxu1 %v2490_v62  ;;  %v2489_v2 = vmul.f32 %v2485_v44, %v2480_v15  ;;  %v2486_v33 = vmul.f32 %v2485_v44, %v2477_v50  ;;  %v2197_v44 = vld [vmem:[#allocation7 + $0x240] sm:$0xff]  ;;  %v2198_v15 = vld [vmem:[#allocation7 + $0x248] sm:$0xff] }
 0x60f   :  { %2832 = vmatpush.msrb.mxu1 %v2489_v2  ;;  %v2139_v2 = vld [vmem:[#allocation7 + $0x70] sm:$0xff] }
 0x611   :  { %2833 = vmatpush.msrb.mxu1 %v2488_v32 }
 0x612   :  { %2786 = vmatmul.f32.gmra.mxu3 %v2152_v14  ;;  %v2144_v14 = vld [vmem:[#allocation7 + $0x98] sm:$0xff] }
 0x613   :  { %v2536_v0 = vpop.permute.xlu1 %2535  ;;  %2834 = vmatpush.msrb.mxu1 %v2487_v6  ;;  %v2149_v6 = vld [vmem:[#allocation7 + $0xc0] sm:$0xff] }
 0x614   :  { %v2559_v25 = vsel %vm1776_vm10, %v2536_v0, 0.0  ;;  %v2154_v0 = vld [vmem:[#allocation7 + $0xe8] sm:$0xff] }
 0x615   :  { %v2568_v53 = vmul.f32 %v7487_v37, %v2559_v25  ;;  %2715 = vmatmul.f32.gmra.mxu2 %v2141_v21  ;;  %2835 = vmatpush.msrb.mxu1 %v2486_v33 }
 0x616   :  { %2836 = vmatmul.f32.vlgmr.msrb.gmra.mxu1 %v2128_v16  ;;  %v2159_v16 = vld [vmem:[#allocation7 + $0x110] sm:$0xff] }
 0x617   :  { %2900 = vmatpush.msra.mxu2 %v2568_v53  ;;  %v2164_v53 = vld [vmem:[#allocation7 + $0x138] sm:$0xff] }
 0x61a   :  { %2789 = vmatmul.f32.gmra.mxu3 %v2157_v52 }
 0x61d   :  { %2718 = vmatmul.f32.gmra.mxu2 %v2146_v18 }
 0x61e   :  { %2839 = vmatmul.f32.gmra.mxu1 %v2133_v39  ;;  %v2169_v39 = vld [vmem:[#allocation7 + $0x160] sm:$0xff] }
 0x620   :  { %v7556_v4 = vpop.f32.mrf.mxu2 }
 0x622   :  { %2792 = vmatmul.f32.gmra.mxu3 %v2162_v56 }
 0x625   :  { %2721 = vmatmul.f32.gmra.mxu2 %v2151_v8  ;;  %v7595_v52 = vpop.f32.mrf.mxu3 }
 0x626   :  { %2842 = vmatmul.f32.gmra.mxu1 %v2138_v10  ;;  %v2174_v10 = vld [vmem:[#allocation7 + $0x188] sm:$0xff] }
 0x628   :  { %v7558_v37 = vpop.f32.mrf.mxu2 }
 0x62a   :  { %2795 = vmatmul.f32.gmra.mxu3 %v2167_v12 }
 0x62d   :  { %2724 = vmatmul.f32.gmra.mxu2 %v2156_v24  ;;  %v7601_v56 = vpop.f32.mrf.mxu3 }
 0x62e   :  { %2845 = vmatmul.f32.gmra.mxu1 %v2143_v51  ;;  %v2179_v51 = vld [vmem:[#allocation7 + $0x1b0] sm:$0xff] }
 0x630   :  { %v7560_v28 = vpop.f32.mrf.mxu2 }
 0x632   :  { %2798 = vmatmul.f32.gmra.mxu3 %v2172_v17 }
 0x635   :  { %2727 = vmatmul.f32.gmra.mxu2 %v2161_v55  ;;  %v7606_v12 = vpop.f32.mrf.mxu3 }
 0x636   :  { %2848 = vmatmul.f32.gmra.mxu1 %v2148_v41  ;;  %v2184_v41 = vld [vmem:[#allocation7 + $0x1d8] sm:$0xff] }
 0x638   :  { %v7562_v1 = vpop.f32.mrf.mxu2 }
 0x63a   :  { %2801 = vmatmul.f32.gmra.mxu3 %v2177_v48 }
 0x63d   :  { %2730 = vmatmul.f32.gmra.mxu2 %v2166_v26  ;;  %v7613_v55 = vpop.f32.mrf.mxu3  ;;  %v2189_v26 = vld [vmem:[#allocation7 + $0x200] sm:$0xff] }
 0x63e   :  { %2851 = vmatmul.f32.gmra.mxu1 %v2153_v29 }
 0x640   :  { %v7564_v7 = vpop.f32.mrf.mxu2 }
 0x642   :  { %2804 = vmatmul.f32.gmra.mxu3 %v2182_v5 }
 0x645   :  { %2733 = vmatmul.f32.gmra.mxu2 %v2171_v54 }
 0x646   :  { %2854 = vmatmul.f32.gmra.mxu1 %v2158_v11  ;;  %v2194_v11 = vld [vmem:[#allocation7 + $0x228] sm:$0xff] }
 0x648   :  { %v7566_v58 = vpop.f32.mrf.mxu2 }
 0x64a   :  { %2807 = vmatmul.f32.gmra.mxu3 %v2187_v40 }
 0x64d   :  { %2736 = vmatmul.f32.gmra.mxu2 %v2176_v45 }
 0x64e   :  { %2857 = vmatmul.f32.gmra.mxu1 %v2163_v42 }
 0x650   :  { %v7568_v57 = vpop.f32.mrf.mxu2 }
 0x652   :  { %2810 = vmatmul.f32.gmra.mxu3 %v2192_v49  ;;  %v2199_v49 = vld [vmem:[#allocation7 + $0x250] sm:$0xff] }
 0x655   :  { %2739 = vmatmul.f32.gmra.mxu2 %v2181_v47 }
 0x656   :  { %2860 = vmatmul.f32.gmra.mxu1 %v2168_v30 }
 0x658   :  { %v7570_v9 = vpop.f32.mrf.mxu2 }
 0x65a   :  { %2813 = vmatmul.f32.gmra.mxu3 %v2197_v44 }
 0x65d   :  { %2742 = vmatmul.f32.gmra.mxu2 %v2186_v46  ;;  %v2204_v46 = vld [vmem:[#allocation7 + $0x278] sm:$0xff] }
 0x65e   :  { %2863 = vmatmul.f32.gmra.mxu1 %v2173_v60 }
 0x660   :  { %v7572_v23 = vpop.f32.mrf.mxu2 }
 0x662   :  { %2816 = vmatmul.f32.gmra.mxu3 %v2202_v63 }
 0x665   :  { %2745 = vmatmul.f32.gmra.mxu2 %v2191_v19 }
 0x666   :  { %2866 = vmatmul.f32.gmra.mxu1 %v2178_v35 }
 0x668   :  { %v7574_v61 = vpop.f32.mrf.mxu2 }
 0x66d   :  { %2748 = vmatmul.f32.gmra.mxu2 %v2196_v43  ;;  %v7618_v29 = vpop.f32.mrf.mxu3 }
 0x66e   :  { %2869 = vmatmul.f32.gmra.mxu1 %v2183_v38 }
 0x670   :  { %v7576_v13 = vpop.f32.mrf.mxu2 }
 0x675   :  { %2751 = vmatmul.f32.gmra.mxu2 %v2201_v36  ;;  %v7626_v40 = vpop.f32.mrf.mxu3 }
 0x676   :  { %2872 = vmatmul.f32.gmra.mxu1 %v2188_v59 }
 0x678   :  { %v7578_v3 = vpop.f32.mrf.mxu2 }
 0x67d   :  { %5614 = vmatmul.msk.f32.vlgmr.msra.gmra.mxu2 %vm2576_vm3, %v2129_v34  ;;  %v7633_v47 = vpop.f32.mrf.mxu3 }
 0x67e   :  { %2875 = vmatmul.f32.gmra.mxu1 %v2193_v22 }
 0x680   :  { %v7581_v62 = vpop.f32.mrf.mxu2 }
 0x685   :  { %5615 = vmatmul.msk.f32.gmra.mxu2 %vm2576_vm3, %v2134_v31  ;;  %v7642_v63 = vpop.f32.mrf.mxu3 }
 0x686   :  { %2878 = vmatmul.f32.gmra.mxu1 %v2198_v15 }
 0x688   :  { %v7584_v27 = vpop.f32.mrf.mxu2 }
 0x68d   :  { %5616 = vmatmul.msk.f32.gmra.mxu2 %vm2576_vm3, %v2139_v2  ;;  %v2784_v43 = vpop.f32.mrf.mxu3 }
 0x68e   :  { %2881 = vmatmul.f32.gmra.mxu1 %v2203_v20 }
 0x690   :  { %v7587_v32 = vpop.f32.mrf.mxu2 }
 0x693   :  { %v7621_v5 = vpop.f32.mrf.mxu1 }
 0x695   :  { %5617 = vmatmul.msk.f32.gmra.mxu2 %vm2576_vm3, %v2144_v14  ;;  %v2787_v59 = vpop.f32.mrf.mxu3 }
 0x698   :  { %v7590_v50 = vpop.f32.mrf.mxu2 }
 0x69b   :  { %v7628_v45 = vpop.f32.mrf.mxu1 }
 0x69d   :  { %5618 = vmatmul.msk.f32.gmra.mxu2 %vm2576_vm3, %v2149_v6  ;;  %v2790_v31 = vpop.f32.mrf.mxu3 }
 0x6a0   :  { %v2719_v21 = vpop.f32.mrf.mxu2 }
 0x6a1   :  { %v2720_v2 = vadd.f32 %v2719_v21, %v7564_v7 }
 0x6a3   :  { %v7637_v44 = vpop.f32.mrf.mxu1  ;;  %v2785_v14 = vadd.f32 %v2784_v43, %v2720_v2 }
 0x6a5   :  { %5619 = vmatmul.msk.f32.gmra.mxu2 %vm2576_vm3, %v2154_v0 }
 0x6a8   :  { %v2722_v33 = vpop.f32.mrf.mxu2 }
 0x6ab   :  { %v7644_v19 = vpop.f32.mrf.mxu1 }
 0x6ad   :  { %5620 = vmatmul.msk.f32.gmra.mxu2 %vm2576_vm3, %v2159_v16  ;;  %v2723_v16 = vadd.f32 %v2722_v33, %v7566_v58 }
 0x6b0   :  { %v2725_v25 = vpop.f32.mrf.mxu2 }
 0x6b3   :  { %v2849_v38 = vpop.f32.mrf.mxu1 }
 0x6b4   :  { %v2850_v6 = vadd.f32 %v2849_v38, %v2785_v14 }
 0x6b5   :  { %5621 = vmatmul.msk.f32.gmra.mxu2 %vm2576_vm3, %v2164_v53 }
 0x6b8   :  { %v7598_v18 = vpop.f32.mrf.mxu2 }
 0x6b9   :  { %v2729_v58 = vadd.f32 %v7598_v18, %v7570_v9 }
 0x6bb   :  { %v2852_v34 = vpop.f32.mrf.mxu1 }
 0x6bd   :  { %5622 = vmatmul.msk.f32.gmra.mxu2 %vm2576_vm3, %v2169_v39  ;;  %v2793_v39 = vpop.f32.mrf.mxu3 }
 0x6be   :  { %v2794_v2 = vadd.f32 %v2793_v39, %v2729_v58 }
 0x6c0   :  { %v7603_v8 = vpop.f32.mrf.mxu2 }
 0x6c3   :  { %v2855_v20 = vpop.f32.mrf.mxu1 }
 0x6c5   :  { %5623 = vmatmul.msk.f32.gmra.mxu2 %vm2576_vm3, %v2174_v10  ;;  %v2796_v7 = vpop.f32.mrf.mxu3 }
 0x6c8   :  { %v7608_v24 = vpop.f32.mrf.mxu2 }
 0x6c9   :  { %v2735_v9 = vadd.f32 %v7608_v24, %v7574_v61 }
 0x6cb   :  { %v2858_v10 = vpop.f32.mrf.mxu1 }
 0x6cd   :  { %5624 = vmatmul.msk.f32.gmra.mxu2 %vm2576_vm3, %v2179_v51  ;;  %v2788_v51 = vadd.f32 %v2787_v59, %v2723_v16  ;;  %v2799_v59 = vpop.f32.mrf.mxu3 }
 0x6ce   :  { %v2800_v39 = vadd.f32 %v2799_v59, %v2735_v9 }
 0x6d0   :  { %v7611_v17 = vpop.f32.mrf.mxu2 }
 0x6d5   :  { %5625 = vmatmul.msk.f32.gmra.mxu2 %vm2576_vm3, %v2184_v41  ;;  %v2853_v41 = vadd.f32 %v2852_v34, %v2788_v51  ;;  %v2859_v34 = vadd.f32 %v2858_v10, %v2794_v2 }
 0x6d8   :  { %v7616_v48 = vpop.f32.mrf.mxu2 }
 0x6d9   :  { %v2741_v61 = vadd.f32 %v7616_v48, %v7578_v3 }
 0x6dd   :  { %5626 = vmatmul.msk.f32.gmra.mxu2 %vm2576_vm3, %v2189_v26 }
 0x6e0   :  { %v7623_v54 = vpop.f32.mrf.mxu2 }
 0x6e5   :  { %5627 = vmatmul.msk.f32.gmra.mxu2 %vm2576_vm3, %v2194_v11  ;;  %v2726_v11 = vadd.f32 %v2725_v25, %v7568_v57  ;;  %v2732_v57 = vadd.f32 %v7603_v8, %v7572_v23  ;;  %v2738_v23 = vadd.f32 %v7611_v17, %v7576_v13  ;;  %v2744_v13 = vadd.f32 %v7623_v54, %v7595_v52 }
 0x6e7   :  { %v2791_v21 = vadd.f32 %v2790_v31, %v2726_v11  ;;  %v2797_v31 = vadd.f32 %v2796_v7, %v2732_v57 }
 0x6e8   :  { %v7630_v42 = vpop.f32.mrf.mxu2 }
 0x6e9   :  { %v2856_v43 = vadd.f32 %v2855_v20, %v2791_v21  ;;  %v2747_v3 = vadd.f32 %v7630_v42, %v7601_v56 }
 0x6ed   :  { %5628 = vmatmul.msk.f32.gmra.mxu2 %vm2576_vm3, %v2199_v49 }
 0x6f0   :  { %v7635_v30 = vpop.f32.mrf.mxu2 }
 0x6f1   :  { %v2750_v52 = vadd.f32 %v7635_v30, %v7606_v12  ;;  %v7683_v12 = vpop.permute.xlu1 %3124  ;;  %v2708_v30 = vadd.f32 %v7581_v62, %v7556_v4 }
 0x6f5   :  { %5629 = vmatmul.msk.f32.gmra.mxu2 %vm2576_vm3, %v2204_v46  ;;  %v2861_v46 = vpop.f32.mrf.mxu1 }
 0x6f6   :  { %v2862_v20 = vadd.f32 %v2861_v46, %v2797_v31 }
 0x6f8   :  { %v7640_v60 = vpop.f32.mrf.mxu2 }
 0x6f9   :  { %v2753_v56 = vadd.f32 %v7640_v60, %v7613_v55  ;;  %v2773_v55 = vadd.f32 %v7618_v29, %v2708_v30  ;;  %v2230_v30 = vld [vmem:[#allocation13 + $0x78] sm:$0xff] }
 0x6fa   :  { %3150 = vmatpush.msrb.mxu3 %v2230_v30 }
 0x6fb   :  { %v2838_v60 = vadd.f32 %v7621_v5, %v2773_v55 }
 0x6fd   :  { %v2864_v14 = vpop.f32.mrf.mxu1 }
 0x6fe   :  { %v2865_v10 = vadd.f32 %v2864_v14, %v2800_v39 }
 0x700   :  { %v7646_v35 = vpop.f32.mrf.mxu2 }
 0x708   :  { %v7648_v36 = vpop.f32.mrf.mxu2 }
 0x710   :  { %v7650_v22 = vpop.f32.mrf.mxu2 }
 0x718   :  { %v7652_v15 = vpop.f32.mrf.mxu2 }
 0x720   :  { %v2914_v0 = vpop.f32.mrf.mxu2 }
 0x721   :  { %v2915_v53 = vadd.f32 %v2914_v0, %v2850_v6  ;;  %v2802_v0 = vpop.f32.mrf.mxu3 }
 0x722   :  { %v2803_v11 = vadd.f32 %v2802_v0, %v2738_v23 }
 0x723   :  { %2954 = vrot.lane.b32.xlu1 %v2915_v53, %s6221_s4  ;;  %v2867_v53 = vpop.f32.mrf.mxu1 }
 0x728   :  { %v2917_v26 = vpop.f32.mrf.mxu2 }
 0x729   :  { %v2918_v49 = vadd.f32 %v2917_v26, %v2853_v41  ;;  %v2805_v41 = vpop.f32.mrf.mxu3 }
 0x72a   :  { %v2806_v46 = vadd.f32 %v2805_v41, %v2741_v61 }
 0x72b   :  { %2956 = vrot.lane.b32.xlu1 %v2918_v49, %s6221_s4  ;;  %v2870_v26 = vpop.f32.mrf.mxu1  ;;  %v2868_v49 = vadd.f32 %v2867_v53, %v2803_v11  ;;  %v2711_v11 = vadd.f32 %v7584_v27, %v7558_v37  ;;  %v2714_v37 = vadd.f32 %v7587_v32, %v7560_v28 }
 0x72d   :  { %v2776_v62 = vadd.f32 %v7626_v40, %v2711_v11  ;;  %v2213_v11 = vld [vmem:[#allocation12 + $0x10] sm:$0xff] }
 0x72f   :  { %v2841_v29 = vadd.f32 %v7628_v45, %v2776_v62  ;;  %v2717_v45 = vadd.f32 %v7590_v50, %v7562_v1  ;;  %v2226_v62 = vld [vmem:[#allocation13 + $0x58] sm:$0xff] }
 0x730   :  { %v2920_v38 = vpop.f32.mrf.mxu2 }
 0x731   :  { %v2921_v33 = vadd.f32 %v2920_v38, %v2856_v43  ;;  %v2808_v21 = vpop.f32.mrf.mxu3  ;;  %v2871_v38 = vadd.f32 %v2870_v26, %v2806_v46  ;;  %v7687_v26 = vpop.permute.xlu0 %3100  ;;  %v2906_v27 = vadd.f32 %v7648_v36, %v2841_v29  ;;  %v2223_v29 = vld [vmem:[#allocation13 + $0x40] sm:$0xff] }
 0x733   :  { %2958 = vrot.lane.b32.xlu1 %v2921_v33, %s6221_s4  ;;  %v2873_v43 = vpop.f32.mrf.mxu1  ;;  %v2809_v33 = vadd.f32 %v2808_v21, %v2744_v13 }
 0x735   :  { %v2874_v59 = vadd.f32 %v2873_v43, %v2809_v33 }
 0x738   :  { %v2923_v6 = vpop.f32.mrf.mxu2 }
 0x739   :  { %v2924_v25 = vadd.f32 %v2923_v6, %v2859_v34  ;;  %v2811_v2 = vpop.f32.mrf.mxu3 }
 0x73a   :  { %v2812_v6 = vadd.f32 %v2811_v2, %v2747_v3  ;;  %v2782_v2 = vadd.f32 %v7642_v63, %v2717_v45  ;;  %v2212_v63 = vld [vmem:[#allocation12 + $0x8] sm:$0xff] }
 0x73b   :  { %2960 = vrot.lane.b32.xlu1 %v2924_v25, %s6221_s4  ;;  %v2876_v34 = vpop.f32.mrf.mxu1 }
 0x73c   :  { %v2877_v57 = vadd.f32 %v2876_v34, %v2812_v6  ;;  %v2209_v6 = vld [vmem:[#allocation10 + $0x10] sm:$0xff] }
 0x740   :  { %v2926_v16 = vpop.f32.mrf.mxu2 }
 0x741   :  { %v2927_v18 = vadd.f32 %v2926_v16, %v2862_v20  ;;  %v2814_v25 = vpop.f32.mrf.mxu3 }
 0x742   :  { %v2815_v0 = vadd.f32 %v2814_v25, %v2750_v52 }
 0x743   :  { %2970 = vrot.lane.b32.xlu2 %v2927_v18, %s6242_s23  ;;  %v2879_v20 = vpop.f32.mrf.mxu1 }
 0x744   :  { %v2880_v16 = vadd.f32 %v2879_v20, %v2815_v0 }
 0x748   :  { %v2929_v51 = vpop.f32.mrf.mxu2 }
 0x749   :  { %v2930_v8 = vadd.f32 %v2929_v51, %v2865_v10  ;;  %v2817_v18 = vpop.f32.mrf.mxu3 }
 0x74a   :  { %v2818_v39 = vadd.f32 %v2817_v18, %v2753_v56 }
 0x74b   :  { %2972 = vrot.lane.b32.xlu2 %v2930_v8, %s6242_s23  ;;  %v2882_v53 = vpop.f32.mrf.mxu1 }
 0x74c   :  { %v2883_v10 = vadd.f32 %v2882_v53, %v2818_v39 }
 0x750   :  { %v2932_v7 = vpop.f32.mrf.mxu2 }
 0x751   :  { %v2933_v24 = vadd.f32 %v2932_v7, %v2868_v49  ;;  %v2903_v49 = vadd.f32 %v7646_v35, %v2838_v60 }
 0x753   :  { %2974 = vrot.lane.b32.xlu2 %v2933_v24, %s6242_s23 }
 0x758   :  { %v2935_v58 = vpop.f32.mrf.mxu2 }
 0x759   :  { %v2936_v17 = vadd.f32 %v2935_v58, %v2871_v38  ;;  %v2779_v38 = vadd.f32 %v7633_v47, %v2714_v37  ;;  %v2222_v37 = vld [vmem:[#allocation13 + $0x38] sm:$0xff] }
 0x75b   :  { %2976 = vrot.lane.b32.xlu2 %v2936_v17, %s6242_s23  ;;  %v2844_v13 = vadd.f32 %v7637_v44, %v2779_v38 }
 0x75d   :  { %v2909_v28 = vadd.f32 %v7650_v22, %v2844_v13  ;;  %v2215_v13 = vld [vmem:[#allocation13] sm:$0xff] }
 0x760   :  { %v2938_v14 = vpop.f32.mrf.mxu2 }
 0x761   :  { %v2939_v48 = vadd.f32 %v2938_v14, %v2874_v59  ;;  %v2847_v59 = vadd.f32 %v7644_v19, %v2782_v2 }
 0x763   :  { %2986 = vrot.lane.b32.xlu0 %v2939_v48, %s6243_s21  ;;  %v2912_v44 = vadd.f32 %v7652_v15, %v2847_v59  ;;  %v2208_v48 = vld [vmem:[#allocation10 + $0x8] sm:$0xff] }
 0x768   :  { %v2941_v31 = vpop.f32.mrf.mxu2 }
 0x769   :  { %v2942_v54 = vadd.f32 %v2941_v31, %v2877_v57  ;;  %v6244_v57 = vmov 128.0  }
 0x76a   :  { %5771 = vrcp.f32 %v6244_v57 }
 0x76b   :  { %2988 = vrot.lane.b32.xlu0 %v2942_v54, %s6243_s21 }
 0x770   :  { %v2944_v9 = vpop.f32.mrf.mxu2  ;;  %v5772_v19 = vpop.eup %5771 }
 0x771   :  { %v2945_v42 = vadd.f32 %v2944_v9, %v2880_v16  ;;  %v3020_v25 = vmul.f32 128.0, %v5772_v19  ;;  %vm3024_vm10 = vweird.f32 %v5772_v19 }
 0x773   :  { %2990 = vrot.lane.b32.xlu0 %v2945_v42, %s6243_s21  ;;  %v3021_v15 = vsub.f32 1.0, %v3020_v25 }
 0x775   :  { %v3022_v31 = vmul.f32 %v5772_v19, %v3021_v15 }
 0x777   :  { %v3023_v52 = vadd.f32 %v5772_v19, %v3022_v31 }
 0x778   :  { %v2947_v51 = vpop.f32.mrf.mxu2 }
 0x779   :  { %v2948_v23 = vadd.f32 %v2947_v51, %v2883_v10  ;;  %v7719_v54 = vsel %vm3024_vm10, %v5772_v19, %v3023_v52 }
 0x77b   :  { %2992 = vrot.lane.b32.xlu0 %v2948_v23, %s6243_s21 }
 0x795   :  { %v2955_v8 = vpop.permute.xlu1 %2954 }
 0x796   :  { %v2998_v7 = vsel %vm1837_vm15, %v2903_v49, %v2955_v8  ;;  %v2214_v49 = vld [vmem:[#allocation12 + $0x18] sm:$0xff] }
 0x79d   :  { %v2971_v41 = vpop.permute.xlu2 %2970  ;;  %v2957_v24 = vpop.permute.xlu1 %2956 }
 0x79e   :  { %v3002_v61 = vsel %vm2576_vm3, %v2998_v7, %v2971_v41  ;;  %v2999_v5 = vsel %vm1837_vm15, %v2906_v27, %v2957_v24  ;;  %v2210_v7 = vld [vmem:[#allocation10 + $0x18] sm:$0xff]  ;;  %v2228_v24 = vld [vmem:[#allocation13 + $0x68] sm:$0xff]  ;;  %v2221_v27 = vld [vmem:[#allocation13 + $0x30] sm:$0xff] }
 0x7a5   :  { %v2973_v21 = vpop.permute.xlu2 %2972  ;;  %v2959_v58 = vpop.permute.xlu1 %2958 }
 0x7a6   :  { %v3003_v35 = vsel %vm2576_vm3, %v2999_v5, %v2973_v21  ;;  %v3000_v32 = vsel %vm1837_vm15, %v2909_v28, %v2959_v58  ;;  %v2225_v21 = vld [vmem:[#allocation13 + $0x50] sm:$0xff]  ;;  %v2220_v5 = vld [vmem:[#allocation13 + $0x28] sm:$0xff] }
 0x7a7   :  { %v2216_v58 = vld [vmem:[#allocation13 + $0x8] sm:$0xff] }
 0x7ad   :  { %v2975_v17 = vpop.permute.xlu2 %2974  ;;  %v2961_v34 = vpop.permute.xlu1 %2960 }
 0x7ae   :  { %v3004_v36 = vsel %vm2576_vm3, %v3000_v32, %v2975_v17  ;;  %v3001_v1 = vsel %vm1837_vm15, %v2912_v44, %v2961_v34 }
 0x7b5   :  { %v2977_v14 = vpop.permute.xlu2 %2976 }
 0x7b6   :  { %v3005_v50 = vsel %vm2576_vm3, %v3001_v1, %v2977_v14 }
 0x7d5   :  { %v2987_v4 = vpop.permute.xlu0 %2986 }
 0x7d6   :  { %v3007_v46 = vsel %vm3006_vm5, %v3002_v61, %v2987_v4  ;;  %v2229_v61 = vld [vmem:[#allocation13 + $0x70] sm:$0xff]  ;;  %v2227_v4 = vld [vmem:[#allocation13 + $0x60] sm:$0xff] }
 0x7d7   :  { %3011 = vadd.xlane.f32.xlu1 %v3007_v46  ;;  %3151 = vmatpush.msrb.mxu3 %v2229_v61 }
 0x7d9   :  { %3152 = vmatpush.msrb.mxu3 %v2228_v24 }
 0x7db   :  { %3153 = vmatpush.msrb.mxu3 %v2227_v4 }
 0x7dd   :  { %v2989_v43 = vpop.permute.xlu0 %2988  ;;  %3154 = vmatpush.msrb.mxu3 %v2226_v62 }
 0x7de   :  { %v3008_v40 = vsel %vm3006_vm5, %v3003_v35, %v2989_v43  ;;  %v2219_v35 = vld [vmem:[#allocation13 + $0x20] sm:$0xff]  ;;  %v2218_v43 = vld [vmem:[#allocation13 + $0x18] sm:$0xff] }
 0x7df   :  { %3013 = vadd.xlane.f32.xlu2 %v3008_v40  ;;  %3155 = vmatpush.msrb.mxu3 %v2225_v21 }
 0x7e5   :  { %v2991_v33 = vpop.permute.xlu0 %2990 }
 0x7e6   :  { %v3009_v47 = vsel %vm3006_vm5, %v3004_v36, %v2991_v33 }
 0x7e7   :  { %3015 = vadd.xlane.f32.xlu0 %v3009_v47 }
 0x7ed   :  { %v2993_v22 = vpop.permute.xlu0 %2992 }
 0x7ee   :  { %v3010_v3 = vsel %vm3006_vm5, %v3005_v50, %v2993_v22 }
 0x7ef   :  { %3017 = vadd.xlane.f32.xlu1 %v3010_v3 }
 0x7f7   :  { %3105 = vperm.xlu2 %5746, %v2208_v48  }
 0x7fb   :  { %3129 = vperm.xlu0 %5744, %v2212_v63  }
 0x808   :  { %3110 = vperm.xlu1 %5745, %v2209_v6  }
 0x84a   :  { %v3012_v20 = vpop.xlane.xlu1 %3011 }
 0x84b   :  { %v3026_v0 = vmul.f32 %v7719_v54, %v3012_v20 }
 0x84d   :  { %v7722_v16 = vsub.f32 %v3007_v46, %v3026_v0  ;;  %v2224_v46 = vld [vmem:[#allocation13 + $0x48] sm:$0xff] }
 0x84e   :  { %3156 = vmatpush.msrb.mxu3 %v2224_v46 }
 0x84f   :  { %v3034_v9 = vmul.f32 %v7722_v16, %v7722_v16 }
 0x850   :  { %3157 = vmatpush.msrb.mxu3 %v2223_v29 }
 0x851   :  { %3038 = vadd.xlane.f32.xlu2 %v3034_v9 }
 0x852   :  { %v3014_v56 = vpop.xlane.xlu2 %3013  ;;  %3158 = vmatpush.msrb.mxu3 %v2222_v37 }
 0x853   :  { %v3027_v42 = vmul.f32 %v7719_v54, %v3014_v56 }
 0x854   :  { %3159 = vmatpush.msrb.mxu3 %v2221_v27 }
 0x855   :  { %v7727_v18 = vsub.f32 %v3008_v40, %v3027_v42  ;;  %v2217_v40 = vld [vmem:[#allocation13 + $0x10] sm:$0xff] }
 0x856   :  { %3160 = vmatpush.msrb.mxu3 %v2220_v5 }
 0x857   :  { %v3035_v53 = vmul.f32 %v7727_v18, %v7727_v18 }
 0x858   :  { %3161 = vmatpush.msrb.mxu3 %v2219_v35 }
 0x859   :  { %3040 = vadd.xlane.f32.xlu0 %v3035_v53 }
 0x85a   :  { %v3016_v39 = vpop.xlane.xlu0 %3015  ;;  %v3106_v38 = vpop.permute.xlu2 %3105  ;;  %3162 = vmatpush.msrb.mxu3 %v2218_v43 }
 0x85b   :  { %v3028_v10 = vmul.f32 %v7719_v54, %v3016_v39 }
 0x85c   :  { %3163 = vmatpush.msrb.mxu3 %v2217_v40 }
 0x85d   :  { %v7732_v51 = vsub.f32 %v3009_v47, %v3028_v10 }
 0x85e   :  { %3164 = vmatpush.msrb.mxu3 %v2216_v58 }
 0x85f   :  { %v3036_v23 = vmul.f32 %v7732_v51, %v7732_v51 }
 0x860   :  { %3165 = vmatpush.msrb.mxu3 %v2215_v13 }
 0x861   :  { %3042 = vadd.xlane.f32.xlu1 %v3036_v23 }
 0x862   :  { %v3018_v8 = vpop.xlane.xlu1 %3017 }
 0x863   :  { %v3029_v41 = vmul.f32 %v7719_v54, %v3018_v8 }
 0x865   :  { %v7737_v55 = vsub.f32 %v3010_v3, %v3029_v41 }
 0x867   :  { %v3037_v60 = vmul.f32 %v7737_v55, %v7737_v55 }
 0x869   :  { %3044 = vadd.xlane.f32.xlu2 %v3037_v60 }
 0x86d   :  { %3134 = vperm.xlu0 %5744, %v2213_v11   ;;  %v3130_v17 = vpop.permute.xlu0 %3129 }
 0x87a   :  { %3139 = vperm.xlu1 %5745, %v2214_v49   ;;  %v3111_v36 = vpop.permute.xlu1 %3110 }
 0x881   :  { %3115 = vperm.xlu2 %5746, %v2210_v7  }
 0x8c4   :  { %v3039_v45 = vpop.xlane.xlu2 %3038 }
 0x8c5   :  { %v3046_v28 = vmul.f32 %v3039_v45, %v7719_v54 }
 0x8c7   :  { %v3050_v32 = vadd.f32 1e-05, %v3046_v28 }
 0x8c9   :  { %5773 = vrsqrt.f32 %v3050_v32  ;;  %vm3060_vm12 = vweird.f32 %v3050_v32 }
 0x8cc   :  { %v3041_v33 = vpop.xlane.xlu0 %3040 }
 0x8cd   :  { %v3047_v2 = vmul.f32 %v3041_v33, %v7719_v54 }
 0x8cf   :  { %v5774_v47 = vpop.eup %5773  ;;  %v3051_v59 = vadd.f32 1e-05, %v3047_v2 }
 0x8d0   :  { %v3055_v34 = vmul.f32 %v5774_v47, %v3050_v32  ;;  %vm3061_vm11 = vweird.f32 %v5774_v47 }
 0x8d1   :  { %5775 = vrsqrt.f32 %v3051_v59  ;;  %vm3062_vm0 = vmor %vm3060_vm12, %vm3061_vm11  ;;  %vm3070_vm6 = vweird.f32 %v3051_v59 }
 0x8d2   :  { %v3056_v44 = vmul.f32 %v5774_v47, %v3055_v34 }
 0x8d4   :  { %v3057_v14 = vmul.f32 0.5, %v3056_v44  ;;  %v3043_v1 = vpop.xlane.xlu1 %3042 }
 0x8d5   :  { %v3048_v50 = vmul.f32 %v3043_v1, %v7719_v54 }
 0x8d6   :  { %v3058_v22 = vsub.f32 1.5, %v3057_v14 }
 0x8d7   :  { %v5776_v3 = vpop.eup %5775  ;;  %v3052_v48 = vadd.f32 1e-05, %v3048_v50 }
 0x8d8   :  { %v3059_v63 = vmul.f32 %v5774_v47, %v3058_v22  ;;  %v3065_v6 = vmul.f32 %v5776_v3, %v3051_v59  ;;  %vm3071_vm9 = vweird.f32 %v5776_v3  ;;  %v7811_v59 = vld [vmem:[#allocation16] sm:$0xff] }
 0x8d9   :  { %5777 = vrsqrt.f32 %v3052_v48  ;;  %vm3072_vm8 = vmor %vm3070_vm6, %vm3071_vm9  ;;  %vm3080_vm2 = vweird.f32 %v3052_v48  ;;  %v3548_v14 = vperm.slane %v7811_v59, 3 }
 0x8da   :  { %v3063_v57 = vsel %vm3062_vm0, %v5774_v47, %v3059_v63  ;;  %v3066_v19 = vmul.f32 %v5776_v3, %v3065_v6  ;;  %vm8811_vm0 = vcmask 130048  }
 0x8db   :  { %v3094_v25 = vmul.f32 %v3063_v57, %v7722_v16  ;;  %v3527_v57 = vperm.slane %v7811_v59, 2  ;;  %vm8812_vm9 = vmmov %vm8811_vm0 }
 0x8dc   :  { %v3067_v15 = vmul.f32 0.5, %v3066_v19  ;;  %v3045_v31 = vpop.xlane.xlu2 %3044  ;;  %vm8813_vm6 = vmmov %vm8811_vm0 }
 0x8dd   :  { %v3118_v52 = vmul.f32 %v7687_v26, %v3094_v25  ;;  %v3049_v20 = vmul.f32 %v3045_v31, %v7719_v54 }
 0x8de   :  { %v3068_v0 = vsub.f32 1.5, %v3067_v15 }
 0x8df   :  { %v5778_v9 = vpop.eup %5777  ;;  %v3053_v56 = vadd.f32 1e-05, %v3049_v20  ;;  %v3142_v42 = vadd.f32 %v7683_v12, %v3118_v52 }
 0x8e0   :  { %v3069_v53 = vmul.f32 %v5776_v3, %v3068_v0  ;;  %v3075_v39 = vmul.f32 %v5778_v9, %v3052_v48  ;;  %vm3081_vm13 = vweird.f32 %v5778_v9 }
 0x8e1   :  { %5779 = vrsqrt.f32 %v3053_v56  ;;  %v3146_v10 = vmax.f32 %v3142_v42, 0.0  ;;  %vm3082_vm3 = vmor %vm3080_vm2, %vm3081_vm13  ;;  %vm3090_vm11 = vweird.f32 %v3053_v56 }
 0x8e2   :  { %v3073_v23 = vsel %vm3072_vm8, %v5776_v3, %v3069_v53  ;;  %v3076_v16 = vmul.f32 %v5778_v9, %v3075_v39  ;;  %vm8815_vm8 = vcmask 146432  }
 0x8e3   :  { %3166 = vmatmul.f32.vlgmr.msrb.gmra.mxu3 %v3146_v10  ;;  %v3095_v30 = vmul.f32 %v3073_v23, %v7727_v18  ;;  %v3135_v18 = vpop.permute.xlu0 %3134  ;;  %vm8816_vm13 = vmmov %vm8815_vm8 }
 0x8e4   :  { %v3077_v26 = vmul.f32 0.5, %v3076_v16  ;;  %v3116_v35 = vpop.permute.xlu2 %3115  ;;  %vm8817_vm2 = vmmov %vm8815_vm8 }
 0x8e5   :  { %v3119_v8 = vmul.f32 %v3106_v38, %v3095_v30 }
 0x8e6   :  { %v3078_v54 = vsub.f32 1.5, %v3077_v26  ;;  %v3506_v26 = vperm.slane %v7811_v59, 1 }
 0x8e7   :  { %v5780_v41 = vpop.eup %5779  ;;  %v3143_v60 = vadd.f32 %v3130_v17, %v3119_v8 }
 0x8e8   :  { %v3085_v11 = vmul.f32 %v5780_v41, %v3053_v56  ;;  %v3079_v12 = vmul.f32 %v5778_v9, %v3078_v54  ;;  %vm3091_vm10 = vweird.f32 %v5780_v41 }
 0x8e9   :  { %v3147_v49 = vmax.f32 %v3143_v60, 0.0  ;;  %vm3092_vm12 = vmor %vm3090_vm11, %vm3091_vm10  ;;  %vm3636_vm11 = vcmask 900096  }
 0x8ea   :  { %v3086_v7 = vmul.f32 %v5780_v41, %v3085_v11  ;;  %v3083_v61 = vsel %vm3082_vm3, %v5778_v9, %v3079_v12  ;;  %vm3614_vm3 = vcmask 916480   ;;  %vm8818_vm10 = vmmov %vm8817_vm2 }
 0x8eb   :  { %v3096_v24 = vmul.f32 %v3083_v61, %v7732_v51  ;;  %3169 = vmatmul.f32.gmra.mxu3 %v3147_v49 }
 0x8ec   :  { %v3087_v4 = vmul.f32 0.5, %v3086_v7  ;;  %v3140_v38 = vpop.permute.xlu1 %3139 }
 0x8ed   :  { %v3120_v62 = vmul.f32 %v3111_v36, %v3096_v24  ;;  %v3485_v24 = vperm.slane %v7811_v59, 0 }
 0x8ee   :  { %v3088_v21 = vsub.f32 1.5, %v3087_v4 }
 0x8ef   :  { %v3144_v46 = vadd.f32 %v3135_v18, %v3120_v62 }
 0x8f0   :  { %v3089_v29 = vmul.f32 %v5780_v41, %v3088_v21 }
 0x8f1   :  { %v3148_v37 = vmax.f32 %v3144_v46, 0.0 }
 0x8f2   :  { %v3093_v27 = vsel %vm3092_vm12, %v5780_v41, %v3089_v29  ;;  %vm3592_vm12 = vcmask 932864  }
 0x8f3   :  { %v3097_v5 = vmul.f32 %v3093_v27, %v7737_v55  ;;  %3172 = vmatmul.f32.gmra.mxu3 %v3148_v37 }
 0x8f5   :  { %v3121_v43 = vmul.f32 %v3116_v35, %v3097_v5 }
 0x8f7   :  { %v3145_v40 = vadd.f32 %v3140_v38, %v3121_v43  ;;  %v3619_v43 = vperm.slane %v7811_v59, 7 }
 0x8f9   :  { %v3149_v51 = vmax.f32 %v3145_v40, 0.0 }
 0x8fb   :  { %3175 = vmatmul.f32.gmra.mxu3 %v3149_v51 }
 0x966   :  { %v7751_v58 = vpop.f32.mrf.mxu3 }
 0x967   :  { %3532 = vrot.lane.b32.xlu0 %v7751_v58, %s6228_s0 }
 0x96e   :  { %v7755_v13 = vpop.f32.mrf.mxu3 }
 0x96f   :  { %3534 = vrot.lane.b32.xlu1 %v7755_v13, %s6228_s0 }
 0x976   :  { %v7759_v17 = vpop.f32.mrf.mxu3 }
 0x977   :  { %3515 = vrot.lane.b32.xlu1 %v7759_v17, %s6234_s10  ;;  %3536 = vrot.lane.b32.xlu2 %v7759_v17, %s6228_s0 }
 0x97e   :  { %v7765_v55 = vpop.f32.mrf.mxu3 }
 0x97f   :  { %3496 = vrot.lane.b32.xlu1 %v7765_v55, %s6210_s1  ;;  %3517 = vrot.lane.b32.xlu2 %v7765_v55, %s6234_s10 }
 0x980   :  { %3538 = vrot.lane.b32.xlu0 %v7765_v55, %s6228_s0 }
 0x987   :  { %3490 = vrot.lane.b32.xlu1 %v7751_v58, %s6210_s1  ;;  %3511 = vrot.lane.b32.xlu2 %v7751_v58, %s6234_s10 }
 0x988   :  { %3513 = vrot.lane.b32.xlu0 %v7755_v13, %s6234_s10 }
 0x98f   :  { %3471 = vrot.lane.b32.xlu1 %v7755_v13, %s6235_s20  ;;  %3492 = vrot.lane.b32.xlu2 %v7755_v13, %s6210_s1 }
 0x990   :  { %3494 = vrot.lane.b32.xlu0 %v7759_v17, %s6210_s1  ;;  %s6247_s1 = smov 110  }
 0x997   :  { %3606 = vrot.lane.b32.xlu1 %v7759_v17, %s6245_s5  ;;  %3473 = vrot.lane.b32.xlu2 %v7759_v17, %s6235_s20 }
 0x998   :  { %3475 = vrot.lane.b32.xlu0 %v7765_v55, %s6235_s20 }
 0x99f   :  { %3586 = vrot.lane.b32.xlu1 %v7765_v55, %s6246_s13  ;;  %3608 = vrot.lane.b32.xlu2 %v7765_v55, %s6245_s5 }
 0x9a0   :  { %3469 = vrot.lane.b32.xlu0 %v7751_v58, %s6235_s20 }
 0x9a7   :  { %3580 = vrot.lane.b32.xlu1 %v7751_v58, %s6246_s13  ;;  %3602 = vrot.lane.b32.xlu2 %v7751_v58, %s6245_s5 }
 0x9a8   :  { %3604 = vrot.lane.b32.xlu0 %v7755_v13, %s6245_s5 }
 0x9af   :  { %3560 = vrot.lane.b32.xlu1 %v7755_v13, %s6238_s3  ;;  %3582 = vrot.lane.b32.xlu2 %v7755_v13, %s6246_s13 }
 0x9b0   :  { %3584 = vrot.lane.b32.xlu0 %v7759_v17, %s6246_s13 }
 0x9b7   :  { %3628 = vrot.lane.b32.xlu1 %v7759_v17, %s6247_s1  ;;  %3562 = vrot.lane.b32.xlu2 %v7759_v17, %s6238_s3 }
 0x9b8   :  { %3564 = vrot.lane.b32.xlu0 %v7765_v55, %s6238_s3 }
 0x9bf   :  { %3630 = vrot.lane.b32.xlu2 %v7765_v55, %s6247_s1 }
 0x9c0   :  { %3558 = vrot.lane.b32.xlu0 %v7751_v58, %s6238_s3 }
 0x9c7   :  { %3624 = vrot.lane.b32.xlu2 %v7751_v58, %s6247_s1 }
 0x9c8   :  { %3626 = vrot.lane.b32.xlu0 %v7755_v13, %s6247_s1 }
 0x9d1   :  { %v3537_v45 = vpop.permute.xlu2 %3536 }
 0x9d2   :  { %v3546_v50 = vsel %vm1687_vm1, 0.0, %v3537_v45 }
 0x9d3   :  { %v3551_v63 = vmul.f32 %v3548_v14, %v3546_v50 }
 0x9d9   :  { %v3518_v28 = vpop.permute.xlu2 %3517  ;;  %v3533_v47 = vpop.permute.xlu0 %3532 }
 0x9da   :  { %v3544_v6 = vsel %vm1687_vm1, 0.0, %v3533_v47  ;;  %v3526_v25 = vsel %vm1741_vm7, 0.0, %v3518_v28  ;;  %v3179_v28 = vld [vmem:[#allocation15] sm:$0xff] }
 0x9db   :  { %v3549_v52 = vmul.f32 %v3548_v14, %v3544_v6  ;;  %v3531_v9 = vmul.f32 %v3527_v57, %v3526_v25 }
 0x9e1   :  { %v3512_v32 = vpop.permute.xlu2 %3511  ;;  %v3535_v36 = vpop.permute.xlu1 %3534 }
 0x9e2   :  { %v3545_v48 = vsel %vm1687_vm1, 0.0, %v3535_v36  ;;  %v3523_v53 = vsel %vm1741_vm7, 0.0, %v3512_v32 }
 0x9e3   :  { %v3550_v19 = vmul.f32 %v3548_v14, %v3545_v48  ;;  %v3528_v30 = vmul.f32 %v3527_v57, %v3523_v53  ;;  %v3182_v48 = vld [vmem:[#allocation15 + $0x18] sm:$0xff] }
 0x9e9   :  { %v3493_v33 = vpop.permute.xlu2 %3492  ;;  %v3516_v2 = vpop.permute.xlu1 %3515 }
 0x9ea   :  { %v3525_v0 = vsel %vm1741_vm7, 0.0, %v3516_v2  ;;  %v3503_v60 = vsel %vm8813_vm6, 0.0, %v3493_v33  ;;  %v7836_v33 = vld [vmem:[#allocation16 + $0x8] ss:$0 sm:$0xff] }
 0x9eb   :  { %v3530_v42 = vmul.f32 %v3527_v57, %v3525_v0  ;;  %v3508_v49 = vmul.f32 %v3506_v26, %v3503_v60  ;;  %v3185_v0 = vld [vmem:[#allocation15 + $0x30] sm:$0xff] }
 0x9f1   :  { %v3474_v34 = vpop.permute.xlu2 %3473  ;;  %v3497_v44 = vpop.permute.xlu1 %3496 }
 0x9f2   :  { %v3539_v1 = vpop.permute.xlu0 %3538  ;;  %v3505_v10 = vsel %vm8811_vm0, 0.0, %v3497_v44  ;;  %v3483_v21 = vsel %vm8815_vm8, 0.0, %v3474_v34 }
 0x9f3   :  { %v3547_v22 = vsel %vm1687_vm1, 0.0, %v3539_v1  ;;  %v3510_v41 = vmul.f32 %v3506_v26, %v3505_v10  ;;  %v3488_v37 = vmul.f32 %v3485_v24, %v3483_v21 }
 0x9f4   :  { %v3552_v3 = vmul.f32 %v3548_v14, %v3547_v22 }
 0x9f6   :  { %3670 = vmatpush.msra.mxu3 %v3552_v3 }
 0x9f8   :  { %3671 = vmatpush.msra.mxu3 %v3551_v63 }
 0x9f9   :  { %v3609_v15 = vpop.permute.xlu2 %3608  ;;  %v3491_v31 = vpop.permute.xlu1 %3490 }
 0x9fa   :  { %v3514_v20 = vpop.permute.xlu0 %3513  ;;  %3672 = vmatpush.msra.mxu3 %v3550_v19  ;;  %v3618_v40 = vsel %vm3614_vm3, %v3609_v15, 0.0 }
 0x9fb   :  { %v3524_v56 = vsel %vm1741_vm7, 0.0, %v3514_v20  ;;  %vm8814_vm7 = vmmov %vm8811_vm0  ;;  %v3623_v36 = vmul.f32 %v3619_v43, %v3618_v40  ;;  %vm3570_vm0 = vcmask 1031168   ;;  %v3190_v40 = vld [vmem:[#allocation15 + $0x58] sm:$0xff] }
 0x9fc   :  { %3673 = vmatpush.msra.mxu3 %v3549_v52  ;;  %v3529_v39 = vmul.f32 %v3527_v57, %v3524_v56  ;;  %v3502_v12 = vsel %vm8814_vm7, 0.0, %v3491_v31  ;;  %v3597_v57 = vperm.slane %v7811_v59, 6 }
 0x9fd   :  { %v3507_v4 = vmul.f32 %v3506_v26, %v3502_v12 }
 0x9fe   :  { %3674 = vmatpush.msra.mxu3 %v3531_v9 }
 0xa00   :  { %3675 = vmatpush.msra.mxu3 %v3530_v42 }
 0xa01   :  { %v3603_v23 = vpop.permute.xlu2 %3602  ;;  %v3472_v16 = vpop.permute.xlu1 %3471 }
 0xa02   :  { %v3495_v8 = vpop.permute.xlu0 %3494  ;;  %3676 = vmatpush.msra.mxu3 %v3529_v39  ;;  %v3482_v29 = vsel %vm8817_vm2, 0.0, %v3472_v16  ;;  %v3615_v1 = vsel %vm3614_vm3, %v3603_v23, 0.0  ;;  %v3575_v39 = vperm.slane %v7811_v59, 5 }
 0xa03   :  { %v3504_v54 = vsel %vm8812_vm9, 0.0, %v3495_v8  ;;  %v3487_v27 = vmul.f32 %v3485_v24, %v3482_v29  ;;  %v3620_v6 = vmul.f32 %v3619_v43, %v3615_v1 }
 0xa04   :  { %3677 = vmatpush.msra.mxu3 %v3528_v30  ;;  %v3509_v11 = vmul.f32 %v3506_v26, %v3504_v54  ;;  %v3188_v54 = vld [vmem:[#allocation15 + $0x48] sm:$0xff] }
 0xa06   :  { %3678 = vmatpush.msra.mxu3 %v3510_v41 }
 0xa08   :  { %3679 = vmatpush.msra.mxu3 %v3509_v11 }
 0xa09   :  { %v3583_v7 = vpop.permute.xlu2 %3582  ;;  %v3607_v61 = vpop.permute.xlu1 %3606 }
 0xa0a   :  { %v3476_v62 = vpop.permute.xlu0 %3475  ;;  %3680 = vmatpush.msra.mxu3 %v3508_v49  ;;  %v3617_v32 = vsel %vm3614_vm3, %v3607_v61, 0.0  ;;  %v3594_v31 = vsel %vm3592_vm12, %v3583_v7, 0.0  ;;  %v3191_v61 = vld [vmem:[#allocation15 + $0x60] sm:$0xff] }
 0xa0b   :  { %v3484_v18 = vsel %vm8816_vm13, 0.0, %v3476_v62  ;;  %v3622_v2 = vmul.f32 %v3619_v43, %v3617_v32  ;;  %v3599_v56 = vmul.f32 %v3597_v57, %v3594_v31  ;;  %v3196_v32 = vld [vmem:[#allocation15 + $0x88] sm:$0xff] }
 0xa0c   :  { %v3489_v46 = vmul.f32 %v3485_v24, %v3484_v18  ;;  %3681 = vmatpush.msra.mxu3 %v3507_v4 }
 0xa0e   :  { %3682 = vmatpush.msra.mxu3 %v3489_v46 }
 0xa10   :  { %3683 = vmatpush.msra.mxu3 %v3488_v37 }
 0xa11   :  { %v3563_v5 = vpop.permute.xlu2 %3562  ;;  %v3587_v35 = vpop.permute.xlu1 %3586 }
 0xa12   :  { %v3470_v38 = vpop.permute.xlu0 %3469  ;;  %3684 = vmatpush.msra.mxu3 %v3487_v27  ;;  %v3596_v63 = vsel %vm3592_vm12, %v3587_v35, 0.0  ;;  %v3573_v16 = vsel %vm3570_vm0, %v3563_v5, 0.0  ;;  %v3194_v5 = vld [vmem:[#allocation15 + $0x78] sm:$0xff]  ;;  %v3184_v35 = vld [vmem:[#allocation15 + $0x28] sm:$0xff] }
 0xa13   :  { %v3481_v51 = vsel %vm8818_vm10, 0.0, %v3470_v38  ;;  %v3601_v19 = vmul.f32 %v3597_v57, %v3596_v63  ;;  %v3578_v60 = vmul.f32 %v3575_v39, %v3573_v16  ;;  %v3187_v38 = vld [vmem:[#allocation15 + $0x40] sm:$0xff]  ;;  %vm4557_vm10 = vcmask 801792  }
 0xa14   :  { %v3486_v45 = vmul.f32 %v3485_v24, %v3481_v51  ;;  %v3553_v24 = vperm.slane %v7811_v59, 4  ;;  %v3183_v51 = vld [vmem:[#allocation15 + $0x20] sm:$0xff] }
 0xa16   :  { %3685 = vmatpush.msra.mxu3 %v3486_v45  ;;  %v3557_v4 = vmul.f32 %v3553_v24, %v7765_v55  ;;  %v3556_v21 = vmul.f32 %v3553_v24, %v7759_v17  ;;  %v3555_v46 = vmul.f32 %v3553_v24, %v7755_v13  ;;  %v3554_v59 = vmul.f32 %v3553_v24, %v7751_v58  ;;  %v3181_v17 = vld [vmem:[#allocation15 + $0x10] sm:$0xff]  ;;  %v3180_v58 = vld [vmem:[#allocation15 + $0x8] sm:$0xff] }
 0xa17   :  { %3686 = vmatmul.f32.vlgmr.msra.gmra.mxu3 %v3179_v28  ;;  %v3197_v13 = vld [vmem:[#allocation15 + $0x90] sm:$0xff]  ;;  %v3186_v28 = vld [vmem:[#allocation15 + $0x38] sm:$0xff] }
 0xa18   :  { %3711 = vmatpush.msrb.mxu3 %v3623_v36  ;;  %v3193_v45 = vld [vmem:[#allocation15 + $0x70] sm:$0xff] }
 0xa19   :  { %v3631_v47 = vpop.permute.xlu2 %3630  ;;  %v3581_v34 = vpop.permute.xlu1 %3580  ;;  %v3189_v36 = vld [vmem:[#allocation15 + $0x50] sm:$0xff] }
 0xa1a   :  { %3712 = vmatpush.msrb.mxu3 %v3622_v2  ;;  %v3640_v44 = vsel %vm3636_vm11, %v3631_v47, 0.0  ;;  %v3605_v14 = vpop.permute.xlu0 %3604  ;;  %v3593_v9 = vsel %vm3592_vm12, %v3581_v34, 0.0  ;;  %v3192_v2 = vld [vmem:[#allocation15 + $0x68] sm:$0xff]  ;;  %v3202_v47 = vld [vmem:[#allocation15 + $0xb8] sm:$0xff]  ;;  %v3195_v34 = vld [vmem:[#allocation15 + $0x80] sm:$0xff] }
 0xa1b   :  { %v3645_v50 = vmul.f32 %v7836_v33, %v3640_v44  ;;  %v3616_v22 = vsel %vm3614_vm3, %v3605_v14, 0.0  ;;  %v3598_v42 = vmul.f32 %v3597_v57, %v3593_v9  ;;  %v3198_v44 = vld [vmem:[#allocation15 + $0x98] sm:$0xff]  ;;  %v3201_v14 = vld [vmem:[#allocation15 + $0xb0] sm:$0xff] }
 0xa1c   :  { %v3621_v3 = vmul.f32 %v3619_v43, %v3616_v22  ;;  %v3200_v43 = vld [vmem:[#allocation15 + $0xa8] sm:$0xff] }
 0xa1d   :  { %3764 = vmatpush.msra.mxu1 %v3645_v50 }
 0xa1e   :  { %3713 = vmatpush.msrb.mxu3 %v3621_v3 }
 0xa1f   :  { %3689 = vmatmul.f32.gmra.mxu3 %v3182_v48 }
 0xa20   :  { %3714 = vmatpush.msrb.mxu3 %v3620_v6 }
 0xa21   :  { %v3561_v25 = vpop.permute.xlu1 %3560  ;;  %v3625_v62 = vpop.permute.xlu2 %3624 }
 0xa22   :  { %v3585_v15 = vpop.permute.xlu0 %3584  ;;  %3715 = vmatpush.msrb.mxu3 %v3601_v19  ;;  %v3572_v41 = vsel %vm3570_vm0, %v3561_v25, 0.0  ;;  %v3637_v29 = vsel %vm3636_vm11, %v3625_v62, 0.0 }
 0xa23   :  { %v3595_v52 = vsel %vm3592_vm12, %v3585_v15, 0.0  ;;  %v3577_v11 = vmul.f32 %v3575_v39, %v3572_v41  ;;  %v3642_v55 = vmul.f32 %v7836_v33, %v3637_v29  ;;  %vm4324_vm12 = vcmask 277504  }
 0xa24   :  { %v3600_v20 = vmul.f32 %v3597_v57, %v3595_v52 }
 0xa26   :  { %3716 = vmatpush.msrb.mxu3 %v3600_v20 }
 0xa27   :  { %3692 = vmatmul.f32.gmra.mxu3 %v3185_v0 }
 0xa28   :  { %3717 = vmatpush.msrb.mxu3 %v3599_v56 }
 0xa29   :  { %v3629_v53 = vpop.permute.xlu1 %3628 }
 0xa2a   :  { %v3565_v10 = vpop.permute.xlu0 %3564  ;;  %3718 = vmatpush.msrb.mxu3 %v3598_v42  ;;  %v3639_v23 = vsel %vm3636_vm11, %v3629_v53, 0.0 }
 0xa2b   :  { %v3574_v30 = vsel %vm3570_vm0, %v3565_v10, 0.0  ;;  %v3644_v26 = vmul.f32 %v7836_v33, %v3639_v23 }
 0xa2c   :  { %v3579_v8 = vmul.f32 %v3575_v39, %v3574_v30 }
 0xa2d   :  { %3765 = vmatpush.msra.mxu1 %v3644_v26 }
 0xa2e   :  { %3719 = vmatpush.msrb.mxu3 %v3579_v8 }
 0xa2f   :  { %3695 = vmatmul.f32.gmra.mxu3 %v3188_v54 }
 0xa30   :  { %3720 = vmatpush.msrb.mxu3 %v3578_v60 }
 0xa32   :  { %v3559_v12 = vpop.permute.xlu0 %3558  ;;  %3721 = vmatpush.msrb.mxu3 %v3577_v11 }
 0xa33   :  { %v3571_v49 = vsel %vm3570_vm0, %v3559_v12, 0.0 }
 0xa34   :  { %v3576_v7 = vmul.f32 %v3575_v39, %v3571_v49 }
 0xa36   :  { %3722 = vmatpush.msrb.mxu3 %v3576_v7 }
 0xa37   :  { %3698 = vmatmul.f32.gmra.mxu3 %v3191_v61 }
 0xa38   :  { %3723 = vmatpush.msrb.mxu3 %v3557_v4 }
 0xa3a   :  { %v3627_v18 = vpop.permute.xlu0 %3626  ;;  %3724 = vmatpush.msrb.mxu3 %v3556_v21 }
 0xa3b   :  { %v3638_v37 = vsel %vm3636_vm11, %v3627_v18, 0.0  ;;  %vm4646_vm11 = vcmask 769024  }
 0xa3c   :  { %v3643_v27 = vmul.f32 %v7836_v33, %v3638_v37  ;;  %3725 = vmatpush.msrb.mxu3 %v3555_v46  ;;  %v3199_v33 = vld [vmem:[#allocation15 + $0xa0] sm:$0xff] }
 0xa3e   :  { %3726 = vmatpush.msrb.mxu3 %v3554_v59  ;;  %3766 = vmatpush.msra.mxu1 %v3643_v27 }
 0xa3f   :  { %3701 = vmatmul.f32.gmra.mxu3 %v3194_v5 }
 0xa40   :  { %3767 = vmatpush.msra.mxu1 %v3642_v55 }
 0xa41   :  { %5630 = vmatmul.msk.f32.vlgmr.msra.gmra.mxu1 %vm1837_vm15, %v3181_v17  ;;  %v3205_v17 = vld [vmem:[%s8671_s11] sm:$0xff] }
 0xa47   :  { %3704 = vmatmul.f32.gmra.mxu3 %v3197_v13  ;;  %v3208_v13 = vld [vmem:[%s8672_s12 + $0x8] sm:$0xff] }
 0xa49   :  { %5631 = vmatmul.msk.f32.gmra.mxu1 %vm1837_vm15, %v3184_v35  ;;  %v6248_v35 = vmov 512.0  }
 0xa4a   :  { %5781 = vrcp.f32 %v6248_v35  ;;  %v3357_v35 = vld [vmem:[#allocation18 + $0x4a0] sm:$0xff] }
 0xa4f   :  { %3707 = vmatmul.f32.gmra.mxu3 %v3200_v43 }
 0xa50   :  { %v5782_v43 = vpop.eup %5781 }
 0xa51   :  { %5632 = vmatmul.msk.f32.gmra.mxu1 %vm1837_vm15, %v3187_v38  ;;  %v3804_v38 = vmul.f32 512.0, %v5782_v43  ;;  %vm3808_vm9 = vweird.f32 %v5782_v43 }
 0xa57   :  { %3727 = vmatmul.f32.vlgmr.msrb.gmra.mxu3 %v3180_v58  ;;  %v3805_v58 = vsub.f32 1.0, %v3804_v38  ;;  %v3207_v38 = vld [vmem:[%s8672_s12] sm:$0xff] }
 0xa59   :  { %5633 = vmatmul.msk.f32.gmra.mxu1 %vm1837_vm15, %v3190_v40  ;;  %v3806_v40 = vmul.f32 %v5782_v43, %v3805_v58  ;;  %v3225_v58 = vld [vmem:[#allocation18 + $0x80] sm:$0xff] }
 0xa5f   :  { %3730 = vmatmul.f32.gmra.mxu3 %v3183_v51  ;;  %v3807_v51 = vadd.f32 %v5782_v43, %v3806_v40  ;;  %v3353_v40 = vld [vmem:[#allocation18 + $0x480] sm:$0xff] }
 0xa61   :  { %5634 = vmatmul.msk.f32.gmra.mxu1 %vm1837_vm15, %v3193_v45  ;;  %v7877_v45 = vsel %vm3808_vm9, %v5782_v43, %v3807_v51  ;;  %v3421_v43 = vld [vmem:[#allocation18 + $0x6a0] sm:$0xff]  ;;  %vm8819_vm9 = vcmask 130048  }
 0xa62   :  { %v3417_v51 = vld [vmem:[#allocation18 + $0x680] sm:$0xff] }
 0xa67   :  { %3733 = vmatmul.f32.gmra.mxu3 %v3186_v28 }
 0xa69   :  { %5635 = vmatmul.msk.f32.gmra.mxu1 %vm1837_vm15, %v3196_v32 }
 0xa6f   :  { %3736 = vmatmul.f32.gmra.mxu3 %v3189_v36 }
 0xa71   :  { %5636 = vmatmul.msk.f32.gmra.mxu1 %vm1837_vm15, %v3199_v33 }
 0xa77   :  { %3739 = vmatmul.f32.gmra.mxu3 %v3192_v2 }
 0xa79   :  { %5637 = vmatmul.msk.f32.gmra.mxu1 %vm1837_vm15, %v3202_v47 }
 0xa7f   :  { %3742 = vmatmul.f32.gmra.mxu3 %v3195_v34 }
 0xa87   :  { %3745 = vmatmul.f32.gmra.mxu3 %v3198_v44 }
 0xa8f   :  { %3748 = vmatmul.f32.gmra.mxu3 %v3201_v14 }
 0xa9a   :  { %v3687_v1 = vpop.f32.mrf.mxu3 }
 0xaa2   :  { %v3690_v50 = vpop.f32.mrf.mxu3 }
 0xaaa   :  { %v3693_v22 = vpop.f32.mrf.mxu3 }
 0xab2   :  { %v3696_v3 = vpop.f32.mrf.mxu3 }
 0xaba   :  { %v3699_v48 = vpop.f32.mrf.mxu3 }
 0xabe   :  { %v3769_v57 = vpop.f32.mrf.mxu1 }
 0xac2   :  { %v3702_v63 = vpop.f32.mrf.mxu3 }
 0xac6   :  { %v3772_v25 = vpop.f32.mrf.mxu1 }
 0xaca   :  { %v3705_v6 = vpop.f32.mrf.mxu3 }
 0xace   :  { %v3775_v31 = vpop.f32.mrf.mxu1 }
 0xad2   :  { %v3708_v19 = vpop.f32.mrf.mxu3 }
 0xad6   :  { %v3778_v0 = vpop.f32.mrf.mxu1 }
 0xada   :  { %v3728_v15 = vpop.f32.mrf.mxu3 }
 0xadb   :  { %v3729_v23 = vadd.f32 %v3728_v15, %v3687_v1 }
 0xadd   :  { %v3770_v8 = vadd.f32 %v3769_v57, %v3729_v23  ;;  %v3389_v23 = vld [vmem:[#allocation18 + $0x5a0] sm:$0xff] }
 0xade   :  { %v3781_v56 = vpop.f32.mrf.mxu1 }
 0xae2   :  { %v3731_v52 = vpop.f32.mrf.mxu3 }
 0xae3   :  { %v3732_v49 = vadd.f32 %v3731_v52, %v3690_v50  ;;  %v3269_v52 = vld [vmem:[#allocation18 + $0x1e0] sm:$0xff] }
 0xae4   :  { %3914 = vmatpush.msrb.mxu2 %v3269_v52  ;;  %v3333_v52 = vld [vmem:[#allocation18 + $0x3e0] sm:$0xff] }
 0xae5   :  { %v3773_v21 = vadd.f32 %v3772_v25, %v3732_v49  ;;  %v3445_v49 = vld [vmem:[#allocation18 + $0x760] sm:$0xff] }
 0xae6   :  { %v3784_v53 = vpop.f32.mrf.mxu1 }
 0xaea   :  { %v3734_v20 = vpop.f32.mrf.mxu3 }
 0xaeb   :  { %v3735_v10 = vadd.f32 %v3734_v20, %v3693_v22  ;;  %v3397_v20 = vld [vmem:[#allocation18 + $0x5e0] sm:$0xff] }
 0xaec   :  { %3960 = vmatpush.msra.mxu3 %v3397_v20  ;;  %v3334_v20 = vld [vmem:[#allocation18 + $0x3e8] sm:$0xff] }
 0xaed   :  { %v3776_v30 = vadd.f32 %v3775_v31, %v3735_v10  ;;  %v3261_v10 = vld [vmem:[#allocation18 + $0x1a0] sm:$0xff] }
 0xaee   :  { %v3787_v26 = vpop.f32.mrf.mxu1 }
 0xaef   :  { %v3793_v60 = vadd.f32 %v3776_v30, %v3770_v8 }
 0xaf2   :  { %v3737_v9 = vpop.f32.mrf.mxu3 }
 0xaf3   :  { %v3738_v11 = vadd.f32 %v3737_v9, %v3696_v3 }
 0xaf5   :  { %v3779_v4 = vadd.f32 %v3778_v0, %v3738_v11  ;;  %v3461_v0 = vld [vmem:[#allocation18 + $0x7e0] sm:$0xff] }
 0xaf6   :  { %v3790_v29 = vpop.f32.mrf.mxu1  ;;  %3983 = vmatpush.msrb.mxu1 %v3461_v0  ;;  %v3253_v11 = vld [vmem:[#allocation18 + $0x160] sm:$0xff]  ;;  %v3398_v0 = vld [vmem:[#allocation18 + $0x5e8] sm:$0xff] }
 0xaf7   :  { %v3798_v37 = vadd.f32 %v3779_v4, %v3773_v21 }
 0xafa   :  { %v3740_v42 = vpop.f32.mrf.mxu3 }
 0xafb   :  { %v3741_v16 = vadd.f32 %v3740_v42, %v3699_v48  ;;  %v3265_v42 = vld [vmem:[#allocation18 + $0x1c0] sm:$0xff] }
 0xafc   :  { %3915 = vmatpush.msrb.mxu2 %v3265_v42  ;;  %v3394_v42 = vld [vmem:[#allocation18 + $0x5c8] sm:$0xff] }
 0xafd   :  { %v3782_v54 = vadd.f32 %v3781_v56, %v3741_v16 }
 0xafe   :  { %3916 = vmatpush.msrb.mxu2 %v3261_v10  ;;  %v3390_v10 = vld [vmem:[#allocation18 + $0x5a8] sm:$0xff] }
 0xaff   :  { %v3794_v7 = vadd.f32 %v3793_v60, %v3782_v54  ;;  %v3449_v60 = vld [vmem:[#allocation18 + $0x780] sm:$0xff] }
 0xb02   :  { %v3743_v39 = vpop.f32.mrf.mxu3 }
 0xb03   :  { %v3744_v61 = vadd.f32 %v3743_v39, %v3702_v63  ;;  %v3457_v39 = vld [vmem:[#allocation18 + $0x7c0] sm:$0xff] }
 0xb04   :  { %3984 = vmatpush.msrb.mxu1 %v3457_v39  ;;  %v3326_v39 = vld [vmem:[#allocation18 + $0x3a8] sm:$0xff] }
 0xb05   :  { %v3785_v18 = vadd.f32 %v3784_v53, %v3744_v61  ;;  %v3393_v53 = vld [vmem:[#allocation18 + $0x5c0] sm:$0xff] }
 0xb06   :  { %3961 = vmatpush.msra.mxu3 %v3393_v53  ;;  %v3377_v61 = vld [vmem:[#allocation18 + $0x540] sm:$0xff] }
 0xb07   :  { %v3799_v59 = vadd.f32 %v3798_v37, %v3785_v18  ;;  %v3237_v37 = vld [vmem:[#allocation18 + $0xe0] sm:$0xff] }
 0xb08   :  { %3962 = vmatpush.msra.mxu3 %v3389_v23  ;;  %v3325_v53 = vld [vmem:[#allocation18 + $0x3a0] sm:$0xff] }
 0xb09   :  { %v3321_v23 = vld [vmem:[#allocation18 + $0x380] sm:$0xff] }
 0xb0a   :  { %v3746_v41 = vpop.f32.mrf.mxu3 }
 0xb0b   :  { %v3747_v12 = vadd.f32 %v3746_v41, %v3705_v6  ;;  %v3385_v41 = vld [vmem:[#allocation18 + $0x580] sm:$0xff] }
 0xb0c   :  { %3963 = vmatpush.msra.mxu3 %v3385_v41  ;;  %v3313_v41 = vld [vmem:[#allocation18 + $0x340] sm:$0xff] }
 0xb0d   :  { %v3788_v24 = vadd.f32 %v3787_v26, %v3747_v12  ;;  %v3453_v26 = vld [vmem:[#allocation18 + $0x7a0] sm:$0xff] }
 0xb0e   :  { %3985 = vmatpush.msrb.mxu1 %v3453_v26  ;;  %v3381_v12 = vld [vmem:[#allocation18 + $0x560] sm:$0xff] }
 0xb0f   :  { %v3795_v62 = vadd.f32 %v3794_v7, %v3788_v24  ;;  %v3249_v7 = vld [vmem:[#allocation18 + $0x140] sm:$0xff]  ;;  %3964 = vmatpush.msra.mxu3 %v3381_v12 }
 0xb10   :  { %3986 = vmatpush.msrb.mxu1 %v3449_v60  ;;  %v3317_v26 = vld [vmem:[#allocation18 + $0x360] sm:$0xff]  ;;  %v3314_v60 = vld [vmem:[#allocation18 + $0x348] sm:$0xff] }
 0xb11   :  { %3796 = vadd.xlane.f32.xlu1 %v3795_v62  ;;  %v3373_v62 = vld [vmem:[#allocation18 + $0x520] sm:$0xff]  ;;  %3965 = vmatpush.msra.mxu3 %v3377_v61 }
 0xb12   :  { %v3749_v46 = vpop.f32.mrf.mxu3  ;;  %3987 = vmatpush.msrb.mxu1 %v3445_v49  ;;  %v3309_v12 = vld [vmem:[#allocation18 + $0x320] sm:$0xff]  ;;  %v3310_v49 = vld [vmem:[#allocation18 + $0x328] sm:$0xff] }
 0xb13   :  { %v3750_v27 = vadd.f32 %v3749_v46, %v3708_v19  ;;  %v3369_v46 = vld [vmem:[#allocation18 + $0x500] sm:$0xff]  ;;  %3966 = vmatpush.msra.mxu3 %v3373_v62 }
 0xb14   :  { %v3305_v61 = vld [vmem:[#allocation18 + $0x300] sm:$0xff] }
 0xb15   :  { %v3791_v5 = vadd.f32 %v3790_v29, %v3750_v27  ;;  %v3433_v29 = vld [vmem:[#allocation18 + $0x700] sm:$0xff]  ;;  %3967 = vmatpush.msra.mxu3 %v3369_v46 }
 0xb16   :  { %v3365_v27 = vld [vmem:[#allocation18 + $0x4e0] sm:$0xff] }
 0xb17   :  { %v3800_v55 = vadd.f32 %v3799_v59, %v3791_v5  ;;  %v3429_v59 = vld [vmem:[#allocation18 + $0x6e0] sm:$0xff]  ;;  %3968 = vmatpush.msra.mxu3 %v3365_v27 }
 0xb18   :  { %v3301_v62 = vld [vmem:[#allocation18 + $0x2e0] sm:$0xff] }
 0xb19   :  { %3801 = vadd.xlane.f32.xlu0 %v3800_v55  ;;  %v3361_v55 = vld [vmem:[#allocation18 + $0x4c0] sm:$0xff] }
 0xb1a   :  { %3969 = vmatpush.msra.mxu3 %v3361_v55  ;;  %v3297_v46 = vld [vmem:[#allocation18 + $0x2c0] sm:$0xff] }
 0xb1b   :  { %v3293_v27 = vld [vmem:[#allocation18 + $0x2a0] sm:$0xff] }
 0xb1c   :  { %3970 = vmatpush.msra.mxu3 %v3357_v35  ;;  %v3289_v55 = vld [vmem:[#allocation18 + $0x280] sm:$0xff] }
 0xb1d   :  { %v3285_v35 = vld [vmem:[#allocation18 + $0x260] sm:$0xff] }
 0xb1e   :  { %3971 = vmatpush.msra.mxu3 %v3353_v40  ;;  %v3282_v40 = vld [vmem:[#allocation18 + $0x248] sm:$0xff] }
 0xb2d   :  { %3872 = vperm.xlu0 %5744, %v3205_v17   ;;  %v3425_v17 = vld [vmem:[#allocation18 + $0x6c0] sm:$0xff] }
 0xb35   :  { %3895 = vperm.xlu0 %5744, %v3208_v13   ;;  %v3229_v13 = vld [vmem:[#allocation18 + $0xa0] sm:$0xff] }
 0xb84   :  { %v3797_v28 = vpop.xlane.xlu1 %3796 }
 0xb85   :  { %v3810_v32 = vmul.f32 %v7877_v45, %v3797_v28  ;;  %v3221_v28 = vld [vmem:[#allocation18 + $0x60] sm:$0xff] }
 0xb87   :  { %v7880_v36 = vsub.f32 %v3770_v8, %v3810_v32  ;;  %v7882_v33 = vsub.f32 %v3776_v30, %v3810_v32  ;;  %v7884_v2 = vsub.f32 %v3782_v54, %v3810_v32  ;;  %v7886_v47 = vsub.f32 %v3788_v24, %v3810_v32  ;;  %v3257_v8 = vld [vmem:[#allocation18 + $0x180] sm:$0xff] }
 0xb88   :  { %3917 = vmatpush.msrb.mxu2 %v3257_v8  ;;  %v3441_v24 = vld [vmem:[#allocation18 + $0x740] sm:$0xff]  ;;  %v3318_v8 = vld [vmem:[#allocation18 + $0x368] sm:$0xff] }
 0xb89   :  { %v3820_v34 = vmul.f32 %v7880_v36, %v7880_v36  ;;  %v3821_v44 = vmul.f32 %v7882_v33, %v7882_v33  ;;  %v3822_v14 = vmul.f32 %v7884_v2, %v7884_v2  ;;  %v3823_v3 = vmul.f32 %v7886_v47, %v7886_v47  ;;  %3988 = vmatpush.msrb.mxu1 %v3441_v24  ;;  %v3349_v32 = vld [vmem:[#allocation18 + $0x460] sm:$0xff]  ;;  %v3306_v24 = vld [vmem:[#allocation18 + $0x308] sm:$0xff] }
 0xb8a   :  { %3918 = vmatpush.msrb.mxu2 %v3253_v11  ;;  %3972 = vmatpush.msra.mxu3 %v3349_v32  ;;  %v3378_v11 = vld [vmem:[#allocation18 + $0x548] sm:$0xff] }
 0xb8b   :  { %v3828_v1 = vadd.f32 %v3821_v44, %v3820_v34  ;;  %v3413_v34 = vld [vmem:[#allocation18 + $0x660] sm:$0xff]  ;;  %v3278_v32 = vld [vmem:[#allocation18 + $0x228] sm:$0xff] }
 0xb8c   :  { %v3802_v50 = vpop.xlane.xlu0 %3801  ;;  %3919 = vmatpush.msrb.mxu2 %v3249_v7  ;;  %v3217_v44 = vld [vmem:[#allocation18 + $0x40] sm:$0xff]  ;;  %v3374_v7 = vld [vmem:[#allocation18 + $0x528] sm:$0xff] }
 0xb8d   :  { %v3811_v22 = vmul.f32 %v7877_v45, %v3802_v50  ;;  %v3829_v48 = vadd.f32 %v3828_v1, %v3822_v14  ;;  %v3345_v14 = vld [vmem:[#allocation18 + $0x440] sm:$0xff] }
 0xb8e   :  { %v3409_v1 = vld [vmem:[#allocation18 + $0x640] sm:$0xff]  ;;  %3973 = vmatpush.msra.mxu3 %v3345_v14  ;;  %v3274_v14 = vld [vmem:[#allocation18 + $0x208] sm:$0xff] }
 0xb8f   :  { %v7897_v63 = vsub.f32 %v3773_v21, %v3811_v22  ;;  %v7899_v6 = vsub.f32 %v3779_v4, %v3811_v22  ;;  %v7901_v57 = vsub.f32 %v3785_v18, %v3811_v22  ;;  %v3830_v19 = vadd.f32 %v3829_v48, %v3823_v3  ;;  %v3245_v4 = vld [vmem:[#allocation18 + $0x120] sm:$0xff] }
 0xb90   :  { %v7903_v25 = vsub.f32 %v3791_v5, %v3811_v22  ;;  %v3437_v21 = vld [vmem:[#allocation18 + $0x720] sm:$0xff]  ;;  %3920 = vmatpush.msrb.mxu2 %v3245_v4  ;;  %v3370_v4 = vld [vmem:[#allocation18 + $0x508] sm:$0xff] }
 0xb91   :  { %3831 = vadd.xlane.f32.xlu2 %v3830_v19  ;;  %v3824_v15 = vmul.f32 %v7897_v63, %v7897_v63  ;;  %v3825_v31 = vmul.f32 %v7899_v6, %v7899_v6  ;;  %v3826_v9 = vmul.f32 %v7901_v57, %v7901_v57  ;;  %v3241_v18 = vld [vmem:[#allocation18 + $0x100] sm:$0xff]  ;;  %3989 = vmatpush.msrb.mxu1 %v3437_v21  ;;  %v3206_v19 = vld [vmem:[%s8671_s11 + $0x8] sm:$0xff]  ;;  %s6249_s11 = smov 98  }
 0xb92   :  { %v3827_v16 = vmul.f32 %v7903_v25, %v7903_v25  ;;  %3921 = vmatpush.msrb.mxu2 %v3241_v18  ;;  %v3233_v5 = vld [vmem:[#allocation18 + $0xc0] sm:$0xff]  ;;  %v3302_v21 = vld [vmem:[#allocation18 + $0x2e8] sm:$0xff] }
 0xb93   :  { %v3833_v56 = vadd.f32 %v3825_v31, %v3824_v15  ;;  %3990 = vmatpush.msrb.mxu1 %v3433_v29  ;;  %v3213_v50 = vld [vmem:[#allocation18 + $0x20] sm:$0xff]  ;;  %v3366_v18 = vld [vmem:[#allocation18 + $0x4e8] sm:$0xff] }
 0xb94   :  { %3922 = vmatpush.msrb.mxu2 %v3237_v37  ;;  %v3341_v22 = vld [vmem:[#allocation18 + $0x420] sm:$0xff]  ;;  %v3298_v29 = vld [vmem:[#allocation18 + $0x2c8] sm:$0xff] }
 0xb95   :  { %v3834_v30 = vadd.f32 %v3833_v56, %v3826_v9  ;;  %3991 = vmatpush.msrb.mxu1 %v3429_v59  ;;  %v3405_v3 = vld [vmem:[#allocation18 + $0x620] sm:$0xff]  ;;  %3974 = vmatpush.msra.mxu3 %v3341_v22  ;;  %v3330_v56 = vld [vmem:[#allocation18 + $0x3c8] sm:$0xff] }
 0xb96   :  { %3923 = vmatpush.msrb.mxu2 %v3233_v5  ;;  %v3209_v48 = vld [vmem:[#allocation18] sm:$0xff]  ;;  %v3362_v37 = vld [vmem:[#allocation18 + $0x4c8] sm:$0xff] }
 0xb97   :  { %v3835_v54 = vadd.f32 %v3834_v30, %v3827_v16  ;;  %3992 = vmatpush.msrb.mxu1 %v3425_v17  ;;  %v3337_v15 = vld [vmem:[#allocation18 + $0x400] sm:$0xff]  ;;  %v3322_v16 = vld [vmem:[#allocation18 + $0x388] sm:$0xff] }
 0xb98   :  { %3924 = vmatpush.msrb.mxu2 %v3229_v13  ;;  %v3401_v31 = vld [vmem:[#allocation18 + $0x600] sm:$0xff]  ;;  %3975 = vmatpush.msra.mxu3 %v3337_v15  ;;  %v3386_v30 = vld [vmem:[#allocation18 + $0x588] sm:$0xff] }
 0xb99   :  { %3836 = vadd.xlane.f32.xlu1 %v3835_v54  ;;  %3993 = vmatpush.msrb.mxu1 %v3421_v43  ;;  %v3329_v9 = vld [vmem:[#allocation18 + $0x3c0] sm:$0xff]  ;;  %v3382_v54 = vld [vmem:[#allocation18 + $0x568] sm:$0xff] }
 0xb9a   :  { %3925 = vmatpush.msrb.mxu2 %v3225_v58  ;;  %4029 = vmatpush.msrb.mxu3 %v3334_v20  ;;  %v3294_v59 = vld [vmem:[#allocation18 + $0x2a8] sm:$0xff]  ;;  %v3281_v58 = vld [vmem:[#allocation18 + $0x240] sm:$0xff] }
 0xb9b   :  { %3994 = vmatpush.msrb.mxu1 %v3417_v51  ;;  %v3358_v5 = vld [vmem:[#allocation18 + $0x4a8] sm:$0xff] }
 0xb9c   :  { %3926 = vmatpush.msrb.mxu2 %v3221_v28  ;;  %4030 = vmatpush.msrb.mxu3 %v3330_v56  ;;  %v3290_v17 = vld [vmem:[#allocation18 + $0x288] sm:$0xff]  ;;  %v3277_v28 = vld [vmem:[#allocation18 + $0x220] sm:$0xff] }
 0xb9d   :  { %3995 = vmatpush.msrb.mxu1 %v3413_v34  ;;  %v3354_v13 = vld [vmem:[#allocation18 + $0x488] sm:$0xff] }
 0xb9e   :  { %3927 = vmatpush.msrb.mxu2 %v3217_v44  ;;  %4031 = vmatpush.msrb.mxu3 %v3326_v39  ;;  %v3286_v43 = vld [vmem:[#allocation18 + $0x268] sm:$0xff]  ;;  %v3273_v44 = vld [vmem:[#allocation18 + $0x200] sm:$0xff] }
 0xb9f   :  { %3996 = vmatpush.msrb.mxu1 %v3409_v1  ;;  %v3346_v51 = vld [vmem:[#allocation18 + $0x448] sm:$0xff] }
 0xba0   :  { %3928 = vmatpush.msrb.mxu2 %v3213_v50  ;;  %4032 = vmatpush.msrb.mxu3 %v3322_v16  ;;  %v3342_v34 = vld [vmem:[#allocation18 + $0x428] sm:$0xff] }
 0xba1   :  { %3997 = vmatpush.msrb.mxu1 %v3405_v3  ;;  %v3338_v1 = vld [vmem:[#allocation18 + $0x408] sm:$0xff] }
 0xba2   :  { %3929 = vmatpush.msrb.mxu2 %v3209_v48  ;;  %4033 = vmatpush.msrb.mxu3 %v3318_v8 }
 0xba3   :  { %3998 = vmatpush.msrb.mxu1 %v3401_v31 }
 0xba4   :  { %3937 = vmatpush.msra.mxu2 %v3333_v52  ;;  %4034 = vmatpush.msrb.mxu3 %v3314_v60 }
 0xba5   :  { %4052 = vmatpush.msra.mxu1 %v3398_v0 }
 0xba6   :  { %3938 = vmatpush.msra.mxu2 %v3329_v9  ;;  %4035 = vmatpush.msrb.mxu3 %v3310_v49 }
 0xba7   :  { %4053 = vmatpush.msra.mxu1 %v3394_v42 }
 0xba8   :  { %3939 = vmatpush.msra.mxu2 %v3325_v53  ;;  %4036 = vmatpush.msrb.mxu3 %v3306_v24  ;;  %v3270_v24 = vld [vmem:[#allocation18 + $0x1e8] sm:$0xff] }
 0xba9   :  { %3890 = vperm.xlu2 %5746, %v3207_v38   ;;  %4054 = vmatpush.msra.mxu1 %v3390_v10  ;;  %v3350_v38 = vld [vmem:[#allocation18 + $0x468] sm:$0xff] }
 0xbaa   :  { %3940 = vmatpush.msra.mxu2 %v3321_v23  ;;  %4037 = vmatpush.msrb.mxu3 %v3302_v21  ;;  %v3335_v21 = vld [vmem:[#allocation18 + $0x3f0] sm:$0xff] }
 0xbab   :  { %4055 = vmatpush.msra.mxu1 %v3386_v30  ;;  %v3873_v30 = vpop.permute.xlu0 %3872 }
 0xbac   :  { %3941 = vmatpush.msra.mxu2 %v3317_v26  ;;  %4038 = vmatpush.msrb.mxu3 %v3298_v29  ;;  %v3266_v29 = vld [vmem:[#allocation18 + $0x1c8] sm:$0xff] }
 0xbad   :  { %4056 = vmatpush.msra.mxu1 %v3382_v54 }
 0xbae   :  { %3942 = vmatpush.msra.mxu2 %v3313_v41  ;;  %4039 = vmatpush.msrb.mxu3 %v3294_v59  ;;  %v3267_v59 = vld [vmem:[#allocation18 + $0x1d0] sm:$0xff] }
 0xbaf   :  { %4057 = vmatpush.msra.mxu1 %v3378_v11 }
 0xbb0   :  { %3943 = vmatpush.msra.mxu2 %v3309_v12  ;;  %4040 = vmatpush.msrb.mxu3 %v3290_v17 }
 0xbb1   :  { %4058 = vmatpush.msra.mxu1 %v3374_v7 }
 0xbb2   :  { %3877 = vperm.xlu1 %5745, %v3206_v19   ;;  %3944 = vmatpush.msra.mxu2 %v3305_v61 }
 0xbb3   :  { %4059 = vmatpush.msra.mxu1 %v3370_v4  ;;  %4041 = vmatpush.msrb.mxu3 %v3286_v43 }
 0xbb4   :  { %3945 = vmatpush.msra.mxu2 %v3301_v62  ;;  %v3271_v62 = vld [vmem:[#allocation18 + $0x1f0] sm:$0xff] }
 0xbb5   :  { %4060 = vmatpush.msra.mxu1 %v3366_v18  ;;  %4042 = vmatpush.msrb.mxu3 %v3282_v40  ;;  %v3258_v40 = vld [vmem:[#allocation18 + $0x188] sm:$0xff] }
 0xbb6   :  { %3946 = vmatpush.msra.mxu2 %v3297_v46 }
 0xbb7   :  { %4061 = vmatpush.msra.mxu1 %v3362_v37  ;;  %4043 = vmatpush.msrb.mxu3 %v3278_v32  ;;  %v3323_v32 = vld [vmem:[#allocation18 + $0x390] sm:$0xff] }
 0xbb8   :  { %3947 = vmatpush.msra.mxu2 %v3293_v27 }
 0xbb9   :  { %4062 = vmatpush.msra.mxu1 %v3358_v5  ;;  %4044 = vmatpush.msrb.mxu3 %v3274_v14  ;;  %v3331_v5 = vld [vmem:[#allocation18 + $0x3d0] sm:$0xff]  ;;  %v3254_v14 = vld [vmem:[#allocation18 + $0x168] sm:$0xff] }
 0xbba   :  { %3948 = vmatpush.msra.mxu2 %v3289_v55 }
 0xbbb   :  { %4063 = vmatpush.msra.mxu1 %v3354_v13  ;;  %v3262_v13 = vld [vmem:[#allocation18 + $0x1a8] sm:$0xff] }
 0xbbc   :  { %3949 = vmatpush.msra.mxu2 %v3285_v35  ;;  %v7941_v35 = vpop.permute.xlu0 %3895 }
 0xbbd   :  { %4064 = vmatpush.msra.mxu1 %v3350_v38 }
 0xbbe   :  { %3950 = vmatpush.msra.mxu2 %v3281_v58 }
 0xbbf   :  { %4065 = vmatpush.msra.mxu1 %v3346_v51 }
 0xbc0   :  { %3951 = vmatpush.msra.mxu2 %v3277_v28  ;;  %v3259_v28 = vld [vmem:[#allocation18 + $0x190] sm:$0xff] }
 0xbc1   :  { %4066 = vmatpush.msra.mxu1 %v3342_v34 }
 0xbc2   :  { %3952 = vmatpush.msra.mxu2 %v3273_v44 }
 0xbc3   :  { %4067 = vmatpush.msra.mxu1 %v3338_v1 }
 0xc04   :  { %v3832_v50 = vpop.xlane.xlu2 %3831 }
 0xc05   :  { %v3838_v22 = vmul.f32 %v3832_v50, %v7877_v45  ;;  %v3255_v50 = vld [vmem:[#allocation18 + $0x170] sm:$0xff] }
 0xc07   :  { %v3840_v3 = vadd.f32 1e-05, %v3838_v22  ;;  %v3319_v22 = vld [vmem:[#allocation18 + $0x370] sm:$0xff] }
 0xc09   :  { %5783 = vrsqrt.f32 %v3840_v3  ;;  %vm3848_vm7 = vweird.f32 %v3840_v3 }
 0xc0c   :  { %v3837_v48 = vpop.xlane.xlu1 %3836  ;;  %v7924_v60 = vpop.permute.xlu2 %3890 }
 0xc0d   :  { %v3839_v19 = vmul.f32 %v3837_v48, %v7877_v45  ;;  %v3251_v48 = vld [vmem:[#allocation18 + $0x150] sm:$0xff] }
 0xc0f   :  { %v5784_v15 = vpop.eup %5783  ;;  %v3841_v31 = vadd.f32 1e-05, %v3839_v19  ;;  %v3315_v19 = vld [vmem:[#allocation18 + $0x350] sm:$0xff] }
 0xc10   :  { %v3843_v52 = vmul.f32 %v5784_v15, %v3840_v3  ;;  %vm3849_vm6 = vweird.f32 %v5784_v15  ;;  %v3250_v3 = vld [vmem:[#allocation18 + $0x148] sm:$0xff] }
 0xc11   :  { %5785 = vrsqrt.f32 %v3841_v31  ;;  %vm3850_vm8 = vmor %vm3848_vm7, %vm3849_vm6  ;;  %vm3858_vm2 = vweird.f32 %v3841_v31 }
 0xc12   :  { %v3844_v20 = vmul.f32 %v5784_v15, %v3843_v52  ;;  %v3247_v52 = vld [vmem:[#allocation18 + $0x130] sm:$0xff]  ;;  %vm8820_vm6 = vmmov %vm8819_vm9 }
 0xc13   :  { %vm8821_vm7 = vmmov %vm8820_vm6 }
 0xc14   :  { %v3845_v0 = vmul.f32 0.5, %v3844_v20  ;;  %v3311_v20 = vld [vmem:[#allocation18 + $0x330] sm:$0xff] }
 0xc16   :  { %v3846_v9 = vsub.f32 1.5, %v3845_v0 }
 0xc17   :  { %v5786_v56 = vpop.eup %5785 }
 0xc18   :  { %v3847_v42 = vmul.f32 %v5784_v15, %v3846_v9  ;;  %v3853_v53 = vmul.f32 %v5786_v56, %v3841_v31  ;;  %vm3859_vm13 = vweird.f32 %v5786_v56  ;;  %v3242_v9 = vld [vmem:[#allocation18 + $0x108] sm:$0xff] }
 0xc19   :  { %vm3860_vm3 = vmor %vm3858_vm2, %vm3859_vm13 }
 0xc1a   :  { %v3851_v39 = vsel %vm3850_vm8, %v5784_v15, %v3847_v42  ;;  %v3854_v10 = vmul.f32 %v5786_v56, %v3853_v53  ;;  %v3246_v15 = vld [vmem:[#allocation18 + $0x128] sm:$0xff]  ;;  %v3307_v42 = vld [vmem:[#allocation18 + $0x310] sm:$0xff]  ;;  %vm8822_vm8 = vmmov %vm8820_vm6 }
 0xc1b   :  { %v3862_v23 = vmul.f32 %v3851_v39, %v7880_v36  ;;  %v3864_v16 = vmul.f32 %v3851_v39, %v7884_v2  ;;  %v3865_v45 = vmul.f32 %v3851_v39, %v7886_v47  ;;  %v3863_v38 = vmul.f32 %v3851_v39, %v7882_v33  ;;  %v3238_v39 = vld [vmem:[#allocation18 + $0xe8] sm:$0xff] }
 0xc1c   :  { %v3855_v26 = vmul.f32 0.5, %v3854_v10 }
 0xc1d   :  { %v3880_v8 = vmul.f32 %v3873_v30, %v3862_v23  ;;  %v3882_v54 = vmul.f32 %v3873_v30, %v3864_v16  ;;  %v3883_v41 = vmul.f32 %v3873_v30, %v3865_v45  ;;  %v3881_v1 = vmul.f32 %v3873_v30, %v3863_v38  ;;  %v3239_v23 = vld [vmem:[#allocation18 + $0xf0] sm:$0xff]  ;;  %v3264_v38 = vld [vmem:[#allocation18 + $0x1b8] sm:$0xff] }
 0xc1e   :  { %v3856_v11 = vsub.f32 1.5, %v3855_v26  ;;  %v3303_v16 = vld [vmem:[#allocation18 + $0x2f0] sm:$0xff]  ;;  %v3230_v26 = vld [vmem:[#allocation18 + $0xa8] sm:$0xff] }
 0xc1f   :  { %v3898_v12 = vadd.f32 %v7924_v60, %v3880_v8  ;;  %v3900_v49 = vadd.f32 %v7924_v60, %v3882_v54  ;;  %v3901_v7 = vadd.f32 %v7924_v60, %v3883_v41  ;;  %v3899_v31 = vadd.f32 %v7924_v60, %v3881_v1  ;;  %v3235_v45 = vld [vmem:[#allocation18 + $0xd0] sm:$0xff]  ;;  %v3226_v60 = vld [vmem:[#allocation18 + $0x88] sm:$0xff] }
 0xc20   :  { %v3857_v36 = vmul.f32 %v5786_v56, %v3856_v11  ;;  %v3299_v30 = vld [vmem:[#allocation18 + $0x2d0] sm:$0xff] }
 0xc21   :  { %v7929_v2 = vmax.f32 %v3898_v12, 0.0  ;;  %v7931_v47 = vmax.f32 %v3900_v49, 0.0  ;;  %v7933_v61 = vmax.f32 %v3901_v7, 0.0  ;;  %v7958_v53 = vmax.f32 %v3899_v31, 0.0  ;;  %v3231_v54 = vld [vmem:[#allocation18 + $0xb0] sm:$0xff]  ;;  %v3222_v7 = vld [vmem:[#allocation18 + $0x68] sm:$0xff] }
 0xc22   :  { %v3861_v4 = vsel %vm3860_vm3, %v5786_v56, %v3857_v36  ;;  %v3243_v56 = vld [vmem:[#allocation18 + $0x110] sm:$0xff]  ;;  %v3244_v31 = vld [vmem:[#allocation18 + $0x118] sm:$0xff] }
 0xc23   :  { %3930 = vmatmul.f32.vlgmr.msrb.gmra.mxu2 %v7929_v2  ;;  %3976 = vmatmul.f32.vlgmr.msra.gmra.mxu3 %v7931_v47  ;;  %v3866_v18 = vmul.f32 %v3861_v4, %v7897_v63  ;;  %v3868_v46 = vmul.f32 %v3861_v4, %v7901_v57  ;;  %v3869_v37 = vmul.f32 %v3861_v4, %v7903_v25  ;;  %v3263_v63 = vld [vmem:[#allocation18 + $0x1b0] sm:$0xff] }
 0xc24   :  { %3999 = vmatmul.f32.vlgmr.msrb.gmra.mxu1 %v7933_v61  ;;  %4006 = vmatpush.msrb.mxu2 %v3270_v24  ;;  %v3878_v27 = vpop.permute.xlu1 %3877  ;;  %v3327_v57 = vld [vmem:[#allocation18 + $0x3b0] sm:$0xff]  ;;  %v3867_v0 = vmul.f32 %v3861_v4, %v7899_v6  ;;  %v3234_v6 = vld [vmem:[#allocation18 + $0xc8] sm:$0xff] }
 0xc25   :  { %4098 = vmatpush.msra.mxu3 %v3271_v62  ;;  %4121 = vmatpush.msrb.mxu1 %v3335_v21  ;;  %v3884_v55 = vmul.f32 %v3878_v27, %v3866_v18  ;;  %v3886_v17 = vmul.f32 %v3878_v27, %v3868_v46  ;;  %v3887_v43 = vmul.f32 %v3878_v27, %v3869_v37  ;;  %v3295_v41 = vld [vmem:[#allocation18 + $0x2b0] sm:$0xff]  ;;  %v3218_v4 = vld [vmem:[#allocation18 + $0x48] sm:$0xff] }
 0xc26   :  { %4007 = vmatpush.msrb.mxu2 %v3266_v29  ;;  %v3885_v10 = vmul.f32 %v3878_v27, %v3867_v0  ;;  %v3227_v11 = vld [vmem:[#allocation18 + $0x90] sm:$0xff]  ;;  %v3214_v18 = vld [vmem:[#allocation18 + $0x28] sm:$0xff]  ;;  %v3240_v0 = vld [vmem:[#allocation18 + $0xf8] sm:$0xff] }
 0xc27   :  { %v3902_v58 = vadd.f32 %v7941_v35, %v3884_v55  ;;  %v3904_v25 = vadd.f32 %v7941_v35, %v3886_v17  ;;  %4099 = vmatpush.msra.mxu3 %v3267_v59  ;;  %4122 = vmatpush.msrb.mxu1 %v3331_v5  ;;  %v3905_v51 = vadd.f32 %v7941_v35, %v3887_v43  ;;  %v3291_v12 = vld [vmem:[#allocation18 + $0x290] sm:$0xff]  ;;  %v3210_v37 = vld [vmem:[#allocation18 + $0x8] sm:$0xff]  ;;  %v3272_v17 = vld [vmem:[#allocation18 + $0x1f8] sm:$0xff] }
 0xc28   :  { %4008 = vmatpush.msrb.mxu2 %v3262_v13  ;;  %v3903_v8 = vadd.f32 %v7941_v35, %v3885_v10  ;;  %v3223_v36 = vld [vmem:[#allocation18 + $0x70] sm:$0xff]  ;;  %v3462_v5 = vld [vmem:[#allocation18 + $0x7e8] sm:$0xff]  ;;  %v3268_v43 = vld [vmem:[#allocation18 + $0x1d8] sm:$0xff] }
 0xc29   :  { %4100 = vmatpush.msra.mxu3 %v3263_v63  ;;  %4123 = vmatpush.msrb.mxu1 %v3327_v57  ;;  %v7947_v34 = vmax.f32 %v3902_v58, 0.0  ;;  %v7949_v44 = vmax.f32 %v3904_v25, 0.0  ;;  %v7951_v33 = vmax.f32 %v3905_v51, 0.0  ;;  %v3287_v24 = vld [vmem:[#allocation18 + $0x270] sm:$0xff]  ;;  %v3458_v13 = vld [vmem:[#allocation18 + $0x7c8] sm:$0xff] }
 0xc2a   :  { %4009 = vmatpush.msrb.mxu2 %v3258_v40  ;;  %v7964_v49 = vmax.f32 %v3903_v8, 0.0  ;;  %v3219_v62 = vld [vmem:[#allocation18 + $0x50] sm:$0xff]  ;;  %v3454_v63 = vld [vmem:[#allocation18 + $0x7a8] sm:$0xff]  ;;  %v3260_v40 = vld [vmem:[#allocation18 + $0x198] sm:$0xff] }
 0xc2b   :  { %4101 = vmatpush.msra.mxu3 %v3259_v28  ;;  %4124 = vmatpush.msrb.mxu1 %v3323_v32  ;;  %v3283_v21 = vld [vmem:[#allocation18 + $0x250] sm:$0xff]  ;;  %v3450_v58 = vld [vmem:[#allocation18 + $0x788] sm:$0xff]  ;;  %v3256_v32 = vld [vmem:[#allocation18 + $0x178] sm:$0xff] }
 0xc2c   :  { %3933 = vmatmul.f32.gmra.mxu2 %v7947_v34  ;;  %3979 = vmatmul.f32.gmra.mxu3 %v7949_v44  ;;  %v3215_v46 = vld [vmem:[#allocation18 + $0x30] sm:$0xff]  ;;  %v3446_v51 = vld [vmem:[#allocation18 + $0x768] sm:$0xff]  ;;  %v3224_v8 = vld [vmem:[#allocation18 + $0x78] sm:$0xff] }
 0xc2d   :  { %4002 = vmatmul.f32.gmra.mxu1 %v7951_v33  ;;  %4010 = vmatpush.msrb.mxu2 %v3254_v14  ;;  %v3279_v29 = vld [vmem:[#allocation18 + $0x230] sm:$0xff]  ;;  %v3442_v14 = vld [vmem:[#allocation18 + $0x748] sm:$0xff] }
 0xc2e   :  { %4102 = vmatpush.msra.mxu3 %v3255_v50  ;;  %4125 = vmatpush.msrb.mxu1 %v3319_v22  ;;  %v3211_v27 = vld [vmem:[#allocation18 + $0x10] sm:$0xff]  ;;  %v3252_v50 = vld [vmem:[#allocation18 + $0x158] sm:$0xff]  ;;  %v3438_v22 = vld [vmem:[#allocation18 + $0x728] sm:$0xff] }
 0xc2f   :  { %4011 = vmatpush.msrb.mxu2 %v3250_v3  ;;  %v3275_v59 = vld [vmem:[#allocation18 + $0x210] sm:$0xff] }
 0xc30   :  { %4103 = vmatpush.msra.mxu3 %v3251_v48  ;;  %4126 = vmatpush.msrb.mxu1 %v3315_v19  ;;  %v3463_v55 = vld [vmem:[#allocation18 + $0x7f0] sm:$0xff]  ;;  %v3248_v48 = vld [vmem:[#allocation18 + $0x138] sm:$0xff]  ;;  %v3434_v19 = vld [vmem:[#allocation18 + $0x708] sm:$0xff] }
 0xc31   :  { %4012 = vmatpush.msrb.mxu2 %v3246_v15  ;;  %v3459_v35 = vld [vmem:[#allocation18 + $0x7d0] sm:$0xff] }
 0xc32   :  { %4104 = vmatpush.msra.mxu3 %v3247_v52  ;;  %4127 = vmatpush.msrb.mxu1 %v3311_v20  ;;  %v3455_v57 = vld [vmem:[#allocation18 + $0x7b0] sm:$0xff]  ;;  %v3430_v52 = vld [vmem:[#allocation18 + $0x6e8] sm:$0xff] }
 0xc33   :  { %4013 = vmatpush.msrb.mxu2 %v3242_v9  ;;  %v3451_v25 = vld [vmem:[#allocation18 + $0x790] sm:$0xff]  ;;  %v3426_v9 = vld [vmem:[#allocation18 + $0x6c8] sm:$0xff] }
 0xc34   :  { %4105 = vmatpush.msra.mxu3 %v3243_v56  ;;  %4128 = vmatpush.msrb.mxu1 %v3307_v42  ;;  %v3447_v28 = vld [vmem:[#allocation18 + $0x770] sm:$0xff]  ;;  %v3236_v42 = vld [vmem:[#allocation18 + $0xd8] sm:$0xff] }
 0xc35   :  { %3953 = vmatmul.f32.vlgmr.msra.gmra.mxu2 %v7958_v53  ;;  %4045 = vmatmul.f32.vlgmr.msrb.gmra.mxu3 %v7958_v53  ;;  %v3443_v1 = vld [vmem:[#allocation18 + $0x750] sm:$0xff] }
 0xc36   :  { %4014 = vmatpush.msrb.mxu2 %v3238_v39  ;;  %4068 = vmatmul.f32.vlgmr.msra.gmra.mxu1 %v7931_v47  ;;  %v3439_v3 = vld [vmem:[#allocation18 + $0x730] sm:$0xff]  ;;  %v3422_v39 = vld [vmem:[#allocation18 + $0x6a8] sm:$0xff] }
 0xc37   :  { %4106 = vmatpush.msra.mxu3 %v3239_v23  ;;  %4129 = vmatpush.msrb.mxu1 %v3303_v16  ;;  %v3435_v15 = vld [vmem:[#allocation18 + $0x710] sm:$0xff]  ;;  %v3232_v23 = vld [vmem:[#allocation18 + $0xb8] sm:$0xff]  ;;  %v3418_v16 = vld [vmem:[#allocation18 + $0x688] sm:$0xff] }
 0xc38   :  { %4015 = vmatpush.msrb.mxu2 %v3234_v6  ;;  %v3431_v20 = vld [vmem:[#allocation18 + $0x6f0] sm:$0xff] }
 0xc39   :  { %4107 = vmatpush.msra.mxu3 %v3235_v45  ;;  %4130 = vmatpush.msrb.mxu1 %v3299_v30  ;;  %v3427_v56 = vld [vmem:[#allocation18 + $0x6d0] sm:$0xff]  ;;  %v3228_v45 = vld [vmem:[#allocation18 + $0x98] sm:$0xff]  ;;  %v3414_v30 = vld [vmem:[#allocation18 + $0x668] sm:$0xff] }
 0xc3a   :  { %4016 = vmatpush.msrb.mxu2 %v3230_v26  ;;  %v3423_v10 = vld [vmem:[#allocation18 + $0x6b0] sm:$0xff] }
 0xc3b   :  { %4108 = vmatpush.msra.mxu3 %v3231_v54  ;;  %4131 = vmatpush.msrb.mxu1 %v3295_v41  ;;  %v3419_v6 = vld [vmem:[#allocation18 + $0x690] sm:$0xff]  ;;  %v3410_v54 = vld [vmem:[#allocation18 + $0x648] sm:$0xff] }
 0xc3c   :  { %4017 = vmatpush.msrb.mxu2 %v3226_v60  ;;  %v3415_v26 = vld [vmem:[#allocation18 + $0x670] sm:$0xff]  ;;  %v3220_v60 = vld [vmem:[#allocation18 + $0x58] sm:$0xff] }
 0xc3d   :  { %4109 = vmatpush.msra.mxu3 %v3227_v11  ;;  %4132 = vmatpush.msrb.mxu1 %v3291_v12  ;;  %v3411_v41 = vld [vmem:[#allocation18 + $0x650] sm:$0xff]  ;;  %v3406_v11 = vld [vmem:[#allocation18 + $0x628] sm:$0xff] }
 0xc3e   :  { %3956 = vmatmul.f32.gmra.mxu2 %v7964_v49  ;;  %4048 = vmatmul.f32.gmra.mxu3 %v7964_v49  ;;  %v3407_v12 = vld [vmem:[#allocation18 + $0x630] sm:$0xff] }
 0xc3f   :  { %4018 = vmatpush.msrb.mxu2 %v3222_v7  ;;  %4071 = vmatmul.f32.gmra.mxu1 %v7949_v44  ;;  %v3216_v7 = vld [vmem:[#allocation18 + $0x38] sm:$0xff] }
 0xc40   :  { %4110 = vmatpush.msra.mxu3 %v3223_v36  ;;  %4133 = vmatpush.msrb.mxu1 %v3287_v24  ;;  %v3402_v36 = vld [vmem:[#allocation18 + $0x608] sm:$0xff]  ;;  %v3403_v24 = vld [vmem:[#allocation18 + $0x610] sm:$0xff] }
 0xc41   :  { %4019 = vmatpush.msrb.mxu2 %v3218_v4  ;;  %v3212_v4 = vld [vmem:[#allocation18 + $0x18] sm:$0xff] }
 0xc42   :  { %4111 = vmatpush.msra.mxu3 %v3219_v62  ;;  %4134 = vmatpush.msrb.mxu1 %v3283_v21  ;;  %v3399_v62 = vld [vmem:[#allocation18 + $0x5f0] sm:$0xff]  ;;  %v3400_v21 = vld [vmem:[#allocation18 + $0x5f8] sm:$0xff] }
 0xc43   :  { %4020 = vmatpush.msrb.mxu2 %v3214_v18  ;;  %v3464_v18 = vld [vmem:[#allocation18 + $0x7f8] sm:$0xff] }
 0xc44   :  { %4112 = vmatpush.msra.mxu3 %v3215_v46  ;;  %4135 = vmatpush.msrb.mxu1 %v3279_v29  ;;  %v3395_v46 = vld [vmem:[#allocation18 + $0x5d0] sm:$0xff]  ;;  %v3396_v29 = vld [vmem:[#allocation18 + $0x5d8] sm:$0xff] }
 0xc45   :  { %4021 = vmatpush.msrb.mxu2 %v3210_v37  ;;  %v3460_v37 = vld [vmem:[#allocation18 + $0x7d8] sm:$0xff] }
 0xc46   :  { %4113 = vmatpush.msra.mxu3 %v3211_v27  ;;  %4136 = vmatpush.msrb.mxu1 %v3275_v59  ;;  %v3391_v27 = vld [vmem:[#allocation18 + $0x5b0] sm:$0xff]  ;;  %v3392_v59 = vld [vmem:[#allocation18 + $0x5b8] sm:$0xff] }
 0xc47   :  { %4075 = vmatpush.msra.mxu2 %v3462_v5  ;;  %4114 = vmatmul.f32.vlgmr.msra.gmra.mxu3 %v7929_v2  ;;  %v3456_v5 = vld [vmem:[#allocation18 + $0x7b8] sm:$0xff] }
 0xc48   :  { %4167 = vmatpush.msrb.mxu3 %v3463_v55  ;;  %4190 = vmatpush.msra.mxu1 %v3272_v17  ;;  %v3387_v55 = vld [vmem:[#allocation18 + $0x590] sm:$0xff]  ;;  %v3388_v17 = vld [vmem:[#allocation18 + $0x598] sm:$0xff] }
 0xc49   :  { %4022 = vmatmul.f32.vlgmr.msrb.gmra.mxu2 %v7929_v2  ;;  %4137 = vmatmul.f32.vlgmr.msrb.gmra.mxu1 %v7958_v53 }
 0xc4a   :  { %4076 = vmatpush.msra.mxu2 %v3458_v13  ;;  %4168 = vmatpush.msrb.mxu3 %v3459_v35  ;;  %v3452_v13 = vld [vmem:[#allocation18 + $0x798] sm:$0xff]  ;;  %v3383_v35 = vld [vmem:[#allocation18 + $0x570] sm:$0xff] }
 0xc4b   :  { %4191 = vmatpush.msra.mxu1 %v3268_v43  ;;  %v3448_v43 = vld [vmem:[#allocation18 + $0x778] sm:$0xff] }
 0xc4c   :  { %4077 = vmatpush.msra.mxu2 %v3454_v63  ;;  %4169 = vmatpush.msrb.mxu3 %v3455_v57  ;;  %v3379_v63 = vld [vmem:[#allocation18 + $0x550] sm:$0xff]  ;;  %v3380_v57 = vld [vmem:[#allocation18 + $0x558] sm:$0xff] }
 0xc4d   :  { %4192 = vmatpush.msra.mxu1 %v3264_v38  ;;  %v3444_v38 = vld [vmem:[#allocation18 + $0x758] sm:$0xff] }
 0xc4e   :  { %4078 = vmatpush.msra.mxu2 %v3450_v58  ;;  %4170 = vmatpush.msrb.mxu3 %v3451_v25  ;;  %v3375_v58 = vld [vmem:[#allocation18 + $0x530] sm:$0xff]  ;;  %v3376_v25 = vld [vmem:[#allocation18 + $0x538] sm:$0xff] }
 0xc4f   :  { %4193 = vmatpush.msra.mxu1 %v3260_v40  ;;  %4117 = vmatmul.f32.gmra.mxu3 %v7947_v34  ;;  %v3440_v40 = vld [vmem:[#allocation18 + $0x738] sm:$0xff] }
 0xc50   :  { %4079 = vmatpush.msra.mxu2 %v3446_v51  ;;  %4171 = vmatpush.msrb.mxu3 %v3447_v28  ;;  %v3371_v51 = vld [vmem:[#allocation18 + $0x510] sm:$0xff]  ;;  %v3372_v28 = vld [vmem:[#allocation18 + $0x518] sm:$0xff] }
 0xc51   :  { %4194 = vmatpush.msra.mxu1 %v3256_v32  ;;  %4025 = vmatmul.f32.gmra.mxu2 %v7947_v34  ;;  %v3436_v32 = vld [vmem:[#allocation18 + $0x718] sm:$0xff] }
 0xc52   :  { %4140 = vmatmul.f32.gmra.mxu1 %v7964_v49  ;;  %4080 = vmatpush.msra.mxu2 %v3442_v14  ;;  %v3367_v14 = vld [vmem:[#allocation18 + $0x4f0] sm:$0xff] }
 0xc53   :  { %4172 = vmatpush.msrb.mxu3 %v3443_v1  ;;  %4195 = vmatpush.msra.mxu1 %v3252_v50  ;;  %v3368_v1 = vld [vmem:[#allocation18 + $0x4f8] sm:$0xff]  ;;  %v3363_v50 = vld [vmem:[#allocation18 + $0x4d0] sm:$0xff] }
 0xc54   :  { %4081 = vmatpush.msra.mxu2 %v3438_v22  ;;  %v3364_v22 = vld [vmem:[#allocation18 + $0x4d8] sm:$0xff] }
 0xc55   :  { %4173 = vmatpush.msrb.mxu3 %v3439_v3  ;;  %4196 = vmatpush.msra.mxu1 %v3248_v48  ;;  %v3428_v3 = vld [vmem:[#allocation18 + $0x6d8] sm:$0xff]  ;;  %v3359_v48 = vld [vmem:[#allocation18 + $0x4b0] sm:$0xff] }
 0xc56   :  { %4082 = vmatpush.msra.mxu2 %v3434_v19  ;;  %v3360_v19 = vld [vmem:[#allocation18 + $0x4b8] sm:$0xff] }
 0xc57   :  { %4174 = vmatpush.msrb.mxu3 %v3435_v15  ;;  %4197 = vmatpush.msra.mxu1 %v3244_v31  ;;  %v3424_v15 = vld [vmem:[#allocation18 + $0x6b8] sm:$0xff]  ;;  %v3355_v31 = vld [vmem:[#allocation18 + $0x490] sm:$0xff] }
 0xc58   :  { %4083 = vmatpush.msra.mxu2 %v3430_v52  ;;  %v3356_v52 = vld [vmem:[#allocation18 + $0x498] sm:$0xff] }
 0xc59   :  { %4175 = vmatpush.msrb.mxu3 %v3431_v20  ;;  %4198 = vmatpush.msra.mxu1 %v3240_v0  ;;  %v3420_v20 = vld [vmem:[#allocation18 + $0x698] sm:$0xff]  ;;  %v3351_v0 = vld [vmem:[#allocation18 + $0x470] sm:$0xff] }
 0xc5a   :  { %4084 = vmatpush.msra.mxu2 %v3426_v9  ;;  %v3352_v9 = vld [vmem:[#allocation18 + $0x478] sm:$0xff] }
 0xc5b   :  { %4176 = vmatpush.msrb.mxu3 %v3427_v56  ;;  %4199 = vmatpush.msra.mxu1 %v3236_v42  ;;  %v3416_v56 = vld [vmem:[#allocation18 + $0x678] sm:$0xff]  ;;  %v3347_v42 = vld [vmem:[#allocation18 + $0x450] sm:$0xff] }
 0xc5c   :  { %4085 = vmatpush.msra.mxu2 %v3422_v39  ;;  %v3348_v39 = vld [vmem:[#allocation18 + $0x458] sm:$0xff] }
 0xc5d   :  { %4177 = vmatpush.msrb.mxu3 %v3423_v10  ;;  %4200 = vmatpush.msra.mxu1 %v3232_v23  ;;  %v3412_v10 = vld [vmem:[#allocation18 + $0x658] sm:$0xff]  ;;  %v3343_v23 = vld [vmem:[#allocation18 + $0x430] sm:$0xff] }
 0xc5e   :  { %4086 = vmatpush.msra.mxu2 %v3418_v16  ;;  %v3344_v16 = vld [vmem:[#allocation18 + $0x438] sm:$0xff] }
 0xc5f   :  { %4178 = vmatpush.msrb.mxu3 %v3419_v6  ;;  %4201 = vmatpush.msra.mxu1 %v3228_v45  ;;  %v3408_v6 = vld [vmem:[#allocation18 + $0x638] sm:$0xff]  ;;  %v3339_v45 = vld [vmem:[#allocation18 + $0x410] sm:$0xff] }
 0xc60   :  { %4087 = vmatpush.msra.mxu2 %v3414_v30  ;;  %v3340_v30 = vld [vmem:[#allocation18 + $0x418] sm:$0xff] }
 0xc61   :  { %4179 = vmatpush.msrb.mxu3 %v3415_v26  ;;  %4202 = vmatpush.msra.mxu1 %v3224_v8  ;;  %v3404_v26 = vld [vmem:[#allocation18 + $0x618] sm:$0xff] }
 0xc62   :  { %4088 = vmatpush.msra.mxu2 %v3410_v54  ;;  %v3336_v8 = vld [vmem:[#allocation18 + $0x3f8] sm:$0xff] }
 0xc63   :  { %4180 = vmatpush.msrb.mxu3 %v3411_v41  ;;  %4203 = vmatpush.msra.mxu1 %v3220_v60  ;;  %v3332_v54 = vld [vmem:[#allocation18 + $0x3d8] sm:$0xff] }
 0xc64   :  { %4089 = vmatpush.msra.mxu2 %v3406_v11  ;;  %v3328_v41 = vld [vmem:[#allocation18 + $0x3b8] sm:$0xff] }
 0xc65   :  { %4181 = vmatpush.msrb.mxu3 %v3407_v12  ;;  %4204 = vmatpush.msra.mxu1 %v3216_v7  ;;  %v3324_v60 = vld [vmem:[#allocation18 + $0x398] sm:$0xff] }
 0xc66   :  { %4090 = vmatpush.msra.mxu2 %v3402_v36  ;;  %v3320_v11 = vld [vmem:[#allocation18 + $0x378] sm:$0xff] }
 0xc67   :  { %4182 = vmatpush.msrb.mxu3 %v3403_v24  ;;  %4205 = vmatpush.msra.mxu1 %v3212_v4  ;;  %v3316_v12 = vld [vmem:[#allocation18 + $0x358] sm:$0xff] }
 0xc68   :  { %4091 = vmatmul.f32.vlgmr.msra.gmra.mxu2 %v7933_v61  ;;  %4183 = vmatmul.f32.vlgmr.msrb.gmra.mxu3 %v7933_v61  ;;  %v3312_v7 = vld [vmem:[#allocation18 + $0x338] sm:$0xff] }
 0xc69   :  { %4144 = vmatpush.msrb.mxu2 %v3399_v62  ;;  %4206 = vmatmul.f32.vlgmr.msra.gmra.mxu1 %v7929_v2  ;;  %v3384_v2 = vld [vmem:[#allocation18 + $0x578] sm:$0xff] }
 0xc6a   :  { %4236 = vmatpush.msra.mxu3 %v3400_v21  ;;  %4259 = vmatpush.msrb.mxu1 %v3464_v18  ;;  %v3304_v36 = vld [vmem:[#allocation18 + $0x2f8] sm:$0xff] }
 0xc6b   :  { %4145 = vmatpush.msrb.mxu2 %v3395_v46  ;;  %v3296_v24 = vld [vmem:[#allocation18 + $0x2b8] sm:$0xff] }
 0xc6c   :  { %4237 = vmatpush.msra.mxu3 %v3396_v29  ;;  %4260 = vmatpush.msrb.mxu1 %v3460_v37  ;;  %v3292_v4 = vld [vmem:[#allocation18 + $0x298] sm:$0xff] }
 0xc6d   :  { %4146 = vmatpush.msrb.mxu2 %v3391_v27  ;;  %v3288_v62 = vld [vmem:[#allocation18 + $0x278] sm:$0xff] }
 0xc6e   :  { %4238 = vmatpush.msra.mxu3 %v3392_v59  ;;  %4261 = vmatpush.msrb.mxu1 %v3456_v5  ;;  %v3284_v21 = vld [vmem:[#allocation18 + $0x258] sm:$0xff] }
 0xc6f   :  { %4147 = vmatpush.msrb.mxu2 %v3387_v55  ;;  %v3276_v18 = vld [vmem:[#allocation18 + $0x218] sm:$0xff] }
 0xc70   :  { %4239 = vmatpush.msra.mxu3 %v3388_v17  ;;  %4094 = vmatmul.f32.gmra.mxu2 %v7951_v33 }
 0xc71   :  { %4262 = vmatpush.msrb.mxu1 %v3452_v13  ;;  %4148 = vmatpush.msrb.mxu2 %v3383_v35 }
 0xc72   :  { %4186 = vmatmul.f32.gmra.mxu3 %v7951_v33  ;;  %4209 = vmatmul.f32.gmra.mxu1 %v7947_v34  ;;  %v3432_v34 = vld [vmem:[#allocation18 + $0x6f8] sm:$0xff] }
 0xc73   :  { %4240 = vmatpush.msra.mxu3 %v3384_v2  ;;  %4263 = vmatpush.msrb.mxu1 %v3448_v43 }
 0xc74   :  { %4149 = vmatpush.msrb.mxu2 %v3379_v63 }
 0xc75   :  { %4241 = vmatpush.msra.mxu3 %v3380_v57  ;;  %4264 = vmatpush.msrb.mxu1 %v3444_v38 }
 0xc76   :  { %4150 = vmatpush.msrb.mxu2 %v3375_v58 }
 0xc77   :  { %4242 = vmatpush.msra.mxu3 %v3376_v25  ;;  %4265 = vmatpush.msrb.mxu1 %v3440_v40 }
 0xc78   :  { %4151 = vmatpush.msrb.mxu2 %v3371_v51 }
 0xc79   :  { %4243 = vmatpush.msra.mxu3 %v3372_v28  ;;  %4266 = vmatpush.msrb.mxu1 %v3436_v32 }
 0xc7a   :  { %4152 = vmatpush.msrb.mxu2 %v3367_v14 }
 0xc7b   :  { %4244 = vmatpush.msra.mxu3 %v3368_v1  ;;  %4267 = vmatpush.msrb.mxu1 %v3432_v34 }
 0xc7c   :  { %4153 = vmatpush.msrb.mxu2 %v3363_v50 }
 0xc7d   :  { %4245 = vmatpush.msra.mxu3 %v3364_v22  ;;  %4268 = vmatpush.msrb.mxu1 %v3428_v3 }
 0xc7e   :  { %4154 = vmatpush.msrb.mxu2 %v3359_v48 }
 0xc7f   :  { %4246 = vmatpush.msra.mxu3 %v3360_v19  ;;  %4269 = vmatpush.msrb.mxu1 %v3424_v15 }
 0xc80   :  { %4155 = vmatpush.msrb.mxu2 %v3355_v31 }
 0xc81   :  { %4247 = vmatpush.msra.mxu3 %v3356_v52  ;;  %4270 = vmatpush.msrb.mxu1 %v3420_v20 }
 0xc82   :  { %4156 = vmatpush.msrb.mxu2 %v3351_v0 }
 0xc83   :  { %4248 = vmatpush.msra.mxu3 %v3352_v9  ;;  %4271 = vmatpush.msrb.mxu1 %v3416_v56 }
 0xc84   :  { %4157 = vmatpush.msrb.mxu2 %v3347_v42 }
 0xc85   :  { %4249 = vmatpush.msra.mxu3 %v3348_v39  ;;  %4272 = vmatpush.msrb.mxu1 %v3412_v10 }
 0xc86   :  { %4158 = vmatpush.msrb.mxu2 %v3343_v23 }
 0xc87   :  { %4250 = vmatpush.msra.mxu3 %v3344_v16  ;;  %4273 = vmatpush.msrb.mxu1 %v3408_v6 }
 0xc88   :  { %4159 = vmatpush.msrb.mxu2 %v3339_v45 }
 0xc89   :  { %4251 = vmatpush.msra.mxu3 %v3340_v30  ;;  %4274 = vmatpush.msrb.mxu1 %v3404_v26 }
 0xc8a   :  { %4160 = vmatmul.f32.vlgmr.msrb.gmra.mxu2 %v7931_v47  ;;  %4252 = vmatmul.f32.vlgmr.msra.gmra.mxu3 %v7931_v47  ;;  %v3308_v47 = vld [vmem:[#allocation18 + $0x318] sm:$0xff] }
 0xc8b   :  { %4213 = vmatpush.msra.mxu2 %v3336_v8  ;;  %4275 = vmatmul.f32.vlgmr.msrb.gmra.mxu1 %v7933_v61  ;;  %v3300_v61 = vld [vmem:[#allocation18 + $0x2d8] sm:$0xff] }
 0xc8d   :  { %4214 = vmatpush.msra.mxu2 %v3332_v54 }
 0xc8f   :  { %4215 = vmatpush.msra.mxu2 %v3328_v41 }
 0xc91   :  { %4216 = vmatpush.msra.mxu2 %v3324_v60 }
 0xc92   :  { %4163 = vmatmul.f32.gmra.mxu2 %v7949_v44  ;;  %4255 = vmatmul.f32.gmra.mxu3 %v7949_v44  ;;  %v3280_v44 = vld [vmem:[#allocation18 + $0x238] sm:$0xff] }
 0xc93   :  { %4217 = vmatpush.msra.mxu2 %v3320_v11  ;;  %4278 = vmatmul.f32.gmra.mxu1 %v7951_v33 }
 0xc95   :  { %4218 = vmatpush.msra.mxu2 %v3316_v12 }
 0xc97   :  { %4219 = vmatpush.msra.mxu2 %v3312_v7 }
 0xc99   :  { %4220 = vmatpush.msra.mxu2 %v3308_v47 }
 0xc9b   :  { %4221 = vmatpush.msra.mxu2 %v3304_v36 }
 0xc9d   :  { %4222 = vmatpush.msra.mxu2 %v3300_v61 }
 0xc9f   :  { %4223 = vmatpush.msra.mxu2 %v3296_v24 }
 0xca1   :  { %4224 = vmatpush.msra.mxu2 %v3292_v4  ;;  %v4000_v5 = vpop.f32.mrf.mxu1 }
 0xca3   :  { %4225 = vmatpush.msra.mxu2 %v3288_v62 }
 0xca5   :  { %4226 = vmatpush.msra.mxu2 %v3284_v21 }
 0xca6   :  { %v3931_v33 = vpop.f32.mrf.mxu2  ;;  %v3977_v27 = vpop.f32.mrf.mxu3 }
 0xca7   :  { %4227 = vmatpush.msra.mxu2 %v3280_v44 }
 0xca9   :  { %4228 = vmatpush.msra.mxu2 %v3276_v18 }
 0xcaa   :  { %4229 = vmatmul.f32.vlgmr.msra.gmra.mxu2 %v7958_v53  ;;  %v4003_v35 = vpop.f32.mrf.mxu1 }
 0xcaf   :  { %v3934_v46 = vpop.f32.mrf.mxu2 }
 0xcb2   :  { %4232 = vmatmul.f32.gmra.mxu2 %v7964_v49  ;;  %v3980_v49 = vpop.f32.mrf.mxu3 }
 0xcb3   :  { %v4069_v58 = vpop.f32.mrf.mxu1 }
 0xcb8   :  { %v3954_v29 = vpop.f32.mrf.mxu2 }
 0xcb9   :  { %v3955_v37 = vadd.f32 %v3954_v29, %v3931_v33 }
 0xcba   :  { %v4046_v57 = vpop.f32.mrf.mxu3 }
 0xcbb   :  { %v3978_v59 = vadd.f32 %v3977_v27, %v3955_v37 }
 0xcbc   :  { %v4072_v14 = vpop.f32.mrf.mxu1 }
 0xcbd   :  { %v7989_v55 = vadd.f32 %v4000_v5, %v3978_v59 }
 0xcbf   :  { %4497 = vrot.lane.b32.xlu0 %v7989_v55, %s6238_s3  ;;  %4541 = vrot.lane.b32.xlu2 %v7989_v55, %s6249_s11 }
 0xcc0   :  { %4586 = vrot.lane.b32.xlu1 %v7989_v55, %s6243_s21 }
 0xcc1   :  { %v3957_v53 = vpop.f32.mrf.mxu2 }
 0xcc2   :  { %v3958_v17 = vadd.f32 %v3957_v53, %v3934_v46  ;;  %v4049_v28 = vpop.f32.mrf.mxu3 }
 0xcc4   :  { %v3981_v13 = vadd.f32 %v3980_v49, %v3958_v17 }
 0xcc6   :  { %v8003_v2 = vadd.f32 %v4003_v35, %v3981_v13  ;;  %v4138_v48 = vpop.f32.mrf.mxu1 }
 0xcc7   :  { %4441 = vrot.lane.b32.xlu0 %v7989_v55, %s6228_s0  ;;  %4397 = vrot.lane.b32.xlu2 %v7989_v55, %s6226_s7 }
 0xcc8   :  { %4353 = vrot.lane.b32.xlu1 %v7989_v55, %s6221_s4 }
 0xcca   :  { %v4115_v22 = vpop.f32.mrf.mxu3 }
 0xccb   :  { %v4139_v19 = vadd.f32 %v4138_v48, %v4115_v22 }
 0xccc   :  { %v4023_v43 = vpop.f32.mrf.mxu2 }
 0xccd   :  { %v4047_v38 = vadd.f32 %v4046_v57, %v4023_v43  ;;  %v8155_v57 = vld [vmem:[#allocation21] sm:$0xff] }
 0xccf   :  { %4630 = vrot.lane.b32.xlu0 %v7989_v55, %s6250_s28  ;;  %4308 = vrot.lane.b32.xlu2 %v7989_v55, %s6251_s8  ;;  %v4070_v25 = vadd.f32 %v4069_v58, %v4047_v38  ;;  %v4141_v0 = vpop.f32.mrf.mxu1  ;;  %v4618_v58 = vperm.slane %v8155_v57, 7 }
 0xcd0   :  { %4505 = vrot.lane.b32.xlu1 %v8003_v2, %s6238_s3 }
 0xcd2   :  { %v4118_v3 = vpop.f32.mrf.mxu3 }
 0xcd3   :  { %v4142_v9 = vadd.f32 %v4141_v0, %v4118_v3  ;;  %v4574_v3 = vperm.slane %v8155_v57, 6 }
 0xcd4   :  { %v4026_v63 = vpop.f32.mrf.mxu2 }
 0xcd5   :  { %v4050_v32 = vadd.f32 %v4049_v28, %v4026_v63 }
 0xcd7   :  { %4549 = vrot.lane.b32.xlu0 %v8003_v2, %s6249_s11  ;;  %4594 = vrot.lane.b32.xlu2 %v8003_v2, %s6243_s21  ;;  %v4073_v1 = vadd.f32 %v4072_v14, %v4050_v32 }
 0xcd8   :  { %4405 = vrot.lane.b32.xlu1 %v8003_v2, %s6226_s7 }
 0xcdf   :  { %4361 = vrot.lane.b32.xlu0 %v8003_v2, %s6221_s4  ;;  %4449 = vrot.lane.b32.xlu2 %v8003_v2, %s6228_s0 }
 0xce6   :  { %v4207_v16 = vpop.f32.mrf.mxu1 }
 0xce7   :  { %4638 = vrot.lane.b32.xlu0 %v8003_v2, %s6250_s28  ;;  %4316 = vrot.lane.b32.xlu2 %v8003_v2, %s6251_s8 }
 0xceb   :  { %v4092_v40 = vpop.f32.mrf.mxu2  ;;  %v4184_v15 = vpop.f32.mrf.mxu3 }
 0xcec   :  { %v8025_v51 = vadd.f32 %v4092_v40, %v4070_v25 }
 0xcee   :  { %4499 = vrot.lane.b32.xlu1 %v8025_v51, %s6238_s3 }
 0xcef   :  { %4543 = vrot.lane.b32.xlu0 %v8025_v51, %s6249_s11  ;;  %4588 = vrot.lane.b32.xlu2 %v8025_v51, %s6243_s21  ;;  %v4210_v45 = vpop.f32.mrf.mxu1 }
 0xcf3   :  { %v4095_v34 = vpop.f32.mrf.mxu2 }
 0xcf4   :  { %v8033_v50 = vadd.f32 %v4095_v34, %v4073_v1 }
 0xcf5   :  { %v4187_v39 = vpop.f32.mrf.mxu3 }
 0xcf6   :  { %4632 = vrot.lane.b32.xlu1 %v8025_v51, %s6250_s28 }
 0xcf7   :  { %4596 = vrot.lane.b32.xlu0 %v8033_v50, %s6243_s21  ;;  %4399 = vrot.lane.b32.xlu2 %v8025_v51, %s6226_s7 }
 0xcfe   :  { %4443 = vrot.lane.b32.xlu1 %v8025_v51, %s6228_s0 }
 0xcff   :  { %4407 = vrot.lane.b32.xlu0 %v8033_v50, %s6226_s7  ;;  %4507 = vrot.lane.b32.xlu2 %v8033_v50, %s6238_s3 }
 0xd06   :  { %4551 = vrot.lane.b32.xlu1 %v8033_v50, %s6249_s11 }
 0xd07   :  { %4451 = vrot.lane.b32.xlu2 %v8033_v50, %s6228_s0 }
 0xd08   :  { %v4276_v54 = vpop.f32.mrf.mxu1 }
 0xd0d   :  { %v4161_v31 = vpop.f32.mrf.mxu2  ;;  %v4253_v26 = vpop.f32.mrf.mxu3 }
 0xd0e   :  { %v4162_v52 = vadd.f32 %v4161_v31, %v4139_v19  ;;  %4640 = vrot.lane.b32.xlu1 %v8033_v50, %s6250_s28 }
 0xd10   :  { %v8053_v20 = vadd.f32 %v4184_v15, %v4162_v52  ;;  %v4279_v24 = vpop.f32.mrf.mxu1  ;;  %v4298_v15 = vld [vmem:[#allocation22] sm:$0xff]  ;;  %v4529_v52 = vperm.slane %v8155_v57, 5 }
 0xd12   :  { %4501 = vrot.lane.b32.xlu0 %v8053_v20, %s6238_s3  ;;  %4545 = vrot.lane.b32.xlu2 %v8053_v20, %s6249_s11 }
 0xd15   :  { %v4164_v56 = vpop.f32.mrf.mxu2  ;;  %v4256_v61 = vpop.f32.mrf.mxu3 }
 0xd16   :  { %v4165_v42 = vadd.f32 %v4164_v56, %v4142_v9  ;;  %4590 = vrot.lane.b32.xlu1 %v8053_v20, %s6243_s21 }
 0xd18   :  { %v8061_v10 = vadd.f32 %v4187_v39, %v4165_v42 }
 0xd19   :  { %v8063_v23 = vpop.permute.xlu2 %4541 }
 0xd1a   :  { %4553 = vrot.lane.b32.xlu0 %v8061_v10, %s6249_s11  ;;  %4445 = vrot.lane.b32.xlu2 %v8053_v20, %s6228_s0 }
 0xd1e   :  { %4509 = vrot.lane.b32.xlu1 %v8061_v10, %s6238_s3 }
 0xd21   :  { %v8071_v6 = vpop.permute.xlu2 %4397 }
 0xd22   :  { %4453 = vrot.lane.b32.xlu0 %v8061_v10, %s6228_s0  ;;  %4598 = vrot.lane.b32.xlu2 %v8061_v10, %s6243_s21 }
 0xd26   :  { %4409 = vrot.lane.b32.xlu1 %v8061_v10, %s6226_s7 }
 0xd29   :  { %v8079_v30 = vpop.permute.xlu2 %4308 }
 0xd2d   :  { %v4230_v8 = vpop.f32.mrf.mxu2 }
 0xd2e   :  { %v4231_v41 = vadd.f32 %v4230_v8, %v4207_v16  ;;  %v4485_v16 = vperm.slane %v8155_v57, 4 }
 0xd30   :  { %v4254_v60 = vadd.f32 %v4253_v26, %v4231_v41  ;;  %v5749_v26 = vld [vmem:[#allocation21 + $0x20] ss:$0 sm:$0xff]  ;;  %v8202_v41 = vld [vmem:[#allocation21 + $0x8] sm:$0xff] }
 0xd31   :  { %v8081_v11 = vpop.permute.xlu0 %4497  ;;  %v4595_v12 = vpop.permute.xlu2 %4594 }
 0xd32   :  { %v8083_v7 = vadd.f32 %v4276_v54, %v4254_v60  ;;  %v4587_v18 = vpop.permute.xlu1 %4586  ;;  %v4299_v60 = vld [vmem:[#allocation24] sm:$0xff] }
 0xd34   :  { %4547 = vrot.lane.b32.xlu0 %v8083_v7, %s6249_s11  ;;  %4592 = vrot.lane.b32.xlu2 %v8083_v7, %s6243_s21 }
 0xd35   :  { %4503 = vrot.lane.b32.xlu1 %v8083_v7, %s6238_s3  ;;  %v4233_v47 = vpop.f32.mrf.mxu2 }
 0xd36   :  { %v4234_v36 = vadd.f32 %v4233_v47, %v4210_v45  ;;  %v4473_v47 = vperm.slane %v8155_v57, 3 }
 0xd38   :  { %v4257_v4 = vadd.f32 %v4256_v61, %v4234_v36  ;;  %v4619_v61 = vperm.slane %v8202_v41, 7 }
 0xd39   :  { %v8091_v62 = vpop.permute.xlu0 %4441  ;;  %v8093_v21 = vpop.permute.xlu2 %4449 }
 0xd3a   :  { %v8095_v44 = vadd.f32 %v4279_v24, %v4257_v4  ;;  %v8107_v29 = vpop.permute.xlu1 %4353  ;;  %v4472_v4 = vsel %vm1687_vm1, 0.0, %v8093_v21 }
 0xd3c   :  { %4600 = vrot.lane.b32.xlu0 %v8095_v44, %s6243_s21  ;;  %4511 = vrot.lane.b32.xlu2 %v8095_v44, %s6238_s3 }
 0xd3d   :  { %4555 = vrot.lane.b32.xlu1 %v8095_v44, %s6249_s11 }
 0xd41   :  { %v8103_v33 = vpop.permute.xlu0 %4630  ;;  %v8105_v46 = vpop.permute.xlu2 %4316 }
 0xd42   :  { %v4506_v59 = vpop.permute.xlu1 %4505 }
 0xd44   :  { %4401 = vrot.lane.b32.xlu0 %v8053_v20, %s6226_s7  ;;  %4365 = vrot.lane.b32.xlu2 %v8061_v10, %s6221_s4 }
 0xd45   :  { %4363 = vrot.lane.b32.xlu1 %v8033_v50, %s6221_s4 }
 0xd49   :  { %v4550_v37 = vpop.permute.xlu0 %4549  ;;  %v8115_v27 = vpop.permute.xlu2 %4588 }
 0xd4a   :  { %v8133_v17 = vpop.permute.xlu1 %4405  ;;  %v4602_v40 = vsel %vm3006_vm5, %v4587_v18, %v8115_v27 }
 0xd4b   :  { %v4622_v1 = vmul.f32 %v4618_v58, %v4602_v40  ;;  %v4428_v40 = vsel %vm1812_vm14, 0.0, %v8133_v17 }
 0xd4c   :  { %4355 = vrot.lane.b32.xlu0 %v8025_v51, %s6221_s4  ;;  %4318 = vrot.lane.b32.xlu2 %v8033_v50, %s6251_s8 }
 0xd4d   :  { %4357 = vrot.lane.b32.xlu1 %v8053_v20, %s6221_s4 }
 0xd51   :  { %v8123_v5 = vpop.permute.xlu0 %4361  ;;  %v8125_v53 = vpop.permute.xlu2 %4399 }
 0xd54   :  { %4320 = vrot.lane.b32.xlu0 %v8061_v10, %s6251_s8  ;;  %4312 = vrot.lane.b32.xlu2 %v8053_v20, %s6251_s8 }
 0xd55   :  { %4310 = vrot.lane.b32.xlu1 %v8025_v51, %s6251_s8 }
 0xd59   :  { %v4639_v49 = vpop.permute.xlu0 %4638  ;;  %v8135_v13 = vpop.permute.xlu2 %4507 }
 0xd5a   :  { %v4516_v9 = vsel %vm3570_vm0, %v4506_v59, %v8135_v13  ;;  %v4471_v59 = vsel %vm1687_vm1, 0.0, %v8091_v62 }
 0xd5c   :  { %4642 = vrot.lane.b32.xlu0 %v8061_v10, %s6250_s28  ;;  %4403 = vrot.lane.b32.xlu2 %v8083_v7, %s6226_s7 }
 0xd5d   :  { %4634 = vrot.lane.b32.xlu1 %v8053_v20, %s6250_s28 }
 0xd60   :  { %v8143_v35 = vpop.permute.xlu1 %4499 }
 0xd61   :  { %v8145_v43 = vpop.permute.xlu0 %4543  ;;  %v8147_v63 = vpop.permute.xlu2 %4451  ;;  %v4513_v39 = vsel %vm3570_vm0, %v8081_v11, %v8143_v35  ;;  %v4493_v11 = vmul.f32 %v4485_v16, %v8003_v2  ;;  %v4489_v2 = vmul.f32 %v4485_v16, %v7989_v55  ;;  %v4427_v55 = vsel %vm1812_vm14, 0.0, %v8071_v6 }
 0xd62   :  { %v4558_v19 = vsel %vm4557_vm10, %v8063_v23, %v8145_v43  ;;  %v4537_v23 = vmul.f32 %v4529_v52, %v4516_v9  ;;  %v4533_v45 = vmul.f32 %v4529_v52, %v4513_v39  ;;  %v4385_v52 = vperm.slane %v8155_v57, 1 }
 0xd63   :  { %v4578_v56 = vmul.f32 %v4574_v3, %v4558_v19 }
 0xd64   :  { %4447 = vrot.lane.b32.xlu0 %v8083_v7, %s6228_s0  ;;  %4455 = vrot.lane.b32.xlu2 %v8095_v44, %s6228_s0 }
 0xd65   :  { %4411 = vrot.lane.b32.xlu1 %v8095_v44, %s6226_s7 }
 0xd68   :  { %v8157_v38 = vpop.permute.xlu1 %4632 }
 0xd69   :  { %v4597_v25 = vpop.permute.xlu0 %4596  ;;  %v4647_v36 = vsel %vm4646_vm11, %v8103_v33, %v8157_v38 }
 0xd6a   :  { %v4605_v28 = vsel %vm3006_vm5, %v4595_v12, %v4597_v25  ;;  %v4667_v33 = vmul.f32 %v5749_v26, %v4647_v36 }
 0xd6b   :  { %v4626_v32 = vmul.f32 %v4618_v58, %v4605_v28  ;;  %v4477_v28 = vmul.f32 %v4473_v47, %v4471_v59  ;;  %v4486_v59 = vperm.slane %v8202_v41, 4 }
 0xd6c   :  { %4367 = vrot.lane.b32.xlu0 %v8095_v44, %s6221_s4  ;;  %4322 = vrot.lane.b32.xlu2 %v8095_v44, %s6251_s8  ;;  %v8167_v14 = vpop.permute.xlu2 %4545 }
 0xd6d   :  { %4359 = vrot.lane.b32.xlu1 %v8083_v7, %s6221_s4  ;;  %4687 = vmatpush.msrb.mxu2 %v4626_v32 }
 0xd6f   :  { %4688 = vmatpush.msrb.mxu2 %v4622_v1 }
 0xd70   :  { %v8171_v34 = vpop.permute.xlu1 %4443 }
 0xd71   :  { %v8192_v42 = vpop.permute.xlu0 %4407 }
 0xd74   :  { %4644 = vrot.lane.b32.xlu0 %v8095_v44, %s6250_s28  ;;  %4636 = vrot.lane.b32.xlu2 %v8083_v7, %s6250_s28  ;;  %v8179_v22 = vpop.permute.xlu2 %4445 }
 0xd75   :  { %4314 = vrot.lane.b32.xlu1 %v8083_v7, %s6251_s8 }
 0xd78   :  { %v8182_v48 = vpop.permute.xlu1 %4551 }
 0xd79   :  { %v4561_v31 = vsel %vm4557_vm10, %v4550_v37, %v8182_v48 }
 0xd7a   :  { %v4582_v0 = vmul.f32 %v4574_v3, %v4561_v31 }
 0xd7c   :  { %5023 = vperm.xlu2 %5746, %v4298_v15   ;;  %4689 = vmatpush.msrb.mxu2 %v4582_v0  ;;  %v8198_v8 = vpop.permute.xlu2 %4598  ;;  %v4384_v15 = vsel %vm1837_vm15, 0.0, %v8123_v5  ;;  %v4575_v0 = vperm.slane %v8202_v41, 6 }
 0xd7d   :  { %v4606_v18 = vsel %vm3006_vm5, %v4597_v25, %v8198_v8  ;;  %v4429_v25 = vperm.slane %v8155_v57, 2 }
 0xd7e   :  { %4690 = vmatpush.msrb.mxu2 %v4578_v56  ;;  %v4627_v58 = vmul.f32 %v4619_v61, %v4606_v18  ;;  %v4383_v56 = vsel %vm1837_vm15, 0.0, %v8107_v29 }
 0xd7f   :  { %v4437_v3 = vmul.f32 %v4429_v25, %v4428_v40  ;;  %v4433_v31 = vmul.f32 %v4429_v25, %v4427_v55  ;;  %v8275_v40 = vld [vmem:[#allocation19 + $0x18] sm:$0xff]  ;;  %v4457_v25 = vsel %vm1687_vm1, %v8091_v62, %v8171_v34 }
 0xd80   :  { %4691 = vmatpush.msrb.mxu2 %v4537_v23  ;;  %v8200_v54 = vpop.permute.xlu1 %4640  ;;  %v4393_v23 = vmul.f32 %v4385_v52, %v4384_v15 }
 0xd81   :  { %v4650_v12 = vsel %vm4646_vm11, %v4639_v49, %v8200_v54  ;;  %v4481_v49 = vmul.f32 %v4473_v47, %v4472_v4 }
 0xd82   :  { %v4671_v24 = vmul.f32 %v5749_v26, %v4650_v12  ;;  %4692 = vmatpush.msrb.mxu2 %v4533_v45  ;;  %v4340_v45 = vsel %vm4324_vm12, 0.0, %v8105_v46  ;;  %v4341_v26 = vperm.slane %v8155_v57, 0 }
 0xd84   :  { %5044 = vperm.xlu2 %5746, %v4299_v60   ;;  %v8216_v37 = vpop.permute.xlu0 %4501  ;;  %4693 = vmatpush.msrb.mxu2 %v4493_v11  ;;  %v4389_v60 = vmul.f32 %v4385_v52, %v4383_v56  ;;  %v4530_v11 = vperm.slane %v8202_v41, 5  ;;  %v8302_v52 = vld [vmem:[#allocation19 + $0x20] sm:$0xff] }
 0xd85   :  { %4730 = vmatpush.msrb.mxu3 %v4671_v24  ;;  %v4514_v36 = vsel %vm3570_vm0, %v8143_v35, %v8216_v37  ;;  %v8266_v35 = vld [vmem:[#allocation19] sm:$0xff] }
 0xd86   :  { %4694 = vmatpush.msrb.mxu2 %v4489_v2  ;;  %v4534_v18 = vmul.f32 %v4530_v11, %v4514_v36 }
 0xd87   :  { %4731 = vmatpush.msrb.mxu3 %v4667_v33  ;;  %v4474_v33 = vperm.slane %v8202_v41, 3 }
 0xd88   :  { %v8224_v32 = vpop.permute.xlu1 %4590  ;;  %4695 = vmatpush.msrb.mxu2 %v4481_v49  ;;  %v4460_v49 = vsel %vm1687_vm1, %v8093_v21, %v8147_v63  ;;  %v4430_v21 = vperm.slane %v8202_v41, 2 }
 0xd89   :  { %4745 = vmatpush.msra.mxu3 %v4627_v58  ;;  %v4603_v1 = vsel %vm3006_vm5, %v8115_v27, %v8224_v32  ;;  %v4559_v27 = vsel %vm4557_vm10, %v8145_v43, %v8167_v14  ;;  %v8251_v43 = vld [vmem:[#allocation19 + $0x8] sm:$0xff]  ;;  %v4490_v58 = vmul.f32 %v4486_v59, %v8025_v51  ;;  %v4478_v55 = vmul.f32 %v4474_v33, %v4457_v25  ;;  %v8286_v51 = vld [vmem:[#allocation19 + $0x10] sm:$0xff] }
 0xd8a   :  { %v4623_v19 = vmul.f32 %v4619_v61, %v4603_v1  ;;  %4696 = vmatpush.msrb.mxu2 %v4477_v28  ;;  %v4579_v12 = vmul.f32 %v4575_v0, %v4559_v27  ;;  %5638 = vmatmul.msk.f32.vlgmr.msrb.gmra.mxu3 %vm8819_vm9, %v8251_v43  ;;  %v4349_v61 = vmul.f32 %v4341_v26, %v4340_v45  ;;  %v8311_v27 = vld [vmem:[#allocation19 + $0x38] sm:$0xff] }
 0xd8b   :  { %v4482_v28 = vmul.f32 %v4474_v33, %v4460_v49  ;;  %v4413_v1 = vsel %vm1812_vm14, %v8071_v6, %v8125_v53 }
 0xd8c   :  { %v8235_v9 = vpop.permute.xlu0 %4553  ;;  %4697 = vmatpush.msrb.mxu2 %v4437_v3  ;;  %4746 = vmatpush.msra.mxu3 %v4623_v19 }
 0xd8d   :  { %v4562_v39 = vsel %vm4557_vm10, %v8182_v48, %v8235_v9  ;;  %v4339_v48 = vsel %vm4324_vm12, 0.0, %v8079_v30 }
 0xd8e   :  { %v4583_v16 = vmul.f32 %v4575_v0, %v4562_v39  ;;  %4698 = vmatpush.msrb.mxu2 %v4433_v31  ;;  %v4345_v4 = vmul.f32 %v4341_v26, %v4339_v48  ;;  %v8263_v2 = vpop.permute.xlu2 %4592  ;;  %v8298_v31 = vld [vmem:[#allocation19 + $0x28] sm:$0xff]  ;;  %v8315_v39 = vld [vmem:[#allocation19 + $0x30] sm:$0xff] }
 0xd8f   :  { %v4604_v26 = vsel %vm3006_vm5, %v8224_v32, %v8263_v2 }
 0xd90   :  { %4747 = vmatpush.msra.mxu3 %v4583_v16  ;;  %v8249_v47 = vpop.permute.xlu1 %4509  ;;  %4699 = vmatpush.msrb.mxu2 %v4393_v23  ;;  %v8317_v23 = vld [vmem:[#allocation21 + $0x10] sm:$0xff] }
 0xd91   :  { %v4517_v57 = vsel %vm3570_vm0, %v8135_v13, %v8249_v47  ;;  %v4494_v13 = vmul.f32 %v4486_v59, %v8033_v50  ;;  %v4416_v50 = vsel %vm1812_vm14, %v8133_v17, %v8192_v42  ;;  %v4434_v17 = vmul.f32 %v4430_v21, %v4413_v1 }
 0xd92   :  { %4748 = vmatpush.msra.mxu3 %v4579_v12  ;;  %v4538_v24 = vmul.f32 %v4530_v11, %v4517_v57  ;;  %4700 = vmatpush.msrb.mxu2 %v4389_v60  ;;  %v4438_v62 = vmul.f32 %v4430_v21, %v4416_v50  ;;  %v4620_v16 = vperm.slane %v8317_v23, 7  ;;  %v4576_v57 = vperm.slane %v8317_v23, 6 }
 0xd93   :  { %5639 = vmatmul.msk.f32.gmra.mxu3 %vm8820_vm6, %v8275_v40  ;;  %v4475_v21 = vperm.slane %v8317_v23, 3 }
 0xd94   :  { %4701 = vmatpush.msrb.mxu2 %v4349_v61  ;;  %4749 = vmatpush.msra.mxu3 %v4538_v24  ;;  %v8291_v3 = vpop.permute.xlu0 %4453  ;;  %v4624_v36 = vmul.f32 %v4620_v16, %v4604_v26 }
 0xd96   :  { %4702 = vmatpush.msrb.mxu2 %v4345_v4  ;;  %4750 = vmatpush.msra.mxu3 %v4534_v18  ;;  %v8293_v19 = vpop.permute.xlu2 %4511 }
 0xd97   :  { %4703 = vmatmul.f32.vlgmr.msrb.gmra.mxu2 %v8266_v35  ;;  %v4518_v4 = vsel %vm3570_vm0, %v8249_v47, %v8293_v19  ;;  %v4487_v47 = vperm.slane %v8317_v23, 4 }
 0xd98   :  { %4751 = vmatpush.msra.mxu3 %v4494_v13  ;;  %v8295_v15 = vpop.permute.xlu1 %4409 }
 0xd99   :  { %v4495_v50 = vmul.f32 %v4487_v47, %v8061_v10  ;;  %v4491_v1 = vmul.f32 %v4487_v47, %v8053_v20  ;;  %v4417_v20 = vsel %vm1812_vm14, %v8192_v42, %v8295_v15 }
 0xd9a   :  { %4752 = vmatpush.msra.mxu3 %v4490_v58 }
 0xd9b   :  { %5640 = vmatmul.msk.f32.gmra.mxu3 %vm8821_vm7, %v8298_v31 }
 0xd9c   :  { %4753 = vmatpush.msra.mxu3 %v4482_v28 }
 0xd9e   :  { %4754 = vmatpush.msra.mxu3 %v4478_v55  ;;  %v8309_v56 = vpop.permute.xlu2 %4365 }
 0xd9f   :  { %4706 = vmatmul.f32.gmra.mxu2 %v8286_v51 }
 0xda0   :  { %4755 = vmatpush.msra.mxu3 %v4438_v62  ;;  %v4458_v62 = vsel %vm1687_vm1, %v8171_v34, %v8179_v22 }
 0xda2   :  { %4756 = vmatpush.msra.mxu3 %v4434_v17 }
 0xda3   :  { %5641 = vmatmul.msk.f32.gmra.mxu3 %vm8822_vm8, %v8311_v27 }
 0xda6   :  { %v8304_v6 = vpop.permute.xlu0 %4547  ;;  %v8335_v61 = vpop.permute.xlu2 %4318 }
 0xda7   :  { %v8306_v0 = vpop.permute.xlu1 %4503  ;;  %4709 = vmatmul.f32.gmra.mxu2 %v8302_v52  ;;  %v4560_v32 = vsel %vm4557_vm10, %v8167_v14, %v8304_v6  ;;  %v4328_v10 = vsel %vm4324_vm12, %v8105_v46, %v8335_v61 }
 0xda8   :  { %v4580_v18 = vmul.f32 %v4576_v57, %v4560_v32  ;;  %v4515_v33 = vsel %vm3570_vm0, %v8216_v37, %v8306_v0  ;;  %v4461_v37 = vsel %vm1687_vm1, %v8147_v63, %v8291_v3  ;;  %v8386_v32 = vld [vmem:[#allocation21 + $0x18] sm:$0xff] }
 0xda9   :  { %v4577_v47 = vperm.slane %v8386_v32, 6 }
 0xdae   :  { %v8320_v45 = vpop.permute.xlu0 %4600  ;;  %v8353_v28 = vpop.permute.xlu2 %4312 }
 0xdaf   :  { %v4607_v60 = vsel %vm3006_vm5, %v8198_v8, %v8320_v45  ;;  %v8328_v12 = vpop.permute.xlu1 %4555  ;;  %4712 = vmatmul.f32.gmra.mxu2 %v8315_v39  ;;  %v4531_v8 = vperm.slane %v8317_v23, 5 }
 0xdb0   :  { %v4628_v11 = vmul.f32 %v4620_v16, %v4607_v60  ;;  %v4563_v48 = vsel %vm4557_vm10, %v8235_v9, %v8328_v12  ;;  %v4386_v9 = vperm.slane %v8202_v41, 1  ;;  %v4483_v16 = vmul.f32 %v4475_v21, %v4461_v37 }
 0xdb1   :  { %v4584_v24 = vmul.f32 %v4576_v57, %v4563_v48  ;;  %v4539_v14 = vmul.f32 %v4531_v8, %v4518_v4  ;;  %v4535_v25 = vmul.f32 %v4531_v8, %v4515_v33  ;;  %v4479_v60 = vmul.f32 %v4475_v21, %v4458_v62 }
 0xdb2   :  { %4803 = vmatpush.msra.mxu2 %v4628_v11  ;;  %v4387_v11 = vperm.slane %v8317_v23, 1  ;;  %v4617_v8 = vsel %vm3006_vm5, %v8320_v45, 0.0  ;;  %v4621_v4 = vperm.slane %v8386_v32, 7  ;;  %v4532_v37 = vperm.slane %v8386_v32, 5 }
 0xdb4   :  { %4804 = vmatpush.msra.mxu2 %v4624_v36 }
 0xdb6   :  { %v8345_v59 = vpop.permute.xlu0 %4401  ;;  %4805 = vmatpush.msra.mxu2 %v4584_v24  ;;  %v8382_v57 = vpop.permute.xlu2 %4403 }
 0xdb7   :  { %v4364_v13 = vpop.permute.xlu1 %4363  ;;  %v4414_v46 = vsel %vm1812_vm14, %v8125_v53, %v8345_v59 }
 0xdb8   :  { %v4372_v49 = vsel %vm1837_vm15, %v8123_v5, %v4364_v13  ;;  %4806 = vmatpush.msra.mxu2 %v4580_v18  ;;  %v4342_v5 = vperm.slane %v8202_v41, 0  ;;  %v4431_v41 = vperm.slane %v8317_v23, 2  ;;  %v4373_v48 = vsel %vm1837_vm15, %v4364_v13, %v8309_v56 }
 0xdb9   :  { %v4394_v58 = vmul.f32 %v4386_v9, %v4372_v49  ;;  %v4343_v18 = vperm.slane %v8317_v23, 0  ;;  %v4616_v13 = vsel %vm3006_vm5, %v8263_v2, 0.0  ;;  %v4629_v49 = vmul.f32 %v4621_v4, %v4617_v8  ;;  %v5750_v2 = vld [vmem:[#allocation21 + $0x28] ss:$0 sm:$0xff]  ;;  %vm8823_vm5 = vmmov %vm8820_vm6 }
 0xdba   :  { %4807 = vmatpush.msra.mxu2 %v4539_v14  ;;  %v4350_v34 = vmul.f32 %v4342_v5, %v4328_v10  ;;  %v4435_v36 = vmul.f32 %v4431_v41, %v4414_v46  ;;  %v4625_v23 = vmul.f32 %v4621_v4, %v4616_v13 }
 0xdbb   :  { %4757 = vmatpush.msra.mxu3 %v4394_v58 }
 0xdbc   :  { %4808 = vmatpush.msra.mxu2 %v4535_v25  ;;  %v4573_v25 = vsel %vm4557_vm10, %v8328_v12, 0.0 }
 0xdbd   :  { %v4585_v21 = vmul.f32 %v4577_v47, %v4573_v25 }
 0xdbe   :  { %v4356_v55 = vpop.permute.xlu0 %4355  ;;  %4809 = vmatpush.msra.mxu2 %v4495_v50  ;;  %v4456_v10 = vpop.permute.xlu2 %4455 }
 0xdbf   :  { %v4369_v17 = vsel %vm1837_vm15, %v8107_v29, %v4356_v55  ;;  %v8370_v63 = vpop.permute.xlu1 %4357  ;;  %v4439_v29 = vmul.f32 %v4431_v41, %v4417_v20  ;;  %v4527_v41 = vsel %vm3570_vm0, %v8306_v0, 0.0  ;;  %v4488_v20 = vperm.slane %v8386_v32, 4 }
 0xdc0   :  { %v4390_v26 = vmul.f32 %v4386_v9, %v4369_v17  ;;  %4810 = vmatpush.msra.mxu2 %v4491_v1  ;;  %v4370_v53 = vsel %vm1837_vm15, %v4356_v55, %v8370_v63  ;;  %v4395_v9 = vmul.f32 %v4387_v11, %v4373_v48 }
 0xdc1   :  { %v4391_v58 = vmul.f32 %v4387_v11, %v4370_v53 }
 0xdc2   :  { %4758 = vmatpush.msra.mxu3 %v4390_v26  ;;  %4811 = vmatpush.msra.mxu2 %v4483_v16 }
 0xdc4   :  { %4759 = vmatpush.msra.mxu3 %v4350_v34  ;;  %4812 = vmatpush.msra.mxu2 %v4479_v60  ;;  %v4496_v60 = vmul.f32 %v4488_v20, %v8095_v44  ;;  %v4462_v34 = vsel %vm1687_vm1, %v8291_v3, %v4456_v10  ;;  %v4432_v44 = vperm.slane %v8386_v32, 2  ;;  %v4388_v3 = vperm.slane %v8386_v32, 1 }
 0xdc6   :  { %v8384_v42 = vpop.permute.xlu0 %4320  ;;  %4813 = vmatpush.msra.mxu2 %v4439_v29  ;;  %v4492_v29 = vmul.f32 %v4488_v20, %v8083_v7  ;;  %v4415_v7 = vsel %vm1812_vm14, %v8345_v59, %v8382_v57  ;;  %v4344_v59 = vperm.slane %v8386_v32, 0 }
 0xdc7   :  { %v4311_v24 = vpop.permute.xlu1 %4310  ;;  %v4329_v45 = vsel %vm4324_vm12, %v8335_v61, %v8384_v42  ;;  %v4572_v61 = vsel %vm4557_vm10, %v8304_v6, 0.0 }
 0xdc8   :  { %v4325_v33 = vsel %vm4324_vm12, %v8079_v30, %v4311_v24  ;;  %4814 = vmatpush.msra.mxu2 %v4435_v36  ;;  %v4351_v30 = vmul.f32 %v4343_v18, %v4329_v45  ;;  %v4326_v50 = vsel %vm4324_vm12, %v4311_v24, %v8353_v28  ;;  %v4581_v6 = vmul.f32 %v4577_v47, %v4572_v61  ;;  %v4323_v36 = vpop.permute.xlu2 %4322 }
 0xdc9   :  { %v4346_v14 = vmul.f32 %v4342_v5, %v4325_v33  ;;  %v4528_v5 = vsel %vm3570_vm0, %v8293_v19, 0.0  ;;  %v4347_v55 = vmul.f32 %v4343_v18, %v4326_v50  ;;  %v4330_v57 = vsel %vm4324_vm12, %v8384_v42, %v4323_v36 }
 0xdca   :  { %4815 = vmatpush.msra.mxu2 %v4395_v9  ;;  %v4540_v19 = vmul.f32 %v4532_v37, %v4528_v5  ;;  %v4436_v9 = vmul.f32 %v4432_v44, %v4415_v7 }
 0xdcb   :  { %4760 = vmatpush.msra.mxu3 %v4346_v14  ;;  %v5751_v14 = vld [vmem:[#allocation21 + $0x38] ss:$0 sm:$0xff] }
 0xdcc   :  { %4816 = vmatpush.msra.mxu2 %v4391_v58  ;;  %4761 = vmatmul.f32.vlgmr.msra.gmra.mxu3 %v8266_v35 }
 0xdcd   :  { %4861 = vmatpush.msrb.mxu3 %v4629_v49  ;;  %v5752_v49 = vld [vmem:[#allocation21 + $0x30] ss:$0 sm:$0xff] }
 0xdce   :  { %v8410_v12 = vpop.permute.xlu0 %4642  ;;  %4817 = vmatpush.msra.mxu2 %v4351_v30 }
 0xdcf   :  { %4862 = vmatpush.msrb.mxu3 %v4625_v23  ;;  %v4651_v1 = vsel %vm4646_vm11, %v8200_v54, %v8410_v12  ;;  %v8417_v62 = vpop.permute.xlu1 %4634  ;;  %v4536_v54 = vmul.f32 %v4532_v37, %v4527_v41 }
 0xdd0   :  { %v4672_v17 = vmul.f32 %v5750_v2, %v4651_v1  ;;  %v4648_v16 = vsel %vm4646_vm11, %v8157_v38, %v8417_v62  ;;  %4818 = vmatpush.msra.mxu2 %v4347_v55  ;;  %v4476_v38 = vperm.slane %v8386_v32, 3  ;;  %v4637_v13 = vpop.permute.xlu2 %4636 }
 0xdd1   :  { %4863 = vmatpush.msrb.mxu3 %v4585_v21  ;;  %4819 = vmatmul.f32.vlgmr.msra.gmra.mxu2 %v8266_v35  ;;  %v4668_v26 = vmul.f32 %v5750_v2, %v4648_v16  ;;  %v4649_v32 = vsel %vm4646_vm11, %v8417_v62, %v4637_v13  ;;  %v4661_v23 = vsel %vm4646_vm11, %v4637_v13, 0.0 }
 0xdd2   :  { %4788 = vmatpush.msra.mxu1 %v4672_v17  ;;  %v4484_v48 = vmul.f32 %v4476_v38, %v4462_v34  ;;  %v4669_v61 = vmul.f32 %v5752_v49, %v4649_v32  ;;  %v4670_v37 = vmul.f32 %v5751_v14, %v4661_v23 }
 0xdd3   :  { %4864 = vmatpush.msrb.mxu3 %v4581_v6 }
 0xdd4   :  { %4789 = vmatpush.msra.mxu1 %v4668_v26  ;;  %4764 = vmatmul.f32.gmra.mxu3 %v8286_v51 }
 0xdd5   :  { %4865 = vmatpush.msrb.mxu3 %v4540_v19  ;;  %5642 = vmatmul.msk.f32.vlgmr.msra.gmra.mxu1 %vm8823_vm5, %v8251_v43 }
 0xdd6   :  { %v4448_v0 = vpop.permute.xlu0 %4447 }
 0xdd7   :  { %4866 = vmatpush.msrb.mxu3 %v4536_v54  ;;  %v4412_v46 = vpop.permute.xlu1 %4411  ;;  %v4459_v11 = vsel %vm1687_vm1, %v8179_v22, %v4448_v0  ;;  %vm8824_vm1 = vmmov %vm8823_vm5 }
 0xdd8   :  { %v4418_v8 = vsel %vm1812_vm14, %v8295_v15, %v4412_v46  ;;  %v4480_v53 = vmul.f32 %v4476_v38, %v4459_v11  ;;  %vm8825_vm14 = vmmov %vm8824_vm1 }
 0xdd9   :  { %4867 = vmatpush.msrb.mxu3 %v4496_v60  ;;  %4822 = vmatmul.f32.gmra.mxu2 %v8286_v51  ;;  %v4440_v22 = vmul.f32 %v4432_v44, %v4418_v8  ;;  %vm8827_vm0 = vmmov %vm8824_vm1 }
 0xdda   :  { %vm8828_vm13 = vmmov %vm8827_vm0 }
 0xddb   :  { %4868 = vmatpush.msrb.mxu3 %v4492_v29  ;;  %vm8829_vm2 = vmmov %vm8827_vm0 }
 0xddc   :  { %4767 = vmatmul.f32.gmra.mxu3 %v8302_v52  ;;  %vm8830_vm3 = vmmov %vm8827_vm0 }
 0xddd   :  { %4869 = vmatpush.msrb.mxu3 %v4484_v48  ;;  %5643 = vmatmul.msk.f32.gmra.mxu1 %vm8824_vm1, %v8275_v40  ;;  %vm8831_vm10 = vmmov %vm8827_vm0 }
 0xdde   :  { %v4368_v24 = vpop.permute.xlu0 %4367  ;;  %vm8834_vm9 = vmmov %vm8827_vm0 }
 0xddf   :  { %4870 = vmatpush.msrb.mxu3 %v4480_v53  ;;  %v4374_v15 = vsel %vm1837_vm15, %v8309_v56, %v4368_v24  ;;  %v4360_v4 = vpop.permute.xlu1 %4359  ;;  %v4352_v56 = vmul.f32 %v4344_v59, %v4330_v57 }
 0xde0   :  { %v4396_v18 = vmul.f32 %v4388_v3, %v4374_v15  ;;  %v4371_v33 = vsel %vm1837_vm15, %v8370_v63, %v4360_v4  ;;  %vm8826_vm15 = vmmov %vm8824_vm1  ;;  %vm5449_vm1 = vcmask 1040384  }
 0xde1   :  { %4871 = vmatpush.msrb.mxu3 %v4440_v22  ;;  %4825 = vmatmul.f32.gmra.mxu2 %v8302_v52  ;;  %v4392_v45 = vmul.f32 %v4388_v3, %v4371_v33 }
 0xde3   :  { %4872 = vmatpush.msrb.mxu3 %v4436_v9 }
 0xde4   :  { %4770 = vmatmul.f32.gmra.mxu3 %v8315_v39 }
 0xde5   :  { %4873 = vmatpush.msrb.mxu3 %v4396_v18  ;;  %5644 = vmatmul.msk.f32.gmra.mxu1 %vm8825_vm14, %v8298_v31  ;;  %vm5453_vm14 = vcmask 1041408  }
 0xde6   :  { %v4645_v63 = vpop.permute.xlu0 %4644 }
 0xde7   :  { %4874 = vmatpush.msrb.mxu3 %v4392_v45  ;;  %v4652_v58 = vsel %vm4646_vm11, %v8410_v12, %v4645_v63  ;;  %v4662_v42 = vsel %vm4646_vm11, %v4645_v63, 0.0  ;;  %v4315_v25 = vpop.permute.xlu1 %4314  ;;  %vm8832_vm11 = vmmov %vm8827_vm0 }
 0xde8   :  { %v4673_v47 = vmul.f32 %v5752_v49, %v4652_v58  ;;  %v4674_v30 = vmul.f32 %v5751_v14, %v4662_v42  ;;  %v4327_v50 = vsel %vm4324_vm12, %v8353_v28, %v4315_v25  ;;  %vm8833_vm12 = vmmov %vm8827_vm0 }
 0xde9   :  { %4875 = vmatpush.msrb.mxu3 %v4352_v56  ;;  %v4348_v2 = vmul.f32 %v4344_v59, %v4327_v50  ;;  %4828 = vmatmul.f32.gmra.mxu2 %v8315_v39 }
 0xdea   :  { %4846 = vmatpush.msrb.mxu1 %v4673_v47  ;;  %4904 = vmatpush.msrb.mxu2 %v4674_v30 }
 0xdeb   :  { %4876 = vmatpush.msrb.mxu3 %v4348_v2 }
 0xdec   :  { %4847 = vmatpush.msrb.mxu1 %v4669_v61  ;;  %4905 = vmatpush.msrb.mxu2 %v4670_v37  ;;  %v6252_v37 = vmov 2048.0  }
 0xded   :  { %4877 = vmatmul.f32.vlgmr.msrb.gmra.mxu3 %v8266_v35  ;;  %5645 = vmatmul.msk.f32.gmra.mxu1 %vm8826_vm15, %v8311_v27  ;;  %5787 = vrcp.f32 %v6252_v37  ;;  %vm5455_vm15 = vcmask 1044484  }
 0xdf1   :  { %5650 = vmatmul.msk.f32.vlgmr.msrb.gmra.mxu2 %vm8827_vm0, %v8251_v43  ;;  %vm5457_vm0 = vcmask 1046534  }
 0xdf5   :  { %4880 = vmatmul.f32.gmra.mxu3 %v8286_v51  ;;  %5646 = vmatmul.msk.f32.vlgmr.msrb.gmra.mxu1 %vm8828_vm13, %v8251_v43  ;;  %vm5459_vm13 = vcmask 1045508  }
 0xdf9   :  { %5651 = vmatmul.msk.f32.gmra.mxu2 %vm8829_vm2, %v8275_v40  ;;  %vm5461_vm2 = vcmask 1043456  }
 0xdfd   :  { %4883 = vmatmul.f32.gmra.mxu3 %v8302_v52  ;;  %5647 = vmatmul.msk.f32.gmra.mxu1 %vm8830_vm3, %v8275_v40 }
 0xe01   :  { %5652 = vmatmul.msk.f32.gmra.mxu2 %vm8831_vm10, %v8298_v31 }
 0xe05   :  { %4886 = vmatmul.f32.gmra.mxu3 %v8315_v39  ;;  %5648 = vmatmul.msk.f32.gmra.mxu1 %vm8832_vm11, %v8298_v31 }
 0xe09   :  { %5653 = vmatmul.msk.f32.gmra.mxu2 %vm8833_vm12, %v8311_v27 }
 0xe0d   :  { %5649 = vmatmul.msk.f32.gmra.mxu1 %vm8834_vm9, %v8311_v27  ;;  %v4733_v43 = vpop.f32.mrf.mxu3 }
 0xe16   :  { %v4736_v51 = vpop.f32.mrf.mxu3 }
 0xe1a   :  { %v4704_v35 = vpop.f32.mrf.mxu2 }
 0xe1b   :  { %v4734_v54 = vadd.f32 %v4733_v43, %v4704_v35  ;;  %v5788_v43 = vpop.eup %5787 }
 0xe1c   :  { %v4937_v35 = vmul.f32 2048.0, %v5788_v43  ;;  %vm4941_vm6 = vweird.f32 %v5788_v43 }
 0xe1e   :  { %v4739_v28 = vpop.f32.mrf.mxu3 }
 0xe22   :  { %v4707_v52 = vpop.f32.mrf.mxu2 }
 0xe23   :  { %v4737_v29 = vadd.f32 %v4736_v51, %v4707_v52  ;;  %v4938_v51 = vsub.f32 1.0, %v4937_v35 }
 0xe25   :  { %v4939_v52 = vmul.f32 %v5788_v43, %v4938_v51 }
 0xe26   :  { %v4742_v21 = vpop.f32.mrf.mxu3 }
 0xe2a   :  { %v4710_v40 = vpop.f32.mrf.mxu2 }
 0xe2b   :  { %v4740_v15 = vadd.f32 %v4739_v28, %v4710_v40  ;;  %v4940_v28 = vadd.f32 %v5788_v43, %v4939_v52 }
 0xe2d   :  { %v4942_v40 = vsel %vm4941_vm6, %v5788_v43, %v4940_v28 }
 0xe32   :  { %v4713_v12 = vpop.f32.mrf.mxu2 }
 0xe33   :  { %v4743_v49 = vadd.f32 %v4742_v21, %v4713_v12 }
 0xe4f   :  { %v4762_v5 = vpop.f32.mrf.mxu3 }
 0xe52   :  { %v4791_v55 = vpop.f32.mrf.mxu1 }
 0xe53   :  { %v4792_v19 = vadd.f32 %v4791_v55, %v4762_v5 }
 0xe54   :  { %v4820_v39 = vpop.f32.mrf.mxu2 }
 0xe55   :  { %v4919_v38 = vadd.f32 %v4792_v19, %v4734_v54 }
 0xe57   :  { %v4765_v1 = vpop.f32.mrf.mxu3 }
 0xe5a   :  { %v4794_v62 = vpop.f32.mrf.mxu1 }
 0xe5b   :  { %v4795_v36 = vadd.f32 %v4794_v62, %v4765_v1 }
 0xe5c   :  { %v4823_v31 = vpop.f32.mrf.mxu2 }
 0xe5f   :  { %v4768_v6 = vpop.f32.mrf.mxu3 }
 0xe62   :  { %v4797_v10 = vpop.f32.mrf.mxu1 }
 0xe63   :  { %v4798_v18 = vadd.f32 %v4797_v10, %v4768_v6 }
 0xe64   :  { %v4826_v17 = vpop.f32.mrf.mxu2 }
 0xe67   :  { %v4771_v16 = vpop.f32.mrf.mxu3 }
 0xe6a   :  { %v4800_v41 = vpop.f32.mrf.mxu1 }
 0xe6b   :  { %v4801_v32 = vadd.f32 %v4800_v41, %v4771_v16 }
 0xe6c   :  { %v4829_v27 = vpop.f32.mrf.mxu2 }
 0xe70   :  { %v4878_v26 = vpop.f32.mrf.mxu3 }
 0xe72   :  { %v4849_v20 = vpop.f32.mrf.mxu1 }
 0xe73   :  { %v4850_v0 = vadd.f32 %v4849_v20, %v4820_v39 }
 0xe74   :  { %v4907_v60 = vpop.f32.mrf.mxu2 }
 0xe75   :  { %v4920_v34 = vadd.f32 %v4919_v38, %v4850_v0  ;;  %v4908_v46 = vadd.f32 %v4907_v60, %v4878_v26 }
 0xe77   :  { %v4921_v11 = vadd.f32 %v4920_v34, %v4908_v46 }
 0xe78   :  { %v4881_v48 = vpop.f32.mrf.mxu3 }
 0xe79   :  { %v4922_v8 = vadd.f32 %v4921_v11, %v4737_v29 }
 0xe7a   :  { %v4852_v44 = vpop.f32.mrf.mxu1 }
 0xe7b   :  { %v4853_v53 = vadd.f32 %v4852_v44, %v4823_v31  ;;  %v4923_v3 = vadd.f32 %v4922_v8, %v4795_v36 }
 0xe7c   :  { %v4910_v7 = vpop.f32.mrf.mxu2 }
 0xe7d   :  { %v4924_v22 = vadd.f32 %v4923_v3, %v4853_v53  ;;  %v4911_v24 = vadd.f32 %v4910_v7, %v4881_v48 }
 0xe7f   :  { %v4925_v4 = vadd.f32 %v4924_v22, %v4911_v24 }
 0xe80   :  { %v4884_v9 = vpop.f32.mrf.mxu3 }
 0xe81   :  { %v4926_v33 = vadd.f32 %v4925_v4, %v4740_v15 }
 0xe82   :  { %v4855_v59 = vpop.f32.mrf.mxu1 }
 0xe83   :  { %v4856_v57 = vadd.f32 %v4855_v59, %v4826_v17  ;;  %v4927_v13 = vadd.f32 %v4926_v33, %v4798_v18 }
 0xe84   :  { %v4913_v45 = vpop.f32.mrf.mxu2 }
 0xe85   :  { %v4928_v56 = vadd.f32 %v4927_v13, %v4856_v57  ;;  %v4914_v14 = vadd.f32 %v4913_v45, %v4884_v9 }
 0xe87   :  { %v4929_v63 = vadd.f32 %v4928_v56, %v4914_v14 }
 0xe88   :  { %v4887_v25 = vpop.f32.mrf.mxu3 }
 0xe89   :  { %v4930_v58 = vadd.f32 %v4929_v63, %v4743_v49 }
 0xe8a   :  { %v4858_v42 = vpop.f32.mrf.mxu1 }
 0xe8b   :  { %v4859_v23 = vadd.f32 %v4858_v42, %v4829_v27  ;;  %v4931_v47 = vadd.f32 %v4930_v58, %v4801_v32 }
 0xe8c   :  { %v4916_v30 = vpop.f32.mrf.mxu2 }
 0xe8d   :  { %v4932_v50 = vadd.f32 %v4931_v47, %v4859_v23  ;;  %v4917_v2 = vadd.f32 %v4916_v30, %v4887_v25 }
 0xe8f   :  { %v4933_v61 = vadd.f32 %v4932_v50, %v4917_v2 }
 0xe91   :  { %4934 = vadd.xlane.f32.xlu0 %v4933_v61 }
 0xf04   :  { %v4935_v21 = vpop.xlane.xlu0 %4934 }
 0xf05   :  { %v4943_v12 = vmul.f32 %v4942_v40, %v4935_v21 }
 0xf07   :  { %v8489_v5 = vsub.f32 %v4734_v54, %v4943_v12  ;;  %v8491_v55 = vsub.f32 %v4792_v19, %v4943_v12  ;;  %v8493_v39 = vsub.f32 %v4850_v0, %v4943_v12  ;;  %v4947_v31 = vsub.f32 %v4908_v46, %v4943_v12 }
 0xf08   :  { %v8499_v6 = vsub.f32 %v4737_v29, %v4943_v12  ;;  %v4949_v16 = vsub.f32 %v4795_v36, %v4943_v12  ;;  %v4950_v19 = vsub.f32 %v4853_v53, %v4943_v12  ;;  %v8505_v20 = vsub.f32 %v4911_v24, %v4943_v12 }
 0xf09   :  { %v4960_v1 = vmul.f32 %v8489_v5, %v8489_v5  ;;  %v4961_v62 = vmul.f32 %v8491_v55, %v8491_v55  ;;  %v4962_v10 = vmul.f32 %v8493_v39, %v8493_v39  ;;  %v4963_v41 = vmul.f32 %v4947_v31, %v4947_v31 }
 0xf0a   :  { %v4964_v26 = vmul.f32 %v8499_v6, %v8499_v6  ;;  %v4965_v38 = vmul.f32 %v4949_v16, %v4949_v16  ;;  %v4952_v60 = vsub.f32 %v4740_v15, %v4943_v12  ;;  %v4966_v34 = vmul.f32 %v4950_v19, %v4950_v19 }
 0xf0b   :  { %v4976_v17 = vadd.f32 %v4961_v62, %v4960_v1  ;;  %v8507_v29 = vsub.f32 %v4798_v18, %v4943_v12  ;;  %v4967_v11 = vmul.f32 %v8505_v20, %v8505_v20  ;;  %v8511_v36 = vsub.f32 %v4856_v57, %v4943_v12 }
 0xf0c   :  { %v4968_v8 = vmul.f32 %v4952_v60, %v4952_v60  ;;  %v8513_v53 = vsub.f32 %v4914_v14, %v4943_v12  ;;  %v8517_v22 = vsub.f32 %v4743_v49, %v4943_v12  ;;  %v8521_v4 = vsub.f32 %v4801_v32, %v4943_v12 }
 0xf0d   :  { %v4977_v27 = vadd.f32 %v4976_v17, %v4962_v10  ;;  %v4969_v3 = vmul.f32 %v8507_v29, %v8507_v29  ;;  %v4970_v24 = vmul.f32 %v8511_v36, %v8511_v36  ;;  %v8525_v33 = vsub.f32 %v4859_v23, %v4943_v12 }
 0xf0e   :  { %v4971_v9 = vmul.f32 %v8513_v53, %v8513_v53  ;;  %v4972_v59 = vmul.f32 %v8517_v22, %v8517_v22  ;;  %v8529_v13 = vsub.f32 %v4917_v2, %v4943_v12  ;;  %v4973_v45 = vmul.f32 %v8521_v4, %v8521_v4  ;;  %v8537_v2 = vpop.permute.xlu2 %5023 }
 0xf0f   :  { %v4978_v54 = vadd.f32 %v4977_v27, %v4963_v41  ;;  %v4974_v14 = vmul.f32 %v8525_v33, %v8525_v33 }
 0xf10   :  { %v4975_v63 = vmul.f32 %v8529_v13, %v8529_v13 }
 0xf11   :  { %v4979_v0 = vadd.f32 %v4978_v54, %v4964_v26 }
 0xf13   :  { %v4980_v46 = vadd.f32 %v4979_v0, %v4965_v38 }
 0xf15   :  { %v4981_v48 = vadd.f32 %v4980_v46, %v4966_v34 }
 0xf17   :  { %v4982_v44 = vadd.f32 %v4981_v48, %v4967_v11  ;;  %v8573_v48 = vld [vmem:[%s8678_s18] sm:$0x1] }
 0xf19   :  { %v4983_v7 = vadd.f32 %v4982_v44, %v4968_v8 }
 0xf1b   :  { %v4984_v15 = vadd.f32 %v4983_v7, %v4969_v3 }
 0xf1d   :  { %v4985_v18 = vadd.f32 %v4984_v15, %v4970_v24 }
 0xf1f   :  { %v4986_v57 = vadd.f32 %v4985_v18, %v4971_v9 }
 0xf21   :  { %v4987_v56 = vadd.f32 %v4986_v57, %v4972_v59 }
 0xf23   :  { %v4988_v49 = vadd.f32 %v4987_v56, %v4973_v45 }
 0xf25   :  { %v4989_v32 = vadd.f32 %v4988_v49, %v4974_v14 }
 0xf27   :  { %v4990_v58 = vadd.f32 %v4989_v32, %v4975_v63 }
 0xf29   :  { %4991 = vadd.xlane.f32.xlu1 %v4990_v58 }
 0xf9c   :  { %v4992_v42 = vpop.xlane.xlu1 %4991 }
 0xf9d   :  { %v4993_v25 = vmul.f32 %v4992_v42, %v4942_v40 }
 0xf9f   :  { %v4994_v23 = vadd.f32 1e-05, %v4993_v25 }
 0xfa1   :  { %5789 = vrsqrt.f32 %v4994_v23  ;;  %vm5001_vm8 = vweird.f32 %v4994_v23 }
 0xfa7   :  { %v5790_v47 = vpop.eup %5789 }
 0xfa8   :  { %v4996_v30 = vmul.f32 %v5790_v47, %v4994_v23  ;;  %vm5002_vm7 = vweird.f32 %v5790_v47 }
 0xfa9   :  { %vm5003_vm5 = vmor %vm5001_vm8, %vm5002_vm7 }
 0xfaa   :  { %v4997_v50 = vmul.f32 %v5790_v47, %v4996_v30 }
 0xfac   :  { %v4998_v61 = vmul.f32 0.5, %v4997_v50 }
 0xfae   :  { %v4999_v37 = vsub.f32 1.5, %v4998_v61 }
 0xfb0   :  { %v5000_v43 = vmul.f32 %v5790_v47, %v4999_v37 }
 0xfb2   :  { %v8539_v35 = vsel %vm5003_vm5, %v5790_v47, %v5000_v43 }
 0xfb3   :  { %v5005_v51 = vmul.f32 %v8539_v35, %v8489_v5  ;;  %v5006_v52 = vmul.f32 %v8539_v35, %v8491_v55  ;;  %v5010_v28 = vmul.f32 %v8539_v35, %v4949_v16  ;;  %v5007_v40 = vmul.f32 %v8539_v35, %v8493_v39  ;;  %v8557_v16 = vpop.permute.xlu2 %5044 }
 0xfb4   :  { %v5008_v21 = vmul.f32 %v8539_v35, %v4947_v31  ;;  %v5013_v12 = vmul.f32 %v8539_v35, %v4952_v60  ;;  %v5009_v1 = vmul.f32 %v8539_v35, %v8499_v6  ;;  %v5011_v62 = vmul.f32 %v8539_v35, %v4950_v19 }
 0xfb5   :  { %v5026_v10 = vmul.f32 %v8537_v2, %v5005_v51  ;;  %v5027_v5 = vmul.f32 %v8537_v2, %v5006_v52  ;;  %v5031_v55 = vmul.f32 %v8537_v2, %v5010_v28  ;;  %v5028_v17 = vmul.f32 %v8537_v2, %v5007_v40 }
 0xfb6   :  { %v5029_v39 = vmul.f32 %v8537_v2, %v5008_v21  ;;  %v5034_v31 = vmul.f32 %v8537_v2, %v5013_v12  ;;  %v5030_v41 = vmul.f32 %v8537_v2, %v5009_v1  ;;  %v5032_v6 = vmul.f32 %v8537_v2, %v5011_v62 }
 0xfb7   :  { %v5047_v27 = vadd.f32 %v8557_v16, %v5026_v10  ;;  %v5048_v19 = vadd.f32 %v8557_v16, %v5027_v5  ;;  %v5052_v26 = vadd.f32 %v8557_v16, %v5031_v55  ;;  %v5049_v54 = vadd.f32 %v8557_v16, %v5028_v17 }
 0xfb8   :  { %v5050_v38 = vadd.f32 %v8557_v16, %v5029_v39  ;;  %v5055_v0 = vadd.f32 %v8557_v16, %v5034_v31  ;;  %v5051_v60 = vadd.f32 %v8557_v16, %v5030_v41  ;;  %v5053_v3 = vadd.f32 %v8557_v16, %v5032_v6 }
 0xfb9   :  { %v5063_v34 = vmax.f32 %v5047_v27, 0.0  ;;  %v5064_v46 = vmax.f32 %v5048_v19, 0.0  ;;  %v5068_v11 = vmax.f32 %v5052_v26, 0.0  ;;  %v5065_v8 = vmax.f32 %v5049_v54, 0.0 }
 0xfba   :  { %v5066_v44 = vmax.f32 %v5050_v38, 0.0  ;;  %v5071_v7 = vmax.f32 %v5055_v0, 0.0  ;;  %v5016_v24 = vmul.f32 %v8539_v35, %v8513_v53  ;;  %v5012_v15 = vmul.f32 %v8539_v35, %v8505_v20 }
 0xfbb   :  { %5098 = vmatpush.msra.mxu1 %v5063_v34  ;;  %5118 = vmatpush.msra.mxu3 %v5064_v46  ;;  %v5014_v9 = vmul.f32 %v8539_v35, %v8507_v29  ;;  %v5019_v18 = vmul.f32 %v8539_v35, %v8525_v33  ;;  %v5067_v59 = vmax.f32 %v5051_v60, 0.0  ;;  %v5069_v29 = vmax.f32 %v5053_v3, 0.0 }
 0xfbc   :  { %5198 = vmatpush.msra.mxu2 %v5068_v11  ;;  %5654 = vmatmul.msk.f32.vlgmr.msra.gmra.mxu1 %vm1714_vm4, %v8573_v48  ;;  %v5037_v53 = vmul.f32 %v8537_v2, %v5016_v24  ;;  %v5033_v57 = vmul.f32 %v8537_v2, %v5012_v15  ;;  %v5015_v14 = vmul.f32 %v8539_v35, %v8511_v36 }
 0xfbd   :  { %5655 = vmatmul.msk.f32.vlgmr.msra.gmra.mxu3 %vm1714_vm4, %v8573_v48  ;;  %5138 = vmatpush.msrb.mxu1 %v5065_v8  ;;  %v5035_v20 = vmul.f32 %v8537_v2, %v5014_v9  ;;  %v5040_v45 = vmul.f32 %v8537_v2, %v5019_v18  ;;  %v5017_v63 = vmul.f32 %v8539_v35, %v8517_v22 }
 0xfbe   :  { %5158 = vmatpush.msrb.mxu3 %v5066_v44  ;;  %5659 = vmatmul.msk.f32.vlgmr.msra.gmra.mxu2 %vm1714_vm4, %v8573_v48  ;;  %v5058_v33 = vadd.f32 %v8557_v16, %v5037_v53  ;;  %v5054_v56 = vadd.f32 %v8557_v16, %v5033_v57  ;;  %v5036_v25 = vmul.f32 %v8537_v2, %v5015_v14 }
 0xfbf   :  { %5258 = vmatpush.msrb.mxu2 %v5071_v7  ;;  %5178 = vmatpush.msra.mxu1 %v5067_v59  ;;  %v5056_v49 = vadd.f32 %v8557_v16, %v5035_v20  ;;  %v5061_v58 = vadd.f32 %v8557_v16, %v5040_v45  ;;  %v5038_v47 = vmul.f32 %v8537_v2, %v5017_v63 }
 0xfc0   :  { %5218 = vmatpush.msra.mxu3 %v5069_v29  ;;  %v5074_v32 = vmax.f32 %v5058_v33, 0.0  ;;  %v5070_v42 = vmax.f32 %v5054_v56, 0.0  ;;  %v5057_v22 = vadd.f32 %v8557_v16, %v5036_v25  ;;  %v5018_v30 = vmul.f32 %v8539_v35, %v8521_v4 }
 0xfc1   :  { %v5072_v23 = vmax.f32 %v5056_v49, 0.0  ;;  %v5077_v36 = vmax.f32 %v5061_v58, 0.0  ;;  %v5059_v50 = vadd.f32 %v8557_v16, %v5038_v47  ;;  %v5020_v61 = vmul.f32 %v8539_v35, %v8529_v13 }
 0xfc2   :  { %5318 = vmatpush.msra.mxu2 %v5074_v32  ;;  %v5073_v37 = vmax.f32 %v5057_v22, 0.0  ;;  %v5039_v43 = vmul.f32 %v8537_v2, %v5018_v30 }
 0xfc3   :  { %v5075_v51 = vmax.f32 %v5059_v50, 0.0  ;;  %v5041_v52 = vmul.f32 %v8537_v2, %v5020_v61 }
 0xfc4   :  { %5656 = vmatmul.msk.f32.vlgmr.msrb.gmra.mxu1 %vm1714_vm4, %v8573_v48  ;;  %v5060_v4 = vadd.f32 %v8557_v16, %v5039_v43 }
 0xfc5   :  { %5657 = vmatmul.msk.f32.vlgmr.msrb.gmra.mxu3 %vm1714_vm4, %v8573_v48  ;;  %5238 = vmatpush.msrb.mxu1 %v5070_v42  ;;  %v5062_v13 = vadd.f32 %v8557_v16, %v5041_v52 }
 0xfc6   :  { %5662 = vmatmul.msk.f32.vlgmr.msrb.gmra.mxu2 %vm1714_vm4, %v8573_v48  ;;  %5278 = vmatpush.msrb.mxu3 %v5072_v23  ;;  %v5076_v35 = vmax.f32 %v5060_v4, 0.0 }
 0xfc7   :  { %5378 = vmatpush.msrb.mxu2 %v5077_v36  ;;  %v5078_v28 = vmax.f32 %v5062_v13, 0.0 }
 0xfcc   :  { %5658 = vmatmul.msk.f32.vlgmr.msra.gmra.mxu1 %vm1714_vm4, %v8573_v48 }
 0xfcd   :  { %5660 = vmatmul.msk.f32.vlgmr.msra.gmra.mxu3 %vm1714_vm4, %v8573_v48  ;;  %5298 = vmatpush.msra.mxu1 %v5073_v37 }
 0xfce   :  { %5338 = vmatpush.msra.mxu3 %v5075_v51  ;;  %5665 = vmatmul.msk.f32.vlgmr.msra.gmra.mxu2 %vm1714_vm4, %v8573_v48 }
 0xfd4   :  { %5661 = vmatmul.msk.f32.vlgmr.msrb.gmra.mxu1 %vm1714_vm4, %v8573_v48 }
 0xfd5   :  { %5663 = vmatmul.msk.f32.vlgmr.msrb.gmra.mxu3 %vm1714_vm4, %v8573_v48  ;;  %5358 = vmatpush.msrb.mxu1 %v5076_v35 }
 0xfd6   :  { %5398 = vmatpush.msrb.mxu3 %v5078_v28  ;;  %5668 = vmatmul.msk.f32.vlgmr.msrb.gmra.mxu2 %vm1714_vm4, %v8573_v48 }
 0xfdc   :  { %5664 = vmatmul.msk.f32.vlgmr.msra.gmra.mxu1 %vm1714_vm4, %v8573_v48 }
 0xfdd   :  { %5666 = vmatmul.msk.f32.vlgmr.msra.gmra.mxu3 %vm1714_vm4, %v8573_v48 }
 0xfe4   :  { %5667 = vmatmul.msk.f32.vlgmr.msrb.gmra.mxu1 %vm1714_vm4, %v8573_v48 }
 0xfe5   :  { %5669 = vmatmul.msk.f32.vlgmr.msrb.gmra.mxu3 %vm1714_vm4, %v8573_v48  ;;  %vm5451_vm4 = vcmask 1042434  }
0x1039   :  { %v5100_v2 = vpop.f32.mrf.mxu1 }
0x1040   :  { %v5120_v40 = vpop.f32.mrf.mxu3 }
0x1041   :  { %v5140_v21 = vpop.f32.mrf.mxu1  ;;  %v5200_v12 = vpop.f32.mrf.mxu2  ;;  %5791 = vtanh.f32 %v5120_v40 }
0x1042   :  { %5793 = vtanh.f32 %v5140_v21 }
0x1047   :  { %v5792_v5 = vpop.eup %5791 }
0x1048   :  { %v5160_v1 = vpop.f32.mrf.mxu3  ;;  %v5794_v17 = vpop.eup %5793  ;;  %v5435_v26 = vrot.slane %v5792_v5, 7 }
0x1049   :  { %v5180_v62 = vpop.f32.mrf.mxu1  ;;  %5795 = vtanh.f32 %v5160_v1  ;;  %v5260_v10 = vpop.f32.mrf.mxu2  ;;  %v5436_v6 = vrot.slane %v5794_v17, 6 }
0x104a   :  { %5797 = vtanh.f32 %v5200_v12 }
0x104b   :  { %5799 = vtanh.f32 %v5180_v62 }
0x104f   :  { %v5796_v39 = vpop.eup %5795 }
0x1050   :  { %v5220_v55 = vpop.f32.mrf.mxu3  ;;  %v5798_v31 = vpop.eup %5797  ;;  %v5437_v27 = vrot.slane %v5796_v39, 5 }
0x1051   :  { %5801 = vtanh.f32 %v5220_v55  ;;  %v5240_v16 = vpop.f32.mrf.mxu1  ;;  %v5800_v41 = vpop.eup %5799  ;;  %v5439_v38 = vrot.slane %v5798_v31, 3 }
0x1052   :  { %5803 = vtanh.f32 %v5240_v16  ;;  %v5438_v54 = vrot.slane %v5800_v41, 4  ;;  %v5452_v34 = vsel %vm5451_vm4, %v5436_v6, %v5437_v27  ;;  %v5320_v8 = vpop.f32.mrf.mxu2 }
0x1053   :  { %5805 = vtanh.f32 %v5100_v2 }
0x1054   :  { %v5456_v7 = vsel %vm5455_vm15, %v5438_v54, %v5439_v38  ;;  %5807 = vtanh.f32 %v5320_v8 }
0x1057   :  { %v5802_v19 = vpop.eup %5801 }
0x1058   :  { %v5804_v0 = vpop.eup %5803  ;;  %v5280_v60 = vpop.f32.mrf.mxu3  ;;  %v5440_v46 = vrot.slane %v5802_v19, 2 }
0x1059   :  { %v5441_v11 = vrot.slane %v5804_v0, 1  ;;  %v5300_v48 = vpop.f32.mrf.mxu1  ;;  %v5806_v44 = vpop.eup %5805  ;;  %5809 = vtanh.f32 %v5280_v60 }
0x105a   :  { %v5450_v3 = vsel %vm5449_vm1, %v5806_v44, %v5435_v26  ;;  %v5380_v53 = vpop.f32.mrf.mxu2  ;;  %5811 = vtanh.f32 %v5300_v48  ;;  %v5808_v20 = vpop.eup %5807 }
0x105b   :  { %v5458_v24 = vsel %vm5457_vm0, %v5440_v46, %v5441_v11  ;;  %v5454_v15 = vsel %vm5453_vm14, %v5450_v3, %v5452_v34  ;;  %5813 = vtanh.f32 %v5380_v53  ;;  %v5444_v63 = vrot.slane %v5808_v20, 5 }
0x105c   :  { %v5460_v9 = vsel %vm5459_vm13, %v5456_v7, %v5458_v24 }
0x105d   :  { %v5462_v18 = vsel %vm5461_vm2, %v5454_v15, %v5460_v9 }
0x105e   :  { %5472 = vst [vmem:[%s8835_s16] sm:$0xff] %v5462_v18 }
0x105f   :  { %v5810_v29 = vpop.eup %5809 }
0x1060   :  { %v5340_v59 = vpop.f32.mrf.mxu3  ;;  %v5812_v33 = vpop.eup %5811  ;;  %v5442_v58 = vrot.slane %v5810_v29, 7 }
0x1061   :  { %v5360_v57 = vpop.f32.mrf.mxu1  ;;  %v5814_v56 = vpop.eup %5813  ;;  %v5443_v49 = vrot.slane %v5812_v33, 6 }
0x1062   :  { %5815 = vtanh.f32 %v5360_v57  ;;  %v5447_v25 = vrot.slane %v5814_v56, 2 }
0x1063   :  { %5817 = vtanh.f32 %v5340_v59  ;;  %v5464_v47 = vsel %vm5451_vm4, %v5443_v49, %v5444_v63 }
0x1068   :  { %v5400_v45 = vpop.f32.mrf.mxu3  ;;  %v5816_v14 = vpop.eup %5815 }
0x1069   :  { %5819 = vtanh.f32 %v5400_v45  ;;  %v5818_v32 = vpop.eup %5817  ;;  %v5446_v42 = vrot.slane %v5816_v14, 3 }
0x106a   :  { %5821 = vtanh.f32 %v5260_v10  ;;  %v5445_v36 = vrot.slane %v5818_v32, 4 }
0x106c   :  { %v5466_v61 = vsel %vm5455_vm15, %v5445_v36, %v5446_v42 }
0x106f   :  { %v5820_v23 = vpop.eup %5819 }
0x1070   :  { %v5448_v22 = vrot.slane %v5820_v23, 1  ;;  %v5822_v30 = vpop.eup %5821 }
0x1071   :  { %v5463_v50 = vsel %vm5449_vm1, %v5822_v30, %v5442_v58 }
0x1072   :  { %v5467_v37 = vsel %vm5457_vm0, %v5447_v25, %v5448_v22  ;;  %v5465_v43 = vsel %vm5453_vm14, %v5463_v50, %v5464_v47 }
0x1073   :  { %v5468_v51 = vsel %vm5459_vm13, %v5466_v61, %v5467_v37 }
0x1074   :  { %v5469_v52 = vsel %vm5461_vm2, %v5465_v43, %v5468_v51 }
0x1075   :  { %5473 = vst [vmem:[%s8835_s16 + $0x8] sm:$0xff] %v5469_v52 }
0x1076   :  { %5478 = vsyncpa [#allocation3], 1 }
0x1077   :  { %5479 = vsyncpa [#allocation5], 1 }
0x1078   :  { %5480 = vsyncpa [#allocation8], 1 }
0x1079   :  { %5481 = vsyncpa [#allocation11], 1 }
0x107a   :  { %5482 = vsyncpa [#allocation14], 1 }
0x107b   :  { %5483 = vsyncpa [#allocation17], 1 }
0x107c   :  { %5484 = vsyncpa [#allocation20], 1 }
0x107d   :  { %5485 = vsyncpa [#allocation23], 1 }

</bundles_post_ra>
